<compile_context>
chip_gen: v7x
topology: tpu7x:2x2x1
jax: 0.10.0
libtpu: 0.0.40
codegen_flags: <defaults>
</compile_context>

<pallas_src>
import functools

import jax
import jax.numpy as jnp
import numpy as np
from jax.experimental import pallas as pl
from jax.experimental.pallas import tpu as pltpu

_LANE = 128


def _round_up(x, m):
    return (x + m - 1) // m * m


def _resnet_block_kernel(x_ref, w1_ref, w2_ref, w3_ref, *rest,
                         H, W, Cin_p, Cout_p, has_proj):
    """Fused ResnetBlock forward for one image (NHWC, channel-padded)."""
    if has_proj:
        wsc_ref, sb_ref, o_ref, xpad_ref, hpad_ref = rest
    else:
        sb_ref, o_ref, xpad_ref, hpad_ref = rest

    f32 = jnp.float32
    bf16 = jnp.bfloat16

    def im2col(xp, C):
        # xp: (H+2, W+2, C) zero-padded image -> (H*W, 9*C) patch matrix.
        taps = []
        for kh in range(3):
            for kw in range(3):
                taps.append(xp[kh:kh + H, kw:kw + W, :].reshape(H * W, C))
        return jnp.concatenate(taps, axis=-1)

    sb = sb_ref[...]                       # (8, Cout_p) folded-BN scale/bias
    s1, b1 = sb[0:1], sb[1:2]
    s2, b2 = sb[2:3], sb[3:4]
    s3, b3 = sb[4:5], sb[5:6]

    x = x_ref[0]                           # (H, W, Cin_p) f32

    # ---- shortcut branch (1x1 conv + BN, or identity) -----------------------
    x_flat = x.reshape(H * W, Cin_p)
    if has_proj:
        ssc, bsc = sb[6:7], sb[7:8]
        sc = jnp.dot(x_flat.astype(bf16), wsc_ref[...],
                     preferred_element_type=f32) * ssc + bsc
    else:
        sc = x_flat                        # Cin_p == Cout_p in this case

    # ---- conv1: 3x3 + BN + ReLU (im2col -> single MXU matmul) ---------------
    xpad_ref[...] = jnp.zeros_like(xpad_ref)          # in-kernel halo padding
    xpad_ref[1:H + 1, 1:W + 1, :] = x
    p = im2col(xpad_ref[...], Cin_p).astype(bf16)     # (H*W, 9*Cin_p)
    h = jnp.dot(p, w1_ref[...], preferred_element_type=f32) * s1 + b1
    h = jnp.maximum(h, 0.0)

    # ---- conv2: 3x3 + BN + ReLU ---------------------------------------------
    hpad_ref[...] = jnp.zeros_like(hpad_ref)
    hpad_ref[1:H + 1, 1:W + 1, :] = h.reshape(H, W, Cout_p)
    p = im2col(hpad_ref[...], Cout_p).astype(bf16)    # (H*W, 9*Cout_p)
    h = jnp.dot(p, w2_ref[...], preferred_element_type=f32) * s2 + b2
    h = jnp.maximum(h, 0.0)

    # ---- conv3: 3x3 + BN, residual add, final ReLU --------------------------
    hpad_ref[1:H + 1, 1:W + 1, :] = h.reshape(H, W, Cout_p)   # border stays 0
    p = im2col(hpad_ref[...], Cout_p).astype(bf16)
    y = jnp.dot(p, w3_ref[...], preferred_element_type=f32) * s3 + b3
    y = jnp.maximum(y + sc, 0.0)

    o_ref[0] = y.astype(o_ref.dtype)       # (H*W, Cout_p) lane-dense store


def resnet_block_forward(x_nchw, params, in_channels, out_channels, stride=1):
    assert stride == 1, "stride>1 not supported"  # TODO(synk): strided conv
    N, Cin, H, W = x_nchw.shape
    assert Cin == in_channels
    Cout = out_channels
    has_proj = (stride != 1) or (in_channels != out_channels)

    Cin_p = _round_up(Cin, _LANE)
    Cout_p = _round_up(Cout, _LANE)

    # NCHW -> NHWC, pad channels to a lane-dense multiple of 128.
    x = jnp.transpose(x_nchw, (0, 2, 3, 1))
    x = jnp.pad(x, ((0, 0), (0, 0), (0, 0), (0, Cin_p - Cin)))

    def pad_w3x3(w, ci, co, ci_p, co_p):
        w = jnp.pad(w, ((0, 0), (0, 0), (0, ci_p - ci), (0, co_p - co)))
        return w.reshape(9 * ci_p, co_p).astype(jnp.bfloat16)   # im2col layout

    w1 = pad_w3x3(params["w1"], Cin, Cout, Cin_p, Cout_p)
    w2 = pad_w3x3(params["w2"], Cout, Cout, Cout_p, Cout_p)
    w3 = pad_w3x3(params["w3"], Cout, Cout, Cout_p, Cout_p)

    def pad_vec(v):
        return jnp.pad(v, (0, Cout_p - Cout))

    sb_rows = [params["s1"], params["b1"], params["s2"], params["b2"],
               params["s3"], params["b3"]]
    if has_proj:
        sb_rows += [params["s_sc"], params["b_sc"]]
    else:
        sb_rows += [jnp.ones((Cout,), jnp.float32),
                    jnp.zeros((Cout,), jnp.float32)]
    sb = jnp.stack([pad_vec(v) for v in sb_rows])               # (8, Cout_p)

    args = [x, w1, w2, w3]
    in_specs = [
        pl.BlockSpec((1, H, W, Cin_p), lambda n: (n, 0, 0, 0)),
        pl.BlockSpec((9 * Cin_p, Cout_p), lambda n: (0, 0)),
        pl.BlockSpec((9 * Cout_p, Cout_p), lambda n: (0, 0)),
        pl.BlockSpec((9 * Cout_p, Cout_p), lambda n: (0, 0)),
    ]
    if has_proj:
        wsc = jnp.pad(params["w_sc"],
                      ((0, Cin_p - Cin), (0, Cout_p - Cout))).astype(jnp.bfloat16)
        args.append(wsc)
        in_specs.append(pl.BlockSpec((Cin_p, Cout_p), lambda n: (0, 0)))
    args.append(sb)
    in_specs.append(pl.BlockSpec((8, Cout_p), lambda n: (0, 0)))

    kernel = functools.partial(_resnet_block_kernel, H=H, W=W,
                               Cin_p=Cin_p, Cout_p=Cout_p, has_proj=has_proj)

    out = pl.pallas_call(
        kernel,
        out_shape=jax.ShapeDtypeStruct((N, H * W, Cout_p), x_nchw.dtype),
        grid=(N,),
        in_specs=in_specs,
        out_specs=pl.BlockSpec((1, H * W, Cout_p), lambda n: (n, 0, 0)),
        scratch_shapes=[
            pltpu.VMEM((H + 2, W + 2, Cin_p), jnp.float32),   # padded x
            pltpu.VMEM((H + 2, W + 2, Cout_p), jnp.float32),  # padded h1/h2
        ],
        compiler_params=pltpu.CompilerParams(
            dimension_semantics=("parallel",)),
    )(*args)

    out = out.reshape(N, H, W, Cout_p)[:, :, :, :Cout]          # drop channel pad
    return jnp.transpose(out, (0, 3, 1, 2))                     # NHWC -> NCHW


# ----------------------------- parameter init --------------------------------
def _fold_bn(key, c, eps=1e-5):
    k1, k2, k3, k4 = jax.random.split(key, 4)
    gamma = jax.random.uniform(k1, (c,), jnp.float32, 0.5, 1.5)
    beta = jax.random.uniform(k2, (c,), jnp.float32, -0.5, 0.5)
    mean = jax.random.uniform(k3, (c,), jnp.float32, -0.2, 0.2)
    var = jax.random.uniform(k4, (c,), jnp.float32, 0.5, 1.5)
    scale = gamma / jnp.sqrt(var + eps)
    bias = beta - mean * scale
    return scale, bias


def _conv_w(key, kh, kw, cin, cout):
    fan_in = cin * kh * kw
    return jax.random.normal(key, (kh, kw, cin, cout), jnp.float32) / np.sqrt(fan_in)


def init_resnet_block_params(key, in_channels, out_channels):
    ks = jax.random.split(key, 8)
    p = {}
    p["w1"] = _conv_w(ks[0], 3, 3, in_channels, out_channels)
    p["s1"], p["b1"] = _fold_bn(ks[1], out_channels)
    p["w2"] = _conv_w(ks[2], 3, 3, out_channels, out_channels)
    p["s2"], p["b2"] = _fold_bn(ks[3], out_channels)
    p["w3"] = _conv_w(ks[4], 3, 3, out_channels, out_channels)
    p["s3"], p["b3"] = _fold_bn(ks[5], out_channels)
    if in_channels != out_channels:
        p["w_sc"] = _conv_w(ks[6], 1, 1, in_channels, out_channels)[0, 0]
        p["s_sc"], p["b_sc"] = _fold_bn(ks[7], out_channels)
    return p


# ---------------- pure-JAX reference (matches kernel's bf16 MXU inputs) ------
def _ref_conv3x3(x, w):
    return jax.lax.conv_general_dilated(
        x.astype(jnp.bfloat16), w.astype(jnp.bfloat16),
        window_strides=(1, 1), padding=[(1, 1), (1, 1)],
        dimension_numbers=("NHWC", "HWIO", "NHWC"),
        preferred_element_type=jnp.float32)


def _ref_conv1x1(x, w):
    return jax.lax.conv_general_dilated(
        x.astype(jnp.bfloat16), w[None, None].astype(jnp.bfloat16),
        window_strides=(1, 1), padding=[(0, 0), (0, 0)],
        dimension_numbers=("NHWC", "HWIO", "NHWC"),
        preferred_element_type=jnp.float32)


def resnet_block_ref(x_nchw, params, in_channels, out_channels):
    x = jnp.transpose(x_nchw, (0, 2, 3, 1))
    if in_channels != out_channels:
        sc = _ref_conv1x1(x, params["w_sc"]) * params["s_sc"] + params["b_sc"]
    else:
        sc = x
    h = jax.nn.relu(_ref_conv3x3(x, params["w1"]) * params["s1"] + params["b1"])
    h = jax.nn.relu(_ref_conv3x3(h, params["w2"]) * params["s2"] + params["b2"])
    h = _ref_conv3x3(h, params["w3"]) * params["s3"] + params["b3"]
    out = jax.nn.relu(h + sc)
    return jnp.transpose(out, (0, 3, 1, 2))


if __name__ == "__main__":
    key = jax.random.PRNGKey(0)
    k_x, k_p = jax.random.split(key)

    N, Cin, H, W = 2, 4, 16, 16
    Cout = 8  # != Cin -> projection shortcut path is exercised

    x = jax.random.normal(k_x, (N, Cin, H, W), jnp.float32)  # NCHW, like PyTorch
    params = init_resnet_block_params(k_p, Cin, Cout)

    out = resnet_block_forward(x, params, Cin, Cout, stride=1)
    out = jax.block_until_ready(out)

    ref = resnet_block_ref(x, params, Cin, Cout)
    np.testing.assert_allclose(np.asarray(out), np.asarray(ref),
                               rtol=1e-2, atol=1e-2)
    assert out.shape == (N, Cout, H, W)
    print("KERNEL_OK")
</pallas_src>

<mosaic_0001>
module attributes {stable_mosaic.version = 11 : i64} {
  func.func @_resnet_block_kernel(%arg0: i32, %arg1: memref<1x16x16x128xf32, #tpu.memory_space<vmem>>, %arg2: memref<1152x128xbf16, #tpu.memory_space<vmem>>, %arg3: memref<1152x128xbf16, #tpu.memory_space<vmem>>, %arg4: memref<1152x128xbf16, #tpu.memory_space<vmem>>, %arg5: memref<128x128xbf16, #tpu.memory_space<vmem>>, %arg6: memref<8x128xf32, #tpu.memory_space<vmem>>, %arg7: memref<1x256x128xf32, #tpu.memory_space<vmem>>, %arg8: memref<18x18x128xf32, #tpu.memory_space<vmem>>, %arg9: memref<18x18x128xf32, #tpu.memory_space<vmem>>) attributes {dimension_semantics = [#tpu.dimension_semantics<parallel>], iteration_bounds = array<i64: 2>, scalar_prefetch = 0 : i64, scratch_operands = 2 : i64, tpu.core_type = #tpu.core_type<tc>, window_params = [{transform_indices = @transform_0, window_bounds = array<i64: 1, 16, 16, 128>}, {pipeline_mode = #tpu.pipeline_mode<synchronous>, transform_indices = @transform_1, window_bounds = array<i64: 1152, 128>}, {pipeline_mode = #tpu.pipeline_mode<synchronous>, transform_indices = @transform_2, window_bounds = array<i64: 1152, 128>}, {pipeline_mode = #tpu.pipeline_mode<synchronous>, transform_indices = @transform_3, window_bounds = array<i64: 1152, 128>}, {pipeline_mode = #tpu.pipeline_mode<synchronous>, transform_indices = @transform_4, window_bounds = array<i64: 128, 128>}, {pipeline_mode = #tpu.pipeline_mode<synchronous>, transform_indices = @transform_5, window_bounds = array<i64: 8, 128>}, {transform_indices = @transform_6, window_bounds = array<i64: 1, 256, 128>}]} {
    %c0 = arith.constant 0 : index
    %c0_0 = arith.constant 0 : index
    %0 = vector.load %arg6[%c0, %c0_0] : memref<8x128xf32, #tpu.memory_space<vmem>>, vector<8x128xf32>
    %1 = vector.extract_strided_slice %0 {offsets = [0, 0], sizes = [1, 128], strides = [1, 1]} : vector<8x128xf32> to vector<1x128xf32>
    %2 = vector.extract_strided_slice %0 {offsets = [1, 0], sizes = [1, 128], strides = [1, 1]} : vector<8x128xf32> to vector<1x128xf32>
    %3 = vector.extract_strided_slice %0 {offsets = [2, 0], sizes = [1, 128], strides = [1, 1]} : vector<8x128xf32> to vector<1x128xf32>
    %4 = vector.extract_strided_slice %0 {offsets = [3, 0], sizes = [1, 128], strides = [1, 1]} : vector<8x128xf32> to vector<1x128xf32>
    %5 = vector.extract_strided_slice %0 {offsets = [4, 0], sizes = [1, 128], strides = [1, 1]} : vector<8x128xf32> to vector<1x128xf32>
    %6 = vector.extract_strided_slice %0 {offsets = [5, 0], sizes = [1, 128], strides = [1, 1]} : vector<8x128xf32> to vector<1x128xf32>
    %c0_1 = arith.constant 0 : index
    %c0_2 = arith.constant 0 : index
    %c0_3 = arith.constant 0 : index
    %c0_4 = arith.constant 0 : index
    %7 = vector.load %arg1[%c0_1, %c0_2, %c0_3, %c0_4] : memref<1x16x16x128xf32, #tpu.memory_space<vmem>>, vector<1x16x16x128xf32>
    %8 = vector.shape_cast %7 : vector<1x16x16x128xf32> to vector<16x16x128xf32>
    %9 = vector.shape_cast %8 : vector<16x16x128xf32> to vector<256x128xf32>
    %10 = vector.extract_strided_slice %0 {offsets = [6, 0], sizes = [1, 128], strides = [1, 1]} : vector<8x128xf32> to vector<1x128xf32>
    %11 = vector.extract_strided_slice %0 {offsets = [7, 0], sizes = [1, 128], strides = [1, 1]} : vector<8x128xf32> to vector<1x128xf32>
    %12 = arith.truncf %9 : vector<256x128xf32> to vector<256x128xbf16>
    %c0_5 = arith.constant 0 : index
    %c0_6 = arith.constant 0 : index
    %13 = vector.load %arg5[%c0_5, %c0_6] : memref<128x128xbf16, #tpu.memory_space<vmem>>, vector<128x128xbf16>
    %cst = arith.constant dense<0.000000e+00> : vector<256x128xf32>
    %14 = tpu.matmul %12, %13, %cst {dimension_numbers = #tpu.dot_dimension_numbers<[1], [0], [0], [1], [0, 0, 1, 1], [], []>} : vector<256x128xbf16>, vector<128x128xbf16>, vector<256x128xf32> -> vector<256x128xf32>
    %15 = vector.broadcast %10 : vector<1x128xf32> to vector<256x128xf32>
    %16 = arith.mulf %14, %15 : vector<256x128xf32>
    %17 = vector.broadcast %11 : vector<1x128xf32> to vector<256x128xf32>
    %18 = arith.addf %16, %17 : vector<256x128xf32>
    %cst_7 = arith.constant 0.000000e+00 : f32
    %19 = vector.broadcast %cst_7 : f32 to vector<18x18x128xf32>
    %c0_8 = arith.constant 0 : index
    %c0_9 = arith.constant 0 : index
    %c0_10 = arith.constant 0 : index
    %20 = vector.load %arg8[%c0_8, %c0_9, %c0_10] : memref<18x18x128xf32, #tpu.memory_space<vmem>>, vector<18x18x128xf32>
    tpu.vector_store %arg8[%c0_8, %c0_9, %c0_10], %19 {strides = array<i32>} : memref<18x18x128xf32, #tpu.memory_space<vmem>>, vector<18x18x128xf32>,
    %c1 = arith.constant 1 : index
    %c1_11 = arith.constant 1 : index
    %c0_12 = arith.constant 0 : index
    %21 = vector.load %arg8[%c1, %c1_11, %c0_12] : memref<18x18x128xf32, #tpu.memory_space<vmem>>, vector<16x16x128xf32>
    tpu.vector_store %arg8[%c1, %c1_11, %c0_12], %8 {strides = array<i32>} : memref<18x18x128xf32, #tpu.memory_space<vmem>>, vector<16x16x128xf32>,
    %c0_13 = arith.constant 0 : index
    %c0_14 = arith.constant 0 : index
    %c0_15 = arith.constant 0 : index
    %22 = vector.load %arg8[%c0_13, %c0_14, %c0_15] : memref<18x18x128xf32, #tpu.memory_space<vmem>>, vector<18x18x128xf32>
    %23 = vector.extract_strided_slice %22 {offsets = [0, 0, 0], sizes = [16, 16, 128], strides = [1, 1, 1]} : vector<18x18x128xf32> to vector<16x16x128xf32>
    %24 = vector.shape_cast %23 : vector<16x16x128xf32> to vector<256x128xf32>
    %25 = vector.extract_strided_slice %22 {offsets = [0, 1, 0], sizes = [16, 16, 128], strides = [1, 1, 1]} : vector<18x18x128xf32> to vector<16x16x128xf32>
    %26 = vector.shape_cast %25 : vector<16x16x128xf32> to vector<256x128xf32>
    %27 = vector.extract_strided_slice %22 {offsets = [0, 2, 0], sizes = [16, 16, 128], strides = [1, 1, 1]} : vector<18x18x128xf32> to vector<16x16x128xf32>
    %28 = vector.shape_cast %27 : vector<16x16x128xf32> to vector<256x128xf32>
    %29 = vector.extract_strided_slice %22 {offsets = [1, 0, 0], sizes = [16, 16, 128], strides = [1, 1, 1]} : vector<18x18x128xf32> to vector<16x16x128xf32>
    %30 = vector.shape_cast %29 : vector<16x16x128xf32> to vector<256x128xf32>
    %31 = vector.extract_strided_slice %22 {offsets = [1, 1, 0], sizes = [16, 16, 128], strides = [1, 1, 1]} : vector<18x18x128xf32> to vector<16x16x128xf32>
    %32 = vector.shape_cast %31 : vector<16x16x128xf32> to vector<256x128xf32>
    %33 = vector.extract_strided_slice %22 {offsets = [1, 2, 0], sizes = [16, 16, 128], strides = [1, 1, 1]} : vector<18x18x128xf32> to vector<16x16x128xf32>
    %34 = vector.shape_cast %33 : vector<16x16x128xf32> to vector<256x128xf32>
    %35 = vector.extract_strided_slice %22 {offsets = [2, 0, 0], sizes = [16, 16, 128], strides = [1, 1, 1]} : vector<18x18x128xf32> to vector<16x16x128xf32>
    %36 = vector.shape_cast %35 : vector<16x16x128xf32> to vector<256x128xf32>
    %37 = vector.extract_strided_slice %22 {offsets = [2, 1, 0], sizes = [16, 16, 128], strides = [1, 1, 1]} : vector<18x18x128xf32> to vector<16x16x128xf32>
    %38 = vector.shape_cast %37 : vector<16x16x128xf32> to vector<256x128xf32>
    %39 = vector.extract_strided_slice %22 {offsets = [2, 2, 0], sizes = [16, 16, 128], strides = [1, 1, 1]} : vector<18x18x128xf32> to vector<16x16x128xf32>
    %40 = vector.shape_cast %39 : vector<16x16x128xf32> to vector<256x128xf32>
    %41 = tpu.concatenate %24, %26, %28, %30, %32, %34, %36, %38, %40 in 1 : vector<256x128xf32>, vector<256x128xf32>, vector<256x128xf32>, vector<256x128xf32>, vector<256x128xf32>, vector<256x128xf32>, vector<256x128xf32>, vector<256x128xf32>, vector<256x128xf32> -> vector<256x1152xf32>
    %42 = arith.truncf %41 : vector<256x1152xf32> to vector<256x1152xbf16>
    %c0_16 = arith.constant 0 : index
    %c0_17 = arith.constant 0 : index
    %43 = vector.load %arg2[%c0_16, %c0_17] : memref<1152x128xbf16, #tpu.memory_space<vmem>>, vector<1152x128xbf16>
    %cst_18 = arith.constant dense<0.000000e+00> : vector<256x128xf32>
    %44 = tpu.matmul %42, %43, %cst_18 {dimension_numbers = #tpu.dot_dimension_numbers<[1], [0], [0], [1], [0, 0, 1, 1], [], []>} : vector<256x1152xbf16>, vector<1152x128xbf16>, vector<256x128xf32> -> vector<256x128xf32>
    %45 = vector.broadcast %1 : vector<1x128xf32> to vector<256x128xf32>
    %46 = arith.mulf %44, %45 : vector<256x128xf32>
    %47 = vector.broadcast %2 : vector<1x128xf32> to vector<256x128xf32>
    %48 = arith.addf %46, %47 : vector<256x128xf32>
    %cst_19 = arith.constant 0.000000e+00 : f32
    %49 = vector.broadcast %cst_19 : f32 to vector<256x128xf32>
    %50 = arith.maximumf %48, %49 : vector<256x128xf32>
    %cst_20 = arith.constant 0.000000e+00 : f32
    %51 = vector.broadcast %cst_20 : f32 to vector<18x18x128xf32>
    %c0_21 = arith.constant 0 : index
    %c0_22 = arith.constant 0 : index
    %c0_23 = arith.constant 0 : index
    %52 = vector.load %arg9[%c0_21, %c0_22, %c0_23] : memref<18x18x128xf32, #tpu.memory_space<vmem>>, vector<18x18x128xf32>
    tpu.vector_store %arg9[%c0_21, %c0_22, %c0_23], %51 {strides = array<i32>} : memref<18x18x128xf32, #tpu.memory_space<vmem>>, vector<18x18x128xf32>,
    %53 = vector.shape_cast %50 : vector<256x128xf32> to vector<16x16x128xf32>
    %c1_24 = arith.constant 1 : index
    %c1_25 = arith.constant 1 : index
    %c0_26 = arith.constant 0 : index
    %54 = vector.load %arg9[%c1_24, %c1_25, %c0_26] : memref<18x18x128xf32, #tpu.memory_space<vmem>>, vector<16x16x128xf32>
    tpu.vector_store %arg9[%c1_24, %c1_25, %c0_26], %53 {strides = array<i32>} : memref<18x18x128xf32, #tpu.memory_space<vmem>>, vector<16x16x128xf32>,
    %c0_27 = arith.constant 0 : index
    %c0_28 = arith.constant 0 : index
    %c0_29 = arith.constant 0 : index
    %55 = vector.load %arg9[%c0_27, %c0_28, %c0_29] : memref<18x18x128xf32, #tpu.memory_space<vmem>>, vector<18x18x128xf32>
    %56 = vector.extract_strided_slice %55 {offsets = [0, 0, 0], sizes = [16, 16, 128], strides = [1, 1, 1]} : vector<18x18x128xf32> to vector<16x16x128xf32>
    %57 = vector.shape_cast %56 : vector<16x16x128xf32> to vector<256x128xf32>
    %58 = vector.extract_strided_slice %55 {offsets = [0, 1, 0], sizes = [16, 16, 128], strides = [1, 1, 1]} : vector<18x18x128xf32> to vector<16x16x128xf32>
    %59 = vector.shape_cast %58 : vector<16x16x128xf32> to vector<256x128xf32>
    %60 = vector.extract_strided_slice %55 {offsets = [0, 2, 0], sizes = [16, 16, 128], strides = [1, 1, 1]} : vector<18x18x128xf32> to vector<16x16x128xf32>
    %61 = vector.shape_cast %60 : vector<16x16x128xf32> to vector<256x128xf32>
    %62 = vector.extract_strided_slice %55 {offsets = [1, 0, 0], sizes = [16, 16, 128], strides = [1, 1, 1]} : vector<18x18x128xf32> to vector<16x16x128xf32>
    %63 = vector.shape_cast %62 : vector<16x16x128xf32> to vector<256x128xf32>
    %64 = vector.extract_strided_slice %55 {offsets = [1, 1, 0], sizes = [16, 16, 128], strides = [1, 1, 1]} : vector<18x18x128xf32> to vector<16x16x128xf32>
    %65 = vector.shape_cast %64 : vector<16x16x128xf32> to vector<256x128xf32>
    %66 = vector.extract_strided_slice %55 {offsets = [1, 2, 0], sizes = [16, 16, 128], strides = [1, 1, 1]} : vector<18x18x128xf32> to vector<16x16x128xf32>
    %67 = vector.shape_cast %66 : vector<16x16x128xf32> to vector<256x128xf32>
    %68 = vector.extract_strided_slice %55 {offsets = [2, 0, 0], sizes = [16, 16, 128], strides = [1, 1, 1]} : vector<18x18x128xf32> to vector<16x16x128xf32>
    %69 = vector.shape_cast %68 : vector<16x16x128xf32> to vector<256x128xf32>
    %70 = vector.extract_strided_slice %55 {offsets = [2, 1, 0], sizes = [16, 16, 128], strides = [1, 1, 1]} : vector<18x18x128xf32> to vector<16x16x128xf32>
    %71 = vector.shape_cast %70 : vector<16x16x128xf32> to vector<256x128xf32>
    %72 = vector.extract_strided_slice %55 {offsets = [2, 2, 0], sizes = [16, 16, 128], strides = [1, 1, 1]} : vector<18x18x128xf32> to vector<16x16x128xf32>
    %73 = vector.shape_cast %72 : vector<16x16x128xf32> to vector<256x128xf32>
    %74 = tpu.concatenate %57, %59, %61, %63, %65, %67, %69, %71, %73 in 1 : vector<256x128xf32>, vector<256x128xf32>, vector<256x128xf32>, vector<256x128xf32>, vector<256x128xf32>, vector<256x128xf32>, vector<256x128xf32>, vector<256x128xf32>, vector<256x128xf32> -> vector<256x1152xf32>
    %75 = arith.truncf %74 : vector<256x1152xf32> to vector<256x1152xbf16>
    %c0_30 = arith.constant 0 : index
    %c0_31 = arith.constant 0 : index
    %76 = vector.load %arg3[%c0_30, %c0_31] : memref<1152x128xbf16, #tpu.memory_space<vmem>>, vector<1152x128xbf16>
    %cst_32 = arith.constant dense<0.000000e+00> : vector<256x128xf32>
    %77 = tpu.matmul %75, %76, %cst_32 {dimension_numbers = #tpu.dot_dimension_numbers<[1], [0], [0], [1], [0, 0, 1, 1], [], []>} : vector<256x1152xbf16>, vector<1152x128xbf16>, vector<256x128xf32> -> vector<256x128xf32>
    %78 = vector.broadcast %3 : vector<1x128xf32> to vector<256x128xf32>
    %79 = arith.mulf %77, %78 : vector<256x128xf32>
    %80 = vector.broadcast %4 : vector<1x128xf32> to vector<256x128xf32>
    %81 = arith.addf %79, %80 : vector<256x128xf32>
    %cst_33 = arith.constant 0.000000e+00 : f32
    %82 = vector.broadcast %cst_33 : f32 to vector<256x128xf32>
    %83 = arith.maximumf %81, %82 : vector<256x128xf32>
    %84 = vector.shape_cast %83 : vector<256x128xf32> to vector<16x16x128xf32>
    %c1_34 = arith.constant 1 : index
    %c1_35 = arith.constant 1 : index
    %c0_36 = arith.constant 0 : index
    %85 = vector.load %arg9[%c1_34, %c1_35, %c0_36] : memref<18x18x128xf32, #tpu.memory_space<vmem>>, vector<16x16x128xf32>
    tpu.vector_store %arg9[%c1_34, %c1_35, %c0_36], %84 {strides = array<i32>} : memref<18x18x128xf32, #tpu.memory_space<vmem>>, vector<16x16x128xf32>,
    %c0_37 = arith.constant 0 : index
    %c0_38 = arith.constant 0 : index
    %c0_39 = arith.constant 0 : index
    %86 = vector.load %arg9[%c0_37, %c0_38, %c0_39] : memref<18x18x128xf32, #tpu.memory_space<vmem>>, vector<18x18x128xf32>
    %87 = vector.extract_strided_slice %86 {offsets = [0, 0, 0], sizes = [16, 16, 128], strides = [1, 1, 1]} : vector<18x18x128xf32> to vector<16x16x128xf32>
    %88 = vector.shape_cast %87 : vector<16x16x128xf32> to vector<256x128xf32>
    %89 = vector.extract_strided_slice %86 {offsets = [0, 1, 0], sizes = [16, 16, 128], strides = [1, 1, 1]} : vector<18x18x128xf32> to vector<16x16x128xf32>
    %90 = vector.shape_cast %89 : vector<16x16x128xf32> to vector<256x128xf32>
    %91 = vector.extract_strided_slice %86 {offsets = [0, 2, 0], sizes = [16, 16, 128], strides = [1, 1, 1]} : vector<18x18x128xf32> to vector<16x16x128xf32>
    %92 = vector.shape_cast %91 : vector<16x16x128xf32> to vector<256x128xf32>
    %93 = vector.extract_strided_slice %86 {offsets = [1, 0, 0], sizes = [16, 16, 128], strides = [1, 1, 1]} : vector<18x18x128xf32> to vector<16x16x128xf32>
    %94 = vector.shape_cast %93 : vector<16x16x128xf32> to vector<256x128xf32>
    %95 = vector.extract_strided_slice %86 {offsets = [1, 1, 0], sizes = [16, 16, 128], strides = [1, 1, 1]} : vector<18x18x128xf32> to vector<16x16x128xf32>
    %96 = vector.shape_cast %95 : vector<16x16x128xf32> to vector<256x128xf32>
    %97 = vector.extract_strided_slice %86 {offsets = [1, 2, 0], sizes = [16, 16, 128], strides = [1, 1, 1]} : vector<18x18x128xf32> to vector<16x16x128xf32>
    %98 = vector.shape_cast %97 : vector<16x16x128xf32> to vector<256x128xf32>
    %99 = vector.extract_strided_slice %86 {offsets = [2, 0, 0], sizes = [16, 16, 128], strides = [1, 1, 1]} : vector<18x18x128xf32> to vector<16x16x128xf32>
    %100 = vector.shape_cast %99 : vector<16x16x128xf32> to vector<256x128xf32>
    %101 = vector.extract_strided_slice %86 {offsets = [2, 1, 0], sizes = [16, 16, 128], strides = [1, 1, 1]} : vector<18x18x128xf32> to vector<16x16x128xf32>
    %102 = vector.shape_cast %101 : vector<16x16x128xf32> to vector<256x128xf32>
    %103 = vector.extract_strided_slice %86 {offsets = [2, 2, 0], sizes = [16, 16, 128], strides = [1, 1, 1]} : vector<18x18x128xf32> to vector<16x16x128xf32>
    %104 = vector.shape_cast %103 : vector<16x16x128xf32> to vector<256x128xf32>
    %105 = tpu.concatenate %88, %90, %92, %94, %96, %98, %100, %102, %104 in 1 : vector<256x128xf32>, vector<256x128xf32>, vector<256x128xf32>, vector<256x128xf32>, vector<256x128xf32>, vector<256x128xf32>, vector<256x128xf32>, vector<256x128xf32>, vector<256x128xf32> -> vector<256x1152xf32>
    %106 = arith.truncf %105 : vector<256x1152xf32> to vector<256x1152xbf16>
    %c0_40 = arith.constant 0 : index
    %c0_41 = arith.constant 0 : index
    %107 = vector.load %arg4[%c0_40, %c0_41] : memref<1152x128xbf16, #tpu.memory_space<vmem>>, vector<1152x128xbf16>
    %cst_42 = arith.constant dense<0.000000e+00> : vector<256x128xf32>
    %108 = tpu.matmul %106, %107, %cst_42 {dimension_numbers = #tpu.dot_dimension_numbers<[1], [0], [0], [1], [0, 0, 1, 1], [], []>} : vector<256x1152xbf16>, vector<1152x128xbf16>, vector<256x128xf32> -> vector<256x128xf32>
    %109 = vector.broadcast %5 : vector<1x128xf32> to vector<256x128xf32>
    %110 = arith.mulf %108, %109 : vector<256x128xf32>
    %111 = vector.broadcast %6 : vector<1x128xf32> to vector<256x128xf32>
    %112 = arith.addf %110, %111 : vector<256x128xf32>
    %113 = arith.addf %112, %18 : vector<256x128xf32>
    %cst_43 = arith.constant 0.000000e+00 : f32
    %114 = vector.broadcast %cst_43 : f32 to vector<256x128xf32>
    %115 = arith.maximumf %113, %114 : vector<256x128xf32>
    %c0_44 = arith.constant 0 : index
    %c0_45 = arith.constant 0 : index
    %c0_46 = arith.constant 0 : index
    %116 = vector.load %arg7[%c0_44, %c0_45, %c0_46] : memref<1x256x128xf32, #tpu.memory_space<vmem>>, vector<1x256x128xf32>
    %117 = vector.shape_cast %116 : vector<1x256x128xf32> to vector<256x128xf32>
    %118 = vector.shape_cast %115 : vector<256x128xf32> to vector<1x256x128xf32>
    tpu.vector_store %arg7[%c0_44, %c0_45, %c0_46], %118 {strides = array<i32>} : memref<1x256x128xf32, #tpu.memory_space<vmem>>, vector<1x256x128xf32>,
    return
  }
  func.func @transform_0(%arg0: i32) -> (i32, i32, i32, i32) {
    %c0_i32 = arith.constant 0 : i32
    %c0_i32_0 = arith.constant 0 : i32
    %c0_i32_1 = arith.constant 0 : i32
    %c0_i32_2 = arith.constant 0 : i32
    return %arg0, %c0_i32, %c0_i32_0, %c0_i32_1 : i32, i32, i32, i32
  }
  func.func @transform_1(%arg0: i32) -> (i32, i32) {
    %c0_i32 = arith.constant 0 : i32
    %c0_i32_0 = arith.constant 0 : i32
    %c0_i32_1 = arith.constant 0 : i32
    return %c0_i32, %c0_i32_0 : i32, i32
  }
  func.func @transform_2(%arg0: i32) -> (i32, i32) {
    %c0_i32 = arith.constant 0 : i32
    %c0_i32_0 = arith.constant 0 : i32
    %c0_i32_1 = arith.constant 0 : i32
    return %c0_i32, %c0_i32_0 : i32, i32
  }
  func.func @transform_3(%arg0: i32) -> (i32, i32) {
    %c0_i32 = arith.constant 0 : i32
    %c0_i32_0 = arith.constant 0 : i32
    %c0_i32_1 = arith.constant 0 : i32
    return %c0_i32, %c0_i32_0 : i32, i32
  }
  func.func @transform_4(%arg0: i32) -> (i32, i32) {
    %c0_i32 = arith.constant 0 : i32
    %c0_i32_0 = arith.constant 0 : i32
    %c0_i32_1 = arith.constant 0 : i32
    return %c0_i32, %c0_i32_0 : i32, i32
  }
  func.func @transform_5(%arg0: i32) -> (i32, i32) {
    %c0_i32 = arith.constant 0 : i32
    %c0_i32_0 = arith.constant 0 : i32
    %c0_i32_1 = arith.constant 0 : i32
    return %c0_i32, %c0_i32_0 : i32, i32
  }
  func.func @transform_6(%arg0: i32) -> (i32, i32, i32) {
    %c0_i32 = arith.constant 0 : i32
    %c0_i32_0 = arith.constant 0 : i32
    %c0_i32_1 = arith.constant 0 : i32
    return %arg0, %c0_i32, %c0_i32_0 : i32, i32, i32
  }
}

</mosaic_0001>

<bundles_post_ra>
// kernel: tpu_custom_call.1
= control target key start
LH: loop header
LB: loop body
LE: loop exit
PB: predicated region body
PF: predicated region fallthrough
CT: control target
= control target key end

     0   :  { %11 = vsyncpa [#allocation5], 0  ;;  %s12363_s0 = inlined_call_operand.hbm [shape: f32[2,16,16,128], index: 0, kind: input, shape index: {}]   ;;  %s12364_s1 = inlined_call_operand.hbm [shape: bf16[1152,128], index: 1, kind: input, shape index: {}]   ;;  %s12365_s2 = inlined_call_operand.hbm [shape: bf16[1152,128], index: 2, kind: input, shape index: {}]   ;;  %s12366_s3 = inlined_call_operand.hbm [shape: bf16[1152,128], index: 3, kind: input, shape index: {}]   ;;  %s12367_s4 = inlined_call_operand.hbm [shape: bf16[128,128], index: 4, kind: input, shape index: {}]   ;;  %s12368_s5 = inlined_call_operand.vmem [shape: f32[8,128], index: 5, kind: input, shape index: {}]   ;;  %s12369_s6 = inlined_call_operand.hbm [shape: f32[2,256,128], index: 6, kind: output, shape index: {}]  }
   0x1   :  { %13 = vsyncpa [#allocation5 + $0x1], 0 }
   0x2   :  { %14 = vsyncpa [#allocation8], 0 }
   0x3   :  { %15 = vsyncpa [#allocation11], 0 }
   0x4   :  { %16 = vsyncpa [#allocation6], 0 }
   0x5   :  { %18 = vsyncpa [#allocation6 + $0x1], 0  ;;  %s9241_s21 = smov 0   ;;  %s9243_s22 = smov 0  }
   0x6   :  { %s9245_s23 = smov 0   ;;  %s9247_s24 = smov 0  }
   0x7 LB: > { %s9262_s25 = sadd.s32 4294967295, %s9190_s24   ;;  %s6769_s26 = sadd.s32 4294967294, %s9190_s24   ;;  %s9190_s24 = sphi %s9247_s24, %s12496_s24   ;;  %s9186_s23 = sphi %s9245_s23, %s12495_s23   ;;  %s9182_s22 = sphi %s9243_s22, %s12494_s22   ;;  %s9178_s21 = sphi %s9241_s21, %s12493_s21  }
   0x8   : > { %p44_p0 = scmp.ne.s32.totalorder %s9182_s22, %s9178_s21  ;;  %p12370_p1 = scmp.eq.s32.totalorder %s9262_s25, 0 }
   0x9   : > { %p179_p3 = scmp.eq.s32.totalorder %s6769_s26, 1  ;;  %p6770_p5 = scmp.ge.s32.totalorder %s9190_s24, 1 }
   0xa   : > { %p9271_p4 = por %p12370_p1, %p44_p0  ;;  %p186_p7 = scmp.lt.s32.totalorder %s9190_s24, 3 }
   0xb   : > { %p9276_p6 = por %p179_p3, %p44_p0  ;;  %s9192_s30 = smov [#allocation7]  }
   0xc   : > { %s12388_s27 = scalar_select %p9271_p4, 1, 0 }
   0xd   : > { %s12389_s28 = scalar_select %p9276_p6, 1, 0 }
   0xe   : > { %p9281_p8 = pnand %p6770_p5, %p186_p7  ;;  %s198_s7 = sshll.u32 %s9192_s30, 4  ;;  %s9285_s7 = int_to_ptr.vmem [resolvable:$true] %s198_s7 }
   0xf   : > { %s9193_s9 = smov [#allocation10]   ;;  %s9194_s11 = smov [#allocation9]  }
  0x10   : > { %s12390_s29 = scalar_select %p9281_p8, 1, 0 }
  0x11   : > { %p8669_p9 = pneg %p9281_p8  ;;  %s224_s10 = sshll.u32 %s9193_s9, 4  ;;  %s9296_s10 = int_to_ptr.vmem [resolvable:$true] %s224_s10 }
  0x12   : > { %s9298_s12 = sshll.u32 %s9194_s11, 4  ;;  %s8974_s15 = scalar_lea.hbm %s12364_s1, 9216  ;;  %s212_s12 = int_to_ptr.vmem [resolvable:$true] %s9298_s12 }
  0x13   : > { %p9292_p11 = pnand %p8669_p9, %p12370_p1  ;;  %p8975_p12 = scmp.ne.s32.totalorder %s12364_s1, %s8974_s15 }
  0x14   : > { %p8981_p5 = scmp.lt.u32.totalorder %s8974_s15, %s12364_s1 }
  0x15   : > { %p9308_p13 = pneg %p9292_p11 }
  0x17   : > { %p8977_p0 = pnand %p9308_p13, %p8975_p12 }
  0x19   : > { %p8978_p3 = pneg %p8977_p0 }
  0x1b   : > { %p8983_p7 = pnand %p8981_p5, %p8978_p3 }
  0x1d   : > { %8986 = shalt.err (!%p8983_p7)
}
  0x1e   : > { %s8987_s26 = scalar_lea.vmem %s9285_s7, 9216  ;;  %p8995_p2 = scmp.lt.s32.totalorder %s9285_s7, %s9285_s7 }
  0x1f   : > { %p8988_p9 = scmp.ne.s32.totalorder %s9285_s7, %s8987_s26  ;;  %p8996_p6 = scmp.lt.s32.totalorder %s8987_s26, %s8987_s26 }
  0x21   : > { %p8990_p10 = pnand %p8988_p9, %p9308_p13  ;;  %p8997_p12 = por %p8996_p6, %p8995_p2 }
  0x23   : > { %p8991_p1 = pneg %p8990_p10 }
  0x25   : > { %p8998_p0 = pnand %p8997_p12, %p8991_p1 }
  0x27   : > { %9001 = shalt.err (!%p8998_p0)
}
  0x28   : > { %s9195_s30 = smov 64   ;;  %s9196_s9 = smov 4  }
  0x29   : > { %8672 = dma.hbm_to_vmem [thread:$0]  (!%p9292_p11), %s12364_s1, 9216, %s9285_s7, [#allocation8], %s9195_s30, %s9195_s30, %s9196_s9  }
  0x2a   : > { %s9002_s16 = scalar_lea.hbm %s12366_s3, 9216 }
  0x2b   : > { %p9003_p1 = scmp.ne.s32.totalorder %s12366_s3, %s9002_s16  ;;  %p9009_p10 = scmp.lt.u32.totalorder %s9002_s16, %s12366_s3 }
  0x2d   : > { %p9005_p2 = pnand %p9003_p1, %p9308_p13 }
  0x2f   : > { %p9006_p6 = pneg %p9005_p2 }
  0x31   : > { %p9011_p3 = pnand %p9009_p10, %p9006_p6 }
  0x33   : > { %9014 = shalt.err (!%p9011_p3)
}
  0x34   : > { %s9015_s7 = scalar_lea.vmem %s9296_s10, 9216  ;;  %p9023_p12 = scmp.lt.s32.totalorder %s9296_s10, %s9296_s10 }
  0x35   : > { %p9016_p5 = scmp.ne.s32.totalorder %s9296_s10, %s9015_s7  ;;  %p9024_p0 = scmp.lt.s32.totalorder %s9015_s7, %s9015_s7 }
  0x37   : > { %p9018_p7 = pnand %p9016_p5, %p9308_p13  ;;  %p9025_p1 = por %p9024_p0, %p9023_p12 }
  0x39   : > { %p9019_p9 = pneg %p9018_p7 }
  0x3b   : > { %p9026_p2 = pnand %p9025_p1, %p9019_p9 }
  0x3d   : > { %9029 = shalt.err (!%p9026_p2)
}
  0x3e   : > { %8678 = dma.hbm_to_vmem [thread:$0]  (!%p9292_p11), %s12366_s3, 9216, %s9296_s10, [#allocation11], %s9195_s30, %s9195_s30, %s9196_s9  }
  0x3f   : > { %s9030_s16 = scalar_lea.hbm %s12365_s2, 9216 }
  0x40   : > { %p9031_p6 = scmp.ne.s32.totalorder %s12365_s2, %s9030_s16  ;;  %p9037_p5 = scmp.lt.u32.totalorder %s9030_s16, %s12365_s2 }
  0x42   : > { %p9033_p10 = pnand %p9031_p6, %p9308_p13 }
  0x44   : > { %p9034_p3 = pneg %p9033_p10 }
  0x46   : > { %p9039_p7 = pnand %p9037_p5, %p9034_p3 }
  0x48   : > { %9042 = shalt.err (!%p9039_p7)
}
  0x49   : > { %s9043_s7 = scalar_lea.vmem %s212_s12, 9216  ;;  %p9051_p1 = scmp.lt.s32.totalorder %s212_s12, %s212_s12 }
  0x4a   : > { %p9044_p9 = scmp.ne.s32.totalorder %s212_s12, %s9043_s7  ;;  %p9052_p2 = scmp.lt.s32.totalorder %s9043_s7, %s9043_s7 }
  0x4c   : > { %p9046_p12 = pnand %p9044_p9, %p9308_p13  ;;  %p9053_p4 = por %p9052_p2, %p9051_p1 }
  0x4e   : > { %p9047_p0 = pneg %p9046_p12 }
  0x50   : > { %p9054_p8 = pnand %p9053_p4, %p9047_p0 }
  0x52   : > { %9057 = shalt.err (!%p9054_p8)
}
  0x53   : > { %8675 = dma.hbm_to_vmem [thread:$0]  (!%p9292_p11), %s12365_s2, 9216, %s212_s12, [#allocation8], %s9195_s30, %s9195_s30, %s9196_s9  }
  0x54   : > { %s9197_s13 = smov [#allocation12]   ;;  %s9058_s17 = scalar_lea.hbm %s12367_s4, 1024 }
  0x55   : > { %s237_s14 = sshll.u32 %s9197_s13, 4  ;;  %p9059_p4 = scmp.ne.s32.totalorder %s12367_s4, %s9058_s17  ;;  %s238_s14 = int_to_ptr.vmem [resolvable:$true] %s237_s14 }
  0x56   : > { %p9065_p10 = scmp.lt.u32.totalorder %s9058_s17, %s12367_s4 }
  0x57   : > { %p9061_p8 = pnand %p9059_p4, %p9308_p13 }
  0x59   : > { %p9062_p6 = pneg %p9061_p8 }
  0x5b   : > { %p9067_p3 = pnand %p9065_p10, %p9062_p6 }
  0x5d   : > { %9070 = shalt.err (!%p9067_p3)
}
  0x5e   : > { %s9071_s12 = scalar_lea.vmem %s238_s14, 1024  ;;  %p9079_p12 = scmp.lt.s32.totalorder %s238_s14, %s238_s14 }
  0x5f   : > { %p9072_p5 = scmp.ne.s32.totalorder %s238_s14, %s9071_s12  ;;  %p9080_p0 = scmp.lt.s32.totalorder %s9071_s12, %s9071_s12 }
  0x61   : > { %p9074_p7 = pnand %p9072_p5, %p9308_p13  ;;  %p9081_p1 = por %p9080_p0, %p9079_p12 }
  0x63   : > { %p9075_p9 = pneg %p9074_p7 }
  0x65   : > { %p9082_p2 = pnand %p9081_p1, %p9075_p9 }
  0x67   : > { %9085 = shalt.err (!%p9082_p2)
}
  0x68   : > { %8681 = dma.hbm_to_vmem [thread:$0]  (!%p9292_p11), %s12367_s4, 1024, %s238_s14, [#allocation11], %s9195_s30, %s9195_s30, %s9196_s9  }
  0x69   : > { %s9402_s18 = sadd.s32 1, %s9190_s24   ;;  %s31_s8 = sadd.s32 1, %s9186_s23 }
  0x6a   : > { %s28_s13 = ssub.s32 %s9190_s24, %s9402_s18  ;;  %p38_p13 = scmp.ne.s32.totalorder %s9186_s23, %s9182_s22 }
  0x6b   : > { %p29_p4 = scmp.eq.s32.totalorder %s28_s13, 0  ;;  %p39_p8 = scmp.eq.s32.totalorder %s9190_s24, 0 }
  0x6c   : > { %p12393_p6 = scmp.eq.s32.totalorder %s9262_s25, 1  ;;  %p8694_p3 = scmp.lt.s32.totalorder %s9190_s24, 2 }
  0x6d   : > { %s9418_s16 = scalar_select %p29_p4, %s9186_s23, %s31_s8  }
  0x6e   : > { %p9412_p10 = por %p12393_p6, %p38_p13  ;;  %p40_p5 = por %p39_p8, %p38_p13 }
  0x6f   : > { %s254_s17 = sand.u32 1, %s9186_s23   ;;  %s7015_s30 = sshll.u32 %s9190_s24, 12 }
  0x70   : > { %s6776_s19 = sshll.u32 %s254_s17, 8  ;;  %s9425_s20 = scalar_lea.hbm %s12363_s0, %s7015_s30 }
  0x71   : > { %s258_s26 = scalar_lea.vmem [#allocation4], %s6776_s19  ;;  %p9429_p11 = pnand %p8694_p3, %p40_p5 }
  0x72   : > { %s265_s7 = sshll.u32 %s258_s26, 4  ;;  %s9433_s10 = scalar_lea.sflag [#allocation5], %s254_s17  ;;  %s9427_s7 = int_to_ptr.vmem [resolvable:$true] %s265_s7 }
  0x73   : > { %s9086_s11 = scalar_lea.hbm %s9425_s20, 4096  ;;  %p9088_p9 = pneg %p9429_p11 }
  0x74   : > { %p9087_p7 = scmp.ne.s32.totalorder %s9425_s20, %s9086_s11  ;;  %s9091_s19 = scalar_lea.hbm %s12363_s0, 8192 }
  0x75   : > { %p9092_p1 = scmp.lt.u32.totalorder %s9425_s20, %s12363_s0  ;;  %p9093_p2 = scmp.lt.u32.totalorder %s9091_s19, %s9086_s11 }
  0x76   : > { %p9089_p12 = pnand %p9088_p9, %p9087_p7  ;;  %p9095_p4 = scmp.lt.u32.totalorder %s9086_s11, %s9425_s20 }
  0x77   : > { %p9094_p13 = por %p9093_p2, %p9092_p1 }
  0x78   : > { %p9090_p0 = pneg %p9089_p12 }
  0x79   : > { %p9096_p8 = por %p9095_p4, %p9094_p13 }
  0x7b   : > { %p9097_p6 = pnand %p9096_p8, %p9090_p0 }
  0x7d   : > { %9100 = shalt.err (!%p9097_p6)
}
  0x7e   : > { %s9101_s17 = scalar_lea.vmem %s9427_s7, 4096  ;;  %s9198_s14 = smov [#allocation4]  }
  0x7f   : > { %p9102_p3 = scmp.ne.s32.totalorder %s9427_s7, %s9101_s17  ;;  %s9106_s26 = sshll.u32 %s9198_s14, 4  ;;  %s9107_s26 = int_to_ptr.vmem [resolvable:$false] %s9106_s26 }
  0x80   : > { %s9108_s8 = scalar_lea.vmem %s9107_s26, 8192  ;;  %p9109_p12 = scmp.lt.s32.totalorder %s9427_s7, %s9107_s26 }
  0x81   : > { %p9104_p5 = pnand %p9102_p3, %p9088_p9  ;;  %p9110_p1 = scmp.lt.s32.totalorder %s9108_s8, %s9101_s17 }
  0x83   : > { %p9105_p7 = pneg %p9104_p5  ;;  %p9111_p2 = por %p9110_p1, %p9109_p12 }
  0x85   : > { %p9112_p13 = pnand %p9111_p2, %p9105_p7 }
  0x87   : > { %9115 = shalt.err (!%p9112_p13)
}
  0x88   : > { %s9199_s11 = smov 128   ;;  %s9200_s13 = smov 8  }
  0x89   : > { %8685 = dma.hbm_to_vmem [thread:$0]  (!%p9429_p11), %s9425_s20, 4096, %s9427_s7, %s9433_s10, %s9199_s11, %s9199_s11, %s9200_s13  }
  0x8a   : > { %p12396_p9 = scmp.ne.s32.totalorder %s12390_s29, 0 }
  0x8c   : > { %277 = sbr.rel (%p12396_p9) target bundleno = 1742 (0x6ce), region = 44 }
  0x93   : > { %s9464_s19 = sand.u32 1, %s9182_s22   ;;  %p12397_p0 = scmp.ne.s32.totalorder %s12388_s27, 0 }
  0x94   : > { %s6780_s30 = sshll.u32 %s9464_s19, 8  ;;  %s280_s9 = scalar_lea.sflag [#allocation5], %s9464_s19 }
  0x95   : > { %s9470_s17 = scalar_lea.vmem [#allocation4], %s6780_s30 }
  0x96   : > { %9161 = dma.done.wait (%p12397_p0), %s280_s9, 4096  }
  0x97   : > { %9163 = vsyncadd (%p12397_p0), %s280_s9, 4294963200  ;;  %p12398_p11 = scmp.eq.s32.totalorder %s9262_s25, 0 }
  0x99   : > { %9165 = dma.done.wait (%p12398_p11), [#allocation8], 18432   ;;  %p12399_p4 = pmov %p12398_p11 }
  0x9b   : > { %9167 = vsyncadd (%p12399_p4), [#allocation8], 4294948864  ;;  %p12400_p8 = pmov %p12399_p4 }
  0x9c   : > { %p12401_p6 = pmov %p12399_p4 }
  0x9d   : > { %9169 = dma.done.wait (%p12400_p8), [#allocation11], 10240  }
  0x9e   : > { %9171 = vsyncadd (%p12401_p6), [#allocation11], 4294957056  ;;  %v9201_v0 = vmov 0.0   ;;  %v8743_v1 = vld [vmem:[#allocation12] sm:$0xff]   ;;  %v8746_v4 = vld [vmem:[#allocation12 + $0x8] sm:$0xff]   ;;  %vm864_vm0 = vcmask 1046528  }
  0x9f   : > { %678 = vst [vmem:[#allocation2 + $0x18] sm:$0xff] %v9201_v0  ;;  %679 = vst [vmem:[#allocation2 + $0x20] sm:$0xff] %v9201_v0  ;;  %v8744_v2 = vld [vmem:[#allocation7 + $0x40] sm:$0xff]   ;;  %8457 = vmatprep.subr.bf16.mxu0 %v8743_v1  ;;  %v8747_v5 = vld [vmem:[#allocation7 + $0x48] sm:$0xff]   ;;  %v865_v21 = vrot.slane %v9201_v0, 1  ;;  %v9202_v62 = vmov 0.0|0.0  }
  0xa0   : > { %680 = vst [vmem:[#allocation2 + $0x28] sm:$0x3] %v9201_v0  ;;  %675 = vst [vmem:[#allocation2] sm:$0xff] %v9201_v0  ;;  %v8745_v3 = vld [vmem:[#allocation7] sm:$0xff]   ;;  %7041 = vmatprep.subr.bf16.mxu1 %v8744_v2  ;;  %8458 = vmatpush3.bf16.msra.mxu0 %v8743_v1  ;;  %v8748_v6 = vld [vmem:[#allocation7 + $0x8] sm:$0xff]   ;;  %vm977_vm1 = vcmask 1045504  }
  0xa1   : > { %677 = vst [vmem:[#allocation2 + $0x10] sm:$0x3] %v9201_v0  ;;  %681 = vst [vmem:[#allocation2 + $0x30] sm:$0xff] %v9201_v0  ;;  %7042 = vmatpush3.bf16.msra.mxu1 %v8745_v3  ;;  %8459 = vmatprep.subr.bf16.mxu0 %v8746_v4  ;;  %v8749_v7 = vld [vmem:[#allocation12 + $0x10] sm:$0xff]   ;;  %v8752_v10 = vld [vmem:[#allocation12 + $0x18] sm:$0xff]   ;;  %s12118_s14 = scalar_lea.vmem [#allocation13], %s6780_s30 }
  0xa2   : > { %682 = vst [vmem:[#allocation2 + $0x38] sm:$0xff] %v9201_v0  ;;  %683 = vst [vmem:[#allocation2 + $0x40] sm:$0x3] %v9201_v0  ;;  %7043 = vmatprep.subr.bf16.mxu1 %v8747_v5  ;;  %v8750_v8 = vld [vmem:[#allocation7 + $0x50] sm:$0xff]   ;;  %v8753_v11 = vld [vmem:[#allocation7 + $0x58] sm:$0xff]   ;;  %s7016_s26 = sshll.u32 %s9262_s25, 12 }
  0xa3   : > { %684 = vst [vmem:[#allocation2 + $0x48] sm:$0xff] %v9201_v0  ;;  %685 = vst [vmem:[#allocation2 + $0x50] sm:$0xff] %v9201_v0  ;;  %v8751_v9 = vld [vmem:[#allocation7 + $0x10] sm:$0xff]   ;;  %v8754_v12 = vld [vmem:[#allocation7 + $0x18] sm:$0xff]   ;;  %s6658_s8 = sshll.u32 %s12118_s14, 4  ;;  %s12314_s30 = scalar_lea.hbm %s12369_s6, %s7016_s26  ;;  %s12316_s8 = int_to_ptr.vmem [resolvable:$true] %s6658_s8 }
  0xa4   : > { %686 = vst [vmem:[#allocation2 + $0x58] sm:$0x3] %v9201_v0  ;;  %687 = vst [vmem:[#allocation2 + $0x60] sm:$0xff] %v9201_v0  ;;  %8460 = vmatpush3.bf16.msra.mxu0 %v8746_v4  ;;  %v8755_v13 = vld [vmem:[#allocation12 + $0x20] sm:$0xff]   ;;  %v8758_v16 = vld [vmem:[#allocation12 + $0x28] sm:$0xff]   ;;  %s6645_s25 = scalar_lea.sflag [#allocation6], %s9464_s19 }
  0xa5   : > { %688 = vst [vmem:[#allocation2 + $0x68] sm:$0xff] %v9201_v0  ;;  %689 = vst [vmem:[#allocation2 + $0x70] sm:$0x3] %v9201_v0  ;;  %7044 = vmatpush3.bf16.msra.mxu1 %v8748_v6  ;;  %8461 = vmatprep.subr.bf16.mxu0 %v8749_v7  ;;  %v8756_v14 = vld [vmem:[#allocation7 + $0x60] sm:$0xff]   ;;  %v8759_v17 = vld [vmem:[#allocation7 + $0x68] sm:$0xff]   ;;  %s9116_s9 = scalar_lea.vmem %s12316_s8, 4096 }
  0xa6   : > { %690 = vst [vmem:[#allocation2 + $0x78] sm:$0xff] %v9201_v0  ;;  %691 = vst [vmem:[#allocation2 + $0x80] sm:$0xff] %v9201_v0  ;;  %7045 = vmatprep.subr.bf16.mxu1 %v8750_v8  ;;  %v8757_v15 = vld [vmem:[#allocation7 + $0x20] sm:$0xff]   ;;  %v8760_v18 = vld [vmem:[#allocation7 + $0x28] sm:$0xff]   ;;  %p9117_p3 = scmp.ne.s32.totalorder %s12316_s8, %s9116_s9 }
  0xa7   : > { %692 = vst [vmem:[#allocation2 + $0x88] sm:$0x3] %v9201_v0  ;;  %693 = vst [vmem:[#allocation2 + $0x90] sm:$0xff] %v9201_v0  ;;  %v8761_v19 = vld [vmem:[#allocation12 + $0x30] sm:$0xff]   ;;  %v8764_v23 = vld [vmem:[#allocation12 + $0x38] sm:$0xff]  }
  0xa8   : > { %694 = vst [vmem:[#allocation2 + $0x98] sm:$0xff] %v9201_v0  ;;  %695 = vst [vmem:[#allocation2 + $0xa0] sm:$0x3] %v9201_v0  ;;  %8462 = vmatpush3.bf16.msra.mxu0 %v8749_v7  ;;  %v8762_v20 = vld [vmem:[#allocation7 + $0x70] sm:$0xff]   ;;  %v8765_v24 = vld [vmem:[#allocation7 + $0x78] sm:$0xff]   ;;  %p9118_p5 = pnand %p9117_p3, %p9412_p10 }
  0xa9   : > { %696 = vst [vmem:[#allocation2 + $0xa8] sm:$0xff] %v9201_v0  ;;  %697 = vst [vmem:[#allocation2 + $0xb0] sm:$0xff] %v9201_v0  ;;  %7046 = vmatpush3.bf16.msra.mxu1 %v8751_v9  ;;  %8463 = vmatprep.subr.bf16.mxu0 %v8752_v10  ;;  %v8763_v22 = vld [vmem:[#allocation7 + $0x30] sm:$0xff]   ;;  %v330_v25 = vld [vmem:[%s9470_s17] sm:$0xff] }
  0xaa   : > { %698 = vst [vmem:[#allocation2 + $0xb8] sm:$0x3] %v9201_v0  ;;  %699 = vst [vmem:[#allocation2 + $0xc0] sm:$0xff] %v9201_v0  ;;  %7047 = vmatprep.subr.bf16.mxu1 %v8753_v11  ;;  %v331_v26 = vld [vmem:[%s9470_s17 + $0x8] sm:$0xff]  ;;  %v9588_v27 = vld [vmem:[#allocation2 + $0x10] sm:$0x3]  ;;  %p9119_p7 = pneg %p9118_p5 }
  0xab   : > { %700 = vst [vmem:[#allocation2 + $0xc8] sm:$0xff] %v9201_v0  ;;  %701 = vst [vmem:[#allocation2 + $0xd0] sm:$0x3] %v9201_v0  ;;  %v362_v28 = vpack.c.bf16 %v331_v26, %v330_v25  ;;  %v868_v29 = vrot.slane %v9588_v27, 1  ;;  %v332_v30 = vld [vmem:[%s9470_s17 + $0x10] sm:$0xff]  ;;  %v333_v31 = vld [vmem:[%s9470_s17 + $0x18] sm:$0xff] }
  0xac   : > { %702 = vst [vmem:[#allocation2 + $0xd8] sm:$0xff] %v9201_v0  ;;  %703 = vst [vmem:[#allocation2 + $0xe0] sm:$0xff] %v9201_v0  ;;  %8464 = vmatpush3.bf16.msra.mxu0 %v8752_v10  ;;  %v8766_v32 = vld [vmem:[#allocation7 + $0x38] sm:$0xff]   ;;  %v8767_v34 = vld [vmem:[#allocation7 + $0x140] sm:$0xff]   ;;  %v363_v43 = vpack.c.bf16 %v333_v31, %v332_v30 }
  0xad   : > { %704 = vst [vmem:[#allocation2 + $0xe8] sm:$0x3] %v9201_v0  ;;  %705 = vst [vmem:[#allocation2 + $0xf0] sm:$0xff] %v9201_v0  ;;  %7048 = vmatpush3.bf16.msra.mxu1 %v8754_v12  ;;  %8465 = vmatprep.subr.bf16.mxu0 %v8755_v13  ;;  %v869_v33 = vsel %vm864_vm0, %v865_v21, %v868_v29  ;;  %v334_v35 = vld [vmem:[%s9470_s17 + $0x20] sm:$0xff]  ;;  %v335_v37 = vld [vmem:[%s9470_s17 + $0x28] sm:$0xff] }
  0xae   : > { %706 = vst [vmem:[#allocation2 + $0xf8] sm:$0xff] %v9201_v0  ;;  %707 = vst [vmem:[#allocation2 + $0x100] sm:$0x3] %v9201_v0  ;;  %7049 = vmatprep.subr.bf16.mxu1 %v8756_v14  ;;  %8473 = vmatprep.mubr.bf16.mxu0 %v362_v28  ;;  %v1125_v36 = vpack.c.bf16 %v869_v33, %v865_v21  ;;  %v9597_v38 = vld [vmem:[%s9470_s17 + $0x30] sm:$0xff]  ;;  %v9600_v39 = vld [vmem:[%s9470_s17 + $0x38] sm:$0xff]  ;;  %v364_v46 = vpack.c.bf16 %v335_v37, %v334_v35 }
  0xaf   : > { %708 = vst [vmem:[#allocation2 + $0x108] sm:$0xff] %v9201_v0  ;;  %709 = vst [vmem:[#allocation2 + $0x110] sm:$0xff] %v9201_v0  ;;  %v9605_v40 = vld [vmem:[%s9470_s17 + $0x40] sm:$0xff]  ;;  %v9608_v41 = vld [vmem:[%s9470_s17 + $0x48] sm:$0xff]  ;;  %v365_v12 = vpack.c.bf16 %v9600_v39, %v9597_v38 }
  0xb0   : > { %710 = vst [vmem:[#allocation2 + $0x118] sm:$0x3] %v9201_v0  ;;  %711 = vst [vmem:[#allocation2 + $0x120] sm:$0xff] %v9201_v0  ;;  %8466 = vmatpush3.bf16.msra.mxu0 %v8755_v13  ;;  %v9611_v42 = vld [vmem:[%s9470_s17 + $0x50] sm:$0xff]  ;;  %1786 = vmatprep.mubr.bf16.mxu1 %v1125_v36  ;;  %v9616_v44 = vld [vmem:[%s9470_s17 + $0x58] sm:$0xff] }
  0xb1   : > { %712 = vst [vmem:[#allocation2 + $0x128] sm:$0xff] %v9201_v0  ;;  %713 = vst [vmem:[#allocation2 + $0x130] sm:$0x3] %v9201_v0  ;;  %7050 = vmatpush3.bf16.msra.mxu1 %v8757_v15  ;;  %8467 = vmatprep.subr.bf16.mxu0 %v8758_v16  ;;  %v8768_v45 = vld [vmem:[#allocation7 + $0x100] sm:$0xff]   ;;  %v8769_v55 = vld [vmem:[#allocation7 + $0x148] sm:$0xff]  }
  0xb2   : > { %714 = vst [vmem:[#allocation2 + $0x138] sm:$0xff] %v9201_v0  ;;  %715 = vst [vmem:[#allocation2 + $0x140] sm:$0xff] %v9201_v0  ;;  %7051 = vmatprep.subr.bf16.mxu1 %v8759_v17  ;;  %v8770_v59 = vld [vmem:[#allocation7 + $0x108] sm:$0xff]   ;;  %v9638_v60 = vld [vmem:[%s9470_s17 + $0x60] sm:$0xff] }
  0xb3   : > { %716 = vst [vmem:[#allocation2 + $0x148] sm:$0x3] %v9201_v0  ;;  %717 = vst [vmem:[#allocation2 + $0x150] sm:$0xff] %v9201_v0  ;;  %v9641_v61 = vld [vmem:[%s9470_s17 + $0x68] sm:$0xff]  ;;  %v9651_v3 = vld [vmem:[%s9470_s17 + $0x70] sm:$0xff] }
  0xb4   : > { %718 = vst [vmem:[#allocation2 + $0x158] sm:$0xff] %v9201_v0  ;;  %719 = vst [vmem:[#allocation2 + $0x160] sm:$0x3] %v9201_v0  ;;  %8468 = vmatpush3.bf16.msra.mxu0 %v8758_v16  ;;  %v9654_v4 = vld [vmem:[%s9470_s17 + $0x78] sm:$0xff]  ;;  %v9665_v8 = vld [vmem:[%s9470_s17 + $0x80] sm:$0xff] }
  0xb5   : > { %720 = vst [vmem:[#allocation2 + $0x168] sm:$0xff] %v9201_v0  ;;  %721 = vst [vmem:[#allocation2 + $0x170] sm:$0xff] %v9201_v0  ;;  %7052 = vmatpush3.bf16.msra.mxu1 %v8760_v18  ;;  %8469 = vmatprep.subr.bf16.mxu0 %v8761_v19  ;;  %v9670_v11 = vld [vmem:[%s9470_s17 + $0x88] sm:$0xff]  ;;  %v9680_v15 = vld [vmem:[%s9470_s17 + $0x90] sm:$0xff]  ;;  %v366_v18 = vpack.c.bf16 %v9608_v41, %v9605_v40 }
  0xb6   : > { %722 = vst [vmem:[#allocation2 + $0x178] sm:$0x3] %v9201_v0  ;;  %723 = vst [vmem:[#allocation2 + $0x180] sm:$0xff] %v9201_v0  ;;  %7053 = vmatprep.subr.bf16.mxu1 %v8762_v20  ;;  %v9683_v16 = vld [vmem:[%s9470_s17 + $0x98] sm:$0xff]  ;;  %v8771_v20 = vld [vmem:[#allocation7 + $0xc0] sm:$0xff]  }
  0xb7   : > { %724 = vst [vmem:[#allocation2 + $0x188] sm:$0xff] %v9201_v0  ;;  %725 = vst [vmem:[#allocation2 + $0x190] sm:$0x3] %v9201_v0  ;;  %v8775_v33 = vld [vmem:[#allocation7 + $0xc8] sm:$0xff]  }
  0xb8   : > { %728 = vst [vmem:[#allocation2 + $0x1a8] sm:$0x3] %v9201_v0  ;;  %2665 = vst [vmem:[#allocation3 + $0x10] sm:$0x3] %v9201_v0  ;;  %8470 = vmatpush3.bf16.msra.mxu0 %v8761_v19 }
  0xb9   : > { %2666 = vst [vmem:[#allocation3 + $0x18] sm:$0xff] %v9201_v0  ;;  %2667 = vst [vmem:[#allocation3 + $0x20] sm:$0xff] %v9201_v0  ;;  %7054 = vmatpush3.bf16.msra.mxu1 %v8763_v22  ;;  %8471 = vmatprep.subr.bf16.mxu0 %v8764_v23  ;;  %v8772_v22 = vld [vmem:[#allocation7 + $0x150] sm:$0xff]  }
  0xba   : > { %2668 = vst [vmem:[#allocation3 + $0x28] sm:$0x3] %v9201_v0  ;;  %2669 = vst [vmem:[#allocation3 + $0x30] sm:$0xff] %v9201_v0  ;;  %7055 = vmatprep.subr.bf16.mxu1 %v8765_v24 }
  0xbb   : > { %2670 = vst [vmem:[#allocation3 + $0x38] sm:$0xff] %v9201_v0  ;;  %2671 = vst [vmem:[#allocation3 + $0x40] sm:$0x3] %v9201_v0 }
  0xbc   : > { %2672 = vst [vmem:[#allocation3 + $0x48] sm:$0xff] %v9201_v0  ;;  %2673 = vst [vmem:[#allocation3 + $0x50] sm:$0xff] %v9201_v0  ;;  %8472 = vmatpush3.bf16.msra.mxu0 %v8764_v23 }
  0xbd   : > { %2674 = vst [vmem:[#allocation3 + $0x58] sm:$0x3] %v9201_v0  ;;  %2675 = vst [vmem:[#allocation3 + $0x60] sm:$0xff] %v9201_v0  ;;  %7056 = vmatpush3.bf16.msra.mxu1 %v8766_v32  ;;  %7153 = vmatprep.subr.bf16.mxu0 %v8771_v20  ;;  %v367_v32 = vpack.c.bf16 %v9616_v44, %v9611_v42 }
  0xbe   : > { %2676 = vst [vmem:[#allocation3 + $0x68] sm:$0xff] %v9201_v0  ;;  %2677 = vst [vmem:[#allocation3 + $0x70] sm:$0x3] %v9201_v0  ;;  %7265 = vmatprep.subr.bf16.mxu1 %v8767_v34 }
  0xbf   : > { %2678 = vst [vmem:[#allocation3 + $0x78] sm:$0xff] %v9201_v0  ;;  %2679 = vst [vmem:[#allocation3 + $0x80] sm:$0xff] %v9201_v0  ;;  %8474 = vmatmul.mubr.bf16.vlgmr.msra.gmra.mrb[0].mxu0 %v363_v43 }
  0xc0   : > { %2680 = vst [vmem:[#allocation3 + $0x88] sm:$0x3] %v9201_v0  ;;  %2681 = vst [vmem:[#allocation3 + $0x90] sm:$0xff] %v9201_v0  ;;  %1787 = vmatmul.mubr.bf16.vlgmr.msra.gmra.mrb[0].mxu1 %v9202_v62  ;;  %8477 = vmatprep.mubr.bf16.mxu0 %v364_v46 }
  0xc1   : > { %2682 = vst [vmem:[#allocation3 + $0x98] sm:$0xff] %v9201_v0  ;;  %2683 = vst [vmem:[#allocation3 + $0xa0] sm:$0x3] %v9201_v0  ;;  %7266 = vmatpush3.bf16.msra.mxu1 %v8768_v45 }
  0xc2   : > { %2684 = vst [vmem:[#allocation3 + $0xa8] sm:$0xff] %v9201_v0  ;;  %2685 = vst [vmem:[#allocation3 + $0xb0] sm:$0xff] %v9201_v0  ;;  %7267 = vmatprep.subr.bf16.mxu1 %v8769_v55 }
  0xc3   : > { %2686 = vst [vmem:[#allocation3 + $0xb8] sm:$0x3] %v9201_v0  ;;  %2687 = vst [vmem:[#allocation3 + $0xc0] sm:$0xff] %v9201_v0 }
  0xc4   : > { %2688 = vst [vmem:[#allocation3 + $0xc8] sm:$0xff] %v9201_v0  ;;  %2689 = vst [vmem:[#allocation3 + $0xd0] sm:$0x3] %v9201_v0 }
  0xc5   : > { %2690 = vst [vmem:[#allocation3 + $0xd8] sm:$0xff] %v9201_v0  ;;  %2691 = vst [vmem:[#allocation3 + $0xe0] sm:$0xff] %v9201_v0  ;;  %7268 = vmatpush3.bf16.msra.mxu1 %v8770_v59 }
  0xc6   : > { %2692 = vst [vmem:[#allocation3 + $0xe8] sm:$0x3] %v9201_v0  ;;  %2693 = vst [vmem:[#allocation3 + $0xf0] sm:$0xff] %v9201_v0  ;;  %7269 = vmatprep.subr.bf16.mxu1 %v8772_v22  ;;  %v369_v22 = vpack.c.bf16 %v9654_v4, %v9651_v3 }
  0xc7   : > { %2694 = vst [vmem:[#allocation3 + $0xf8] sm:$0xff] %v9201_v0  ;;  %2695 = vst [vmem:[#allocation3 + $0x100] sm:$0x3] %v9201_v0  ;;  %8478 = vmatmul.mubr.bf16.gmra.mrb[4].mxu0 %v365_v12 }
  0xc8   : > { %2696 = vst [vmem:[#allocation3 + $0x108] sm:$0xff] %v9201_v0  ;;  %2697 = vst [vmem:[#allocation3 + $0x110] sm:$0xff] %v9201_v0  ;;  %8481 = vmatprep.mubr.bf16.mxu0 %v366_v18 }
  0xc9   : > { %2698 = vst [vmem:[#allocation3 + $0x118] sm:$0x3] %v9201_v0  ;;  %2699 = vst [vmem:[#allocation3 + $0x120] sm:$0xff] %v9201_v0 }
  0xca   : > { %2700 = vst [vmem:[#allocation3 + $0x128] sm:$0xff] %v9201_v0  ;;  %2701 = vst [vmem:[#allocation3 + $0x130] sm:$0x3] %v9201_v0 }
  0xcb   : > { %2702 = vst [vmem:[#allocation3 + $0x138] sm:$0xff] %v9201_v0  ;;  %2703 = vst [vmem:[#allocation3 + $0x140] sm:$0xff] %v9201_v0 }
  0xcc   : > { %2704 = vst [vmem:[#allocation3 + $0x148] sm:$0x3] %v9201_v0  ;;  %2705 = vst [vmem:[#allocation3 + $0x150] sm:$0xff] %v9201_v0 }
  0xcd   : > { %2706 = vst [vmem:[#allocation3 + $0x158] sm:$0xff] %v9201_v0  ;;  %2707 = vst [vmem:[#allocation3 + $0x160] sm:$0x3] %v9201_v0 }
  0xce   : > { %2708 = vst [vmem:[#allocation3 + $0x168] sm:$0xff] %v9201_v0  ;;  %2709 = vst [vmem:[#allocation3 + $0x170] sm:$0xff] %v9201_v0 }
  0xcf   : > { %2710 = vst [vmem:[#allocation3 + $0x178] sm:$0x3] %v9201_v0  ;;  %2711 = vst [vmem:[#allocation3 + $0x180] sm:$0xff] %v9201_v0  ;;  %8482 = vmatmul.mubr.bf16.gmra.mrb[8].mxu0 %v367_v32 }
  0xd0   : > { %2712 = vst [vmem:[#allocation3 + $0x188] sm:$0xff] %v9201_v0  ;;  %2713 = vst [vmem:[#allocation3 + $0x190] sm:$0x3] %v9201_v0 }
  0xd1   : > { %2716 = vst [vmem:[#allocation3 + $0x1a8] sm:$0x3] %v9201_v0  ;;  %730 = vst [vmem:[#allocation2 + $0x19] sm:$0xff] %v330_v25  ;;  %v8773_v25 = vld [vmem:[#allocation7 + $0x80] sm:$0xff]  }
  0xd2   : > { %731 = vst [vmem:[#allocation2 + $0x21] sm:$0xff] %v331_v26  ;;  %732 = vst [vmem:[#allocation2 + $0x31] sm:$0xff] %v332_v30  ;;  %v8774_v30 = vld [vmem:[#allocation7 + $0x110] sm:$0xff]   ;;  %7154 = vmatpush3.bf16.msra.mxu0 %v8773_v25 }
  0xd3   : > { %733 = vst [vmem:[#allocation2 + $0x39] sm:$0xff] %v333_v31  ;;  %734 = vst [vmem:[#allocation2 + $0x49] sm:$0xff] %v334_v35  ;;  %7270 = vmatpush3.bf16.msra.mxu1 %v8774_v30  ;;  %7155 = vmatprep.subr.bf16.mxu0 %v8775_v33  ;;  %v9791_v33 = vld [vmem:[%s9470_s17 + $0xd8] sm:$0xff] }
  0xd4   : > { %735 = vst [vmem:[#allocation2 + $0x51] sm:$0xff] %v335_v37  ;;  %736 = vst [vmem:[#allocation2 + $0x61] sm:$0xff] %v9597_v38  ;;  %v8776_v38 = vld [vmem:[#allocation7 + $0x88] sm:$0xff]  }
  0xd5   : > { %737 = vst [vmem:[#allocation2 + $0x69] sm:$0xff] %v9600_v39  ;;  %738 = vst [vmem:[#allocation2 + $0x79] sm:$0xff] %v9605_v40 }
  0xd6   : > { %739 = vst [vmem:[#allocation2 + $0x81] sm:$0xff] %v9608_v41  ;;  %740 = vst [vmem:[#allocation2 + $0x91] sm:$0xff] %v9611_v42  ;;  %v9716_v41 = vld [vmem:[%s9470_s17 + $0xa0] sm:$0xff]  ;;  %v9719_v42 = vld [vmem:[%s9470_s17 + $0xa8] sm:$0xff]  ;;  %7156 = vmatpush3.bf16.msra.mxu0 %v8776_v38 }
  0xd7   : > { %741 = vst [vmem:[#allocation2 + $0x99] sm:$0xff] %v9616_v44  ;;  %742 = vst [vmem:[#allocation2 + $0xa9] sm:$0xff] %v9638_v60 }
  0xd8   : > { %v9620_v47 = vld [vmem:[#allocation2 + $0x18] sm:$0xff]  ;;  %743 = vst [vmem:[#allocation2 + $0xb1] sm:$0xff] %v9641_v61  ;;  %744 = vst [vmem:[#allocation2 + $0xc1] sm:$0xff] %v9651_v3 }
  0xd9   : > { %v9622_v48 = vld [vmem:[#allocation2 + $0x20] sm:$0xff]  ;;  %v9624_v49 = vld [vmem:[#allocation2 + $0x28] sm:$0x3]  ;;  %v870_v50 = vrot.slane %v9620_v47, 1  ;;  %v9629_v53 = vld [vmem:[#allocation2 + $0x30] sm:$0xff]  ;;  %745 = vst [vmem:[#allocation2 + $0xc9] sm:$0xff] %v9654_v4 }
  0xda   : > { %v871_v51 = vrot.slane %v9622_v48, 1  ;;  %v873_v52 = vrot.slane %v9624_v49, 1  ;;  %v9631_v54 = vld [vmem:[#allocation2 + $0x38] sm:$0xff]  ;;  %v9633_v56 = vld [vmem:[#allocation2 + $0x40] sm:$0x3]  ;;  %v875_v57 = vrot.slane %v9629_v53, 1  ;;  %v9687_v17 = vpack.c.bf16 %v9622_v48, %v9620_v47 }
  0xdb   : > { %v876_v58 = vrot.slane %v9631_v54, 1  ;;  %v878_v1 = vrot.slane %v9633_v56, 1  ;;  %v9648_v2 = vld [vmem:[#allocation2 + $0x48] sm:$0xff]  ;;  %v9658_v6 = vld [vmem:[#allocation2 + $0x50] sm:$0xff]  ;;  %v9660_v7 = vld [vmem:[#allocation2 + $0x58] sm:$0x3] }
  0xdc   : > { %v872_v63 = vsel %vm864_vm0, %v870_v50, %v871_v51  ;;  %v874_v0 = vsel %vm864_vm0, %v871_v51, %v873_v52  ;;  %746 = vst [vmem:[#allocation2 + $0xd9] sm:$0xff] %v9665_v8  ;;  %v880_v13 = vrot.slane %v9648_v2, 1  ;;  %v881_v14 = vrot.slane %v9658_v6, 1  ;;  %747 = vst [vmem:[#allocation2 + $0xe1] sm:$0xff] %v9670_v11  ;;  %v9697_v24 = vld [vmem:[#allocation2 + $0x60] sm:$0xff]  ;;  %v9700_v28 = vld [vmem:[#allocation2 + $0x68] sm:$0xff] }
  0xdd   : > { %v9656_v5 = vpack.c.bf16 %v874_v0, %v872_v63  ;;  %v877_v9 = vsel %vm864_vm0, %v875_v57, %v876_v58  ;;  %v879_v10 = vsel %vm864_vm0, %v876_v58, %v878_v1  ;;  %v883_v19 = vrot.slane %v9660_v7, 1  ;;  %748 = vst [vmem:[#allocation2 + $0xf1] sm:$0xff] %v9680_v15  ;;  %749 = vst [vmem:[#allocation2 + $0xf9] sm:$0xff] %v9683_v16  ;;  %v9702_v29 = vld [vmem:[#allocation2 + $0x70] sm:$0x3]  ;;  %v9749_v59 = vld [vmem:[#allocation2 + $0x78] sm:$0xff] }
  0xde   : > { %v9694_v21 = vpack.c.bf16 %v879_v10, %v877_v9  ;;  %v983_v23 = vrot.slane %v9620_v47, 2  ;;  %v984_v26 = vrot.slane %v9622_v48, 2  ;;  %v986_v31 = vrot.slane %v9624_v49, 2  ;;  %750 = vst [vmem:[#allocation2 + $0x109] sm:$0xff] %v9716_v41  ;;  %751 = vst [vmem:[#allocation2 + $0x111] sm:$0xff] %v9719_v42  ;;  %v9734_v49 = vld [vmem:[%s9470_s17 + $0xb0] sm:$0xff] }
  0xdf   : > { %1794 = vmatprep.mubr.bf16.mxu1 %v9656_v5  ;;  %v988_v35 = vrot.slane %v9629_v53, 2  ;;  %v882_v36 = vsel %vm864_vm0, %v880_v13, %v881_v14  ;;  %v884_v37 = vsel %vm864_vm0, %v881_v14, %v883_v19  ;;  %v989_v40 = vrot.slane %v9631_v54, 2  ;;  %752 = vst [vmem:[#allocation2 + $0x121] sm:$0xff] %v9734_v49  ;;  %v9751_v62 = vld [vmem:[#allocation2 + $0x80] sm:$0xff]  ;;  %v9758_v0 = vld [vmem:[#allocation2 + $0x88] sm:$0x3] }
  0xe0   : > { %1795 = vmatmul.mubr.bf16.gmra.mrb[4].mxu1 %v9687_v17  ;;  %v985_v34 = vsel %vm977_vm1, %v983_v23, %v984_v26  ;;  %v987_v39 = vsel %vm977_vm1, %v984_v26, %v986_v31  ;;  %v991_v44 = vrot.slane %v9633_v56, 2  ;;  %v993_v45 = vrot.slane %v9648_v2, 2  ;;  %v8777_v56 = vld [vmem:[#allocation7 + $0xd0] sm:$0xff]   ;;  %v8779_v10 = vld [vmem:[#allocation7 + $0xd8] sm:$0xff]   ;;  %v9766_v13 = vld [vmem:[%s9470_s17 + $0xc0] sm:$0xff]  ;;  %757 = vst [vmem:[#allocation2 + $0x159] sm:$0xff] %v9791_v33 }
  0xe1   : > { %1802 = vmatprep.mubr.bf16.mxu1 %v9694_v21  ;;  %v9721_v43 = vpack.c.bf16 %v987_v39, %v985_v34  ;;  %v994_v46 = vrot.slane %v9658_v6, 2  ;;  %v9728_v47 = vpack.c.bf16 %v9631_v54, %v9629_v53  ;;  %v885_v48 = vrot.slane %v9697_v24, 1  ;;  %v9743_v54 = vld [vmem:[%s9470_s17 + $0xb8] sm:$0xff]  ;;  %7157 = vmatprep.subr.bf16.mxu0 %v8777_v56  ;;  %v8778_v1 = vld [vmem:[#allocation7 + $0x90] sm:$0xff]   ;;  %v9769_v14 = vld [vmem:[%s9470_s17 + $0xc8] sm:$0xff]  ;;  %754 = vst [vmem:[#allocation2 + $0x139] sm:$0xff] %v9766_v13 }
  0xe2   : > { %v990_v50 = vsel %vm977_vm1, %v988_v35, %v989_v40  ;;  %v996_v51 = vrot.slane %v9660_v7, 2  ;;  %v368_v52 = vpack.c.bf16 %v9641_v61, %v9638_v60  ;;  %v886_v55 = vrot.slane %v9700_v28, 1  ;;  %753 = vst [vmem:[#allocation2 + $0x129] sm:$0xff] %v9743_v54  ;;  %7158 = vmatpush3.bf16.msra.mxu0 %v8778_v1  ;;  %v8780_v23 = vld [vmem:[#allocation7 + $0x98] sm:$0xff]   ;;  %755 = vst [vmem:[#allocation2 + $0x141] sm:$0xff] %v9769_v14  ;;  %v9785_v3 = vld [vmem:[#allocation2 + $0x90] sm:$0xff] }
  0xe3   : > { %12402 = vst [vmem:[#allocation18_spill] sm:$0xff] %v9728_v47  ;;  %v888_v53 = vrot.slane %v9702_v29, 1  ;;  %v992_v57 = vsel %vm977_vm1, %v989_v40, %v991_v44  ;;  %v9747_v58 = vpack.c.bf16 %v884_v37, %v882_v36  ;;  %v995_v61 = vsel %vm977_vm1, %v993_v45, %v994_v46  ;;  %7159 = vmatprep.subr.bf16.mxu0 %v8779_v10  ;;  %v9788_v4 = vld [vmem:[%s9470_s17 + $0xd0] sm:$0xff]  ;;  %v8781_v34 = vld [vmem:[#allocation7 + $0xe0] sm:$0xff]   ;;  %v9797_v36 = vld [vmem:[#allocation2 + $0x98] sm:$0xff] }
  0xe4   : > { %v9754_v60 = vpack.c.bf16 %v992_v57, %v990_v50  ;;  %v997_v63 = vsel %vm977_vm1, %v994_v46, %v996_v51  ;;  %v998_v9 = vrot.slane %v9697_v24, 2  ;;  %v999_v12 = vrot.slane %v9700_v28, 2  ;;  %8485 = vmatprep.mubr.bf16.mxu0 %v368_v52  ;;  %756 = vst [vmem:[#allocation2 + $0x151] sm:$0xff] %v9788_v4  ;;  %v9807_v45 = vld [vmem:[#allocation2 + $0xa0] sm:$0x3]  ;;  %v8785_v52 = vld [vmem:[#allocation7 + $0xe8] sm:$0xff]  }
  0xe5   : > { %v9760_v7 = vpack.c.bf16 %v997_v63, %v995_v61  ;;  %v1001_v18 = vrot.slane %v9702_v29, 2  ;;  %v1003_v19 = vrot.slane %v9749_v59, 2  ;;  %v1004_v20 = vrot.slane %v9751_v62, 2  ;;  %v8783_v50 = vld [vmem:[#allocation7 + $0xa0] sm:$0xff]   ;;  %8486 = vmatmul.mubr.bf16.gmra.mrb[12].mxu0 %v369_v22  ;;  %v8786_v57 = vld [vmem:[#allocation7 + $0xa8] sm:$0xff]  }
  0xe6   : > { %v1000_v25 = vsel %vm977_vm1, %v998_v9, %v999_v12  ;;  %v1006_v26 = vrot.slane %v9758_v0, 2  ;;  %v887_v29 = vsel %vm864_vm0, %v885_v48, %v886_v55  ;;  %v889_v30 = vsel %vm864_vm0, %v886_v55, %v888_v53  ;;  %7160 = vmatpush3.bf16.msra.mxu0 %v8780_v23  ;;  %v9820_v53 = vld [vmem:[%s9470_s17 + $0xe0] sm:$0xff]  ;;  %v9825_v61 = vld [vmem:[%s9470_s17 + $0xe8] sm:$0xff]  ;;  %v785_v23 = vld [vmem:[#allocation2 + $0xb8] sm:$0x3] }
  0xe7   : > { %v890_v31 = vrot.slane %v9749_v59, 1  ;;  %v891_v32 = vrot.slane %v9751_v62, 1  ;;  %v9795_v35 = vpack.c.bf16 %v9658_v6, %v9648_v2  ;;  %v1002_v37 = vsel %vm977_vm1, %v999_v12, %v1001_v18  ;;  %v8782_v2 = vld [vmem:[#allocation7 + $0x158] sm:$0xff]   ;;  %7161 = vmatprep.subr.bf16.mxu0 %v8781_v34  ;;  %758 = vst [vmem:[#allocation2 + $0x169] sm:$0xff] %v9820_v53  ;;  %759 = vst [vmem:[#allocation2 + $0x171] sm:$0xff] %v9825_v61  ;;  %v9834_v12 = vld [vmem:[#allocation2 + $0xa8] sm:$0xff] }
  0xe8   : > { %1803 = vmatmul.mubr.bf16.gmra.mrb[8].mxu1 %v9728_v47  ;;  %v1005_v38 = vsel %vm977_vm1, %v1003_v19, %v1004_v20  ;;  %v1007_v39 = vsel %vm977_vm1, %v1004_v20, %v1006_v26  ;;  %v370_v40 = vpack.c.bf16 %v9670_v11, %v9665_v8  ;;  %v893_v44 = vrot.slane %v9758_v0, 1  ;;  %7271 = vmatprep.subr.bf16.mxu1 %v8782_v2  ;;  %v8784_v8 = vld [vmem:[#allocation7 + $0x118] sm:$0xff]   ;;  %v9837_v18 = vld [vmem:[%s9470_s17 + $0xf0] sm:$0xff] }
  0xe9   : > { %1810 = vmatprep.mubr.bf16.mxu1 %v9747_v58  ;;  %v9809_v6 = vpack.c.bf16 %v1002_v37, %v1000_v25  ;;  %v9811_v46 = vpack.c.bf16 %v1007_v39, %v1005_v38  ;;  %v9813_v48 = vpack.c.bf16 %v889_v30, %v887_v29  ;;  %v1008_v51 = vrot.slane %v9785_v3, 2  ;;  %7272 = vmatpush3.bf16.msra.mxu1 %v8784_v8  ;;  %v9840_v19 = vld [vmem:[%s9470_s17 + $0xf8] sm:$0xff]  ;;  %v8787_v25 = vld [vmem:[#allocation7 + $0xf0] sm:$0xff]   ;;  %s9203_s17 = smov [#allocation13]  }
  0xea   : > { %v1009_v11 = vrot.slane %v9797_v36, 2  ;;  %v1011_v55 = vrot.slane %v9807_v45, 2  ;;  %8489 = vmatprep.mubr.bf16.mxu0 %v370_v40  ;;  %7162 = vmatpush3.bf16.msra.mxu0 %v8783_v50  ;;  %v892_v0 = vsel %vm864_vm0, %v890_v31, %v891_v32  ;;  %v894_v1 = vsel %vm864_vm0, %v891_v32, %v893_v44  ;;  %760 = vst [vmem:[#allocation2 + $0x181] sm:$0xff] %v9837_v18  ;;  %v9855_v31 = vld [vmem:[#allocation2 + $0xb0] sm:$0xff]  ;;  %v8789_v37 = vld [vmem:[#allocation7 + $0xf8] sm:$0xff]   ;;  %v8792_v44 = vld [vmem:[#allocation7 + $0x120] sm:$0xff]  }
  0xeb   : > { %v895_v9 = vrot.slane %v9785_v3, 1  ;;  %v896_v10 = vrot.slane %v9797_v36, 1  ;;  %7163 = vmatprep.subr.bf16.mxu0 %v8785_v52  ;;  %v371_v20 = vpack.c.bf16 %v9683_v16, %v9680_v15  ;;  %v898_v22 = vrot.slane %v9807_v45, 1  ;;  %761 = vst [vmem:[#allocation2 + $0x189] sm:$0xff] %v9840_v19  ;;  %v8788_v32 = vld [vmem:[#allocation7 + $0xb0] sm:$0xff]   ;;  %v9871_v50 = vld [vmem:[#allocation2 + $0xc0] sm:$0xff] }
  0xec   : > { %v1010_v56 = vsel %vm977_vm1, %v1008_v51, %v1009_v11  ;;  %v1012_v63 = vsel %vm977_vm1, %v1009_v11, %v1011_v55  ;;  %v9851_v29 = vpack.c.bf16 %v9700_v28, %v9697_v24  ;;  %v372_v30 = vpack.c.bf16 %v9719_v42, %v9716_v41  ;;  %v8790_v28 = vld [vmem:[#allocation7 + $0xb8] sm:$0xff]   ;;  %v8791_v41 = vld [vmem:[#allocation7 + $0x160] sm:$0xff]   ;;  %v9881_v55 = vld [vmem:[#allocation2 + $0xc8] sm:$0xff]  ;;  %s9120_s27 = sshll.u32 %s9203_s17, 4  ;;  %s9121_s27 = int_to_ptr.vmem [resolvable:$false] %s9120_s27 }
  0xed   : > { %v9847_v26 = vpack.c.bf16 %v1012_v63, %v1010_v56  ;;  %v1013_v15 = vrot.slane %v9834_v12, 2  ;;  %v9858_v16 = vpack.c.bf16 %v894_v1, %v892_v0  ;;  %v1014_v34 = vrot.slane %v9855_v31, 2  ;;  %8490 = vmatmul.mubr.bf16.gmra.mrb[16].mxu0 %v371_v20  ;;  %7273 = vmatprep.subr.bf16.mxu1 %v8791_v41  ;;  %v788_v56 = vld [vmem:[#allocation2 + $0xd0] sm:$0x3]  ;;  %s9122_s29 = scalar_lea.vmem %s9121_s27, 8192  ;;  %p9123_p12 = scmp.lt.s32.totalorder %s12316_s8, %s9121_s27 }
  0xee   : > { %7164 = vmatpush3.bf16.msra.mxu0 %v8786_v57  ;;  %v1016_v38 = vrot.slane %v785_v23, 2  ;;  %8493 = vmatprep.mubr.bf16.mxu0 %v372_v30  ;;  %v897_v39 = vsel %vm864_vm0, %v895_v9, %v896_v10  ;;  %v899_v40 = vsel %vm864_vm0, %v896_v10, %v898_v22  ;;  %v373_v2 = vpack.c.bf16 %v9743_v54, %v9734_v49  ;;  %v8793_v57 = vld [vmem:[#allocation7 + $0x168] sm:$0xff]   ;;  %v8796_v0 = vld [vmem:[#allocation7 + $0x130] sm:$0xff]   ;;  %v9899_v30 = vld [vmem:[#allocation2] sm:$0xff]  ;;  %p9124_p1 = scmp.lt.s32.totalorder %s9122_s29, %s9116_s9 }
  0xef   : > { %7165 = vmatprep.subr.bf16.mxu0 %v8787_v25  ;;  %v1015_v24 = vsel %vm977_vm1, %v1013_v15, %v1014_v34  ;;  %v9875_v51 = vpack.c.bf16 %v9751_v62, %v9749_v59  ;;  %v374_v8 = vpack.c.bf16 %v9769_v14, %v9766_v13  ;;  %v900_v11 = vrot.slane %v9834_v12, 1  ;;  %7274 = vmatpush3.bf16.msra.mxu1 %v8792_v44  ;;  %v8794_v54 = vld [vmem:[#allocation7 + $0x128] sm:$0xff]   ;;  %v8795_v14 = vld [vmem:[#allocation7 + $0x170] sm:$0xff]  }
  0xf0   : > { %1811 = vmatmul.mubr.bf16.gmra.mrb[12].mxu1 %v9795_v35  ;;  %v1017_v42 = vsel %vm977_vm1, %v1014_v34, %v1016_v38  ;;  %v901_v52 = vrot.slane %v9855_v31, 1  ;;  %v9883_v63 = vpack.c.bf16 %v899_v40, %v897_v39  ;;  %v903_v49 = vrot.slane %v785_v23, 1  ;;  %7275 = vmatprep.subr.bf16.mxu1 %v8793_v57  ;;  %v9895_v23 = vld [vmem:[#allocation2 + $0xd8] sm:$0xff]  ;;  %v9909_v38 = vld [vmem:[#allocation2 + $0xe0] sm:$0xff]  ;;  %p9125_p2 = por %p9124_p1, %p9123_p12 }
  0xf1   : > { %1818 = vmatprep.mubr.bf16.mxu1 %v9813_v48  ;;  %v9867_v45 = vpack.c.bf16 %v1017_v42, %v1015_v24  ;;  %v1018_v59 = vrot.slane %v9871_v50, 2  ;;  %v1019_v62 = vrot.slane %v9881_v55, 2  ;;  %v1021_v13 = vrot.slane %v788_v56, 2  ;;  %v9917_v42 = vld [vmem:[#allocation2 + $0xf0] sm:$0xff] }
  0xf2   : > { %7166 = vmatpush3.bf16.msra.mxu0 %v8788_v32  ;;  %12403 = vst [vmem:[#allocation19_spill] sm:$0xff] %v9883_v63  ;;  %v902_v1 = vsel %vm864_vm0, %v900_v11, %v901_v52  ;;  %v904_v9 = vsel %vm864_vm0, %v901_v52, %v903_v49  ;;  %v375_v22 = vpack.c.bf16 %v9791_v33, %v9788_v4  ;;  %v978_v15 = vrot.slane %v9899_v30, 2  ;;  %v9911_v4 = vld [vmem:[#allocation2 + $0xe8] sm:$0x3]  ;;  %v8797_v33 = vld [vmem:[#allocation7 + $0x178] sm:$0xff]   ;;  %v8799_v52 = vld [vmem:[#allocation7 + $0x1c0] sm:$0xff]   ;;  %p9126_p13 = pnand %p9125_p2, %p9119_p7 }
  0xf3   : > { %7167 = vmatprep.subr.bf16.mxu0 %v8789_v37  ;;  %7276 = vmatpush3.bf16.msra.mxu1 %v8794_v54  ;;  %v1020_v10 = vsel %vm977_vm1, %v1018_v59, %v1019_v62  ;;  %v1022_v20 = vsel %vm977_vm1, %v1019_v62, %v1021_v13  ;;  %v981_v32 = vrot.slane %v9588_v27, 2  ;;  %v9905_v34 = vpack.c.bf16 %v9797_v36, %v9785_v3  ;;  %v9919_v27 = vld [vmem:[#allocation2 + $0xf8] sm:$0xff]  ;;  %v9939_v13 = vld [vmem:[#allocation2 + $0x108] sm:$0xff] }
  0xf4   : > { %7277 = vmatprep.subr.bf16.mxu1 %v8795_v14  ;;  %v9897_v25 = vpack.c.bf16 %v1022_v20, %v1020_v10  ;;  %v376_v37 = vpack.c.bf16 %v9825_v61, %v9820_v53  ;;  %v9913_v24 = vpack.c.bf16 %v904_v9, %v902_v1  ;;  %v906_v41 = vrot.slane %v9881_v55, 1  ;;  %v8798_v36 = vld [vmem:[#allocation7 + $0x138] sm:$0xff]   ;;  %v9921_v53 = vld [vmem:[#allocation2 + $0x100] sm:$0x3]  ;;  %v9950_v10 = vld [vmem:[#allocation2 + $0x110] sm:$0xff] }
  0xf5   : > { %8494 = vmatmul.mubr.bf16.gmra.mrb[20].mxu0 %v373_v2  ;;  %v908_v3 = vrot.slane %v788_v56, 1  ;;  %v1023_v61 = vrot.slane %v9895_v23, 2  ;;  %v1024_v39 = vrot.slane %v9909_v38, 2  ;;  %v910_v40 = vrot.slane %v9895_v23, 1  ;;  %v9941_v14 = vld [vmem:[#allocation2 + $0x118] sm:$0x3] }
  0xf6   : > { %7168 = vmatpush3.bf16.msra.mxu0 %v8790_v28  ;;  %8497 = vmatprep.mubr.bf16.mxu0 %v374_v8  ;;  %12404 = vst [vmem:[#allocation20_spill] sm:$0xff] %v9913_v24  ;;  %v905_v28 = vrot.slane %v9871_v50, 1  ;;  %v911_v44 = vrot.slane %v9909_v38, 1  ;;  %v913_v2 = vrot.slane %v9911_v4, 1  ;;  %v1026_v59 = vrot.slane %v9911_v4, 2 }
  0xf7   : > { %7278 = vmatpush3.bf16.msra.mxu1 %v8796_v0  ;;  %v1025_v56 = vsel %vm977_vm1, %v1023_v61, %v1024_v39  ;;  %v909_v49 = vsel %vm864_vm0, %v906_v41, %v908_v3  ;;  %v377_v62 = vpack.c.bf16 %v9840_v19, %v9837_v18  ;;  %7377 = vmatprep.subr.bf16.mxu0 %v8799_v52  ;;  %v9943_v0 = vld [vmem:[#allocation7 + $0x200] sm:$0xff]   ;;  %v1028_v1 = vrot.slane %v9917_v42, 2  ;;  %v9973_v61 = vld [vmem:[#allocation2 + $0x138] sm:$0xff] }
  0xf8   : > { %1819 = vmatmul.mubr.bf16.gmra.mrb[16].mxu1 %v9851_v29  ;;  %7279 = vmatprep.subr.bf16.mxu1 %v8797_v33  ;;  %v907_v57 = vsel %vm864_vm0, %v905_v28, %v906_v41  ;;  %v9948_v9 = vpack.c.bf16 %v9855_v31, %v9834_v12  ;;  %v1027_v20 = vsel %vm977_vm1, %v1024_v39, %v1026_v59  ;;  %v9956_v19 = vld [vmem:[#allocation2 + $0x120] sm:$0xff]  ;;  %v1031_v4 = vrot.slane %v9921_v53, 2  ;;  %v9962_v33 = vld [vmem:[#allocation2 + $0x128] sm:$0xff]  ;;  %v9964_v12 = vld [vmem:[#allocation2 + $0x130] sm:$0x3] }
  0xf9   : > { %1826 = vmatprep.mubr.bf16.mxu1 %v9858_v16  ;;  %v9954_v18 = vpack.c.bf16 %v909_v49, %v907_v57  ;;  %v1033_v28 = vrot.slane %v9939_v13, 2  ;;  %v1034_v41 = vrot.slane %v9950_v10, 2  ;;  %v1036_v3 = vrot.slane %v9941_v14, 2  ;;  %v9975_v39 = vld [vmem:[#allocation2 + $0x148] sm:$0x3]  ;;  %v9981_v57 = vld [vmem:[#allocation2 + $0x140] sm:$0xff] }
  0xfb   : > { %7280 = vmatpush3.bf16.msra.mxu1 %v8798_v36  ;;  %12405 = vst [vmem:[#allocation21_spill] sm:$0xff] %v9954_v18  ;;  %v982_v36 = vsel %vm977_vm1, %v978_v15, %v981_v32  ;;  %v1035_v59 = vsel %vm977_vm1, %v1033_v28, %v1034_v41  ;;  %v1037_v32 = vsel %vm977_vm1, %v1034_v41, %v1036_v3  ;;  %v1043_v41 = vrot.slane %v9973_v61, 2 }
  0xfc   : > { %8505 = vmatprep.subr.bf16.mxu1 %v9943_v0  ;;  %v1044_v3 = vrot.slane %v9981_v57, 2 }
  0xfd   : > { %8498 = vmatmul.mubr.bf16.gmra.mrb[24].mxu0 %v375_v22  ;;  %v1029_v22 = vrot.slane %v9919_v27, 2 }
  0xfe   : > { %8501 = vmatprep.mubr.bf16.mxu0 %v376_v37  ;;  %v9959_v37 = vpack.c.bf16 %v1027_v20, %v1025_v56  ;;  %v1038_v56 = vrot.slane %v9956_v19, 2  ;;  %v914_v20 = vsel %vm864_vm0, %v911_v44, %v913_v2  ;;  %v1126_v2 = vpack.c.bf16 %v982_v36, %v978_v15  ;;  %v10024_v36 = vld [vmem:[#allocation2 + $0x178] sm:$0x3] }
  0xff   : > { %v1030_v31 = vsel %vm977_vm1, %v1028_v1, %v1029_v22  ;;  %v1032_v52 = vsel %vm977_vm1, %v1029_v22, %v1031_v4  ;;  %v912_v1 = vsel %vm864_vm0, %v910_v40, %v911_v44  ;;  %v9991_v22 = vld [vmem:[#allocation2 + $0x150] sm:$0xff]  ;;  %v9993_v4 = vpack.c.bf16 %v1037_v32, %v1035_v59  ;;  %v10011_v32 = vld [vmem:[#allocation2 + $0x168] sm:$0xff] }
 0x100   : > { %1827 = vmatmul.mubr.bf16.gmra.mrb[20].mxu1 %v9875_v51  ;;  %v9983_v49 = vpack.c.bf16 %v1032_v52, %v1030_v31  ;;  %v9996_v31 = vld [vmem:[#allocation2 + $0x158] sm:$0xff]  ;;  %v9998_v52 = vld [vmem:[#allocation2 + $0x160] sm:$0x3]  ;;  %v1046_v40 = vrot.slane %v9975_v39, 2  ;;  %v10006_v44 = vpack.c.bf16 %v9881_v55, %v9871_v50  ;;  %v1048_v11 = vrot.slane %v9991_v22, 2  ;;  %v8802_v50 = vld [vmem:[#allocation7 + $0x1c8] sm:$0xff]  }
 0x101   : > { %1834 = vmatprep.mubr.bf16.mxu1 %v9883_v63  ;;  %v1049_v30 = vrot.slane %v9996_v31, 2  ;;  %v1051_v15 = vrot.slane %v9998_v52, 2  ;;  %v10059_v63 = vpack.c.bf16 %v9909_v38, %v9895_v23  ;;  %v938_v23 = vrot.slane %v9998_v52, 1  ;;  %v8809_v38 = vld [vmem:[#allocation7 + $0x198] sm:$0xff]   ;;  %v8813_v52 = vld [vmem:[#allocation7 + $0x1e8] sm:$0xff]  }
 0x102   : > { %v1047_v8 = vsel %vm977_vm1, %v1044_v3, %v1046_v40  ;;  %v920_v40 = vrot.slane %v9939_v13, 1 }
 0x105   : > { %8502 = vmatmul.mubr.bf16.gmra.mrb[28].mxu0 %v377_v62  ;;  %v1039_v62 = vrot.slane %v9962_v33, 2 }
 0x106   : > { %1947 = vmatprep.mubr.bf16.mxu0 %v9687_v17  ;;  %v1041_v17 = vrot.slane %v9964_v12, 2 }
 0x107   : > { %v1040_v28 = vsel %vm977_vm1, %v1038_v56, %v1039_v62  ;;  %v1045_v56 = vsel %vm977_vm1, %v1043_v41, %v1044_v3  ;;  %v12409_v41 = vrot.slane %v9919_v27, 1  ;;  %v12410_v3 = vrot.slane %v9917_v42, 1 }
 0x108   : > { %1835 = vmatmul.mubr.bf16.gmra.mrb[24].mxu1 %v9905_v34  ;;  %v1042_v59 = vsel %vm977_vm1, %v1039_v62, %v1041_v17  ;;  %v10020_v55 = vpack.c.bf16 %v1047_v8, %v1045_v56  ;;  %v10026_v62 = vld [vmem:[#allocation2 + $0x170] sm:$0xff]  ;;  %v1050_v17 = vsel %vm977_vm1, %v1048_v11, %v1049_v30  ;;  %v1056_v56 = vrot.slane %v10024_v36, 2 }
 0x109   : > { %1842 = vmatprep.mubr.bf16.mxu1 %v9913_v24  ;;  %v10013_v54 = vpack.c.bf16 %v1042_v59, %v1040_v28  ;;  %v8800_v24 = vld [vmem:[#allocation7 + $0x180] sm:$0xff]   ;;  %v1052_v28 = vsel %vm977_vm1, %v1049_v30, %v1051_v15  ;;  %v917_v11 = vsel %vm864_vm0, %v12410_v3, %v12409_v41  ;;  %v8803_v59 = vld [vmem:[#allocation7 + $0x188] sm:$0xff]   ;;  %v12411_v30 = vrot.slane %v9921_v53, 1  ;;  %v8805_v3 = vld [vmem:[#allocation7 + $0x1d0] sm:$0xff]  }
 0x10a   : > { %12407 = vst [vmem:[#allocation23_spill] sm:$0xff] %v10020_v55  ;;  %v10033_v8 = vpack.c.bf16 %v1052_v28, %v1050_v17  ;;  %v12412_v15 = vmov %v12409_v41  ;;  %v923_v28 = vrot.slane %v9941_v14, 1  ;;  %v926_v41 = vrot.slane %v9962_v33, 1  ;;  %v8806_v55 = vld [vmem:[#allocation7 + $0x190] sm:$0xff]  }
 0x10b   : > { %v919_v17 = vsel %vm864_vm0, %v12412_v15, %v12411_v30  ;;  %v931_v14 = vrot.slane %v9981_v57, 1  ;;  %v933_v30 = vrot.slane %v9975_v39, 1  ;;  %v8810_v39 = vld [vmem:[#allocation7 + $0x1e0] sm:$0xff]  }
 0x10c   : > { %12408 = vst [vmem:[#allocation24_spill] sm:$0xff] %v10033_v8 }
 0x10d   : > { %1948 = vmatmul.mubr.bf16.vlgmr.msra.gmra.mrb[32].mxu0 %v1126_v2  ;;  %v921_v2 = vrot.slane %v9950_v10, 1 }
 0x10e   : > { %1955 = vmatprep.mubr.bf16.mxu0 %v9728_v47  ;;  %7378 = vmatpush3.bf16.msra.mxu0 %v8800_v24  ;;  %v928_v47 = vrot.slane %v9964_v12, 1  ;;  %v930_v24 = vrot.slane %v9973_v61, 1  ;;  %v935_v12 = vrot.slane %v9991_v22, 1 }
 0x10f   : > { %7379 = vmatprep.subr.bf16.mxu0 %v8802_v50  ;;  %v10065_v50 = vpack.c.bf16 %v919_v17, %v917_v11  ;;  %v924_v11 = vsel %vm864_vm0, %v921_v2, %v923_v28  ;;  %v10091_v28 = vpack.c.bf16 %v9950_v10, %v9939_v13  ;;  %v934_v13 = vsel %vm864_vm0, %v931_v14, %v933_v30 }
 0x110   : > { %1843 = vmatmul.mubr.bf16.gmra.mrb[28].mxu1 %v9948_v9  ;;  %v10103_v10 = vpack.c.bf16 %v9962_v33, %v9956_v19  ;;  %v10117_v33 = vpack.c.bf16 %v9981_v57, %v9973_v61  ;;  %v10133_v57 = vld [vmem:[#allocation2 + $0x180] sm:$0xff] }
 0x111   : > { %1850 = vmatprep.mubr.bf16.mxu1 %v9954_v18  ;;  %v10018_v18 = vpack.c.bf16 %v914_v20, %v912_v1  ;;  %v1053_v1 = vrot.slane %v10011_v32, 2  ;;  %v1054_v20 = vrot.slane %v10026_v62, 2 }
 0x112   : > { %7380 = vmatpush3.bf16.msra.mxu0 %v8803_v59  ;;  %v8812_v59 = vld [vmem:[#allocation7 + $0x1a0] sm:$0xff]  }
 0x113   : > { %12406 = vst [vmem:[#allocation22_spill] sm:$0xff] %v10018_v18  ;;  %v1055_v8 = vsel %vm977_vm1, %v1053_v1, %v1054_v20  ;;  %v1057_v53 = vsel %vm977_vm1, %v1054_v20, %v1056_v56  ;;  %v936_v1 = vrot.slane %v9996_v31, 1  ;;  %7381 = vmatprep.subr.bf16.mxu0 %v8805_v3  ;;  %v8808_v20 = vld [vmem:[#allocation7 + $0x1d8] sm:$0xff]   ;;  %v10078_v56 = vpack.c.bf16 %v9919_v27, %v9917_v42  ;;  %v8814_v3 = vld [vmem:[#allocation7 + $0x1a8] sm:$0xff]  }
 0x114   : > { %v10063_v15 = vpack.c.bf16 %v1057_v53, %v1055_v8  ;;  %v922_v8 = vsel %vm864_vm0, %v920_v40, %v921_v2  ;;  %v8815_v40 = vld [vmem:[#allocation7 + $0x1f0] sm:$0xff]   ;;  %v929_v27 = vsel %vm864_vm0, %v926_v41, %v928_v47  ;;  %v8817_v53 = vld [vmem:[#allocation7 + $0x1f8] sm:$0xff]   ;;  %v932_v47 = vsel %vm864_vm0, %v930_v24, %v931_v14 }
 0x115   : > { %1956 = vmatmul.mubr.bf16.gmra.mrb[36].mxu0 %v9721_v43  ;;  %v10080_v17 = vpack.c.bf16 %v924_v11, %v922_v8  ;;  %v8816_v2 = vld [vmem:[#allocation7 + $0x1b0] sm:$0xff]   ;;  %v943_v24 = vrot.slane %v10024_v36, 1  ;;  %v937_v14 = vsel %vm864_vm0, %v935_v12, %v936_v1  ;;  %v10148_v11 = vpack.c.bf16 %v10026_v62, %v10011_v32 }
 0x116   : > { %1963 = vmatprep.mubr.bf16.mxu0 %v9795_v35  ;;  %7382 = vmatpush3.bf16.msra.mxu0 %v8806_v55  ;;  %v940_v55 = vrot.slane %v10011_v32, 1  ;;  %v8807_v32 = vld [vmem:[#allocation7 + $0x210] sm:$0xff]  }
 0x117   : > { %7383 = vmatprep.subr.bf16.mxu0 %v8808_v20 }
 0x118   : > { %1851 = vmatmul.mubr.bf16.gmra.mrb[32].mxu1 %v10006_v44 }
 0x119   : > { %1858 = vmatprep.mubr.bf16.mxu1 %v10018_v18  ;;  %v925_v18 = vrot.slane %v9956_v19, 1  ;;  %v939_v19 = vsel %vm864_vm0, %v936_v1, %v938_v23  ;;  %v10129_v1 = vpack.c.bf16 %v9996_v31, %v9991_v22  ;;  %v10135_v23 = vld [vmem:[#allocation2 + $0x188] sm:$0xff]  ;;  %v10143_v22 = vld [vmem:[#allocation2 + $0x190] sm:$0x3] }
 0x11a   : > { %7384 = vmatpush3.bf16.msra.mxu0 %v8809_v38  ;;  %v8818_v38 = vld [vmem:[#allocation7 + $0x1b8] sm:$0xff]   ;;  %v10119_v30 = vpack.c.bf16 %v939_v19, %v937_v14  ;;  %v1094_v8 = vrot.slane %v10135_v23, 1  ;;  %v1096_v31 = vrot.slane %v10143_v22, 1 }
 0x11b   : > { %7385 = vmatprep.subr.bf16.mxu0 %v8810_v39  ;;  %v927_v42 = vsel %vm864_vm0, %v925_v18, %v926_v41  ;;  %v10105_v18 = vpack.c.bf16 %v934_v13, %v932_v47  ;;  %v941_v41 = vrot.slane %v10026_v62, 1  ;;  %v1093_v39 = vrot.slane %v10133_v57, 1  ;;  %v8811_v62 = vld [vmem:[#allocation7 + $0x218] sm:$0xff]   ;;  %v12418_v13 = vld [vmem:[#allocation18_spill] sm:$0xff] }
 0x11c   : > { %v10093_v20 = vpack.c.bf16 %v929_v27, %v927_v42  ;;  %v12413_v42 = vld [vmem:[#allocation23_spill] sm:$0xff]  ;;  %v12417_v47 = vld [vmem:[#allocation21_spill] sm:$0xff] }
 0x11d   : > { %1964 = vmatmul.mubr.bf16.gmra.mrb[40].mxu0 %v9754_v60  ;;  %v942_v36 = vsel %vm864_vm0, %v940_v55, %v941_v41  ;;  %v944_v12 = vsel %vm864_vm0, %v941_v41, %v943_v24  ;;  %v8804_v55 = vld [vmem:[#allocation7 + $0x208] sm:$0xff]   ;;  %v12419_v41 = vld [vmem:[#allocation22_spill] sm:$0xff] }
 0x11e   : > { %1971 = vmatprep.mubr.bf16.mxu0 %v9851_v29  ;;  %7386 = vmatpush3.bf16.msra.mxu0 %v8812_v59  ;;  %v10131_v61 = vpack.c.bf16 %v944_v12, %v942_v36  ;;  %v1095_v59 = vsel %vm864_vm0, %v1093_v39, %v1094_v8  ;;  %v12414_v27 = vld [vmem:[#allocation19_spill] sm:$0xff] }
 0x11f   : > { %7387 = vmatprep.subr.bf16.mxu0 %v8813_v52  ;;  %v1097_v52 = vsel %vm864_vm0, %v1094_v8, %v1096_v31 }
 0x120   : > { %1859 = vmatmul.mubr.bf16.gmra.mrb[36].mxu1 %v10059_v63 }
 0x121   : > { %1866 = vmatprep.mubr.bf16.mxu1 %v10065_v50 }
 0x122   : > { %7388 = vmatpush3.bf16.msra.mxu0 %v8814_v3  ;;  %v10152_v3 = vpack.c.bf16 %v1097_v52, %v1095_v59 }
 0x123   : > { %7389 = vmatprep.subr.bf16.mxu0 %v8815_v40  ;;  %v8822_v40 = vld [vmem:[#allocation7 + $0x238] sm:$0xff]  }
 0x125   : > { %1972 = vmatmul.mubr.bf16.gmra.mrb[44].mxu0 %v9760_v7 }
 0x126   : > { %1979 = vmatprep.mubr.bf16.mxu0 %v9875_v51  ;;  %7390 = vmatpush3.bf16.msra.mxu0 %v8816_v2  ;;  %v10185_v2 = vpack.c.bf16 %v10135_v23, %v10133_v57 }
 0x127   : > { %7391 = vmatprep.subr.bf16.mxu0 %v8817_v53  ;;  %v12415_v53 = vld [vmem:[#allocation24_spill] sm:$0xff] }
 0x128   : > { %1867 = vmatmul.mubr.bf16.gmra.mrb[40].mxu1 %v10078_v56 }
 0x129   : > { %1874 = vmatprep.mubr.bf16.mxu1 %v10080_v17 }
 0x12a   : > { %7392 = vmatpush3.bf16.msra.mxu0 %v8818_v38  ;;  %v12416_v38 = vld [vmem:[#allocation20_spill] sm:$0xff] }
 0x12d   : > { %1980 = vmatmul.mubr.bf16.gmra.mrb[48].mxu0 %v9809_v6 }
 0x12e   : > { %1987 = vmatprep.mubr.bf16.mxu0 %v9905_v34 }
 0x130   : > { %1875 = vmatmul.mubr.bf16.gmra.mrb[44].mxu1 %v10091_v28 }
 0x131   : > { %1882 = vmatprep.mubr.bf16.mxu1 %v10093_v20 }
 0x135   : > { %1988 = vmatmul.mubr.bf16.gmra.mrb[52].mxu0 %v9811_v46 }
 0x136   : > { %1995 = vmatprep.mubr.bf16.mxu0 %v9948_v9 }
 0x138   : > { %1883 = vmatmul.mubr.bf16.gmra.mrb[48].mxu1 %v10103_v10 }
 0x139   : > { %1890 = vmatprep.mubr.bf16.mxu1 %v10105_v18 }
 0x13d   : > { %1996 = vmatmul.mubr.bf16.gmra.mrb[56].mxu0 %v9847_v26 }
 0x13e   : > { %2003 = vmatprep.mubr.bf16.mxu0 %v10006_v44 }
 0x140   : > { %1891 = vmatmul.mubr.bf16.gmra.mrb[52].mxu1 %v10117_v33 }
 0x141   : > { %1898 = vmatprep.mubr.bf16.mxu1 %v10119_v30 }
 0x145   : > { %2004 = vmatmul.mubr.bf16.gmra.mrb[60].mxu0 %v9867_v45 }
 0x146   : > { %2011 = vmatprep.mubr.bf16.mxu0 %v10059_v63 }
 0x148   : > { %1899 = vmatmul.mubr.bf16.gmra.mrb[56].mxu1 %v10129_v1 }
 0x149   : > { %1906 = vmatprep.mubr.bf16.mxu1 %v10131_v61 }
 0x14d   : > { %2012 = vmatmul.mubr.bf16.gmra.mrb[64].mxu0 %v9897_v25 }
 0x14e   : > { %2019 = vmatprep.mubr.bf16.mxu0 %v10078_v56 }
 0x150   : > { %1907 = vmatmul.mubr.bf16.gmra.mrb[60].mxu1 %v10148_v11 }
 0x151   : > { %2108 = vmatprep.mubr.bf16.mxu1 %v9721_v43  ;;  %v8819_v43 = vld [vmem:[#allocation7 + $0x220] sm:$0xff]  }
 0x155   : > { %2020 = vmatmul.mubr.bf16.gmra.mrb[68].mxu0 %v9959_v37 }
 0x156   : > { %2027 = vmatprep.mubr.bf16.mxu0 %v10091_v28 }
 0x158   : > { %2109 = vmatmul.mubr.bf16.vlgmr.msra.gmra.mrb[64].mxu1 %v9656_v5  ;;  %v8820_v5 = vld [vmem:[#allocation7 + $0x228] sm:$0xff]  }
 0x159   : > { %8506 = vmatpush3.bf16.msra.mxu1 %v9943_v0  ;;  %2116 = vmatprep.mubr.bf16.mxu1 %v9754_v60  ;;  %v8821_v0 = vld [vmem:[#allocation7 + $0x230] sm:$0xff]  }
 0x15a   : > { %8507 = vmatprep.subr.bf16.mxu1 %v8804_v55 }
 0x15d   : > { %8508 = vmatpush3.bf16.msra.mxu1 %v8804_v55  ;;  %2028 = vmatmul.mubr.bf16.gmra.mrb[72].mxu0 %v9983_v49 }
 0x15e   : > { %8509 = vmatprep.subr.bf16.mxu1 %v8807_v32  ;;  %2035 = vmatprep.mubr.bf16.mxu0 %v10103_v10 }
 0x160   : > { %2117 = vmatmul.mubr.bf16.gmra.mrb[68].mxu1 %v9694_v21 }
 0x161   : > { %2124 = vmatprep.mubr.bf16.mxu1 %v9760_v7  ;;  %8510 = vmatpush3.bf16.msra.mxu1 %v8807_v32 }
 0x162   : > { %8511 = vmatprep.subr.bf16.mxu1 %v8811_v62 }
 0x165   : > { %8512 = vmatpush3.bf16.msra.mxu1 %v8811_v62  ;;  %2036 = vmatmul.mubr.bf16.gmra.mrb[76].mxu0 %v9993_v4 }
 0x166   : > { %8513 = vmatprep.subr.bf16.mxu1 %v8819_v43  ;;  %2043 = vmatprep.mubr.bf16.mxu0 %v10117_v33 }
 0x168   : > { %2125 = vmatmul.mubr.bf16.gmra.mrb[72].mxu1 %v9747_v58 }
 0x169   : > { %2132 = vmatprep.mubr.bf16.mxu1 %v9809_v6  ;;  %8514 = vmatpush3.bf16.msra.mxu1 %v8819_v43 }
 0x16a   : > { %8515 = vmatprep.subr.bf16.mxu1 %v8820_v5 }
 0x16d   : > { %8516 = vmatpush3.bf16.msra.mxu1 %v8820_v5  ;;  %2044 = vmatmul.mubr.bf16.gmra.mrb[80].mxu0 %v10013_v54 }
 0x16e   : > { %8517 = vmatprep.subr.bf16.mxu1 %v8821_v0  ;;  %2051 = vmatprep.mubr.bf16.mxu0 %v10129_v1 }
 0x170   : > { %2133 = vmatmul.mubr.bf16.gmra.mrb[76].mxu1 %v9813_v48 }
 0x171   : > { %2140 = vmatprep.mubr.bf16.mxu1 %v9811_v46  ;;  %8518 = vmatpush3.bf16.msra.mxu1 %v8821_v0 }
 0x172   : > { %8519 = vmatprep.subr.bf16.mxu1 %v8822_v40 }
 0x175   : > { %8520 = vmatpush3.bf16.msra.mxu1 %v8822_v40  ;;  %2052 = vmatmul.mubr.bf16.gmra.mrb[84].mxu0 %v12413_v42 }
 0x176   : > { %2059 = vmatprep.mubr.bf16.mxu0 %v10148_v11 }
 0x178   : > { %2141 = vmatmul.mubr.bf16.gmra.mrb[80].mxu1 %v9858_v16 }
 0x179   : > { %2148 = vmatprep.mubr.bf16.mxu1 %v9847_v26 }
 0x17d   : > { %2060 = vmatmul.mubr.bf16.gmra.mrb[88].mxu0 %v12415_v53 }
 0x17e   : > { %2067 = vmatprep.mubr.bf16.mxu0 %v10185_v2 }
 0x180   : > { %2149 = vmatmul.mubr.bf16.gmra.mrb[84].mxu1 %v12414_v27 }
 0x181   : > { %2156 = vmatprep.mubr.bf16.mxu1 %v9867_v45 }
 0x185   : > { %2068 = vmatmul.mubr.bf16.gmra.mrb[92].mxu0 %v10063_v15 }
 0x186   : > { %2269 = vmatprep.mubr.bf16.mxu0 %v9694_v21 }
 0x188   : > { %2157 = vmatmul.mubr.bf16.gmra.mrb[88].mxu1 %v12416_v38 }
 0x189   : > { %2164 = vmatprep.mubr.bf16.mxu1 %v9897_v25 }
 0x18d   : > { %2270 = vmatmul.mubr.bf16.vlgmr.msra.gmra.mrb[96].mxu0 %v12418_v13 }
 0x18e   : > { %2277 = vmatprep.mubr.bf16.mxu0 %v9747_v58 }
 0x190   : > { %2165 = vmatmul.mubr.bf16.gmra.mrb[92].mxu1 %v12417_v47 }
 0x191   : > { %2172 = vmatprep.mubr.bf16.mxu1 %v9959_v37 }
 0x192   : > { %v10207_v21 = vpop.f32.mrb[0].mxu0 }
 0x193   : > { %12420 = vst [vmem:[#allocation23_spill] sm:$0xff] %v10207_v21  ;;  %v7057_v58 = vpop.f32.mrb[0].mxu1  ;;  %v10209_v24 = vpop.f32.mrb[1].mxu0 }
 0x194   : > { %12421 = vst [vmem:[#allocation19_spill] sm:$0xff] %v10209_v24  ;;  %v10211_v14 = vpop.f32.mrb[2].mxu0 }
 0x195   : > { %2278 = vmatmul.mubr.bf16.gmra.mrb[100].mxu0 %v9795_v35  ;;  %v7058_v35 = vpop.f32.mrb[1].mxu1  ;;  %12422 = vst [vmem:[#allocation24_spill] sm:$0xff] %v10211_v14  ;;  %v10215_v36 = vpop.f32.mrb[3].mxu0 }
 0x196   : > { %2285 = vmatprep.mubr.bf16.mxu0 %v9813_v48  ;;  %v10213_v19 = vadd.f32 %v7058_v35, %v7057_v58  ;;  %v7060_v48 = vpop.f32.mrb[2].mxu1  ;;  %12423 = vst [vmem:[#allocation20_spill] sm:$0xff] %v10215_v36 }
 0x198   : > { %2173 = vmatmul.mubr.bf16.gmra.mrb[96].mxu1 %v12419_v41 }
 0x199   : > { %2180 = vmatprep.mubr.bf16.mxu1 %v9983_v49 }
 0x19d   : > { %2286 = vmatmul.mubr.bf16.gmra.mrb[104].mxu0 %v9851_v29  ;;  %v7061_v29 = vpop.f32.mrb[3].mxu1 }
 0x19e   : > { %2293 = vmatprep.mubr.bf16.mxu0 %v9858_v16  ;;  %v10217_v12 = vadd.f32 %v7061_v29, %v7060_v48  ;;  %v10223_v16 = vpop.f32.mrb[4].mxu0  ;;  %v1101_v48 = vrot.slane %v10135_v23, 2  ;;  %v1103_v29 = vrot.slane %v10143_v22, 2 }
 0x19f   : > { %12424 = vst [vmem:[#allocation21_spill] sm:$0xff] %v10223_v16  ;;  %v10225_v8 = vpop.f32.mrb[5].mxu0 }
 0x1a0   : > { %2181 = vmatmul.mubr.bf16.gmra.mrb[100].mxu1 %v10065_v50  ;;  %12425 = vst [vmem:[#allocation18_spill] sm:$0xff] %v10225_v8  ;;  %v10227_v59 = vpop.f32.mrb[6].mxu0  ;;  %v1104_v23 = vsel %vm977_vm1, %v1101_v48, %v1103_v29 }
 0x1a1   : > { %2188 = vmatprep.mubr.bf16.mxu1 %v9993_v4  ;;  %12426 = vst [vmem:[#allocation22_spill] sm:$0xff] %v10227_v59  ;;  %v10231_v32 = vpop.f32.mrb[7].mxu0 }
 0x1a2   : > { %12427 = vst [vmem:[#allocation25_spill] sm:$0xff] %v10231_v32  ;;  %v10239_v43 = vpop.f32.mrb[8].mxu0 }
 0x1a3   : > { %12428 = vst [vmem:[#allocation26_spill] sm:$0xff] %v10239_v43  ;;  %v10241_v0 = vpop.f32.mrb[9].mxu0 }
 0x1a4   : > { %12429 = vst [vmem:[#allocation27_spill] sm:$0xff] %v10241_v0  ;;  %v8875_v0 = vld [vmem:[#allocation9 + $0x178] sm:$0xff]  }
 0x1a5   : > { %2294 = vmatmul.mubr.bf16.gmra.mrb[108].mxu0 %v9875_v51 }
 0x1a6   : > { %2301 = vmatprep.mubr.bf16.mxu0 %v12414_v27  ;;  %v10243_v27 = vpop.f32.mrb[10].mxu0 }
 0x1a7   : > { %12430 = vst [vmem:[#allocation28_spill] sm:$0xff] %v10243_v27  ;;  %v10247_v35 = vpop.f32.mrb[11].mxu0 }
 0x1a8   : > { %2189 = vmatmul.mubr.bf16.gmra.mrb[104].mxu1 %v10080_v17  ;;  %12431 = vst [vmem:[#allocation29_spill] sm:$0xff] %v10247_v35 }
 0x1a9   : > { %2196 = vmatprep.mubr.bf16.mxu1 %v10013_v54 }
 0x1ad   : > { %2302 = vmatmul.mubr.bf16.gmra.mrb[112].mxu0 %v9905_v34  ;;  %v1100_v34 = vrot.slane %v10133_v57, 2 }
 0x1ae   : > { %2309 = vmatprep.mubr.bf16.mxu0 %v12416_v38 }
 0x1af   : > { %v1102_v57 = vsel %vm977_vm1, %v1100_v34, %v1101_v48 }
 0x1b0   : > { %2197 = vmatmul.mubr.bf16.gmra.mrb[108].mxu1 %v10093_v20 }
 0x1b1   : > { %2204 = vmatprep.mubr.bf16.mxu1 %v12413_v42 }
 0x1b3   : > { %v7063_v39 = vpop.f32.mrb[4].mxu1 }
 0x1b4   : > { %v7064_v31 = vpop.f32.mrb[5].mxu1 }
 0x1b5   : > { %v10229_v52 = vadd.f32 %v7064_v31, %v7063_v39  ;;  %v7066_v55 = vpop.f32.mrb[6].mxu1  ;;  %2310 = vmatmul.mubr.bf16.gmra.mrb[116].mxu0 %v9948_v9  ;;  %v8823_v31 = vld [vmem:[#allocation9 + $0x40] sm:$0xff]  }
 0x1b6   : > { %v7067_v51 = vpop.f32.mrb[7].mxu1  ;;  %2317 = vmatprep.mubr.bf16.mxu0 %v12417_v47  ;;  %7513 = vmatprep.subr.bf16.mxu0 %v8823_v31 }
 0x1b7   : > { %v10233_v62 = vadd.f32 %v7067_v51, %v7066_v55  ;;  %v8824_v55 = vld [vmem:[#allocation9] sm:$0xff]  }
 0x1b8   : > { %2205 = vmatmul.mubr.bf16.gmra.mrb[112].mxu1 %v10105_v18  ;;  %v10260_v51 = vpop.f32.mrb[12].mxu0  ;;  %7514 = vmatpush3.bf16.msra.mxu0 %v8824_v55 }
 0x1b9   : > { %2212 = vmatprep.mubr.bf16.mxu1 %v12415_v53  ;;  %12432 = vst [vmem:[#allocation30_spill] sm:$0xff] %v10260_v51 }
 0x1bb   : > { %v7069_v5 = vpop.f32.mrb[8].mxu1 }
 0x1bc   : > { %v7070_v40 = vpop.f32.mrb[9].mxu1 }
 0x1bd   : > { %v10245_v13 = vadd.f32 %v7070_v40, %v7069_v5  ;;  %v7072_v58 = vpop.f32.mrb[10].mxu1  ;;  %v10262_v5 = vpop.f32.mrb[13].mxu0  ;;  %2318 = vmatmul.mubr.bf16.gmra.mrb[120].mxu0 %v10006_v44 }
 0x1be   : > { %v7073_v38 = vpop.f32.mrb[11].mxu1  ;;  %12433 = vst [vmem:[#allocation31_spill] sm:$0xff] %v10262_v5  ;;  %v10264_v40 = vpop.f32.mrb[14].mxu0  ;;  %2325 = vmatprep.mubr.bf16.mxu0 %v12419_v41  ;;  %v8825_v41 = vld [vmem:[#allocation9 + $0x48] sm:$0xff]  }
 0x1bf   : > { %v10252_v39 = vadd.f32 %v7073_v38, %v7072_v58  ;;  %12434 = vst [vmem:[#allocation32_spill] sm:$0xff] %v10264_v40  ;;  %v10268_v38 = vpack.c.bf16 %v1104_v23, %v1102_v57  ;;  %v10270_v31 = vpop.f32.mrb[15].mxu0  ;;  %7515 = vmatprep.subr.bf16.mxu0 %v8825_v41 }
 0x1c0   : > { %2213 = vmatmul.mubr.bf16.gmra.mrb[116].mxu1 %v10119_v30  ;;  %12435 = vst [vmem:[#allocation33_spill] sm:$0xff] %v10270_v31  ;;  %v10278_v48 = vpop.f32.mrb[16].mxu0 }
 0x1c1   : > { %2220 = vmatprep.mubr.bf16.mxu1 %v10063_v15  ;;  %12436 = vst [vmem:[#allocation34_spill] sm:$0xff] %v10278_v48  ;;  %v10280_v55 = vpop.f32.mrb[17].mxu0 }
 0x1c2   : > { %12437 = vst [vmem:[#allocation35_spill] sm:$0xff] %v10280_v55  ;;  %v10282_v23 = vpop.f32.mrb[18].mxu0  ;;  %v8826_v55 = vld [vmem:[#allocation9 + $0x8] sm:$0xff]  }
 0x1c3   : > { %v7075_v22 = vpop.f32.mrb[12].mxu1  ;;  %12438 = vst [vmem:[#allocation36_spill] sm:$0xff] %v10282_v23  ;;  %7516 = vmatpush3.bf16.msra.mxu0 %v8826_v55 }
 0x1c4   : > { %v7076_v9 = vpop.f32.mrb[13].mxu1 }
 0x1c5   : > { %v10266_v58 = vadd.f32 %v7076_v9, %v7075_v22  ;;  %v7078_v47 = vpop.f32.mrb[14].mxu1  ;;  %v10286_v9 = vpop.f32.mrb[19].mxu0  ;;  %2326 = vmatmul.mubr.bf16.gmra.mrb[124].mxu0 %v10059_v63 }
 0x1c6   : > { %v7079_v35 = vpop.f32.mrb[15].mxu1  ;;  %12439 = vst [vmem:[#allocation37_spill] sm:$0xff] %v10286_v9  ;;  %2333 = vmatprep.mubr.bf16.mxu0 %v10065_v50 }
 0x1c7   : > { %v10272_v34 = vadd.f32 %v7079_v35, %v7078_v47 }
 0x1c8   : > { %2221 = vmatmul.mubr.bf16.gmra.mrb[120].mxu1 %v10131_v61  ;;  %v10294_v23 = vpop.f32.mrb[20].mxu0 }
 0x1c9   : > { %2228 = vmatprep.mubr.bf16.mxu1 %v10268_v38  ;;  %12440 = vst [vmem:[#allocation38_spill] sm:$0xff] %v10294_v23 }
 0x1cb   : > { %v7081_v29 = vpop.f32.mrb[16].mxu1 }
 0x1cc   : > { %v7082_v57 = vpop.f32.mrb[17].mxu1 }
 0x1cd   : > { %v10284_v22 = vadd.f32 %v7082_v57, %v7081_v29  ;;  %v7084_v35 = vpop.f32.mrb[18].mxu1  ;;  %v10296_v57 = vpop.f32.mrb[21].mxu0  ;;  %2334 = vmatmul.mubr.bf16.gmra.mrb[128].mxu0 %v10078_v56 }
 0x1ce   : > { %v7085_v44 = vpop.f32.mrb[19].mxu1  ;;  %12441 = vst [vmem:[#allocation39_spill] sm:$0xff] %v10296_v57  ;;  %2341 = vmatprep.mubr.bf16.mxu0 %v10080_v17 }
 0x1cf   : > { %v10288_v47 = vadd.f32 %v7085_v44, %v7084_v35  ;;  %v10298_v35 = vpop.f32.mrb[22].mxu0 }
 0x1d0   : > { %2229 = vmatmul.mubr.bf16.gmra.mrb[124].mxu1 %v10152_v3  ;;  %12442 = vst [vmem:[#allocation40_spill] sm:$0xff] %v10298_v35  ;;  %v10302_v48 = vpop.f32.mrb[23].mxu0 }
 0x1d1   : > { %8521 = vmatprep.mubr.bf16.mxu1 %v9754_v60  ;;  %12443 = vst [vmem:[#allocation41_spill] sm:$0xff] %v10302_v48  ;;  %v10310_v60 = vpop.f32.mrb[24].mxu0 }
 0x1d2   : > { %12444 = vst [vmem:[#allocation42_spill] sm:$0xff] %v10310_v60  ;;  %v10312_v41 = vpop.f32.mrb[25].mxu0 }
 0x1d3   : > { %v7087_v29 = vpop.f32.mrb[20].mxu1  ;;  %12445 = vst [vmem:[#allocation43_spill] sm:$0xff] %v10312_v41 }
 0x1d4   : > { %v7088_v9 = vpop.f32.mrb[21].mxu1 }
 0x1d5   : > { %v10300_v44 = vadd.f32 %v7088_v9, %v7087_v29  ;;  %v7090_v63 = vpop.f32.mrb[22].mxu1  ;;  %v10314_v29 = vpop.f32.mrb[26].mxu0  ;;  %2342 = vmatmul.mubr.bf16.gmra.mrb[132].mxu0 %v10091_v28 }
 0x1d6   : > { %v7091_v31 = vpop.f32.mrb[23].mxu1  ;;  %12446 = vst [vmem:[#allocation44_spill] sm:$0xff] %v10314_v29  ;;  %2349 = vmatprep.mubr.bf16.mxu0 %v10093_v20 }
 0x1d7   : > { %v10304_v50 = vadd.f32 %v7091_v31, %v7090_v63  ;;  %v10318_v63 = vpop.f32.mrb[27].mxu0 }
 0x1d8   : > { %8522 = vmatmul.mubr.bf16.vlgmr.msra.gmra.mrb[128].mxu1 %v9760_v7  ;;  %12447 = vst [vmem:[#allocation45_spill] sm:$0xff] %v10318_v63  ;;  %v8827_v7 = vld [vmem:[#allocation9 + $0x50] sm:$0xff]   ;;  %v10326_v17 = vpop.f32.mrb[28].mxu0 }
 0x1d9   : > { %8525 = vmatprep.mubr.bf16.mxu1 %v9809_v6  ;;  %7517 = vmatprep.subr.bf16.mxu0 %v8827_v7  ;;  %v8828_v6 = vld [vmem:[#allocation9 + $0x10] sm:$0xff]   ;;  %12448 = vst [vmem:[#allocation46_spill] sm:$0xff] %v10326_v17 }
 0x1da   : > { %7518 = vmatpush3.bf16.msra.mxu0 %v8828_v6 }
 0x1db   : > { %v7093_v55 = vpop.f32.mrb[24].mxu1 }
 0x1dc   : > { %v7094_v9 = vpop.f32.mrb[25].mxu1 }
 0x1dd   : > { %v10316_v48 = vadd.f32 %v7094_v9, %v7093_v55  ;;  %v7096_v31 = vpop.f32.mrb[26].mxu1  ;;  %v10328_v9 = vpop.f32.mrb[29].mxu0  ;;  %2350 = vmatmul.mubr.bf16.gmra.mrb[136].mxu0 %v10103_v10 }
 0x1de   : > { %v7097_v56 = vpop.f32.mrb[27].mxu1  ;;  %12449 = vst [vmem:[#allocation47_spill] sm:$0xff] %v10328_v9  ;;  %2357 = vmatprep.mubr.bf16.mxu0 %v10105_v18 }
 0x1df   : > { %v10320_v35 = vadd.f32 %v7097_v56, %v7096_v31  ;;  %v10330_v31 = vpop.f32.mrb[30].mxu0 }
 0x1e0   : > { %8526 = vmatmul.mubr.bf16.gmra.mrb[132].mxu1 %v9811_v46  ;;  %12450 = vst [vmem:[#allocation48_spill] sm:$0xff] %v10330_v31  ;;  %v10334_v29 = vpop.f32.mrb[31].mxu0 }
 0x1e1   : > { %8529 = vmatprep.mubr.bf16.mxu1 %v9847_v26  ;;  %12451 = vst [vmem:[#allocation49_spill] sm:$0xff] %v10334_v29  ;;  %v7169_v26 = vpop.f32.mrb[32].mxu0 }
 0x1e2   : > { %v7170_v6 = vpop.f32.mrb[33].mxu0 }
 0x1e3   : > { %v7099_v55 = vpop.f32.mrb[28].mxu1 }
 0x1e4   : > { %v7100_v63 = vpop.f32.mrb[29].mxu1 }
 0x1e5   : > { %v10332_v56 = vadd.f32 %v7100_v63, %v7099_v55  ;;  %v7102_v28 = vpop.f32.mrb[30].mxu1  ;;  %v7171_v63 = vadd.f32 %v7170_v6, %v7169_v26  ;;  %v7172_v55 = vpop.f32.mrb[34].mxu0  ;;  %2358 = vmatmul.mubr.bf16.gmra.mrb[140].mxu0 %v10117_v33 }
 0x1e6   : > { %v7103_v46 = vpop.f32.mrb[31].mxu1  ;;  %v7173_v17 = vpop.f32.mrb[35].mxu0  ;;  %2365 = vmatprep.mubr.bf16.mxu0 %v10119_v30 }
 0x1e7   : > { %v10336_v20 = vadd.f32 %v7103_v46, %v7102_v28  ;;  %v10345_v28 = vadd.f32 %v7171_v63, %v10213_v19  ;;  %v7174_v46 = vadd.f32 %v7173_v17, %v7172_v55 }
 0x1e8   : > { %8530 = vmatmul.mubr.bf16.gmra.mrb[136].mxu1 %v9867_v45  ;;  %v7175_v19 = vpop.f32.mrb[36].mxu0 }
 0x1e9   : > { %8533 = vmatprep.mubr.bf16.mxu1 %v9897_v25  ;;  %v8829_v25 = vld [vmem:[#allocation9 + $0x58] sm:$0xff]   ;;  %v10351_v18 = vadd.f32 %v7174_v46, %v10217_v12 }
 0x1ea   : > { %7519 = vmatprep.subr.bf16.mxu0 %v8829_v25  ;;  %v815_v25 = vld [vmem:[#allocation2 + $0x1a8] sm:$0x3] }
 0x1eb   : > { %v7105_v7 = vpop.f32.mrb[32].mxu1 }
 0x1ec   : > { %v7106_v31 = vpop.f32.mrb[33].mxu1 }
 0x1ed   : > { %v10342_v9 = vadd.f32 %v7106_v31, %v7105_v7  ;;  %v7108_v29 = vpop.f32.mrb[34].mxu1  ;;  %v8830_v31 = vld [vmem:[#allocation9 + $0x18] sm:$0xff]   ;;  %v7176_v7 = vpop.f32.mrb[37].mxu0  ;;  %2366 = vmatmul.mubr.bf16.gmra.mrb[144].mxu0 %v10129_v1 }
 0x1ee   : > { %v7109_v10 = vpop.f32.mrb[35].mxu1  ;;  %7520 = vmatpush3.bf16.msra.mxu0 %v8830_v31  ;;  %v7177_v17 = vadd.f32 %v7176_v7, %v7175_v19  ;;  %v7178_v6 = vpop.f32.mrb[38].mxu0  ;;  %2373 = vmatprep.mubr.bf16.mxu0 %v10131_v61 }
 0x1ef   : > { %v10347_v45 = vadd.f32 %v7109_v10, %v7108_v29  ;;  %v7179_v12 = vpop.f32.mrb[39].mxu0 }
 0x1f0   : > { %8534 = vmatmul.mubr.bf16.gmra.mrb[140].mxu1 %v9959_v37  ;;  %v10359_v55 = vadd.f32 %v7177_v17, %v10229_v52  ;;  %v7180_v30 = vadd.f32 %v7179_v12, %v7178_v6  ;;  %v7181_v46 = vpop.f32.mrb[40].mxu0  ;;  %v8968_v6 = vld [vmem:[#allocation2] sm:$0xff] }
 0x1f1   : > { %8537 = vmatprep.mubr.bf16.mxu1 %v9983_v49  ;;  %v7182_v52 = vpop.f32.mrb[41].mxu0 }
 0x1f2   : > { %v10365_v49 = vadd.f32 %v7180_v30, %v10233_v62  ;;  %v7184_v7 = vpop.f32.mrb[42].mxu0  ;;  %v10372_v62 = vrot.slane %v8968_v6, 1 }
 0x1f3   : > { %v7111_v26 = vpop.f32.mrb[36].mxu1  ;;  %v7185_v1 = vpop.f32.mrb[43].mxu0 }
 0x1f4   : > { %v7112_v29 = vpop.f32.mrb[37].mxu1 }
 0x1f5   : > { %v10356_v33 = vadd.f32 %v7112_v29, %v7111_v26  ;;  %v7114_v63 = vpop.f32.mrb[38].mxu1  ;;  %v7183_v26 = vadd.f32 %v7182_v52, %v7181_v46  ;;  %2374 = vmatmul.mubr.bf16.gmra.mrb[148].mxu0 %v10148_v11  ;;  %v8832_v46 = vld [vmem:[#allocation9 + $0x20] sm:$0xff]  }
 0x1f6   : > { %v7115_v37 = vpop.f32.mrb[39].mxu1  ;;  %2381 = vmatprep.mubr.bf16.mxu0 %v10152_v3 }
 0x1f7   : > { %v10361_v10 = vadd.f32 %v7115_v37, %v7114_v63  ;;  %v1113_v63 = vrot.slane %v815_v25, 1  ;;  %v8831_v37 = vld [vmem:[#allocation9 + $0x60] sm:$0xff]  }
 0x1f8   : > { %8538 = vmatmul.mubr.bf16.gmra.mrb[144].mxu1 %v9993_v4  ;;  %v10375_v4 = vadd.f32 %v7183_v26, %v10245_v13  ;;  %7521 = vmatprep.subr.bf16.mxu0 %v8831_v37 }
 0x1f9   : > { %8541 = vmatprep.mubr.bf16.mxu1 %v10013_v54  ;;  %v7186_v54 = vadd.f32 %v7185_v1, %v7184_v7  ;;  %v1114_v13 = vsel %vm864_vm0, %v10372_v62, %v1113_v63  ;;  %7522 = vmatpush3.bf16.msra.mxu0 %v8832_v46  ;;  %v10391_v1 = vrot.slane %v8968_v6, 2 }
 0x1fb   : > { %v7117_v31 = vpop.f32.mrb[40].mxu1  ;;  %v10381_v30 = vadd.f32 %v7186_v54, %v10252_v39  ;;  %v1176_v39 = vpack.c.bf16 %v1114_v13, %v10372_v62 }
 0x1fc   : > { %v7118_v19 = vpop.f32.mrb[41].mxu1 }
 0x1fd   : > { %v10370_v29 = vadd.f32 %v7118_v19, %v7117_v31  ;;  %v7120_v17 = vpop.f32.mrb[42].mxu1  ;;  %v7187_v31 = vpop.f32.mrb[44].mxu0  ;;  %2382 = vmatmul.mubr.bf16.gmra.mrb[152].mxu0 %v10185_v2 }
 0x1fe   : > { %v7121_v61 = vpop.f32.mrb[43].mxu1  ;;  %v7188_v19 = vpop.f32.mrb[45].mxu0  ;;  %2389 = vmatprep.mubr.bf16.mxu0 %v1176_v39 }
 0x1ff   : > { %v10377_v12 = vadd.f32 %v7121_v61, %v7120_v17  ;;  %v7189_v26 = vadd.f32 %v7188_v19, %v7187_v31  ;;  %v7190_v7 = vpop.f32.mrb[46].mxu0 }
 0x200   : > { %8542 = vmatmul.mubr.bf16.gmra.mrb[148].mxu1 %v12413_v42  ;;  %v7191_v3 = vpop.f32.mrb[47].mxu0 }
 0x201   : > { %8545 = vmatprep.mubr.bf16.mxu1 %v12415_v53  ;;  %v1120_v53 = vrot.slane %v815_v25, 2  ;;  %v10394_v63 = vadd.f32 %v7189_v26, %v10266_v58  ;;  %v7192_v54 = vadd.f32 %v7191_v3, %v7190_v7  ;;  %v7193_v13 = vpop.f32.mrb[48].mxu0 }
 0x202   : > { %v7194_v31 = vpop.f32.mrb[49].mxu0 }
 0x203   : > { %v7123_v52 = vpop.f32.mrb[44].mxu1  ;;  %v10400_v46 = vadd.f32 %v7192_v54, %v10272_v34  ;;  %v1121_v25 = vsel %vm977_vm1, %v10391_v1, %v1120_v53  ;;  %v7196_v26 = vpop.f32.mrb[50].mxu0 }
 0x204   : > { %v7124_v11 = vpop.f32.mrb[45].mxu1  ;;  %v1177_v2 = vpack.c.bf16 %v1121_v25, %v10391_v1 }
 0x205   : > { %v10389_v17 = vadd.f32 %v7124_v11, %v7123_v52  ;;  %v7126_v42 = vpop.f32.mrb[46].mxu1  ;;  %v10406_v52 = vpack.c.bf16 %v8968_v6, %v8968_v6  ;;  %v7195_v11 = vadd.f32 %v7194_v31, %v7193_v13  ;;  %v8833_v6 = vld [vmem:[#allocation9 + $0x68] sm:$0xff]  }
 0x206   : > { %v7127_v61 = vpop.f32.mrb[47].mxu1  ;;  %7523 = vmatprep.subr.bf16.mxu0 %v8833_v6 }
 0x207   : > { %v10396_v37 = vadd.f32 %v7127_v61, %v7126_v42  ;;  %v10412_v39 = vadd.f32 %v7195_v11, %v10284_v22  ;;  %2390 = vmatmul.mubr.bf16.gmra.mrb[156].mxu0 %v10406_v52  ;;  %v8834_v61 = vld [vmem:[#allocation9 + $0x28] sm:$0xff]  }
 0x208   : > { %8546 = vmatmul.mubr.bf16.gmra.mrb[152].mxu1 %v10063_v15  ;;  %v7197_v15 = vpop.f32.mrb[51].mxu0  ;;  %7524 = vmatpush3.bf16.msra.mxu0 %v8834_v61 }
 0x209   : > { %8549 = vmatprep.mubr.bf16.mxu1 %v10268_v38  ;;  %v7198_v42 = vadd.f32 %v7197_v15, %v7196_v26  ;;  %v7199_v54 = vpop.f32.mrb[52].mxu0 }
 0x20a   : > { %v7200_v13 = vpop.f32.mrb[53].mxu0 }
 0x20b   : > { %v7129_v58 = vpop.f32.mrb[48].mxu1  ;;  %v10418_v53 = vadd.f32 %v7198_v42, %v10288_v47  ;;  %v7201_v22 = vadd.f32 %v7200_v13, %v7199_v54  ;;  %v7202_v31 = vpop.f32.mrb[54].mxu0 }
 0x20c   : > { %v7130_v19 = vpop.f32.mrb[49].mxu1  ;;  %v7203_v26 = vpop.f32.mrb[55].mxu0 }
 0x20d   : > { %v10409_v34 = vadd.f32 %v7130_v19, %v7129_v58  ;;  %v7132_v7 = vpop.f32.mrb[50].mxu1  ;;  %v7204_v47 = vadd.f32 %v7203_v26, %v7202_v31  ;;  %v8835_v26 = vld [vmem:[#allocation9 + $0x70] sm:$0xff]  }
 0x20e   : > { %v7133_v38 = vpop.f32.mrb[51].mxu1  ;;  %7525 = vmatprep.subr.bf16.mxu0 %v8835_v26 }
 0x20f   : > { %v10414_v3 = vadd.f32 %v7133_v38, %v7132_v7  ;;  %v10423_v7 = vadd.f32 %v7201_v22, %v10300_v44 }
 0x210   : > { %8550 = vmatmul.mubr.bf16.gmra.mrb[156].mxu1 %v1177_v2  ;;  %v10428_v2 = vadd.f32 %v7204_v47, %v10304_v50  ;;  %v7205_v42 = vpop.f32.mrb[56].mxu0  ;;  %v8836_v47 = vld [vmem:[#allocation9 + $0x30] sm:$0xff]  }
 0x211   : > { %v7206_v61 = vpop.f32.mrb[57].mxu0  ;;  %7526 = vmatpush3.bf16.msra.mxu0 %v8836_v47 }
 0x212   : > { %v7207_v54 = vadd.f32 %v7206_v61, %v7205_v42  ;;  %v7208_v13 = vpop.f32.mrb[58].mxu0  ;;  %v8838_v42 = vld [vmem:[#allocation9 + $0x80] sm:$0xff]  }
 0x213   : > { %v7135_v25 = vpop.f32.mrb[52].mxu1  ;;  %v7209_v60 = vpop.f32.mrb[59].mxu0 }
 0x214   : > { %v7136_v58 = vpop.f32.mrb[53].mxu1  ;;  %v10433_v44 = vadd.f32 %v7207_v54, %v10316_v48  ;;  %v7210_v31 = vadd.f32 %v7209_v60, %v7208_v13  ;;  %v8839_v60 = vld [vmem:[#allocation9 + $0xc8] sm:$0xff]  }
 0x215   : > { %v10420_v19 = vadd.f32 %v7136_v58, %v7135_v25  ;;  %v7138_v11 = vpop.f32.mrb[54].mxu1 }
 0x216   : > { %v7139_v15 = vpop.f32.mrb[55].mxu1  ;;  %v10438_v50 = vadd.f32 %v7210_v31, %v10320_v35  ;;  %v8840_v35 = vld [vmem:[#allocation9 + $0x88] sm:$0xff]  }
 0x217   : > { %v10425_v38 = vadd.f32 %v7139_v15, %v7138_v11  ;;  %v8837_v15 = vld [vmem:[#allocation9 + $0xc0] sm:$0xff]  }
 0x218   : > { %v7211_v61 = vpop.f32.mrb[60].mxu0  ;;  %7625 = vmatprep.subr.bf16.mxu1 %v8837_v15 }
 0x219   : > { %7626 = vmatpush3.bf16.msra.mxu1 %v8838_v42  ;;  %v8841_v42 = vld [vmem:[#allocation9 + $0xd0] sm:$0xff]  }
 0x21a   : > { %7627 = vmatprep.subr.bf16.mxu1 %v8839_v60 }
 0x21b   : > { %v7141_v6 = vpop.f32.mrb[56].mxu1 }
 0x21c   : > { %v7142_v41 = vpop.f32.mrb[57].mxu1 }
 0x21d   : > { %v10430_v25 = vadd.f32 %v7142_v41, %v7141_v6  ;;  %v7144_v58 = vpop.f32.mrb[58].mxu1  ;;  %v7212_v6 = vpop.f32.mrb[61].mxu0  ;;  %7628 = vmatpush3.bf16.msra.mxu1 %v8840_v35 }
 0x21e   : > { %v7145_v22 = vpop.f32.mrb[59].mxu1  ;;  %v7213_v54 = vadd.f32 %v7212_v6, %v7211_v61  ;;  %v7214_v57 = vpop.f32.mrb[62].mxu0  ;;  %v8842_v61 = vld [vmem:[#allocation9 + $0x90] sm:$0xff]   ;;  %7629 = vmatprep.subr.bf16.mxu1 %v8841_v42 }
 0x21f   : > { %v10435_v11 = vadd.f32 %v7145_v22, %v7144_v58  ;;  %v7215_v22 = vpop.f32.mrb[63].mxu0 }
 0x220   : > { %v10443_v31 = vadd.f32 %v7213_v54, %v10332_v56  ;;  %v7216_v23 = vadd.f32 %v7215_v22, %v7214_v57  ;;  %v7217_v6 = vpop.f32.mrb[64].mxu0  ;;  %v8845_v54 = vld [vmem:[#allocation9 + $0xd8] sm:$0xff]  }
 0x221   : > { %7630 = vmatpush3.bf16.msra.mxu1 %v8842_v61  ;;  %v8847_v61 = vld [vmem:[#allocation9 + $0xe0] sm:$0xff]  }
 0x222   : > { %v10448_v47 = vadd.f32 %v7216_v23, %v10336_v20  ;;  %7631 = vmatprep.subr.bf16.mxu1 %v8845_v54  ;;  %v8843_v54 = vld [vmem:[#allocation9 + $0x78] sm:$0xff]  }
 0x223   : > { %v7147_v41 = vpop.f32.mrb[60].mxu1  ;;  %7527 = vmatprep.subr.bf16.mxu0 %v8843_v54 }
 0x224   : > { %v7148_v48 = vpop.f32.mrb[61].mxu1 }
 0x225   : > { %v10440_v13 = vadd.f32 %v7148_v48, %v7147_v41  ;;  %v7150_v58 = vpop.f32.mrb[62].mxu1  ;;  %v7218_v48 = vpop.f32.mrb[65].mxu0 }
 0x226   : > { %v7151_v26 = vpop.f32.mrb[63].mxu1  ;;  %v7219_v40 = vadd.f32 %v7218_v48, %v7217_v6  ;;  %v7220_v56 = vpop.f32.mrb[66].mxu0  ;;  %v8848_v6 = vld [vmem:[#allocation9 + $0xa0] sm:$0xff]  }
 0x227   : > { %v10445_v15 = vadd.f32 %v7151_v26, %v7150_v58  ;;  %v7221_v60 = vpop.f32.mrb[67].mxu0  ;;  %v8846_v58 = vld [vmem:[#allocation9 + $0x98] sm:$0xff]   ;;  %v10462_v48 = vld [vmem:[#allocation3 + $0x10] sm:$0x3] }
 0x228   : > { %v10451_v22 = vadd.f32 %v7219_v40, %v10342_v9  ;;  %v7222_v23 = vadd.f32 %v7221_v60, %v7220_v56  ;;  %7632 = vmatpush3.bf16.msra.mxu1 %v8846_v58 }
 0x229   : > { %7633 = vmatprep.subr.bf16.mxu1 %v8847_v61 }
 0x22a   : > { %v10457_v42 = vadd.f32 %v7222_v23, %v10347_v45  ;;  %v2855_v45 = vrot.slane %v10462_v48, 1 }
 0x22b   : > { %v7281_v41 = vpop.f32.mrb[64].mxu1 }
 0x22c   : > { %v7282_v5 = vpop.f32.mrb[65].mxu1  ;;  %7634 = vmatpush3.bf16.msra.mxu1 %v8848_v6  ;;  %v2856_v6 = vsel %vm864_vm0, %v10372_v62, %v2855_v45 }
 0x22d   : > { %v7283_v51 = vadd.f32 %v7282_v5, %v7281_v41  ;;  %v7284_v57 = vpop.f32.mrb[66].mxu1  ;;  %v7223_v41 = vpop.f32.mrb[68].mxu0 }
 0x22e   : > { %v7285_v20 = vpop.f32.mrb[67].mxu1  ;;  %v7224_v9 = vpop.f32.mrb[69].mxu0 }
 0x22f   : > { %v10454_v35 = vadd.f32 %v7283_v51, %v10345_v28  ;;  %v7286_v26 = vadd.f32 %v7285_v20, %v7284_v57  ;;  %v7225_v56 = vadd.f32 %v7224_v9, %v7223_v41  ;;  %v7226_v28 = vpop.f32.mrb[70].mxu0  ;;  %v8849_v57 = vld [vmem:[#allocation9 + $0xe8] sm:$0xff]  }
 0x230   : > { %v7227_v23 = vpop.f32.mrb[71].mxu0  ;;  %v8850_v20 = vld [vmem:[#allocation9 + $0xa8] sm:$0xff]   ;;  %7635 = vmatprep.subr.bf16.mxu1 %v8849_v57 }
 0x231   : > { %v10460_v5 = vadd.f32 %v7286_v26, %v10351_v18  ;;  %v8844_v18 = vld [vmem:[#allocation9 + $0x38] sm:$0xff]   ;;  %v10466_v26 = vadd.f32 %v7225_v56, %v10356_v33  ;;  %v7228_v61 = vadd.f32 %v7227_v23, %v7226_v28  ;;  %7636 = vmatpush3.bf16.msra.mxu1 %v8850_v20  ;;  %v8851_v33 = vld [vmem:[#allocation9 + $0xf0] sm:$0xff]   ;;  %v7229_v54 = vpop.f32.mrb[72].mxu0 }
 0x232   : > { %7528 = vmatpush3.bf16.msra.mxu0 %v8844_v18  ;;  %v8852_v28 = vld [vmem:[#allocation9 + $0xb0] sm:$0xff]   ;;  %7637 = vmatprep.subr.bf16.mxu1 %v8851_v33  ;;  %v7230_v57 = vpop.f32.mrb[73].mxu0  ;;  %v8856_v18 = vld [vmem:[#allocation9 + $0xb8] sm:$0xff]  }
 0x233   : > { %v7287_v40 = vpop.f32.mrb[68].mxu1 }
 0x234   : > { %v7288_v51 = vpop.f32.mrb[69].mxu1 }
 0x235   : > { %v7289_v60 = vadd.f32 %v7288_v51, %v7287_v40  ;;  %v7290_v58 = vpop.f32.mrb[70].mxu1  ;;  %v3111_v40 = vpack.c.bf16 %v2856_v6, %v10372_v62  ;;  %v10475_v51 = vadd.f32 %v7228_v61, %v10361_v10  ;;  %7638 = vmatpush3.bf16.msra.mxu1 %v8852_v28  ;;  %v8854_v62 = vld [vmem:[#allocation9 + $0xf8] sm:$0xff]  }
 0x236   : > { %v7291_v27 = vpop.f32.mrb[71].mxu1  ;;  %7639 = vmatprep.subr.bf16.mxu1 %v8854_v62 }
 0x237   : > { %v10471_v41 = vadd.f32 %v7289_v60, %v10359_v55  ;;  %v7292_v9 = vadd.f32 %v7291_v27, %v7290_v58  ;;  %3772 = vmatprep.mubr.bf16.mxu0 %v3111_v40  ;;  %v7231_v27 = vadd.f32 %v7230_v57, %v7229_v54  ;;  %v7232_v60 = vpop.f32.mrb[74].mxu0 }
 0x238   : > { %3773 = vmatmul.mubr.bf16.vlgmr.msra.gmra.mrb[160].mxu0 %v10406_v52  ;;  %v7233_v23 = vpop.f32.mrb[75].mxu0 }
 0x239   : > { %v10478_v56 = vadd.f32 %v7292_v9, %v10365_v49  ;;  %v10482_v49 = vadd.f32 %v7231_v27, %v10370_v29  ;;  %v7234_v20 = vadd.f32 %v7233_v23, %v7232_v60  ;;  %7640 = vmatpush3.bf16.msra.mxu1 %v8856_v18  ;;  %v7235_v33 = vpop.f32.mrb[76].mxu0  ;;  %v8855_v23 = vld [vmem:[#allocation9 + $0x100] sm:$0xff]  }
 0x23a   : > { %v7236_v54 = vpop.f32.mrb[77].mxu0 }
 0x23b   : > { %v7293_v55 = vpop.f32.mrb[72].mxu1  ;;  %v10488_v9 = vadd.f32 %v7234_v20, %v10377_v12  ;;  %v7238_v57 = vpop.f32.mrb[78].mxu0 }
 0x23c   : > { %v7294_v45 = vpop.f32.mrb[73].mxu1  ;;  %v7239_v60 = vpop.f32.mrb[79].mxu0 }
 0x23d   : > { %v7295_v58 = vadd.f32 %v7294_v45, %v7293_v55  ;;  %v7296_v10 = vpop.f32.mrb[74].mxu1  ;;  %v7237_v55 = vadd.f32 %v7236_v54, %v7235_v33  ;;  %v7240_v62 = vadd.f32 %v7239_v60, %v7238_v57 }
 0x23e   : > { %v7297_v61 = vpop.f32.mrb[75].mxu1 }
 0x23f   : > { %v10485_v6 = vadd.f32 %v7295_v58, %v10375_v4  ;;  %v7298_v52 = vadd.f32 %v7297_v61, %v7296_v10  ;;  %v10494_v4 = vadd.f32 %v7237_v55, %v10389_v17  ;;  %v8853_v10 = vld [vmem:[#allocation9 + $0x140] sm:$0xff]   ;;  %v10500_v18 = vadd.f32 %v7240_v62, %v10396_v37 }
 0x240   : > { %7737 = vmatprep.subr.bf16.mxu0 %v8853_v10  ;;  %v7241_v61 = vpop.f32.mrb[80].mxu0 }
 0x241   : > { %v10491_v40 = vadd.f32 %v7298_v52, %v10381_v30  ;;  %7738 = vmatpush3.bf16.msra.mxu0 %v8855_v23  ;;  %v7242_v17 = vpop.f32.mrb[81].mxu0 }
 0x242   : > { %v7243_v33 = vadd.f32 %v7242_v17, %v7241_v61  ;;  %v7244_v54 = vpop.f32.mrb[82].mxu0 }
 0x243   : > { %v7299_v28 = vpop.f32.mrb[76].mxu1 }
 0x244   : > { %v7300_v29 = vpop.f32.mrb[77].mxu1  ;;  %v10506_v57 = vadd.f32 %v7243_v33, %v10409_v34 }
 0x245   : > { %v7301_v27 = vadd.f32 %v7300_v29, %v7299_v28  ;;  %v7302_v45 = vpop.f32.mrb[78].mxu1 }
 0x246   : > { %v7303_v58 = vpop.f32.mrb[79].mxu1 }
 0x247   : > { %v10497_v12 = vadd.f32 %v7301_v27, %v10394_v63  ;;  %v7304_v30 = vadd.f32 %v7303_v58, %v7302_v45  ;;  %v7245_v63 = vpop.f32.mrb[83].mxu0 }
 0x248   : > { %v7246_v27 = vadd.f32 %v7245_v63, %v7244_v54  ;;  %v7247_v58 = vpop.f32.mrb[84].mxu0 }
 0x249   : > { %v10503_v20 = vadd.f32 %v7304_v30, %v10400_v46  ;;  %v7248_v30 = vpop.f32.mrb[85].mxu0 }
 0x24a   : > { %v10512_v60 = vadd.f32 %v7246_v27, %v10414_v3  ;;  %v7249_v23 = vadd.f32 %v7248_v30, %v7247_v58 }
 0x24b   : > { %v7305_v52 = vpop.f32.mrb[80].mxu1 }
 0x24c   : > { %v7306_v28 = vpop.f32.mrb[81].mxu1 }
 0x24d   : > { %v7307_v55 = vadd.f32 %v7306_v28, %v7305_v52  ;;  %v7308_v29 = vpop.f32.mrb[82].mxu1  ;;  %v7250_v52 = vpop.f32.mrb[86].mxu0  ;;  %v10518_v28 = vadd.f32 %v7249_v23, %v10420_v19 }
 0x24e   : > { %v7309_v37 = vpop.f32.mrb[83].mxu1  ;;  %v7251_v33 = vpop.f32.mrb[87].mxu0 }
 0x24f   : > { %v10509_v45 = vadd.f32 %v7307_v55, %v10412_v39  ;;  %v7310_v46 = vadd.f32 %v7309_v37, %v7308_v29  ;;  %v7252_v39 = vadd.f32 %v7251_v33, %v7250_v52  ;;  %v8857_v55 = vld [vmem:[#allocation9 + $0x148] sm:$0xff]  }
 0x250   : > { %v8858_v29 = vld [vmem:[#allocation9 + $0x108] sm:$0xff]   ;;  %7739 = vmatprep.subr.bf16.mxu0 %v8857_v55  ;;  %v7253_v37 = vpop.f32.mrb[88].mxu0 }
 0x251   : > { %v10515_v62 = vadd.f32 %v7310_v46, %v10418_v53  ;;  %v10524_v63 = vadd.f32 %v7252_v39, %v10425_v38  ;;  %7740 = vmatpush3.bf16.msra.mxu0 %v8858_v29  ;;  %v7254_v19 = vpop.f32.mrb[89].mxu0 }
 0x252   : > { %v7255_v58 = vadd.f32 %v7254_v19, %v7253_v37  ;;  %v7256_v30 = vpop.f32.mrb[90].mxu0 }
 0x253   : > { %v7311_v10 = vpop.f32.mrb[84].mxu1 }
 0x254   : > { %v7312_v61 = vpop.f32.mrb[85].mxu1  ;;  %v10530_v52 = vadd.f32 %v7255_v58, %v10430_v25 }
 0x255   : > { %v7313_v34 = vadd.f32 %v7312_v61, %v7311_v10  ;;  %v7314_v17 = vpop.f32.mrb[86].mxu1 }
 0x256   : > { %v7315_v54 = vpop.f32.mrb[87].mxu1 }
 0x257   : > { %v10521_v3 = vadd.f32 %v7313_v34, %v10423_v7  ;;  %v7316_v53 = vadd.f32 %v7315_v54, %v7314_v17  ;;  %v7257_v7 = vpop.f32.mrb[91].mxu0 }
 0x258   : > { %v7258_v34 = vadd.f32 %v7257_v7, %v7256_v30  ;;  %v7259_v54 = vpop.f32.mrb[92].mxu0 }
 0x259   : > { %v10527_v27 = vadd.f32 %v7316_v53, %v10428_v2  ;;  %v7260_v53 = vpop.f32.mrb[93].mxu0 }
 0x25a   : > { %v10536_v33 = vadd.f32 %v7258_v34, %v10435_v11  ;;  %v7261_v29 = vadd.f32 %v7260_v53, %v7259_v54 }
 0x25b   : > { %v7317_v46 = vpop.f32.mrb[88].mxu1 }
 0x25c   : > { %v7318_v10 = vpop.f32.mrb[89].mxu1 }
 0x25d   : > { %v7319_v23 = vadd.f32 %v7318_v10, %v7317_v46  ;;  %v7320_v61 = vpop.f32.mrb[90].mxu1  ;;  %v7262_v46 = vpop.f32.mrb[94].mxu0  ;;  %v10542_v10 = vadd.f32 %v7261_v29, %v10440_v13 }
 0x25e   : > { %v7321_v38 = vpop.f32.mrb[91].mxu1  ;;  %v7263_v58 = vpop.f32.mrb[95].mxu0 }
 0x25f   : > { %v10533_v17 = vadd.f32 %v7319_v23, %v10433_v44  ;;  %v7322_v2 = vadd.f32 %v7321_v38, %v7320_v61  ;;  %v7264_v44 = vadd.f32 %v7263_v58, %v7262_v46  ;;  %v8859_v23 = vld [vmem:[#allocation9 + $0x150] sm:$0xff]  }
 0x260   : > { %v8860_v61 = vld [vmem:[#allocation9 + $0x110] sm:$0xff]   ;;  %7741 = vmatprep.subr.bf16.mxu0 %v8859_v23  ;;  %v7393_v38 = vpop.f32.mrb[96].mxu0  ;;  %v8861_v23 = vld [vmem:[#allocation9 + $0x158] sm:$0xff]  }
 0x261   : > { %v10539_v39 = vadd.f32 %v7322_v2, %v10438_v50  ;;  %v10548_v7 = vadd.f32 %v7264_v44, %v10445_v15  ;;  %7742 = vmatpush3.bf16.msra.mxu0 %v8860_v61  ;;  %v7394_v13 = vpop.f32.mrb[97].mxu0 }
 0x262   : > { %v7396_v53 = vpop.f32.mrb[98].mxu0  ;;  %7743 = vmatprep.subr.bf16.mxu0 %v8861_v23 }
 0x263   : > { %v7323_v55 = vpop.f32.mrb[92].mxu1 }
 0x264   : > { %v7324_v37 = vpop.f32.mrb[93].mxu1 }
 0x265   : > { %v7325_v25 = vadd.f32 %v7324_v37, %v7323_v55  ;;  %v7326_v19 = vpop.f32.mrb[94].mxu1  ;;  %v7395_v55 = vadd.f32 %v7394_v13, %v7393_v38 }
 0x266   : > { %v7327_v30 = vpop.f32.mrb[95].mxu1 }
 0x267   : > { %v10545_v11 = vadd.f32 %v7325_v25, %v10443_v31  ;;  %v7328_v50 = vadd.f32 %v7327_v30, %v7326_v19  ;;  %v7397_v31 = vpop.f32.mrb[99].mxu0  ;;  %v10554_v19 = vadd.f32 %v7395_v55, %v10454_v35 }
 0x268   : > { %v7398_v25 = vadd.f32 %v7397_v31, %v7396_v53  ;;  %v7399_v30 = vpop.f32.mrb[100].mxu0 }
 0x269   : > { %v10551_v34 = vadd.f32 %v7328_v50, %v10448_v47  ;;  %v8862_v50 = vld [vmem:[#allocation9 + $0x118] sm:$0xff]   ;;  %v7400_v38 = vpop.f32.mrb[101].mxu0 }
 0x26a   : > { %v10560_v58 = vadd.f32 %v7398_v25, %v10460_v5  ;;  %v7401_v13 = vadd.f32 %v7400_v38, %v7399_v30  ;;  %7744 = vmatpush3.bf16.msra.mxu0 %v8862_v50 }
 0x26b   : > { %v7329_v2 = vpop.f32.mrb[96].mxu1 }
 0x26c   : > { %v7330_v54 = vpop.f32.mrb[97].mxu1  ;;  %v10566_v5 = vadd.f32 %v7401_v13, %v10471_v41 }
 0x26d   : > { %v7331_v29 = vadd.f32 %v7330_v54, %v7329_v2  ;;  %v7332_v37 = vpop.f32.mrb[98].mxu1  ;;  %v7402_v54 = vpop.f32.mrb[102].mxu0 }
 0x26e   : > { %v7333_v46 = vpop.f32.mrb[99].mxu1 }
 0x26f   : > { %v10557_v15 = vadd.f32 %v7331_v29, %v10451_v22  ;;  %v7334_v47 = vadd.f32 %v7333_v46, %v7332_v37  ;;  %v7403_v22 = vpop.f32.mrb[103].mxu0 }
 0x270   : > { %v7404_v29 = vadd.f32 %v7403_v22, %v7402_v54  ;;  %v7405_v25 = vpop.f32.mrb[104].mxu0 }
 0x271   : > { %v10563_v44 = vadd.f32 %v7334_v47, %v10457_v42  ;;  %v7406_v30 = vpop.f32.mrb[105].mxu0 }
 0x272   : > { %v10572_v31 = vadd.f32 %v7404_v29, %v10478_v56  ;;  %v7407_v50 = vadd.f32 %v7406_v30, %v7405_v25 }
 0x273   : > { %v7335_v61 = vpop.f32.mrb[100].mxu1 }
 0x274   : > { %v7336_v2 = vpop.f32.mrb[101].mxu1 }
 0x275   : > { %v7337_v35 = vadd.f32 %v7336_v2, %v7335_v61  ;;  %v7338_v55 = vpop.f32.mrb[102].mxu1  ;;  %v7408_v61 = vpop.f32.mrb[106].mxu0 }
 0x276   : > { %v7339_v53 = vpop.f32.mrb[103].mxu1  ;;  %v7409_v41 = vpop.f32.mrb[107].mxu0 }
 0x277   : > { %v10569_v42 = vadd.f32 %v7337_v35, %v10466_v26  ;;  %v7340_v37 = vadd.f32 %v7339_v53, %v7338_v55  ;;  %v7410_v54 = vadd.f32 %v7409_v41, %v7408_v61  ;;  %v10578_v26 = vadd.f32 %v7407_v50, %v10485_v6  ;;  %v8863_v35 = vld [vmem:[#allocation9 + $0x160] sm:$0xff]  }
 0x278   : > { %v8864_v55 = vld [vmem:[#allocation9 + $0x120] sm:$0xff]   ;;  %7745 = vmatprep.subr.bf16.mxu0 %v8863_v35  ;;  %v7411_v29 = vpop.f32.mrb[108].mxu0 }
 0x279   : > { %v10575_v46 = vadd.f32 %v7340_v37, %v10475_v51  ;;  %v10584_v22 = vadd.f32 %v7410_v54, %v10491_v40  ;;  %7746 = vmatpush3.bf16.msra.mxu0 %v8864_v55  ;;  %v7412_v25 = vpop.f32.mrb[109].mxu0 }
 0x27a   : > { %v7413_v6 = vadd.f32 %v7412_v25, %v7411_v29  ;;  %v7414_v30 = vpop.f32.mrb[110].mxu0 }
 0x27b   : > { %v7341_v47 = vpop.f32.mrb[104].mxu1 }
 0x27c   : > { %v7342_v23 = vpop.f32.mrb[105].mxu1 }
 0x27d   : > { %v7343_v38 = vadd.f32 %v7342_v23, %v7341_v47  ;;  %v7344_v2 = vpop.f32.mrb[106].mxu1 }
 0x27e   : > { %v7345_v13 = vpop.f32.mrb[107].mxu1 }
 0x27f   : > { %v10581_v56 = vadd.f32 %v7343_v38, %v10482_v49  ;;  %v7346_v51 = vadd.f32 %v7345_v13, %v7344_v2  ;;  %v7415_v49 = vpop.f32.mrb[111].mxu0  ;;  %v10590_v2 = vadd.f32 %v7413_v6, %v10497_v12 }
 0x280   : > { %v7416_v38 = vadd.f32 %v7415_v49, %v7414_v30  ;;  %v7417_v54 = vpop.f32.mrb[112].mxu0 }
 0x281   : > { %v10587_v53 = vadd.f32 %v7346_v51, %v10488_v9  ;;  %v7418_v51 = vpop.f32.mrb[113].mxu0 }
 0x282   : > { %v10596_v41 = vadd.f32 %v7416_v38, %v10503_v20  ;;  %v7419_v29 = vadd.f32 %v7418_v51, %v7417_v54 }
 0x283   : > { %v7347_v37 = vpop.f32.mrb[108].mxu1 }
 0x284   : > { %v7348_v47 = vpop.f32.mrb[109].mxu1 }
 0x285   : > { %v7349_v23 = vadd.f32 %v7348_v47, %v7347_v37  ;;  %v7350_v50 = vpop.f32.mrb[110].mxu1  ;;  %v7420_v37 = vpop.f32.mrb[114].mxu0 }
 0x286   : > { %v7351_v61 = vpop.f32.mrb[111].mxu1  ;;  %v7421_v12 = vpop.f32.mrb[115].mxu0 }
 0x287   : > { %v10593_v40 = vadd.f32 %v7349_v23, %v10494_v4  ;;  %v7352_v9 = vadd.f32 %v7351_v61, %v7350_v50  ;;  %v7422_v30 = vadd.f32 %v7421_v12, %v7420_v37  ;;  %v10602_v4 = vadd.f32 %v7419_v29, %v10509_v45  ;;  %v8865_v23 = vld [vmem:[#allocation9 + $0x168] sm:$0xff]  }
 0x288   : > { %v8866_v50 = vld [vmem:[#allocation9 + $0x128] sm:$0xff]   ;;  %7747 = vmatprep.subr.bf16.mxu0 %v8865_v23  ;;  %v7423_v38 = vpop.f32.mrb[116].mxu0 }
 0x289   : > { %v10599_v13 = vadd.f32 %v7352_v9, %v10500_v18  ;;  %v10608_v49 = vadd.f32 %v7422_v30, %v10515_v62  ;;  %7748 = vmatpush3.bf16.msra.mxu0 %v8866_v50  ;;  %v7424_v54 = vpop.f32.mrb[117].mxu0 }
 0x28a   : > { %v7425_v45 = vadd.f32 %v7424_v54, %v7423_v38  ;;  %v7426_v51 = vpop.f32.mrb[118].mxu0 }
 0x28b   : > { %v7353_v35 = vpop.f32.mrb[112].mxu1 }
 0x28c   : > { %v7354_v55 = vpop.f32.mrb[113].mxu1 }
 0x28d   : > { %v7355_v25 = vadd.f32 %v7354_v55, %v7353_v35  ;;  %v7356_v47 = vpop.f32.mrb[114].mxu1 }
 0x28e   : > { %v7357_v6 = vpop.f32.mrb[115].mxu1 }
 0x28f   : > { %v10605_v20 = vadd.f32 %v7355_v25, %v10506_v57  ;;  %v7358_v18 = vadd.f32 %v7357_v6, %v7356_v47  ;;  %v7427_v57 = vpop.f32.mrb[119].mxu0  ;;  %v10614_v47 = vadd.f32 %v7425_v45, %v10521_v3 }
 0x290   : > { %v7428_v25 = vadd.f32 %v7427_v57, %v7426_v51  ;;  %v7429_v30 = vpop.f32.mrb[120].mxu0  ;;  %v603_v57 = vlaneseq }
 0x291   : > { %v10611_v61 = vadd.f32 %v7358_v18, %v10512_v60  ;;  %v7430_v18 = vpop.f32.mrb[121].mxu0 }
 0x292   : > { %v10620_v12 = vadd.f32 %v7428_v25, %v10527_v27  ;;  %v7431_v38 = vadd.f32 %v7430_v18, %v7429_v30 }
 0x293   : > { %v7359_v9 = vpop.f32.mrb[116].mxu1 }
 0x294   : > { %v7360_v35 = vpop.f32.mrb[117].mxu1 }
 0x295   : > { %v7361_v55 = vadd.f32 %v7360_v35, %v7359_v9  ;;  %v7362_v29 = vpop.f32.mrb[118].mxu1  ;;  %v7432_v9 = vpop.f32.mrb[122].mxu0 }
 0x296   : > { %v7363_v37 = vpop.f32.mrb[119].mxu1  ;;  %v7433_v3 = vpop.f32.mrb[123].mxu0 }
 0x297   : > { %v10617_v62 = vadd.f32 %v7361_v55, %v10518_v28  ;;  %v7364_v60 = vadd.f32 %v7363_v37, %v7362_v29  ;;  %v7434_v51 = vadd.f32 %v7433_v3, %v7432_v9  ;;  %v10626_v28 = vadd.f32 %v7431_v38, %v10533_v17  ;;  %v8867_v55 = vld [vmem:[#allocation9 + $0x170] sm:$0xff]  }
 0x298   : > { %v8868_v29 = vld [vmem:[#allocation9 + $0x130] sm:$0xff]   ;;  %7749 = vmatprep.subr.bf16.mxu0 %v8867_v55  ;;  %v10637_v17 = vshrl.u32 %v603_v57, 7  ;;  %v329_v57 = vld [vmem:[%s12368_s5] sm:$0xff] }
 0x299   : > { %v10623_v6 = vadd.f32 %v7364_v60, %v10524_v63  ;;  %v10632_v37 = vadd.f32 %v7434_v51, %v10539_v39  ;;  %7750 = vmatpush3.bf16.msra.mxu0 %v8868_v29  ;;  %v7435_v60 = vpop.f32.mrb[124].mxu0 }
 0x29a   : > { %12452 = vst [vmem:[#allocation50_spill] sm:$0xff] %v10637_v17  ;;  %7751 = vmatprep.subr.bf16.mxu0 %v8875_v0 }
 0x29b   : > { %v7365_v23 = vpop.f32.mrb[120].mxu1 }
 0x29c   : > { %v7366_v50 = vpop.f32.mrb[121].mxu1 }
 0x29d   : > { %v7367_v54 = vadd.f32 %v7366_v50, %v7365_v23  ;;  %v7368_v35 = vpop.f32.mrb[122].mxu1  ;;  %v7436_v23 = vpop.f32.mrb[125].mxu0 }
 0x29e   : > { %v7369_v45 = vpop.f32.mrb[123].mxu1  ;;  %v7437_v50 = vadd.f32 %v7436_v23, %v7435_v60 }
 0x29f   : > { %v10629_v27 = vadd.f32 %v7367_v54, %v10530_v52  ;;  %v7370_v63 = vadd.f32 %v7369_v45, %v7368_v35  ;;  %v7438_v52 = vpop.f32.mrb[126].mxu0  ;;  %v8869_v35 = vld [vmem:[#allocation9 + $0x1c0] sm:$0xff]   ;;  %v2561_v45 = vsub.s32 0, %v10637_v17 }
 0x2a0   : > { %v7439_v54 = vpop.f32.mrb[127].mxu0  ;;  %7849 = vmatprep.subr.bf16.mxu1 %v8869_v35 }
 0x2a1   : > { %v10635_v25 = vadd.f32 %v7370_v63, %v10536_v33  ;;  %v7440_v39 = vadd.f32 %v7439_v54, %v7438_v52  ;;  %v10641_v33 = vadd.f32 %v7437_v50, %v10545_v11  ;;  %v2597_v63 = vsub.s32 1, %v10637_v17 }
 0x2a2   : > { %v10656_v11 = vrot.slane %v329_v57, %v2561_v45 }
 0x2a3   : > { %v7371_v30 = vpop.f32.mrb[124].mxu1  ;;  %v10648_v29 = vadd.f32 %v7440_v39, %v10551_v34  ;;  %v10659_v50 = vrot.slane %v329_v57, %v2597_v63  ;;  %v8876_v57 = vld [vmem:[#allocation9 + $0x138] sm:$0xff]  }
 0x2a4   : > { %v7372_v18 = vpop.f32.mrb[125].mxu1  ;;  %7752 = vmatpush3.bf16.msra.mxu0 %v8876_v57 }
 0x2a5   : > { %v7373_v38 = vadd.f32 %v7372_v18, %v7371_v30  ;;  %v7374_v9 = vpop.f32.mrb[126].mxu1  ;;  %v7441_v30 = vpop.f32.mrb[128].mxu0 }
 0x2a6   : > { %v7375_v3 = vpop.f32.mrb[127].mxu1 }
 0x2a7   : > { %v10644_v51 = vadd.f32 %v7373_v38, %v10542_v10  ;;  %v7376_v55 = vadd.f32 %v7375_v3, %v7374_v9  ;;  %v7442_v10 = vpop.f32.mrb[129].mxu0 }
 0x2a8   : > { %v7443_v52 = vadd.f32 %v7442_v10, %v7441_v30  ;;  %v7444_v34 = vpop.f32.mrb[130].mxu0 }
 0x2a9   : > { %v10654_v60 = vadd.f32 %v7376_v55, %v10548_v7  ;;  %v7445_v35 = vpop.f32.mrb[131].mxu0 }
 0x2aa   : > { %v7446_v39 = vadd.f32 %v7445_v35, %v7444_v34  ;;  %v10665_v55 = vadd.f32 %v7443_v52, %v10557_v15  ;;  %v7447_v52 = vpop.f32.mrb[132].mxu0 }
 0x2ab   : > { %v8523_v23 = vpop.f32.mrb[128].mxu1 }
 0x2ac   : > { %v2441_v18 = vadd.f32 %v8523_v23, %v10566_v5  ;;  %v2432_v38 = vpop.f32.mrb[129].mxu1  ;;  %v10672_v23 = vadd.f32 %v7446_v39, %v10563_v44 }
 0x2ad   : > { %v2433_v9 = vadd.f32 %v2432_v38, %v10554_v19  ;;  %v8524_v54 = vpop.f32.mrb[130].mxu1 }
 0x2ae   : > { %v2565_v3 = vmul.f32 %v10656_v11, %v2441_v18  ;;  %v2444_v7 = vadd.f32 %v8524_v54, %v10572_v31  ;;  %v2435_v45 = vpop.f32.mrb[131].mxu1 }
 0x2af   : > { %v2563_v5 = vmul.f32 %v10656_v11, %v2433_v9  ;;  %v2436_v63 = vadd.f32 %v2435_v45, %v10560_v58  ;;  %v7448_v9 = vpop.f32.mrb[133].mxu0 }
 0x2b0   : > { %v2601_v30 = vadd.f32 %v10659_v50, %v2565_v3  ;;  %v2566_v19 = vmul.f32 %v10656_v11, %v2444_v7  ;;  %v7449_v35 = vadd.f32 %v7448_v9, %v7447_v52  ;;  %v7450_v3 = vpop.f32.mrb[134].mxu0  ;;  %v2967_v7 = vrot.slane %v10462_v48, 2 }
 0x2b1   : > { %v2599_v31 = vadd.f32 %v10659_v50, %v2563_v5  ;;  %v2564_v10 = vmul.f32 %v10656_v11, %v2436_v63  ;;  %v7451_v63 = vpop.f32.mrb[135].mxu0 }
 0x2b2   : > { %v2633_v15 = vmax.f32 %v2601_v30, 0.0  ;;  %v2602_v18 = vadd.f32 %v10659_v50, %v2566_v19  ;;  %v7452_v19 = vadd.f32 %v7451_v63, %v7450_v3 }
 0x2b3   : > { %v2631_v38 = vmax.f32 %v2599_v31, 0.0  ;;  %v2600_v58 = vadd.f32 %v10659_v50, %v2564_v10  ;;  %v8527_v34 = vpop.f32.mrb[132].mxu1 }
 0x2b4   : > { %2720 = vst [vmem:[#allocation3 + $0x31] sm:$0xff] %v2633_v15  ;;  %v2634_v54 = vmax.f32 %v2602_v18, 0.0  ;;  %v2457_v44 = vadd.f32 %v8527_v34, %v10590_v2  ;;  %v2448_v0 = vpop.f32.mrb[133].mxu1  ;;  %v10684_v2 = vadd.f32 %v7449_v35, %v10569_v42  ;;  %v2968_v18 = vsel %vm977_vm1, %v10391_v1, %v2967_v7  ;;  %v7453_v34 = vpop.f32.mrb[136].mxu0 }
 0x2b5   : > { %2718 = vst [vmem:[#allocation3 + $0x19] sm:$0xff] %v2631_v38  ;;  %v2632_v39 = vmax.f32 %v2600_v58, 0.0  ;;  %v2449_v45 = vadd.f32 %v2448_v0, %v10578_v26  ;;  %v8528_v5 = vpop.f32.mrb[134].mxu1  ;;  %v10693_v52 = vadd.f32 %v7452_v19, %v10575_v46  ;;  %v3112_v35 = vpack.c.bf16 %v2968_v18, %v10391_v1 }
 0x2b6   : > { %2721 = vst [vmem:[#allocation3 + $0x39] sm:$0xff] %v2634_v54  ;;  %v2569_v57 = vmul.f32 %v10656_v11, %v2457_v44  ;;  %v2460_v30 = vadd.f32 %v8528_v5, %v10596_v41  ;;  %v2451_v31 = vpop.f32.mrb[135].mxu1  ;;  %v7454_v44 = vpop.f32.mrb[137].mxu0 }
 0x2b7   : > { %2719 = vst [vmem:[#allocation3 + $0x21] sm:$0xff] %v2632_v39  ;;  %v2567_v10 = vmul.f32 %v10656_v11, %v2449_v45  ;;  %v2452_v48 = vadd.f32 %v2451_v31, %v10584_v22  ;;  %v10703_v7 = vadd.f32 %v7454_v44, %v7453_v34  ;;  %v7456_v45 = vpop.f32.mrb[138].mxu0 }
 0x2b8   : > { %v2605_v15 = vadd.f32 %v10659_v50, %v2569_v57  ;;  %v2570_v26 = vmul.f32 %v10656_v11, %v2460_v30  ;;  %v7457_v1 = vpop.f32.mrb[139].mxu0 }
 0x2b9   : > { %v2603_v41 = vadd.f32 %v10659_v50, %v2567_v10  ;;  %v2568_v42 = vmul.f32 %v10656_v11, %v2452_v48 }
 0x2ba   : > { %v2637_v38 = vmax.f32 %v2605_v15, 0.0  ;;  %v2606_v58 = vadd.f32 %v10659_v50, %v2570_v26  ;;  %v10715_v26 = vadd.f32 %v7457_v1, %v7456_v45  ;;  %v8871_v45 = vld [vmem:[#allocation9 + $0x1c8] sm:$0xff]  }
 0x2bb   : > { %v2635_v9 = vmax.f32 %v2603_v41, 0.0  ;;  %v2604_v22 = vadd.f32 %v10659_v50, %v2568_v42  ;;  %v8531_v54 = vpop.f32.mrb[136].mxu1  ;;  %v10700_v0 = vld [vmem:[#allocation3 + $0x30] sm:$0xff] }
 0x2bc   : > { %2724 = vst [vmem:[#allocation3 + $0x61] sm:$0xff] %v2637_v38  ;;  %v2638_v46 = vmax.f32 %v2606_v58, 0.0  ;;  %v2473_v3 = vadd.f32 %v8531_v54, %v10614_v47  ;;  %v2464_v39 = vpop.f32.mrb[137].mxu1  ;;  %v10705_v5 = vld [vmem:[#allocation3 + $0x18] sm:$0xff]  ;;  %v2862_v63 = vrot.slane %v10700_v0, 1  ;;  %v10732_v54 = vld [vmem:[#allocation9 + $0x200] sm:$0xff]  }
 0x2bd   : > { %2722 = vst [vmem:[#allocation3 + $0x49] sm:$0xff] %v2635_v9  ;;  %v2636_v57 = vmax.f32 %v2604_v22, 0.0  ;;  %v2465_v30 = vadd.f32 %v2464_v39, %v10602_v4  ;;  %v8532_v19 = vpop.f32.mrb[138].mxu1  ;;  %v10709_v31 = vld [vmem:[#allocation3 + $0x38] sm:$0xff]  ;;  %v2857_v10 = vrot.slane %v10705_v5, 1  ;;  %v8870_v22 = vld [vmem:[#allocation9 + $0x180] sm:$0xff]   ;;  %8553 = vmatprep.subr.bf16.mxu0 %v10732_v54 }
 0x2be   : > { %2725 = vst [vmem:[#allocation3 + $0x69] sm:$0xff] %v2638_v46  ;;  %v2573_v48 = vmul.f32 %v10656_v11, %v2473_v3  ;;  %v2476_v15 = vadd.f32 %v8532_v19, %v10620_v12  ;;  %v2467_v18 = vpop.f32.mrb[139].mxu1  ;;  %v10717_v41 = vld [vmem:[#allocation3 + $0x20] sm:$0xff]  ;;  %v10721_v4 = vpack.c.bf16 %v10709_v31, %v10700_v0  ;;  %v10723_v42 = vld [vmem:[#allocation3 + $0x28] sm:$0x3]  ;;  %v2863_v39 = vrot.slane %v10709_v31, 1 }
 0x2bf   : > { %v10725_v38 = vld [vmem:[#allocation3 + $0x40] sm:$0x3]  ;;  %2723 = vst [vmem:[#allocation3 + $0x51] sm:$0xff] %v2636_v57  ;;  %v2571_v58 = vmul.f32 %v10656_v11, %v2465_v30  ;;  %v2468_v34 = vadd.f32 %v2467_v18, %v10608_v49  ;;  %v3113_v12 = vpack.c.bf16 %v10717_v41, %v10705_v5  ;;  %v2858_v9 = vrot.slane %v10717_v41, 1 }
 0x2c0   : > { %v2609_v44 = vadd.f32 %v10659_v50, %v2573_v48  ;;  %v2574_v46 = vmul.f32 %v10656_v11, %v2476_v15  ;;  %v2860_v3 = vrot.slane %v10723_v42, 1  ;;  %v2865_v19 = vrot.slane %v10725_v38, 1  ;;  %v7459_v15 = vpop.f32.mrb[140].mxu0 }
 0x2c1   : > { %v2607_v57 = vadd.f32 %v10659_v50, %v2571_v58  ;;  %v2572_v49 = vmul.f32 %v10656_v11, %v2468_v34  ;;  %3933 = vmatprep.mubr.bf16.mxu1 %v3113_v12  ;;  %v2859_v30 = vsel %vm864_vm0, %v2857_v10, %v2858_v9  ;;  %v2864_v47 = vsel %vm864_vm0, %v2862_v63, %v2863_v39  ;;  %v7460_v10 = vpop.f32.mrb[141].mxu0 }
 0x2c2   : > { %v2641_v1 = vmax.f32 %v2609_v44, 0.0  ;;  %v2610_v48 = vadd.f32 %v10659_v50, %v2574_v46  ;;  %3934 = vmatmul.mubr.bf16.vlgmr.msra.gmra.mrb[160].mxu1 %v3112_v35  ;;  %v2861_v18 = vsel %vm864_vm0, %v2858_v9, %v2860_v3  ;;  %v2866_v59 = vsel %vm864_vm0, %v2863_v39, %v2865_v19  ;;  %v7462_v63 = vpop.f32.mrb[142].mxu0 }
 0x2c3   : > { %v2639_v43 = vmax.f32 %v2607_v57, 0.0  ;;  %v2608_v58 = vadd.f32 %v10659_v50, %v2572_v49  ;;  %v8535_v34 = vpop.f32.mrb[140].mxu1  ;;  %3941 = vmatprep.mubr.bf16.mxu1 %v10721_v4  ;;  %v10748_v32 = vpack.c.bf16 %v2861_v18, %v2859_v30  ;;  %7850 = vmatpush3.bf16.msra.mxu1 %v8870_v22  ;;  %v10752_v46 = vadd.f32 %v7460_v10, %v7459_v15  ;;  %v8872_v49 = vld [vmem:[#allocation9 + $0x188] sm:$0xff]   ;;  %v7463_v39 = vpop.f32.mrb[143].mxu0 }
 0x2c4   : > { %2728 = vst [vmem:[#allocation3 + $0x91] sm:$0xff] %v2641_v1  ;;  %v2642_v44 = vmax.f32 %v2610_v48, 0.0  ;;  %v2489_v35 = vadd.f32 %v8535_v34, %v10641_v33  ;;  %v2480_v9 = vpop.f32.mrb[141].mxu1  ;;  %v10754_v3 = vpack.c.bf16 %v2866_v59, %v2864_v47  ;;  %v10756_v57 = vld [vmem:[#allocation3 + $0x48] sm:$0xff]  ;;  %7851 = vmatprep.subr.bf16.mxu1 %v8871_v45  ;;  %v2970_v33 = vrot.slane %v10717_v41, 2  ;;  %v8873_v1 = vld [vmem:[#allocation9 + $0x1d0] sm:$0xff]  }
 0x2c5   : > { %2726 = vst [vmem:[#allocation3 + $0x79] sm:$0xff] %v2639_v43  ;;  %v2640_v30 = vmax.f32 %v2608_v58, 0.0  ;;  %v2481_v18 = vadd.f32 %v2480_v9, %v10626_v28  ;;  %3780 = vmatprep.mubr.bf16.mxu0 %v10748_v32  ;;  %v8536_v22 = vpop.f32.mrb[142].mxu1  ;;  %v2972_v19 = vrot.slane %v10723_v42, 2  ;;  %v10764_v45 = vadd.f32 %v7463_v39, %v7462_v63 }
 0x2c6   : > { %2729 = vst [vmem:[#allocation3 + $0x99] sm:$0xff] %v2642_v44  ;;  %v2577_v59 = vmul.f32 %v10656_v11, %v2489_v35  ;;  %v2492_v47 = vadd.f32 %v8536_v22, %v10648_v29  ;;  %3781 = vmatmul.mubr.bf16.gmra.mrb[164].mxu0 %v3113_v12  ;;  %v2483_v43 = vpop.f32.mrb[143].mxu1  ;;  %v10766_v48 = vld [vmem:[#allocation3 + $0x50] sm:$0xff]  ;;  %v10768_v28 = vld [vmem:[#allocation3 + $0x58] sm:$0x3]  ;;  %v2867_v15 = vrot.slane %v10756_v57, 1 }
 0x2c7   : > { %2727 = vst [vmem:[#allocation3 + $0x81] sm:$0xff] %v2640_v30  ;;  %v2575_v41 = vmul.f32 %v10656_v11, %v2481_v18  ;;  %v2484_v42 = vadd.f32 %v2483_v43, %v10632_v37  ;;  %3788 = vmatprep.mubr.bf16.mxu0 %v10754_v3  ;;  %v12453_v58 = vrot.slane %v10705_v5, 2  ;;  %v2973_v12 = vsel %vm977_vm1, %v2970_v33, %v2972_v19  ;;  %v8874_v37 = vld [vmem:[#allocation9 + $0x190] sm:$0xff]   ;;  %v8877_v18 = vld [vmem:[#allocation9 + $0x1d8] sm:$0xff]  }
 0x2c8   : > { %v2613_v34 = vadd.f32 %v10659_v50, %v2577_v59  ;;  %v2578_v10 = vmul.f32 %v10656_v11, %v2492_v47  ;;  %v10784_v35 = vpack.c.bf16 %v10766_v48, %v10756_v57  ;;  %7852 = vmatpush3.bf16.msra.mxu1 %v8872_v49  ;;  %v2868_v63 = vrot.slane %v10766_v48, 1 }
 0x2c9   : > { %v2971_v29 = vsel %vm977_vm1, %v12453_v58, %v2970_v33  ;;  %v2611_v9 = vadd.f32 %v10659_v50, %v2575_v41  ;;  %v2576_v5 = vmul.f32 %v10656_v11, %v2484_v42  ;;  %v2870_v30 = vrot.slane %v10768_v28, 1  ;;  %7853 = vmatprep.subr.bf16.mxu1 %v8873_v1  ;;  %v7465_v33 = vpop.f32.mrb[144].mxu0 }
 0x2ca   : > { %v10780_v44 = vpack.c.bf16 %v2973_v12, %v2971_v29  ;;  %v2645_v22 = vmax.f32 %v2613_v34, 0.0  ;;  %v2614_v39 = vadd.f32 %v10659_v50, %v2578_v10  ;;  %v2974_v19 = vrot.slane %v10700_v0, 2  ;;  %v7466_v41 = vpop.f32.mrb[145].mxu0  ;;  %v10803_v10 = vld [vmem:[#allocation3 + $0x68] sm:$0xff] }
 0x2cb   : > { %v2975_v49 = vrot.slane %v10709_v31, 2  ;;  %v2643_v59 = vmax.f32 %v2611_v9, 0.0  ;;  %v2612_v47 = vadd.f32 %v10659_v50, %v2576_v5  ;;  %v8539_v43 = vpop.f32.mrb[144].mxu1  ;;  %v2869_v1 = vsel %vm864_vm0, %v2867_v15, %v2868_v63  ;;  %v7468_v34 = vpop.f32.mrb[146].mxu0  ;;  %v8878_v9 = vld [vmem:[#allocation9 + $0x198] sm:$0xff]  }
 0x2cc   : > { %3942 = vmatmul.mubr.bf16.gmra.mrb[164].mxu1 %v10780_v44  ;;  %v2871_v42 = vsel %vm864_vm0, %v2868_v63, %v2870_v30  ;;  %2732 = vst [vmem:[#allocation3 + $0xc1] sm:$0xff] %v2645_v22  ;;  %v2646_v58 = vmax.f32 %v2614_v39, 0.0  ;;  %v2505_v29 = vadd.f32 %v8539_v43, %v10684_v2  ;;  %v10799_v12 = vadd.f32 %v7466_v41, %v7465_v33  ;;  %v2496_v0 = vpop.f32.mrb[145].mxu1  ;;  %v7469_v63 = vpop.f32.mrb[147].mxu0  ;;  %v8879_v22 = vld [vmem:[#allocation9 + $0x1e0] sm:$0xff]  }
 0x2cd   : > { %3949 = vmatprep.mubr.bf16.mxu1 %v10784_v35  ;;  %v10801_v31 = vpack.c.bf16 %v2871_v42, %v2869_v1  ;;  %7854 = vmatpush3.bf16.msra.mxu1 %v8874_v37  ;;  %2730 = vst [vmem:[#allocation3 + $0xa9] sm:$0xff] %v2643_v59  ;;  %v2644_v5 = vmax.f32 %v2612_v47, 0.0  ;;  %v2497_v15 = vadd.f32 %v2496_v0, %v10665_v55  ;;  %v8540_v8 = vpop.f32.mrb[146].mxu1  ;;  %v2977_v2 = vrot.slane %v10725_v38, 2  ;;  %v10815_v47 = vld [vmem:[#allocation3 + $0x60] sm:$0xff] }
 0x2ce   : > { %v2976_v30 = vsel %vm977_vm1, %v2974_v19, %v2975_v49  ;;  %7855 = vmatprep.subr.bf16.mxu1 %v8877_v18  ;;  %2733 = vst [vmem:[#allocation3 + $0xc9] sm:$0xff] %v2646_v58  ;;  %v2581_v39 = vmul.f32 %v10656_v11, %v2505_v29  ;;  %v2508_v33 = vadd.f32 %v8540_v8, %v10693_v52  ;;  %v2499_v59 = vpop.f32.mrb[147].mxu1  ;;  %v10831_v41 = vld [vmem:[#allocation3 + $0x70] sm:$0x3]  ;;  %v8881_v29 = vld [vmem:[#allocation9 + $0x1e8] sm:$0xff]  }
 0x2cf   : > { %3789 = vmatmul.mubr.bf16.gmra.mrb[168].mxu0 %v10721_v4  ;;  %v10811_v37 = vadd.f32 %v7469_v63, %v7468_v34  ;;  %v2360_v55 = vadd.f32 %v10752_v46, %v10593_v40  ;;  %2731 = vst [vmem:[#allocation3 + $0xb1] sm:$0xff] %v2644_v5  ;;  %v2579_v38 = vmul.f32 %v10656_v11, %v2497_v15 }
 0x2d0   : > { %v2500_v18 = vadd.f32 %v2499_v59, %v10672_v23  ;;  %3796 = vmatprep.mubr.bf16.mxu0 %v10801_v31  ;;  %v2978_v19 = vsel %vm977_vm1, %v2975_v49, %v2977_v2  ;;  %v10823_v8 = vpack.c.bf16 %v10803_v10, %v10815_v47  ;;  %v2617_v52 = vadd.f32 %v10659_v50, %v2581_v39  ;;  %v8880_v23 = vld [vmem:[#allocation9 + $0x1a0] sm:$0xff]  }
 0x2d1   : > { %v2582_v43 = vmul.f32 %v10656_v11, %v2508_v33  ;;  %v10827_v40 = vpack.c.bf16 %v2978_v19, %v2976_v30  ;;  %v2352_v46 = vadd.f32 %v10703_v7, %v10581_v56  ;;  %7856 = vmatpush3.bf16.msra.mxu1 %v8878_v9  ;;  %v2615_v1 = vadd.f32 %v10659_v50, %v2579_v38  ;;  %v7471_v56 = vpop.f32.mrb[148].mxu0 }
 0x2d2   : > { %v2580_v49 = vmul.f32 %v10656_v11, %v2500_v18  ;;  %v2363_v42 = vadd.f32 %v10764_v45, %v10599_v13  ;;  %v2355_v58 = vadd.f32 %v10715_v26, %v10587_v53  ;;  %7857 = vmatprep.subr.bf16.mxu1 %v8879_v22  ;;  %v2649_v0 = vmax.f32 %v2617_v52, 0.0  ;;  %v7472_v13 = vpop.f32.mrb[149].mxu0 }
 0x2d3   : > { %v2618_v34 = vadd.f32 %v10659_v50, %v2582_v43  ;;  %v2872_v7 = vrot.slane %v10815_v47, 1  ;;  %v2873_v9 = vrot.slane %v10803_v10, 1  ;;  %v2647_v5 = vmax.f32 %v2615_v1, 0.0  ;;  %v8543_v63 = vpop.f32.mrb[148].mxu1  ;;  %v7474_v39 = vpop.f32.mrb[150].mxu0  ;;  %v10850_v1 = vld [vmem:[#allocation3 + $0x80] sm:$0xff] }
 0x2d4   : > { %3950 = vmatmul.mubr.bf16.gmra.mrb[168].mxu1 %v10827_v40  ;;  %v2616_v15 = vadd.f32 %v10659_v50, %v2580_v49  ;;  %v2875_v53 = vrot.slane %v10831_v41, 1  ;;  %v2979_v26 = vrot.slane %v10756_v57, 2  ;;  %2736 = vst [vmem:[#allocation3 + $0xf1] sm:$0xff] %v2649_v0  ;;  %v2521_v30 = vadd.f32 %v8543_v63, %v2360_v55  ;;  %v2512_v22 = vpop.f32.mrb[149].mxu1  ;;  %v7475_v19 = vpop.f32.mrb[151].mxu0  ;;  %v8882_v57 = vld [vmem:[#allocation9 + $0x1a8] sm:$0xff]  }
 0x2d5   : > { %3957 = vmatprep.mubr.bf16.mxu1 %v10823_v8  ;;  %v2650_v45 = vmax.f32 %v2618_v34, 0.0  ;;  %v7473_v2 = vadd.f32 %v7472_v13, %v7471_v56  ;;  %v2874_v33 = vsel %vm864_vm0, %v2872_v7, %v2873_v9  ;;  %7858 = vmatpush3.bf16.msra.mxu1 %v8880_v23  ;;  %2734 = vst [vmem:[#allocation3 + $0xd9] sm:$0xff] %v2647_v5  ;;  %v8544_v18 = vpop.f32.mrb[150].mxu1  ;;  %v2980_v43 = vrot.slane %v10766_v48, 2 }
 0x2d6   : > { %v2648_v59 = vmax.f32 %v2616_v15, 0.0  ;;  %v2513_v38 = vadd.f32 %v2512_v22, %v2352_v46  ;;  %v2876_v52 = vsel %vm864_vm0, %v2873_v9, %v2875_v53  ;;  %7859 = vmatprep.subr.bf16.mxu1 %v8881_v29  ;;  %v2585_v55 = vmul.f32 %v10656_v11, %v2521_v30  ;;  %v2515_v0 = vpop.f32.mrb[151].mxu1  ;;  %v8883_v46 = vld [vmem:[#allocation9 + $0x1f0] sm:$0xff]   ;;  %v10859_v9 = vld [vmem:[#allocation3 + $0x78] sm:$0xff] }
 0x2d7   : > { %2737 = vst [vmem:[#allocation3 + $0xf9] sm:$0xff] %v2650_v45  ;;  %v2524_v49 = vadd.f32 %v8544_v18, %v2363_v42  ;;  %3797 = vmatmul.mubr.bf16.gmra.mrb[172].mxu0 %v10784_v35  ;;  %v7476_v23 = vadd.f32 %v7475_v19, %v7474_v39  ;;  %v10854_v34 = vpack.c.bf16 %v2876_v52, %v2874_v33  ;;  %v2982_v29 = vrot.slane %v10768_v28, 2  ;;  %v10878_v39 = vld [vmem:[#allocation3 + $0x88] sm:$0x3] }
 0x2d8   : > { %2735 = vst [vmem:[#allocation3 + $0xe1] sm:$0xff] %v2648_v59  ;;  %v2583_v56 = vmul.f32 %v10656_v11, %v2513_v38  ;;  %v2516_v7 = vadd.f32 %v2515_v0, %v2355_v58  ;;  %v2981_v48 = vsel %vm977_vm1, %v2979_v26, %v2980_v43  ;;  %v2621_v5 = vadd.f32 %v10659_v50, %v2585_v55  ;;  %v8884_v26 = vld [vmem:[#allocation9 + $0x1b0] sm:$0xff]   ;;  %v8886_v19 = vld [vmem:[#allocation9 + $0x1f8] sm:$0xff]  }
 0x2d9   : > { %v2586_v42 = vmul.f32 %v10656_v11, %v2524_v49  ;;  %3804 = vmatprep.mubr.bf16.mxu0 %v10854_v34  ;;  %v2376_v15 = vadd.f32 %v7473_v2, %v10617_v62  ;;  %v10867_v63 = vpack.c.bf16 %v10850_v1, %v10859_v9  ;;  %v2983_v28 = vsel %vm977_vm1, %v2980_v43, %v2982_v29  ;;  %v7477_v62 = vpop.f32.mrb[152].mxu0 }
 0x2da   : > { %v2619_v58 = vadd.f32 %v10659_v50, %v2583_v56  ;;  %v2584_v13 = vmul.f32 %v10656_v11, %v2516_v7  ;;  %v2368_v53 = vadd.f32 %v10799_v12, %v10605_v20  ;;  %7860 = vmatpush3.bf16.msra.mxu1 %v8882_v57  ;;  %v2653_v45 = vmax.f32 %v2621_v5, 0.0  ;;  %v7478_v18 = vpop.f32.mrb[153].mxu0  ;;  %v8887_v7 = vld [vmem:[#allocation9 + $0x1b8] sm:$0xff]  }
 0x2db   : > { %v2622_v30 = vadd.f32 %v10659_v50, %v2586_v42  ;;  %v10875_v22 = vpack.c.bf16 %v2983_v28, %v2981_v48  ;;  %v2379_v2 = vadd.f32 %v7476_v23, %v10623_v6  ;;  %7861 = vmatprep.subr.bf16.mxu1 %v8883_v46  ;;  %v8547_v38 = vpop.f32.mrb[152].mxu1  ;;  %v2371_v20 = vadd.f32 %v10811_v37, %v10611_v61  ;;  %v7480_v55 = vpop.f32.mrb[154].mxu0 }
 0x2dc   : > { %v2651_v33 = vmax.f32 %v2619_v58, 0.0  ;;  %v2620_v59 = vadd.f32 %v10659_v50, %v2584_v13  ;;  %v2877_v12 = vrot.slane %v10859_v9, 1  ;;  %2740 = vst [vmem:[#allocation3 + $0x121] sm:$0xff] %v2653_v45  ;;  %v2537_v43 = vadd.f32 %v8547_v38, %v2376_v15  ;;  %v2528_v57 = vpop.f32.mrb[153].mxu1  ;;  %v7481_v61 = vpop.f32.mrb[155].mxu0  ;;  %v10892_v58 = vld [vmem:[#allocation3 + $0x98] sm:$0xff] }
 0x2dd   : > { %v2654_v52 = vmax.f32 %v2622_v30, 0.0  ;;  %3958 = vmatmul.mubr.bf16.gmra.mrb[172].mxu1 %v10875_v22  ;;  %v7479_v6 = vadd.f32 %v7478_v18, %v7477_v62  ;;  %v2878_v49 = vrot.slane %v10850_v1, 1  ;;  %v2529_v0 = vadd.f32 %v2528_v57, %v2368_v53  ;;  %v8548_v46 = vpop.f32.mrb[154].mxu1 }
 0x2de   : > { %2738 = vst [vmem:[#allocation3 + $0x109] sm:$0xff] %v2651_v33  ;;  %v2652_v23 = vmax.f32 %v2620_v59, 0.0  ;;  %3965 = vmatprep.mubr.bf16.mxu1 %v10867_v63  ;;  %v2880_v37 = vrot.slane %v10878_v39, 1  ;;  %v2984_v56 = vrot.slane %v10815_v47, 2  ;;  %7862 = vmatpush3.bf16.msra.mxu1 %v8884_v26  ;;  %v2589_v48 = vmul.f32 %v10656_v11, %v2537_v43  ;;  %v2531_v42 = vpop.f32.mrb[155].mxu1 }
 0x2df   : > { %2741 = vst [vmem:[#allocation3 + $0x129] sm:$0xff] %v2654_v52  ;;  %v2540_v29 = vadd.f32 %v8548_v46, %v2379_v2  ;;  %3805 = vmatmul.mubr.bf16.gmra.mrb[176].mxu0 %v10823_v8  ;;  %v7482_v5 = vadd.f32 %v7481_v61, %v7480_v55  ;;  %v2879_v15 = vsel %vm864_vm0, %v2877_v12, %v2878_v49  ;;  %v2985_v53 = vrot.slane %v10803_v10, 2  ;;  %v10902_v2 = vld [vmem:[#allocation3 + $0x90] sm:$0xff]  ;;  %v7483_v12 = vpop.f32.mrb[156].mxu0  ;;  %v10915_v52 = vld [vmem:[#allocation3 + $0xa0] sm:$0x3] }
 0x2e0   : > { %2739 = vst [vmem:[#allocation3 + $0x111] sm:$0xff] %v2652_v23  ;;  %v2587_v13 = vmul.f32 %v10656_v11, %v2529_v0  ;;  %v2532_v28 = vadd.f32 %v2531_v42, %v2371_v20  ;;  %v2881_v47 = vsel %vm864_vm0, %v2878_v49, %v2880_v37  ;;  %7863 = vmatprep.subr.bf16.mxu1 %v8886_v19  ;;  %v2987_v62 = vrot.slane %v10831_v41, 2  ;;  %v7484_v23 = vpop.f32.mrb[157].mxu0 }
 0x2e1   : > { %v2625_v26 = vadd.f32 %v10659_v50, %v2589_v48  ;;  %v2590_v45 = vmul.f32 %v10656_v11, %v2540_v29  ;;  %v10899_v30 = vpack.c.bf16 %v2881_v47, %v2879_v15  ;;  %v2986_v38 = vsel %vm977_vm1, %v2984_v56, %v2985_v53  ;;  %v7486_v56 = vpop.f32.mrb[158].mxu0 }
 0x2e2   : > { %v2623_v33 = vadd.f32 %v10659_v50, %v2587_v13  ;;  %v2588_v59 = vmul.f32 %v10656_v11, %v2532_v28  ;;  %v10909_v10 = vpack.c.bf16 %v10892_v58, %v10902_v2  ;;  %7864 = vmatpush3.bf16.msra.mxu1 %v8887_v7  ;;  %v2988_v41 = vsel %vm977_vm1, %v2985_v53, %v2987_v62  ;;  %v7487_v42 = vpop.f32.mrb[159].mxu0 }
 0x2e3   : > { %v2657_v18 = vmax.f32 %v2625_v26, 0.0  ;;  %v2626_v20 = vadd.f32 %v10659_v50, %v2590_v45  ;;  %3812 = vmatprep.mubr.bf16.mxu0 %v10899_v30  ;;  %v2384_v19 = vadd.f32 %v7479_v6, %v10629_v27  ;;  %v10918_v55 = vpack.c.bf16 %v2988_v41, %v2986_v38  ;;  %v8551_v49 = vpop.f32.mrb[156].mxu1  ;;  %v10931_v26 = vld [vmem:[#allocation3 + $0xb0] sm:$0xff] }
 0x2e4   : > { %v2655_v43 = vmax.f32 %v2623_v33, 0.0  ;;  %v2624_v57 = vadd.f32 %v10659_v50, %v2588_v59  ;;  %v2387_v0 = vadd.f32 %v7482_v5, %v10635_v25  ;;  %v7485_v61 = vadd.f32 %v7484_v23, %v7483_v12  ;;  %v2544_v37 = vpop.f32.mrb[157].mxu1  ;;  %v10936_v59 = vld [vmem:[#allocation3 + $0xa8] sm:$0xff] }
 0x2e5   : > { %2744 = vst [vmem:[#allocation3 + $0x151] sm:$0xff] %v2657_v18  ;;  %v2658_v46 = vmax.f32 %v2626_v20, 0.0  ;;  %v2882_v7 = vrot.slane %v10902_v2, 1  ;;  %v2883_v27 = vrot.slane %v10892_v58, 1  ;;  %3966 = vmatmul.mubr.bf16.gmra.mrb[176].mxu1 %v10918_v55  ;;  %v2545_v48 = vadd.f32 %v2544_v37, %v2384_v19  ;;  %v8552_v29 = vpop.f32.mrb[158].mxu1 }
 0x2e6   : > { %2742 = vst [vmem:[#allocation3 + $0x139] sm:$0xff] %v2655_v43  ;;  %v2656_v6 = vmax.f32 %v2624_v57, 0.0  ;;  %v2885_v15 = vrot.slane %v10915_v52, 1  ;;  %v2989_v25 = vrot.slane %v10859_v9, 2  ;;  %3973 = vmatprep.mubr.bf16.mxu1 %v10909_v10  ;;  %v2392_v5 = vadd.f32 %v7485_v61, %v10644_v51  ;;  %v2547_v28 = vpop.f32.mrb[159].mxu1 }
 0x2e7   : > { %2745 = vst [vmem:[#allocation3 + $0x159] sm:$0xff] %v2658_v46  ;;  %3813 = vmatmul.mubr.bf16.gmra.mrb[180].mxu0 %v10867_v63  ;;  %v7488_v13 = vadd.f32 %v7487_v42, %v7486_v56  ;;  %v2884_v47 = vsel %vm864_vm0, %v2882_v7, %v2883_v27  ;;  %v2990_v53 = vrot.slane %v10850_v1, 2  ;;  %v2591_v45 = vmul.f32 %v10656_v11, %v2545_v48  ;;  %v2773_v1 = vld [vmem:[#allocation3 + $0xb8] sm:$0x3] }
 0x2e8   : > { %2743 = vst [vmem:[#allocation3 + $0x141] sm:$0xff] %v2656_v6  ;;  %v2548_v62 = vadd.f32 %v2547_v28, %v2387_v0  ;;  %v2886_v9 = vsel %vm864_vm0, %v2883_v27, %v2885_v15  ;;  %v2992_v33 = vrot.slane %v10878_v39, 2  ;;  %v2553_v51 = vadd.f32 %v8551_v49, %v2392_v5  ;;  %v10960_v6 = vld [vmem:[#allocation3 + $0xc8] sm:$0xff]  ;;  %v2776_v5 = vld [vmem:[#allocation3 + $0xd0] sm:$0x3] }
 0x2e9   : > { %v2395_v38 = vadd.f32 %v7488_v13, %v10654_v60  ;;  %v10939_v18 = vpack.c.bf16 %v2886_v9, %v2884_v47  ;;  %v2991_v20 = vsel %vm977_vm1, %v2989_v25, %v2990_v53  ;;  %v2627_v41 = vadd.f32 %v10659_v50, %v2591_v45  ;;  %v2774_v25 = vld [vmem:[#allocation3 + $0xc0] sm:$0xff] }
 0x2ea   : > { %v2592_v12 = vmul.f32 %v10656_v11, %v2548_v62  ;;  %v2993_v19 = vsel %vm977_vm1, %v2990_v53, %v2992_v33  ;;  %v10947_v43 = vpack.c.bf16 %v10931_v26, %v10936_v59  ;;  %v2593_v39 = vmul.f32 %v10656_v11, %v2553_v51  ;;  %v2778_v33 = vld [vmem:[#allocation3 + $0xe0] sm:$0xff]  ;;  %v2779_v51 = vld [vmem:[#allocation3 + $0xe8] sm:$0x3] }
 0x2eb   : > { %v2556_v57 = vadd.f32 %v8552_v29, %v2395_v38  ;;  %3820 = vmatprep.mubr.bf16.mxu0 %v10939_v18  ;;  %v10951_v60 = vpack.c.bf16 %v2993_v19, %v2991_v20  ;;  %v2887_v49 = vrot.slane %v10936_v59, 1  ;;  %v2659_v23 = vmax.f32 %v2627_v41, 0.0  ;;  %v2777_v19 = vld [vmem:[#allocation3 + $0xd8] sm:$0xff] }
 0x2ec   : > { %v2628_v0 = vadd.f32 %v10659_v50, %v2592_v12  ;;  %v2888_v46 = vrot.slane %v10931_v26, 1  ;;  %v2890_v61 = vrot.slane %v2773_v1, 1  ;;  %v2629_v37 = vadd.f32 %v10659_v50, %v2593_v39 }
 0x2ed   : > { %v2594_v56 = vmul.f32 %v10656_v11, %v2556_v57  ;;  %v2994_v7 = vrot.slane %v10902_v2, 2  ;;  %v2995_v27 = vrot.slane %v10892_v58, 2  ;;  %2746 = vst [vmem:[#allocation3 + $0x169] sm:$0xff] %v2659_v23  ;;  %3974 = vmatmul.mubr.bf16.gmra.mrb[180].mxu1 %v10951_v60  ;;  %v2997_v15 = vrot.slane %v10915_v52, 2 }
 0x2ee   : > { %v2660_v48 = vmax.f32 %v2628_v0, 0.0  ;;  %v2889_v29 = vsel %vm864_vm0, %v2887_v49, %v2888_v46  ;;  %v2891_v42 = vsel %vm864_vm0, %v2888_v46, %v2890_v61  ;;  %v2661_v13 = vmax.f32 %v2629_v37, 0.0  ;;  %3981 = vmatprep.mubr.bf16.mxu1 %v10947_v43  ;;  %v2781_v37 = vld [vmem:[#allocation3 + $0xf8] sm:$0xff] }
 0x2ef   : > { %v2630_v11 = vadd.f32 %v10659_v50, %v2594_v56  ;;  %3821 = vmatmul.mubr.bf16.gmra.mrb[184].mxu0 %v10909_v10  ;;  %v10969_v58 = vpack.c.bf16 %v2891_v42, %v2889_v29  ;;  %v2996_v2 = vsel %vm977_vm1, %v2994_v7, %v2995_v27  ;;  %v2893_v28 = vrot.slane %v10960_v6, 1  ;;  %v2782_v56 = vld [vmem:[#allocation3 + $0x100] sm:$0x3]  ;;  %v2780_v29 = vld [vmem:[#allocation3 + $0xf0] sm:$0xff] }
 0x2f0   : > { %2747 = vst [vmem:[#allocation3 + $0x171] sm:$0xff] %v2660_v48  ;;  %2748 = vst [vmem:[#allocation3 + $0x181] sm:$0xff] %v2661_v13  ;;  %v2998_v52 = vsel %vm977_vm1, %v2995_v27, %v2997_v15  ;;  %v2892_v53 = vrot.slane %v2774_v25, 1  ;;  %v2895_v45 = vrot.slane %v2776_v5, 1  ;;  %v10980_v38 = vpack.c.bf16 %v10960_v6, %v2774_v25 }
 0x2f1   : > { %v2662_v47 = vmax.f32 %v2630_v11, 0.0  ;;  %3828 = vmatprep.mubr.bf16.mxu0 %v10969_v58  ;;  %v10977_v9 = vpack.c.bf16 %v2998_v52, %v2996_v2  ;;  %v3000_v20 = vrot.slane %v10931_v26, 2  ;;  %v3002_v41 = vrot.slane %v2773_v1, 2  ;;  %v11011_v52 = vld [vmem:[#allocation3 + $0x110] sm:$0xff] }
 0x2f2   : > { %v2894_v50 = vsel %vm864_vm0, %v2892_v53, %v2893_v28  ;;  %v2896_v62 = vsel %vm864_vm0, %v2893_v28, %v2895_v45  ;;  %v2999_v39 = vrot.slane %v10936_v59, 2  ;;  %v2898_v57 = vrot.slane %v2778_v33, 1  ;;  %v2785_v53 = vld [vmem:[#allocation3 + $0x118] sm:$0x3] }
 0x2f3   : > { %2749 = vst [vmem:[#allocation3 + $0x189] sm:$0xff] %v2662_v47  ;;  %v10984_v12 = vpack.c.bf16 %v2896_v62, %v2894_v50  ;;  %v2900_v49 = vrot.slane %v2779_v51, 1  ;;  %v3003_v26 = vsel %vm977_vm1, %v3000_v20, %v3002_v41  ;;  %v2897_v1 = vrot.slane %v2777_v19, 1 }
 0x2f4   : > { %v3001_v23 = vsel %vm977_vm1, %v2999_v39, %v3000_v20  ;;  %v10996_v7 = vpack.c.bf16 %v2778_v33, %v2777_v19  ;;  %v3005_v59 = vrot.slane %v10960_v6, 2  ;;  %v3007_v27 = vrot.slane %v2776_v5, 2  ;;  %v2783_v20 = vld [vmem:[#allocation3 + $0x108] sm:$0xff] }
 0x2f5   : > { %3982 = vmatmul.mubr.bf16.gmra.mrb[184].mxu1 %v10977_v9  ;;  %v2899_v0 = vsel %vm864_vm0, %v2897_v1, %v2898_v57  ;;  %v2901_v46 = vsel %vm864_vm0, %v2898_v57, %v2900_v49  ;;  %v10994_v61 = vpack.c.bf16 %v3003_v26, %v3001_v23  ;;  %v3004_v42 = vrot.slane %v2774_v25, 2 }
 0x2f6   : > { %3989 = vmatprep.mubr.bf16.mxu1 %v10980_v38  ;;  %v11000_v48 = vpack.c.bf16 %v2901_v46, %v2899_v0  ;;  %v2903_v15 = vrot.slane %v2781_v37, 1  ;;  %v2905_v13 = vrot.slane %v2782_v56, 1  ;;  %v3008_v2 = vsel %vm977_vm1, %v3005_v59, %v3007_v27  ;;  %v11028_v0 = vld [vmem:[#allocation3 + $0x128] sm:$0xff]  ;;  %v2788_v46 = vld [vmem:[#allocation3 + $0x130] sm:$0x3] }
 0x2f7   : > { %3829 = vmatmul.mubr.bf16.gmra.mrb[188].mxu0 %v10947_v43  ;;  %v3006_v11 = vsel %vm977_vm1, %v3004_v42, %v3005_v59  ;;  %v2902_v6 = vrot.slane %v2780_v29, 1  ;;  %v11013_v45 = vpack.c.bf16 %v2781_v37, %v2780_v29  ;;  %v3010_v25 = vrot.slane %v2778_v33, 2 }
 0x2f8   : > { %3836 = vmatprep.mubr.bf16.mxu0 %v10984_v12  ;;  %v2906_v28 = vsel %vm864_vm0, %v2903_v15, %v2905_v13  ;;  %v11009_v47 = vpack.c.bf16 %v3008_v2, %v3006_v11  ;;  %v3012_v50 = vrot.slane %v2779_v51, 2  ;;  %v3009_v41 = vrot.slane %v2777_v19, 2 }
 0x2f9   : > { %v2904_v5 = vsel %vm864_vm0, %v2902_v6, %v2903_v15  ;;  %v2908_v39 = vrot.slane %v11011_v52, 1  ;;  %v2910_v57 = vrot.slane %v2785_v53, 1  ;;  %v2907_v51 = vrot.slane %v2783_v20, 1  ;;  %v2786_v15 = vld [vmem:[#allocation3 + $0x120] sm:$0xff] }
 0x2fa   : > { %v11016_v62 = vpack.c.bf16 %v2906_v28, %v2904_v5  ;;  %v3011_v49 = vsel %vm977_vm1, %v3009_v41, %v3010_v25  ;;  %v3013_v33 = vsel %vm977_vm1, %v3010_v25, %v3012_v50  ;;  %v11031_v19 = vpack.c.bf16 %v11011_v52, %v2783_v20 }
 0x2fb   : > { %v2909_v23 = vsel %vm864_vm0, %v2907_v51, %v2908_v39  ;;  %v2911_v26 = vsel %vm864_vm0, %v2908_v39, %v2910_v57  ;;  %v11026_v1 = vpack.c.bf16 %v3013_v33, %v3011_v49  ;;  %v3015_v59 = vrot.slane %v2781_v37, 2  ;;  %v2790_v33 = vld [vmem:[#allocation3 + $0x140] sm:$0xff]  ;;  %v2791_v51 = vld [vmem:[#allocation3 + $0x148] sm:$0x3] }
 0x2fc   : > { %v3017_v27 = vrot.slane %v2782_v56, 2  ;;  %v11034_v42 = vpack.c.bf16 %v2911_v26, %v2909_v23  ;;  %v3014_v13 = vrot.slane %v2780_v29, 2  ;;  %v2913_v11 = vrot.slane %v11028_v0, 1 }
 0x2fd   : > { %3990 = vmatmul.mubr.bf16.gmra.mrb[188].mxu1 %v10994_v61  ;;  %v2915_v2 = vrot.slane %v2788_v46, 1  ;;  %v2912_v28 = vrot.slane %v2786_v15, 1  ;;  %v11051_v23 = vpack.c.bf16 %v11028_v0, %v2786_v15  ;;  %v3020_v26 = vrot.slane %v11011_v52, 2 }
 0x2fe   : > { %3997 = vmatprep.mubr.bf16.mxu1 %v10996_v7  ;;  %v3016_v37 = vsel %vm977_vm1, %v3014_v13, %v3015_v59  ;;  %v3018_v56 = vsel %vm977_vm1, %v3015_v59, %v3017_v27  ;;  %v3022_v59 = vrot.slane %v2785_v53, 2  ;;  %v2789_v13 = vld [vmem:[#allocation3 + $0x138] sm:$0xff]  ;;  %v3032_v14 = vrot.slane %v2791_v51, 2 }
 0x2ff   : > { %3837 = vmatmul.mubr.bf16.gmra.mrb[192].mxu0 %v10980_v38  ;;  %v2914_v39 = vsel %vm864_vm0, %v2912_v28, %v2913_v11  ;;  %v2916_v29 = vsel %vm864_vm0, %v2913_v11, %v2915_v2  ;;  %v11048_v49 = vpack.c.bf16 %v3018_v56, %v3016_v37  ;;  %v3019_v11 = vrot.slane %v2783_v20, 2 }
 0x300   : > { %3844 = vmatprep.mubr.bf16.mxu0 %v11000_v48  ;;  %v11055_v27 = vpack.c.bf16 %v2916_v29, %v2914_v39  ;;  %v2918_v2 = vrot.slane %v2790_v33, 1  ;;  %v3023_v37 = vsel %vm977_vm1, %v3020_v26, %v3022_v59  ;;  %v2917_v52 = vrot.slane %v2789_v13, 1 }
 0x301   : > { %v11066_v39 = vpack.c.bf16 %v2790_v33, %v2789_v13  ;;  %v3025_v20 = vrot.slane %v11028_v0, 2  ;;  %v3027_v29 = vrot.slane %v2788_v46, 2 }
 0x302   : > { %v2919_v53 = vsel %vm864_vm0, %v2917_v52, %v2918_v2 }
 0x305   : > { %3998 = vmatmul.mubr.bf16.gmra.mrb[192].mxu1 %v11009_v47 }
 0x306   : > { %4005 = vmatprep.mubr.bf16.mxu1 %v11013_v45 }
 0x307   : > { %3845 = vmatmul.mubr.bf16.gmra.mrb[196].mxu0 %v10996_v7 }
 0x308   : > { %3852 = vmatprep.mubr.bf16.mxu0 %v11016_v62 }
 0x30b   : > { %v7529_v6 = vpop.f32.mrb[160].mxu0 }
 0x30c   : > { %v7530_v5 = vpop.f32.mrb[161].mxu0 }
 0x30d   : > { %4006 = vmatmul.mubr.bf16.gmra.mrb[196].mxu1 %v11026_v1  ;;  %v11042_v25 = vadd.f32 %v7530_v5, %v7529_v6  ;;  %v7532_v50 = vpop.f32.mrb[162].mxu0  ;;  %v2920_v6 = vrot.slane %v2791_v51, 1  ;;  %v3021_v5 = vsel %vm977_vm1, %v3019_v11, %v3020_v26  ;;  %v2792_v11 = vld [vmem:[#allocation3 + $0x150] sm:$0xff]  ;;  %v3024_v26 = vrot.slane %v2786_v15, 2 }
 0x30e   : > { %4013 = vmatprep.mubr.bf16.mxu1 %v11031_v19  ;;  %v7533_v41 = vpop.f32.mrb[163].mxu0  ;;  %v11064_v28 = vpack.c.bf16 %v3023_v37, %v3021_v5  ;;  %v3028_v5 = vsel %vm977_vm1, %v3025_v20, %v3027_v29  ;;  %v2922_v0 = vrot.slane %v2792_v11, 1  ;;  %v3030_v15 = vrot.slane %v2790_v33, 2 }
 0x30f   : > { %3853 = vmatmul.mubr.bf16.gmra.mrb[200].mxu0 %v11013_v45  ;;  %v11046_v57 = vadd.f32 %v7533_v41, %v7532_v50  ;;  %v2921_v56 = vsel %vm864_vm0, %v2918_v2, %v2920_v6  ;;  %v2793_v50 = vld [vmem:[#allocation3 + $0x158] sm:$0xff]  ;;  %v2794_v41 = vld [vmem:[#allocation3 + $0x160] sm:$0x3]  ;;  %v3026_v6 = vsel %vm977_vm1, %v3024_v26, %v3025_v20  ;;  %v2795_v26 = vld [vmem:[#allocation3 + $0x168] sm:$0xff]  ;;  %v3029_v20 = vrot.slane %v2789_v13, 2 }
 0x310   : > { %3860 = vmatprep.mubr.bf16.mxu0 %v11034_v42  ;;  %v11070_v16 = vpack.c.bf16 %v2921_v56, %v2919_v53  ;;  %v2923_v59 = vrot.slane %v2793_v50, 1  ;;  %v2925_v2 = vrot.slane %v2794_v41, 1  ;;  %v11079_v52 = vpack.c.bf16 %v3028_v5, %v3026_v6  ;;  %v2796_v53 = vld [vmem:[#allocation3 + $0x170] sm:$0xff]  ;;  %v2797_v56 = vld [vmem:[#allocation3 + $0x178] sm:$0x3] }
 0x311   : > { %v11081_v36 = vpack.c.bf16 %v2793_v50, %v2792_v11  ;;  %v2928_v29 = vrot.slane %v2796_v53, 1  ;;  %v3033_v6 = vsel %vm977_vm1, %v3030_v15, %v3032_v14  ;;  %v2927_v33 = vrot.slane %v2795_v26, 1 }
 0x312   : > { %v2924_v46 = vsel %vm864_vm0, %v2922_v0, %v2923_v59  ;;  %v2926_v37 = vsel %vm864_vm0, %v2923_v59, %v2925_v2  ;;  %v2930_v59 = vrot.slane %v2797_v56, 1  ;;  %v3031_v2 = vsel %vm977_vm1, %v3029_v20, %v3030_v15 }
 0x313   : > { %v11084_v24 = vpack.c.bf16 %v2926_v37, %v2924_v46  ;;  %v2929_v51 = vsel %vm864_vm0, %v2927_v33, %v2928_v29  ;;  %v11093_v0 = vpack.c.bf16 %v3033_v6, %v3031_v2  ;;  %v11095_v46 = vpack.c.bf16 %v2796_v53, %v2795_v26 }
 0x314   : > { %v2931_v5 = vsel %vm864_vm0, %v2928_v29, %v2930_v59  ;;  %v3035_v37 = vrot.slane %v2793_v50, 2  ;;  %v3037_v21 = vrot.slane %v2794_v41, 2  ;;  %v3034_v14 = vrot.slane %v2792_v11, 2  ;;  %v11105_v29 = vld [vmem:[#allocation3 + $0x188] sm:$0xff]  ;;  %v11109_v50 = vld [vmem:[#allocation3 + $0x180] sm:$0xff] }
 0x315   : > { %4014 = vmatmul.mubr.bf16.gmra.mrb[200].mxu1 %v11048_v49  ;;  %v11098_v13 = vpack.c.bf16 %v2931_v5, %v2929_v51  ;;  %v11113_v41 = vpack.c.bf16 %v11105_v29, %v11109_v50  ;;  %v3040_v2 = vrot.slane %v2796_v53, 2  ;;  %v3042_v6 = vrot.slane %v2797_v56, 2  ;;  %v8888_v5 = vld [vmem:[#allocation9 + $0x208] sm:$0xff]   ;;  %v8889_v53 = vld [vmem:[#allocation9 + $0x210] sm:$0xff]  }
 0x316   : > { %4021 = vmatprep.mubr.bf16.mxu1 %v11051_v23  ;;  %v3036_v15 = vsel %vm977_vm1, %v3034_v14, %v3035_v37  ;;  %v3038_v20 = vsel %vm977_vm1, %v3035_v37, %v3037_v21  ;;  %v3039_v11 = vrot.slane %v2795_v26, 2  ;;  %v8892_v56 = vld [vmem:[#allocation9 + $0x228] sm:$0xff]   ;;  %v2800_v26 = vld [vmem:[#allocation3 + $0x190] sm:$0x3] }
 0x317   : > { %3861 = vmatmul.mubr.bf16.gmra.mrb[204].mxu0 %v11031_v19  ;;  %v11107_v59 = vpack.c.bf16 %v3038_v20, %v3036_v15  ;;  %v3043_v33 = vsel %vm977_vm1, %v3040_v2, %v3042_v6  ;;  %v3082_v6 = vrot.slane %v2800_v26, 1 }
 0x318   : > { %3868 = vmatprep.mubr.bf16.mxu0 %v11055_v27  ;;  %v3041_v21 = vsel %vm977_vm1, %v3039_v11, %v3040_v2  ;;  %v3080_v2 = vrot.slane %v11105_v29, 1  ;;  %v8895_v11 = vld [vmem:[#allocation10 + $0x40] sm:$0xff]  }
 0x319   : > { %v11121_v51 = vpack.c.bf16 %v3043_v33, %v3041_v21  ;;  %v3087_v33 = vrot.slane %v11105_v29, 2  ;;  %7985 = vmatprep.subr.bf16.mxu1 %v8895_v11 }
 0x31a   : > { %v3083_v29 = vsel %vm864_vm0, %v3080_v2, %v3082_v6 }
 0x31d   : > { %4022 = vmatmul.mubr.bf16.gmra.mrb[204].mxu1 %v11064_v28 }
 0x31e   : > { %4029 = vmatprep.mubr.bf16.mxu1 %v11066_v39 }
 0x31f   : > { %3869 = vmatmul.mubr.bf16.gmra.mrb[208].mxu0 %v11051_v23 }
 0x320   : > { %3876 = vmatprep.mubr.bf16.mxu0 %v11070_v16 }
 0x325   : > { %4030 = vmatmul.mubr.bf16.gmra.mrb[208].mxu1 %v11079_v52 }
 0x326   : > { %4037 = vmatprep.mubr.bf16.mxu1 %v11081_v36 }
 0x327   : > { %3877 = vmatmul.mubr.bf16.gmra.mrb[212].mxu0 %v11066_v39 }
 0x328   : > { %3884 = vmatprep.mubr.bf16.mxu0 %v11084_v24 }
 0x32d   : > { %4038 = vmatmul.mubr.bf16.gmra.mrb[212].mxu1 %v11093_v0 }
 0x32e   : > { %4045 = vmatprep.mubr.bf16.mxu1 %v11095_v46 }
 0x32f   : > { %3885 = vmatmul.mubr.bf16.gmra.mrb[216].mxu0 %v11081_v36 }
 0x330   : > { %3892 = vmatprep.mubr.bf16.mxu0 %v11098_v13 }
 0x335   : > { %4046 = vmatmul.mubr.bf16.gmra.mrb[216].mxu1 %v11107_v59 }
 0x336   : > { %4053 = vmatprep.mubr.bf16.mxu1 %v11113_v41 }
 0x337   : > { %3893 = vmatmul.mubr.bf16.gmra.mrb[220].mxu0 %v11095_v46 }
 0x338   : > { %4094 = vmatprep.mubr.bf16.mxu0 %v10780_v44  ;;  %v8890_v44 = vld [vmem:[#allocation9 + $0x218] sm:$0xff]  }
 0x33d   : > { %4054 = vmatmul.mubr.bf16.gmra.mrb[220].mxu1 %v11121_v51 }
 0x33e   : > { %4255 = vmatprep.mubr.bf16.mxu1 %v10754_v3 }
 0x33f   : > { %4095 = vmatmul.mubr.bf16.vlgmr.msra.gmra.mrb[224].mxu0 %v10748_v32  ;;  %v8891_v32 = vld [vmem:[#allocation9 + $0x220] sm:$0xff]  }
 0x340   : > { %4102 = vmatprep.mubr.bf16.mxu0 %v10827_v40  ;;  %8554 = vmatpush3.bf16.msra.mxu0 %v10732_v54  ;;  %v8894_v54 = vld [vmem:[#allocation9 + $0x238] sm:$0xff]  }
 0x341   : > { %8555 = vmatprep.subr.bf16.mxu0 %v8888_v5 }
 0x344   : > { %8556 = vmatpush3.bf16.msra.mxu0 %v8888_v5  ;;  %v3089_v5 = vrot.slane %v2800_v26, 2 }
 0x345   : > { %8557 = vmatprep.subr.bf16.mxu0 %v8889_v53  ;;  %4256 = vmatmul.mubr.bf16.vlgmr.msra.gmra.mrb[224].mxu1 %v10721_v4  ;;  %v8893_v4 = vld [vmem:[#allocation9 + $0x230] sm:$0xff]  }
 0x346   : > { %4263 = vmatprep.mubr.bf16.mxu1 %v10801_v31 }
 0x347   : > { %4103 = vmatmul.mubr.bf16.gmra.mrb[228].mxu0 %v10754_v3 }
 0x348   : > { %4110 = vmatprep.mubr.bf16.mxu0 %v10875_v22  ;;  %8558 = vmatpush3.bf16.msra.mxu0 %v8889_v53 }
 0x349   : > { %8559 = vmatprep.subr.bf16.mxu0 %v8890_v44 }
 0x34c   : > { %8560 = vmatpush3.bf16.msra.mxu0 %v8890_v44 }
 0x34d   : > { %8561 = vmatprep.subr.bf16.mxu0 %v8891_v32  ;;  %4264 = vmatmul.mubr.bf16.gmra.mrb[228].mxu1 %v10784_v35 }
 0x34e   : > { %4271 = vmatprep.mubr.bf16.mxu1 %v10854_v34 }
 0x34f   : > { %4111 = vmatmul.mubr.bf16.gmra.mrb[232].mxu0 %v10801_v31 }
 0x350   : > { %4118 = vmatprep.mubr.bf16.mxu0 %v10918_v55  ;;  %8562 = vmatpush3.bf16.msra.mxu0 %v8891_v32  ;;  %v8896_v32 = vld [vmem:[#allocation10] sm:$0xff]  }
 0x351   : > { %8563 = vmatprep.subr.bf16.mxu0 %v8892_v56  ;;  %7986 = vmatpush3.bf16.msra.mxu1 %v8896_v32 }
 0x354   : > { %8564 = vmatpush3.bf16.msra.mxu0 %v8892_v56 }
 0x355   : > { %8565 = vmatprep.subr.bf16.mxu0 %v8893_v4  ;;  %4272 = vmatmul.mubr.bf16.gmra.mrb[232].mxu1 %v10823_v8 }
 0x356   : > { %4279 = vmatprep.mubr.bf16.mxu1 %v10899_v30 }
 0x357   : > { %4119 = vmatmul.mubr.bf16.gmra.mrb[236].mxu0 %v10854_v34 }
 0x358   : > { %4126 = vmatprep.mubr.bf16.mxu0 %v10951_v60  ;;  %8566 = vmatpush3.bf16.msra.mxu0 %v8893_v4  ;;  %v3086_v4 = vrot.slane %v11109_v50, 2 }
 0x359   : > { %8567 = vmatprep.subr.bf16.mxu0 %v8894_v54 }
 0x35c   : > { %8568 = vmatpush3.bf16.msra.mxu0 %v8894_v54  ;;  %v11194_v54 = vld [vmem:[#allocation3 + $0x1a8] sm:$0x3] }
 0x35d   : > { %4280 = vmatmul.mubr.bf16.gmra.mrb[236].mxu1 %v10867_v63 }
 0x35e   : > { %4287 = vmatprep.mubr.bf16.mxu1 %v10939_v18 }
 0x35f   : > { %4127 = vmatmul.mubr.bf16.gmra.mrb[240].mxu0 %v10899_v30 }
 0x360   : > { %4134 = vmatprep.mubr.bf16.mxu0 %v10977_v9 }
 0x365   : > { %4288 = vmatmul.mubr.bf16.gmra.mrb[240].mxu1 %v10909_v10 }
 0x366   : > { %4295 = vmatprep.mubr.bf16.mxu1 %v10969_v58 }
 0x367   : > { %4135 = vmatmul.mubr.bf16.gmra.mrb[244].mxu0 %v10939_v18 }
 0x368   : > { %4142 = vmatprep.mubr.bf16.mxu0 %v10994_v61 }
 0x36d   : > { %4296 = vmatmul.mubr.bf16.gmra.mrb[244].mxu1 %v10947_v43 }
 0x36e   : > { %4303 = vmatprep.mubr.bf16.mxu1 %v10984_v12 }
 0x36f   : > { %4143 = vmatmul.mubr.bf16.gmra.mrb[248].mxu0 %v10969_v58 }
 0x370   : > { %4150 = vmatprep.mubr.bf16.mxu0 %v11009_v47 }
 0x375   : > { %4304 = vmatmul.mubr.bf16.gmra.mrb[248].mxu1 %v10980_v38 }
 0x376   : > { %4311 = vmatprep.mubr.bf16.mxu1 %v11000_v48 }
 0x377   : > { %4151 = vmatmul.mubr.bf16.gmra.mrb[252].mxu0 %v10984_v12 }
 0x378   : > { %4158 = vmatprep.mubr.bf16.mxu0 %v11026_v1 }
 0x37d   : > { %4312 = vmatmul.mubr.bf16.gmra.mrb[252].mxu1 %v10996_v7 }
 0x37e   : > { %4319 = vmatprep.mubr.bf16.mxu1 %v11016_v62 }
 0x37f   : > { %4159 = vmatmul.mubr.bf16.gmra.mrb[0].mxu0 %v11000_v48 }
 0x380   : > { %4166 = vmatprep.mubr.bf16.mxu0 %v11048_v49 }
 0x385   : > { %4320 = vmatmul.mubr.bf16.gmra.mrb[0].mxu1 %v11013_v45 }
 0x386   : > { %4327 = vmatprep.mubr.bf16.mxu1 %v11034_v42 }
 0x387   : > { %4167 = vmatmul.mubr.bf16.gmra.mrb[4].mxu0 %v11016_v62 }
 0x388   : > { %4174 = vmatprep.mubr.bf16.mxu0 %v11064_v28 }
 0x38d   : > { %4328 = vmatmul.mubr.bf16.gmra.mrb[4].mxu1 %v11031_v19 }
 0x38e   : > { %4335 = vmatprep.mubr.bf16.mxu1 %v11055_v27 }
 0x38f   : > { %4175 = vmatmul.mubr.bf16.gmra.mrb[8].mxu0 %v11034_v42 }
 0x390   : > { %4182 = vmatprep.mubr.bf16.mxu0 %v11079_v52 }
 0x395   : > { %4336 = vmatmul.mubr.bf16.gmra.mrb[8].mxu1 %v11051_v23  ;;  %v7641_v3 = vpop.f32.mrb[160].mxu1 }
 0x396   : > { %4343 = vmatprep.mubr.bf16.mxu1 %v11070_v16  ;;  %v7642_v35 = vpop.f32.mrb[161].mxu1 }
 0x397   : > { %4183 = vmatmul.mubr.bf16.gmra.mrb[12].mxu0 %v11055_v27  ;;  %v7643_v31 = vadd.f32 %v7642_v35, %v7641_v3  ;;  %v7644_v8 = vpop.f32.mrb[162].mxu1 }
 0x398   : > { %4190 = vmatprep.mubr.bf16.mxu0 %v11093_v0  ;;  %v7645_v34 = vpop.f32.mrb[163].mxu1 }
 0x399   : > { %v7535_v63 = vpop.f32.mrb[164].mxu0  ;;  %v7646_v30 = vadd.f32 %v7645_v34, %v7644_v8  ;;  %v11173_v10 = vadd.f32 %v7643_v31, %v11042_v25  ;;  %v3088_v34 = vsel %vm977_vm1, %v3086_v4, %v3087_v33 }
 0x39a   : > { %v7536_v18 = vpop.f32.mrb[165].mxu0 }
 0x39b   : > { %v7537_v43 = vadd.f32 %v7536_v18, %v7535_v63  ;;  %v7538_v58 = vpop.f32.mrb[166].mxu0  ;;  %v11176_v38 = vadd.f32 %v7646_v30, %v11046_v57  ;;  %v3090_v63 = vsel %vm977_vm1, %v3087_v33, %v3089_v5  ;;  %v8898_v33 = vld [vmem:[#allocation10 + $0x8] sm:$0xff]  }
 0x39c   : > { %v7539_v12 = vpop.f32.mrb[167].mxu0 }
 0x39d   : > { %4344 = vmatmul.mubr.bf16.gmra.mrb[12].mxu1 %v11066_v39  ;;  %v7540_v7 = vadd.f32 %v7539_v12, %v7538_v58  ;;  %v3099_v58 = vrot.slane %v11194_v54, 1 }
 0x39e   : > { %4351 = vmatprep.mubr.bf16.mxu1 %v11084_v24 }
 0x39f   : > { %v7647_v48 = vpop.f32.mrb[164].mxu1  ;;  %4191 = vmatmul.mubr.bf16.gmra.mrb[16].mxu0 %v11070_v16 }
 0x3a0   : > { %v7648_v45 = vpop.f32.mrb[165].mxu1  ;;  %4198 = vmatprep.mubr.bf16.mxu0 %v11107_v59 }
 0x3a1   : > { %v7649_v62 = vadd.f32 %v7648_v45, %v7647_v48  ;;  %v7650_v19 = vpop.f32.mrb[166].mxu1 }
 0x3a2   : > { %v7651_v42 = vpop.f32.mrb[167].mxu1  ;;  %v7541_v25 = vpop.f32.mrb[168].mxu0 }
 0x3a3   : > { %v7652_v23 = vadd.f32 %v7651_v42, %v7650_v19  ;;  %v11182_v27 = vadd.f32 %v7649_v62, %v7537_v43  ;;  %v7542_v57 = vpop.f32.mrb[169].mxu0  ;;  %v11202_v43 = vld [vmem:[#allocation2] sm:$0xff]  ;;  %v11211_v62 = vpack.c.bf16 %v3090_v63, %v3088_v34 }
 0x3a4   : > { %v7543_v37 = vadd.f32 %v7542_v57, %v7541_v25  ;;  %v7544_v39 = vpop.f32.mrb[170].mxu0 }
 0x3a5   : > { %v11184_v14 = vadd.f32 %v7652_v23, %v7540_v7  ;;  %v7545_v15 = vpop.f32.mrb[171].mxu0  ;;  %4352 = vmatmul.mubr.bf16.gmra.mrb[16].mxu1 %v11081_v36  ;;  %v3079_v36 = vrot.slane %v11109_v50, 1  ;;  %v11205_v50 = vrot.slane %v11202_v43, 1 }
 0x3a6   : > { %v7546_v16 = vadd.f32 %v7545_v15, %v7544_v39  ;;  %4359 = vmatprep.mubr.bf16.mxu1 %v11098_v13 }
 0x3a7   : > { %v7653_v20 = vpop.f32.mrb[168].mxu1  ;;  %4199 = vmatmul.mubr.bf16.gmra.mrb[20].mxu0 %v11084_v24  ;;  %v3081_v24 = vsel %vm864_vm0, %v3079_v36, %v3080_v2  ;;  %v3100_v42 = vsel %vm864_vm0, %v11205_v50, %v3099_v58  ;;  %v11226_v36 = vpack.c.bf16 %v11202_v43, %v11202_v43 }
 0x3a8   : > { %v7654_v21 = vpop.f32.mrb[169].mxu1  ;;  %4206 = vmatprep.mubr.bf16.mxu0 %v11121_v51  ;;  %v3159_v48 = vpack.c.bf16 %v3083_v29, %v3081_v24 }
 0x3a9   : > { %v7655_v53 = vadd.f32 %v7654_v21, %v7653_v20  ;;  %v7656_v44 = vpop.f32.mrb[170].mxu1  ;;  %v8897_v21 = vld [vmem:[#allocation10 + $0x48] sm:$0xff]  }
 0x3aa   : > { %v7657_v56 = vpop.f32.mrb[171].mxu1  ;;  %v7547_v3 = vpop.f32.mrb[172].mxu0  ;;  %7987 = vmatprep.subr.bf16.mxu1 %v8897_v21 }
 0x3ab   : > { %v7658_v35 = vadd.f32 %v7657_v56, %v7656_v44  ;;  %v11198_v31 = vadd.f32 %v7655_v53, %v7543_v37  ;;  %v7548_v8 = vpop.f32.mrb[173].mxu0  ;;  %7988 = vmatpush3.bf16.msra.mxu1 %v8898_v33 }
 0x3ac   : > { %v7549_v30 = vadd.f32 %v7548_v8, %v7547_v3  ;;  %v7550_v18 = vpop.f32.mrb[174].mxu0 }
 0x3ad   : > { %v11208_v12 = vadd.f32 %v7658_v35, %v7546_v16  ;;  %v7551_v7 = vpop.f32.mrb[175].mxu0  ;;  %4360 = vmatmul.mubr.bf16.gmra.mrb[20].mxu1 %v11095_v46  ;;  %v3162_v46 = vpack.c.bf16 %v3100_v42, %v11205_v50 }
 0x3ae   : > { %v7552_v45 = vadd.f32 %v7551_v7, %v7550_v18  ;;  %4367 = vmatprep.mubr.bf16.mxu1 %v3159_v48 }
 0x3af   : > { %4207 = vmatmul.mubr.bf16.gmra.mrb[24].mxu0 %v11098_v13 }
 0x3b0   : > { %v7659_v19 = vpop.f32.mrb[172].mxu1  ;;  %4214 = vmatprep.mubr.bf16.mxu0 %v11211_v62 }
 0x3b1   : > { %v7660_v25 = vpop.f32.mrb[173].mxu1 }
 0x3b2   : > { %v7661_v23 = vadd.f32 %v7660_v25, %v7659_v19  ;;  %v7662_v57 = vpop.f32.mrb[174].mxu1  ;;  %v7553_v26 = vpop.f32.mrb[176].mxu0 }
 0x3b3   : > { %v7663_v37 = vpop.f32.mrb[175].mxu1  ;;  %v7554_v39 = vpop.f32.mrb[177].mxu0 }
 0x3b4   : > { %v7664_v15 = vadd.f32 %v7663_v37, %v7662_v57  ;;  %v7555_v16 = vadd.f32 %v7554_v39, %v7553_v26  ;;  %v7556_v20 = vpop.f32.mrb[178].mxu0  ;;  %v11218_v2 = vadd.f32 %v7661_v23, %v7549_v30  ;;  %v8899_v37 = vld [vmem:[#allocation10 + $0x50] sm:$0xff]  }
 0x3b5   : > { %v7557_v13 = vpop.f32.mrb[179].mxu0  ;;  %4368 = vmatmul.mubr.bf16.gmra.mrb[24].mxu1 %v11113_v41  ;;  %7989 = vmatprep.subr.bf16.mxu1 %v8899_v37 }
 0x3b6   : > { %v7558_v6 = vadd.f32 %v7557_v13, %v7556_v20  ;;  %v11221_v11 = vadd.f32 %v7664_v15, %v7552_v45  ;;  %4375 = vmatprep.mubr.bf16.mxu1 %v3162_v46 }
 0x3b7   : > { %4215 = vmatmul.mubr.bf16.gmra.mrb[28].mxu0 %v3159_v48 }
 0x3b8   : > { %8569 = vmatprep.mubr.bf16.mxu0 %v10827_v40  ;;  %v7665_v5 = vpop.f32.mrb[176].mxu1 }
 0x3b9   : > { %v7666_v53 = vpop.f32.mrb[177].mxu1 }
 0x3ba   : > { %v7559_v44 = vpop.f32.mrb[180].mxu0  ;;  %v7667_v32 = vadd.f32 %v7666_v53, %v7665_v5  ;;  %v7668_v41 = vpop.f32.mrb[178].mxu1 }
 0x3bb   : > { %v7560_v56 = vpop.f32.mrb[181].mxu0  ;;  %v7669_v4 = vpop.f32.mrb[179].mxu1 }
 0x3bc   : > { %v7561_v3 = vadd.f32 %v7560_v56, %v7559_v44  ;;  %v7562_v35 = vpop.f32.mrb[182].mxu0  ;;  %v7670_v24 = vadd.f32 %v7669_v4, %v7668_v41  ;;  %v11228_v8 = vadd.f32 %v7667_v32, %v7555_v16 }
 0x3bd   : > { %v7563_v29 = vpop.f32.mrb[183].mxu0  ;;  %4376 = vmatmul.mubr.bf16.gmra.mrb[28].mxu1 %v11226_v36 }
 0x3be   : > { %v7564_v40 = vadd.f32 %v7563_v29, %v7562_v35  ;;  %v11232_v34 = vadd.f32 %v7670_v24, %v7558_v6 }
 0x3bf   : > { %8570 = vmatmul.mubr.bf16.vlgmr.msra.gmra.mrb[32].mxu0 %v10875_v22 }
 0x3c0   : > { %8573 = vmatprep.mubr.bf16.mxu0 %v10918_v55  ;;  %v7671_v63 = vpop.f32.mrb[180].mxu1  ;;  %v8900_v55 = vld [vmem:[#allocation10 + $0x10] sm:$0xff]  }
 0x3c1   : > { %v7672_v30 = vpop.f32.mrb[181].mxu1  ;;  %7990 = vmatpush3.bf16.msra.mxu1 %v8900_v55 }
 0x3c2   : > { %v7565_v18 = vpop.f32.mrb[184].mxu0  ;;  %v7673_v58 = vadd.f32 %v7672_v30, %v7671_v63  ;;  %v7674_v7 = vpop.f32.mrb[182].mxu1 }
 0x3c3   : > { %v7566_v48 = vpop.f32.mrb[185].mxu0  ;;  %v7675_v45 = vpop.f32.mrb[183].mxu1 }
 0x3c4   : > { %v7567_v19 = vadd.f32 %v7566_v48, %v7565_v18  ;;  %v7568_v42 = vpop.f32.mrb[186].mxu0  ;;  %v7676_v25 = vadd.f32 %v7675_v45, %v7674_v7  ;;  %v11235_v57 = vadd.f32 %v7673_v58, %v7561_v3  ;;  %v8901_v7 = vld [vmem:[#allocation10 + $0x58] sm:$0xff]  }
 0x3c5   : > { %v7569_v23 = vpop.f32.mrb[187].mxu0  ;;  %7991 = vmatprep.subr.bf16.mxu1 %v8901_v7  ;;  %v3106_v7 = vrot.slane %v11194_v54, 2 }
 0x3c6   : > { %v7570_v26 = vadd.f32 %v7569_v23, %v7568_v42  ;;  %v11238_v22 = vadd.f32 %v7676_v25, %v7564_v40 }
 0x3c7   : > { %8574 = vmatmul.mubr.bf16.gmra.mrb[36].mxu0 %v10951_v60 }
 0x3c8   : > { %8577 = vmatprep.mubr.bf16.mxu0 %v10977_v9  ;;  %v7677_v39 = vpop.f32.mrb[184].mxu1 }
 0x3c9   : > { %v7678_v46 = vpop.f32.mrb[185].mxu1 }
 0x3ca   : > { %v7571_v15 = vpop.f32.mrb[188].mxu0  ;;  %v7679_v16 = vadd.f32 %v7678_v46, %v7677_v39  ;;  %v7680_v20 = vpop.f32.mrb[186].mxu1 }
 0x3cb   : > { %v7572_v13 = vpop.f32.mrb[189].mxu0  ;;  %v7681_v6 = vpop.f32.mrb[187].mxu1 }
 0x3cc   : > { %v7573_v21 = vadd.f32 %v7572_v13, %v7571_v15  ;;  %v7574_v33 = vpop.f32.mrb[190].mxu0  ;;  %v7682_v5 = vadd.f32 %v7681_v6, %v7680_v20  ;;  %v11241_v44 = vadd.f32 %v7679_v16, %v7567_v19 }
 0x3cd   : > { %v7575_v53 = vpop.f32.mrb[191].mxu0 }
 0x3ce   : > { %v7576_v60 = vadd.f32 %v7575_v53, %v7574_v33  ;;  %v11244_v9 = vadd.f32 %v7682_v5, %v7570_v26 }
 0x3cf   : > { %8578 = vmatmul.mubr.bf16.gmra.mrb[40].mxu0 %v10994_v61 }
 0x3d0   : > { %8581 = vmatprep.mubr.bf16.mxu0 %v11009_v47  ;;  %v7683_v32 = vpop.f32.mrb[188].mxu1  ;;  %v8902_v47 = vld [vmem:[#allocation10 + $0x18] sm:$0xff]  }
 0x3d1   : > { %v7684_v41 = vpop.f32.mrb[189].mxu1  ;;  %7992 = vmatpush3.bf16.msra.mxu1 %v8902_v47 }
 0x3d2   : > { %v7577_v56 = vpop.f32.mrb[192].mxu0  ;;  %v7685_v4 = vadd.f32 %v7684_v41, %v7683_v32  ;;  %v7686_v3 = vpop.f32.mrb[190].mxu1 }
 0x3d3   : > { %v7578_v35 = vpop.f32.mrb[193].mxu0  ;;  %v7687_v24 = vpop.f32.mrb[191].mxu1 }
 0x3d4   : > { %v7579_v29 = vadd.f32 %v7578_v35, %v7577_v56  ;;  %v7580_v40 = vpop.f32.mrb[194].mxu0  ;;  %v7688_v63 = vadd.f32 %v7687_v24, %v7686_v3  ;;  %v11247_v18 = vadd.f32 %v7685_v4, %v7573_v21  ;;  %v8903_v3 = vld [vmem:[#allocation10 + $0x60] sm:$0xff]  }
 0x3d5   : > { %v7581_v30 = vpop.f32.mrb[195].mxu0  ;;  %7993 = vmatprep.subr.bf16.mxu1 %v8903_v3 }
 0x3d6   : > { %v7582_v58 = vadd.f32 %v7581_v30, %v7580_v40  ;;  %v11250_v61 = vadd.f32 %v7688_v63, %v7576_v60 }
 0x3d7   : > { %8582 = vmatmul.mubr.bf16.gmra.mrb[44].mxu0 %v11026_v1 }
 0x3d8   : > { %8585 = vmatprep.mubr.bf16.mxu0 %v11048_v49  ;;  %v7689_v48 = vpop.f32.mrb[192].mxu1 }
 0x3d9   : > { %v7690_v45 = vpop.f32.mrb[193].mxu1 }
 0x3da   : > { %v7583_v19 = vpop.f32.mrb[196].mxu0  ;;  %v7691_v42 = vadd.f32 %v7690_v45, %v7689_v48  ;;  %v7692_v25 = vpop.f32.mrb[194].mxu1 }
 0x3db   : > { %v7584_v23 = vpop.f32.mrb[197].mxu0  ;;  %v7693_v26 = vpop.f32.mrb[195].mxu1 }
 0x3dc   : > { %v7585_v37 = vadd.f32 %v7584_v23, %v7583_v19  ;;  %v7586_v55 = vpop.f32.mrb[198].mxu0  ;;  %v11253_v39 = vadd.f32 %v7691_v42, %v7579_v29  ;;  %v7694_v46 = vadd.f32 %v7693_v26, %v7692_v25 }
 0x3dd   : > { %v7587_v1 = vpop.f32.mrb[199].mxu0 }
 0x3de   : > { %v7588_v15 = vadd.f32 %v7587_v1, %v7586_v55  ;;  %v11255_v16 = vadd.f32 %v7694_v46, %v7582_v58  ;;  %v3103_v58 = vrot.slane %v11202_v43, 2 }
 0x3df   : > { %8586 = vmatmul.mubr.bf16.gmra.mrb[48].mxu0 %v11064_v28  ;;  %v8904_v28 = vld [vmem:[#allocation10 + $0x20] sm:$0xff]  }
 0x3e0   : > { %8589 = vmatprep.mubr.bf16.mxu0 %v11079_v52  ;;  %v7695_v49 = vpop.f32.mrb[196].mxu1  ;;  %7994 = vmatpush3.bf16.msra.mxu1 %v8904_v28  ;;  %v3107_v23 = vsel %vm977_vm1, %v3103_v58, %v3106_v7 }
 0x3e1   : > { %v7696_v20 = vpop.f32.mrb[197].mxu1  ;;  %v3163_v54 = vpack.c.bf16 %v3107_v23, %v3103_v58 }
 0x3e2   : > { %v7589_v13 = vpop.f32.mrb[200].mxu0  ;;  %v7697_v6 = vadd.f32 %v7696_v20, %v7695_v49  ;;  %v7698_v21 = vpop.f32.mrb[198].mxu1 }
 0x3e3   : > { %v7590_v33 = vpop.f32.mrb[201].mxu0  ;;  %v7699_v5 = vpop.f32.mrb[199].mxu1 }
 0x3e4   : > { %v7591_v53 = vadd.f32 %v7590_v33, %v7589_v13  ;;  %v7592_v60 = vpop.f32.mrb[202].mxu0  ;;  %v11259_v32 = vadd.f32 %v7697_v6, %v7585_v37  ;;  %v7700_v41 = vadd.f32 %v7699_v5, %v7698_v21 }
 0x3e5   : > { %v7593_v56 = vpop.f32.mrb[203].mxu0 }
 0x3e6   : > { %v7594_v4 = vadd.f32 %v7593_v56, %v7592_v60  ;;  %v11261_v35 = vadd.f32 %v7700_v41, %v7588_v15 }
 0x3e7   : > { %8590 = vmatmul.mubr.bf16.gmra.mrb[52].mxu0 %v11093_v0 }
 0x3e8   : > { %8593 = vmatprep.mubr.bf16.mxu0 %v11107_v59  ;;  %v7701_v52 = vpop.f32.mrb[200].mxu1 }
 0x3e9   : > { %v7702_v24 = vpop.f32.mrb[201].mxu1 }
 0x3ea   : > { %v7595_v29 = vpop.f32.mrb[204].mxu0  ;;  %v7703_v40 = vadd.f32 %v7702_v24, %v7701_v52  ;;  %v7704_v63 = vpop.f32.mrb[202].mxu1 }
 0x3eb   : > { %v7596_v30 = vpop.f32.mrb[205].mxu0  ;;  %v7705_v47 = vpop.f32.mrb[203].mxu1 }
 0x3ec   : > { %v7597_v48 = vadd.f32 %v7596_v30, %v7595_v29  ;;  %v7598_v45 = vpop.f32.mrb[206].mxu0  ;;  %v11267_v19 = vadd.f32 %v7703_v40, %v7591_v53  ;;  %v7706_v0 = vadd.f32 %v7705_v47, %v7704_v63 }
 0x3ed   : > { %v7599_v59 = vpop.f32.mrb[207].mxu0 }
 0x3ee   : > { %v7600_v42 = vadd.f32 %v7599_v59, %v7598_v45  ;;  %v11269_v25 = vadd.f32 %v7706_v0, %v7594_v4 }
 0x3ef   : > { %8594 = vmatmul.mubr.bf16.gmra.mrb[56].mxu0 %v11121_v51  ;;  %v8905_v51 = vld [vmem:[#allocation10 + $0x68] sm:$0xff]  }
 0x3f0   : > { %8597 = vmatprep.mubr.bf16.mxu0 %v11211_v62  ;;  %v7707_v26 = vpop.f32.mrb[204].mxu1  ;;  %7995 = vmatprep.subr.bf16.mxu1 %v8905_v51  ;;  %v8906_v62 = vld [vmem:[#allocation10 + $0x28] sm:$0xff]  }
 0x3f1   : > { %v7708_v43 = vpop.f32.mrb[205].mxu1  ;;  %7996 = vmatpush3.bf16.msra.mxu1 %v8906_v62  ;;  %v8909_v62 = vld [vmem:[#allocation10 + $0xc0] sm:$0xff]  }
 0x3f2   : > { %v7601_v37 = vpop.f32.mrb[208].mxu0  ;;  %v7709_v55 = vadd.f32 %v7708_v43, %v7707_v26  ;;  %v7710_v46 = vpop.f32.mrb[206].mxu1  ;;  %8097 = vmatprep.subr.bf16.mxu0 %v8909_v62 }
 0x3f3   : > { %v7602_v1 = vpop.f32.mrb[209].mxu0  ;;  %v7711_v15 = vpop.f32.mrb[207].mxu1 }
 0x3f4   : > { %v7603_v49 = vadd.f32 %v7602_v1, %v7601_v37  ;;  %v7604_v20 = vpop.f32.mrb[210].mxu0  ;;  %v11274_v13 = vadd.f32 %v7709_v55, %v7597_v48  ;;  %v7712_v6 = vadd.f32 %v7711_v15, %v7710_v46  ;;  %v8907_v46 = vld [vmem:[#allocation10 + $0x70] sm:$0xff]  }
 0x3f5   : > { %v7605_v21 = vpop.f32.mrb[211].mxu0  ;;  %7997 = vmatprep.subr.bf16.mxu1 %v8907_v46  ;;  %v8908_v15 = vld [vmem:[#allocation10 + $0x30] sm:$0xff]  }
 0x3f6   : > { %v7606_v33 = vadd.f32 %v7605_v21, %v7604_v20  ;;  %v11276_v5 = vadd.f32 %v7712_v6, %v7600_v42  ;;  %7998 = vmatpush3.bf16.msra.mxu1 %v8908_v15 }
 0x3f7   : > { %8598 = vmatmul.mubr.bf16.gmra.mrb[60].mxu0 %v3163_v54 }
 0x3f8   : > { %v7713_v53 = vpop.f32.mrb[208].mxu1 }
 0x3f9   : > { %v7714_v60 = vpop.f32.mrb[209].mxu1 }
 0x3fa   : > { %v7607_v41 = vpop.f32.mrb[212].mxu0  ;;  %v7715_v56 = vadd.f32 %v7714_v60, %v7713_v53  ;;  %v7716_v4 = vpop.f32.mrb[210].mxu1 }
 0x3fb   : > { %v7608_v3 = vpop.f32.mrb[213].mxu0  ;;  %v7717_v28 = vpop.f32.mrb[211].mxu1 }
 0x3fc   : > { %v7609_v52 = vadd.f32 %v7608_v3, %v7607_v41  ;;  %v7610_v24 = vpop.f32.mrb[214].mxu0  ;;  %v11278_v29 = vadd.f32 %v7715_v56, %v7603_v49  ;;  %v7718_v40 = vadd.f32 %v7717_v28, %v7716_v4  ;;  %v8910_v28 = vld [vmem:[#allocation10 + $0x80] sm:$0xff]  }
 0x3fd   : > { %v7611_v63 = vpop.f32.mrb[215].mxu0  ;;  %8098 = vmatpush3.bf16.msra.mxu0 %v8910_v28 }
 0x3fe   : > { %v7612_v30 = vadd.f32 %v7611_v63, %v7610_v24  ;;  %v11280_v58 = vadd.f32 %v7718_v40, %v7606_v33  ;;  %v8911_v40 = vld [vmem:[#allocation10 + $0xc8] sm:$0xff]  }
 0x3ff   : > { %v8912_v63 = vld [vmem:[#allocation10 + $0x88] sm:$0xff]   ;;  %8099 = vmatprep.subr.bf16.mxu0 %v8911_v40 }
 0x400   : > { %v7719_v7 = vpop.f32.mrb[212].mxu1 }
 0x401   : > { %v7720_v47 = vpop.f32.mrb[213].mxu1  ;;  %8100 = vmatpush3.bf16.msra.mxu0 %v8912_v63 }
 0x402   : > { %v7613_v48 = vpop.f32.mrb[216].mxu0  ;;  %v7721_v45 = vadd.f32 %v7720_v47, %v7719_v7  ;;  %v7722_v0 = vpop.f32.mrb[214].mxu1 }
 0x403   : > { %v7614_v59 = vpop.f32.mrb[217].mxu0  ;;  %v7723_v42 = vpop.f32.mrb[215].mxu1 }
 0x404   : > { %v7615_v23 = vadd.f32 %v7614_v59, %v7613_v48  ;;  %v7616_v26 = vpop.f32.mrb[218].mxu0  ;;  %v11282_v43 = vadd.f32 %v7721_v45, %v7609_v52  ;;  %v7724_v37 = vadd.f32 %v7723_v42, %v7722_v0  ;;  %v8913_v59 = vld [vmem:[#allocation10 + $0xd0] sm:$0xff]  }
 0x405   : > { %v7617_v54 = vpop.f32.mrb[219].mxu0  ;;  %8101 = vmatprep.subr.bf16.mxu0 %v8913_v59 }
 0x406   : > { %v7618_v55 = vadd.f32 %v7617_v54, %v7616_v26  ;;  %v11284_v1 = vadd.f32 %v7724_v37, %v7612_v30 }
 0x408   : > { %v7725_v49 = vpop.f32.mrb[216].mxu1 }
 0x409   : > { %v7726_v20 = vpop.f32.mrb[217].mxu1 }
 0x40a   : > { %v7619_v6 = vpop.f32.mrb[220].mxu0  ;;  %v7727_v21 = vadd.f32 %v7726_v20, %v7725_v49  ;;  %v7728_v33 = vpop.f32.mrb[218].mxu1 }
 0x40b   : > { %v7620_v51 = vpop.f32.mrb[221].mxu0  ;;  %v7729_v53 = vpop.f32.mrb[219].mxu1 }
 0x40c   : > { %v7621_v60 = vadd.f32 %v7620_v51, %v7619_v6  ;;  %v7622_v41 = vpop.f32.mrb[222].mxu0  ;;  %v11286_v56 = vadd.f32 %v7727_v21, %v7615_v23  ;;  %v7730_v4 = vadd.f32 %v7729_v53, %v7728_v33 }
 0x40d   : > { %v7623_v3 = vpop.f32.mrb[223].mxu0 }
 0x40e   : > { %v7624_v52 = vadd.f32 %v7623_v3, %v7622_v41  ;;  %v11288_v24 = vadd.f32 %v7730_v4, %v7618_v55  ;;  %v8914_v41 = vld [vmem:[#allocation10 + $0x90] sm:$0xff]  }
 0x40f   : > { %8102 = vmatpush3.bf16.msra.mxu0 %v8914_v41  ;;  %v11305_v41 = vld [vmem:[#allocation3 + $0x10] sm:$0x3] }
 0x410   : > { %v7731_v30 = vpop.f32.mrb[220].mxu1 }
 0x411   : > { %v7732_v7 = vpop.f32.mrb[221].mxu1 }
 0x412   : > { %v7753_v47 = vpop.f32.mrb[224].mxu0  ;;  %v7733_v48 = vadd.f32 %v7732_v7, %v7731_v30  ;;  %v7734_v45 = vpop.f32.mrb[222].mxu1  ;;  %v8917_v7 = vld [vmem:[#allocation10 + $0xd8] sm:$0xff]  }
 0x413   : > { %v7754_v0 = vpop.f32.mrb[225].mxu0  ;;  %v7735_v42 = vpop.f32.mrb[223].mxu1  ;;  %8103 = vmatprep.subr.bf16.mxu0 %v8917_v7 }
 0x414   : > { %v7755_v23 = vadd.f32 %v7754_v0, %v7753_v47  ;;  %v7756_v26 = vpop.f32.mrb[226].mxu0  ;;  %v11290_v37 = vadd.f32 %v7733_v48, %v7621_v60  ;;  %v7736_v54 = vadd.f32 %v7735_v42, %v7734_v45  ;;  %v8918_v47 = vld [vmem:[#allocation10 + $0x98] sm:$0xff]   ;;  %v8919_v45 = vld [vmem:[#allocation10 + $0xe0] sm:$0xff]  }
 0x415   : > { %v7757_v55 = vpop.f32.mrb[227].mxu0  ;;  %8104 = vmatpush3.bf16.msra.mxu0 %v8918_v47 }
 0x416   : > { %v4097_v46 = vadd.f32 %v7755_v23, %v11173_v10  ;;  %v7758_v15 = vadd.f32 %v7757_v55, %v7756_v26  ;;  %v11293_v49 = vadd.f32 %v7736_v54, %v7624_v52  ;;  %v8915_v10 = vld [vmem:[#allocation10 + $0x78] sm:$0xff]   ;;  %8105 = vmatprep.subr.bf16.mxu0 %v8919_v45  ;;  %v8920_v55 = vld [vmem:[#allocation10 + $0xa0] sm:$0xff]   ;;  %v8924_v45 = vld [vmem:[#allocation10 + $0xb0] sm:$0xff]  }
 0x417   : > { %7999 = vmatprep.subr.bf16.mxu1 %v8915_v10 }
 0x418   : > { %v4100_v20 = vadd.f32 %v7758_v15, %v11176_v38  ;;  %v7865_v6 = vpop.f32.mrb[224].mxu1  ;;  %v8916_v38 = vld [vmem:[#allocation10 + $0x38] sm:$0xff]  }
 0x419   : > { %v7866_v21 = vpop.f32.mrb[225].mxu1  ;;  %8000 = vmatpush3.bf16.msra.mxu1 %v8916_v38  ;;  %8106 = vmatpush3.bf16.msra.mxu0 %v8920_v55  ;;  %v8926_v55 = vld [vmem:[#allocation10 + $0xf8] sm:$0xff]  }
 0x41a   : > { %v7759_v33 = vpop.f32.mrb[228].mxu0  ;;  %v7867_v51 = vadd.f32 %v7866_v21, %v7865_v6  ;;  %v7868_v62 = vpop.f32.mrb[226].mxu1 }
 0x41b   : > { %v7760_v53 = vpop.f32.mrb[229].mxu0  ;;  %v7869_v4 = vpop.f32.mrb[227].mxu1 }
 0x41c   : > { %v7761_v60 = vadd.f32 %v7760_v53, %v7759_v33  ;;  %v7762_v3 = vpop.f32.mrb[230].mxu0  ;;  %v7870_v28 = vadd.f32 %v7869_v4, %v7868_v62  ;;  %v11296_v63 = vadd.f32 %v7867_v51, %v4097_v46  ;;  %v8921_v62 = vld [vmem:[#allocation10 + $0xe8] sm:$0xff]  }
 0x41d   : > { %v7763_v40 = vpop.f32.mrb[231].mxu0  ;;  %v8922_v53 = vld [vmem:[#allocation10 + $0xa8] sm:$0xff]   ;;  %8107 = vmatprep.subr.bf16.mxu0 %v8921_v62 }
 0x41e   : > { %v4105_v52 = vadd.f32 %v7761_v60, %v11182_v27  ;;  %v7764_v30 = vadd.f32 %v7763_v40, %v7762_v3  ;;  %v11299_v48 = vadd.f32 %v7870_v28, %v4100_v20  ;;  %v4786_v60 = vrot.slane %v11305_v41, 1  ;;  %v8923_v3 = vld [vmem:[#allocation10 + $0xf0] sm:$0xff]   ;;  %8108 = vmatpush3.bf16.msra.mxu0 %v8922_v53 }
 0x41f   : > { %8109 = vmatprep.subr.bf16.mxu0 %v8923_v3 }
 0x420   : > { %v4108_v0 = vadd.f32 %v7764_v30, %v11184_v14  ;;  %v7871_v59 = vpop.f32.mrb[228].mxu1  ;;  %v4787_v10 = vsel %vm864_vm0, %v11205_v50, %v4786_v60 }
 0x421   : > { %v7872_v42 = vpop.f32.mrb[229].mxu1  ;;  %v5042_v30 = vpack.c.bf16 %v4787_v10, %v11205_v50 }
 0x422   : > { %v7765_v23 = vpop.f32.mrb[232].mxu0  ;;  %v7873_v26 = vadd.f32 %v7872_v42, %v7871_v59  ;;  %v7874_v54 = vpop.f32.mrb[230].mxu1  ;;  %8110 = vmatpush3.bf16.msra.mxu0 %v8924_v45 }
 0x423   : > { %v7766_v27 = vpop.f32.mrb[233].mxu0  ;;  %v7875_v46 = vpop.f32.mrb[231].mxu1  ;;  %5703 = vmatprep.mubr.bf16.mxu1 %v5042_v30  ;;  %8111 = vmatprep.subr.bf16.mxu0 %v8926_v55  ;;  %v8929_v55 = vld [vmem:[#allocation10 + $0x148] sm:$0xff]  }
 0x424   : > { %v7767_v15 = vadd.f32 %v7766_v27, %v7765_v23  ;;  %v7768_v6 = vpop.f32.mrb[234].mxu0  ;;  %v7876_v21 = vadd.f32 %v7875_v46, %v7874_v54  ;;  %v11302_v33 = vadd.f32 %v7873_v26, %v4105_v52  ;;  %5704 = vmatmul.mubr.bf16.vlgmr.msra.gmra.mrb[32].mxu1 %v11226_v36  ;;  %v8925_v54 = vld [vmem:[#allocation10 + $0x140] sm:$0xff]  }
 0x425   : > { %v7769_v20 = vpop.f32.mrb[235].mxu0  ;;  %v8927_v46 = vld [vmem:[#allocation10 + $0x100] sm:$0xff]   ;;  %8209 = vmatprep.subr.bf16.mxu1 %v8925_v54 }
 0x426   : > { %v4113_v14 = vadd.f32 %v7767_v15, %v11198_v31  ;;  %v7770_v51 = vadd.f32 %v7769_v20, %v7768_v6  ;;  %v11307_v4 = vadd.f32 %v7876_v21, %v4108_v0  ;;  %v8928_v15 = vld [vmem:[#allocation10 + $0xb8] sm:$0xff]   ;;  %8210 = vmatpush3.bf16.msra.mxu1 %v8927_v46 }
 0x427   : > { %8112 = vmatpush3.bf16.msra.mxu0 %v8928_v15  ;;  %v8930_v15 = vld [vmem:[#allocation10 + $0x108] sm:$0xff]   ;;  %8211 = vmatprep.subr.bf16.mxu1 %v8929_v55 }
 0x428   : > { %v4116_v28 = vadd.f32 %v7770_v51, %v11208_v12  ;;  %v7877_v40 = vpop.f32.mrb[232].mxu1 }
 0x429   : > { %v7878_v52 = vpop.f32.mrb[233].mxu1 }
 0x42a   : > { %v7771_v31 = vpop.f32.mrb[236].mxu0  ;;  %v7879_v38 = vadd.f32 %v7878_v52, %v7877_v40  ;;  %v7880_v7 = vpop.f32.mrb[234].mxu1  ;;  %8212 = vmatpush3.bf16.msra.mxu1 %v8930_v15  ;;  %v8932_v15 = vld [vmem:[#allocation10 + $0x110] sm:$0xff]  }
 0x42b   : > { %v7772_v47 = vpop.f32.mrb[237].mxu0  ;;  %v7881_v0 = vpop.f32.mrb[235].mxu1 }
 0x42c   : > { %v7773_v59 = vadd.f32 %v7772_v47, %v7771_v31  ;;  %v7774_v42 = vpop.f32.mrb[238].mxu0  ;;  %v7882_v12 = vadd.f32 %v7881_v0, %v7880_v7  ;;  %v11314_v26 = vadd.f32 %v7879_v38, %v4113_v14 }
 0x42d   : > { %v7775_v23 = vpop.f32.mrb[239].mxu0 }
 0x42e   : > { %v4121_v27 = vadd.f32 %v7773_v59, %v11218_v2  ;;  %v7776_v50 = vadd.f32 %v7775_v23, %v7774_v42  ;;  %v11318_v6 = vadd.f32 %v7882_v12, %v4116_v28 }
 0x430   : > { %v4124_v21 = vadd.f32 %v7776_v50, %v11221_v11  ;;  %v7883_v20 = vpop.f32.mrb[236].mxu1 }
 0x431   : > { %v7884_v14 = vpop.f32.mrb[237].mxu1 }
 0x432   : > { %v7777_v51 = vpop.f32.mrb[240].mxu0  ;;  %v7885_v36 = vadd.f32 %v7884_v14, %v7883_v20  ;;  %v7886_v62 = vpop.f32.mrb[238].mxu1 }
 0x433   : > { %v7778_v53 = vpop.f32.mrb[241].mxu0  ;;  %v7887_v60 = vpop.f32.mrb[239].mxu1 }
 0x434   : > { %v7779_v2 = vadd.f32 %v7778_v53, %v7777_v51  ;;  %v7780_v3 = vpop.f32.mrb[242].mxu0  ;;  %v7888_v40 = vadd.f32 %v7887_v60, %v7886_v62  ;;  %v11321_v52 = vadd.f32 %v7885_v36, %v4121_v27 }
 0x435   : > { %v7781_v10 = vpop.f32.mrb[243].mxu0 }
 0x436   : > { %v4129_v28 = vadd.f32 %v7779_v2, %v11228_v8  ;;  %v7782_v31 = vadd.f32 %v7781_v10, %v7780_v3  ;;  %v11324_v11 = vadd.f32 %v7888_v40, %v4124_v21 }
 0x438   : > { %v4132_v30 = vadd.f32 %v7782_v31, %v11232_v34  ;;  %v7889_v38 = vpop.f32.mrb[240].mxu1 }
 0x439   : > { %v7890_v7 = vpop.f32.mrb[241].mxu1 }
 0x43a   : > { %v7783_v47 = vpop.f32.mrb[244].mxu0  ;;  %v7891_v45 = vadd.f32 %v7890_v7, %v7889_v38  ;;  %v7892_v0 = vpop.f32.mrb[242].mxu1 }
 0x43b   : > { %v7784_v59 = vpop.f32.mrb[245].mxu0  ;;  %v7893_v42 = vpop.f32.mrb[243].mxu1 }
 0x43c   : > { %v7785_v12 = vadd.f32 %v7784_v59, %v7783_v47  ;;  %v7786_v23 = vpop.f32.mrb[246].mxu0  ;;  %v7894_v54 = vadd.f32 %v7893_v42, %v7892_v0  ;;  %v11327_v27 = vadd.f32 %v7891_v45, %v4129_v28 }
 0x43d   : > { %v7787_v50 = vpop.f32.mrb[247].mxu0 }
 0x43e   : > { %v4137_v8 = vadd.f32 %v7785_v12, %v11235_v57  ;;  %v7788_v46 = vadd.f32 %v7787_v50, %v7786_v23  ;;  %v11330_v21 = vadd.f32 %v7894_v54, %v4132_v30 }
 0x440   : > { %v4140_v34 = vadd.f32 %v7788_v46, %v11238_v22  ;;  %v7895_v20 = vpop.f32.mrb[244].mxu1 }
 0x441   : > { %v7896_v14 = vpop.f32.mrb[245].mxu1 }
 0x442   : > { %v7789_v51 = vpop.f32.mrb[248].mxu0  ;;  %v7897_v36 = vadd.f32 %v7896_v14, %v7895_v20  ;;  %v7898_v62 = vpop.f32.mrb[246].mxu1 }
 0x443   : > { %v7790_v53 = vpop.f32.mrb[249].mxu0  ;;  %v7899_v60 = vpop.f32.mrb[247].mxu1 }
 0x444   : > { %v7791_v2 = vadd.f32 %v7790_v53, %v7789_v51  ;;  %v7792_v3 = vpop.f32.mrb[250].mxu0  ;;  %v7900_v40 = vadd.f32 %v7899_v60, %v7898_v62  ;;  %v11333_v57 = vadd.f32 %v7897_v36, %v4137_v8  ;;  %v8931_v8 = vld [vmem:[#allocation10 + $0x150] sm:$0xff]  }
 0x445   : > { %v7793_v10 = vpop.f32.mrb[251].mxu0  ;;  %8213 = vmatprep.subr.bf16.mxu1 %v8931_v8 }
 0x446   : > { %v4145_v28 = vadd.f32 %v7791_v2, %v11241_v44  ;;  %v7794_v31 = vadd.f32 %v7793_v10, %v7792_v3  ;;  %v11336_v30 = vadd.f32 %v7900_v40, %v4140_v34  ;;  %8214 = vmatpush3.bf16.msra.mxu1 %v8932_v15 }
 0x448   : > { %v4148_v22 = vadd.f32 %v7794_v31, %v11244_v9  ;;  %v7901_v38 = vpop.f32.mrb[248].mxu1 }
 0x449   : > { %v7902_v7 = vpop.f32.mrb[249].mxu1 }
 0x44a   : > { %v7795_v47 = vpop.f32.mrb[252].mxu0  ;;  %v7903_v45 = vadd.f32 %v7902_v7, %v7901_v38  ;;  %v7904_v0 = vpop.f32.mrb[250].mxu1  ;;  %v8934_v7 = vld [vmem:[#allocation10 + $0x118] sm:$0xff]  }
 0x44b   : > { %v7796_v59 = vpop.f32.mrb[253].mxu0  ;;  %v7905_v42 = vpop.f32.mrb[251].mxu1 }
 0x44c   : > { %v7797_v12 = vadd.f32 %v7796_v59, %v7795_v47  ;;  %v7798_v23 = vpop.f32.mrb[254].mxu0  ;;  %v7906_v54 = vadd.f32 %v7905_v42, %v7904_v0  ;;  %v11339_v55 = vadd.f32 %v7903_v45, %v4145_v28 }
 0x44d   : > { %v7799_v50 = vpop.f32.mrb[255].mxu0 }
 0x44e   : > { %v4153_v44 = vadd.f32 %v7797_v12, %v11247_v18  ;;  %v7800_v46 = vadd.f32 %v7799_v50, %v7798_v23  ;;  %v11342_v34 = vadd.f32 %v7906_v54, %v4148_v22 }
 0x450   : > { %v4156_v9 = vadd.f32 %v7800_v46, %v11250_v61  ;;  %v7907_v20 = vpop.f32.mrb[252].mxu1  ;;  %v8933_v61 = vld [vmem:[#allocation10 + $0x158] sm:$0xff]  }
 0x451   : > { %v7908_v14 = vpop.f32.mrb[253].mxu1  ;;  %8215 = vmatprep.subr.bf16.mxu1 %v8933_v61 }
 0x452   : > { %v7801_v51 = vpop.f32.mrb[0].mxu0  ;;  %v7909_v36 = vadd.f32 %v7908_v14, %v7907_v20  ;;  %v7910_v62 = vpop.f32.mrb[254].mxu1  ;;  %8216 = vmatpush3.bf16.msra.mxu1 %v8934_v7  ;;  %v8935_v20 = vld [vmem:[#allocation10 + $0x1c0] sm:$0xff]  }
 0x453   : > { %v7802_v53 = vpop.f32.mrb[1].mxu0  ;;  %v7911_v60 = vpop.f32.mrb[255].mxu1  ;;  %8321 = vmatprep.subr.bf16.mxu0 %v8935_v20 }
 0x454   : > { %v7803_v2 = vadd.f32 %v7802_v53, %v7801_v51  ;;  %v7804_v3 = vpop.f32.mrb[2].mxu0  ;;  %v7912_v40 = vadd.f32 %v7911_v60, %v7910_v62  ;;  %v11345_v18 = vadd.f32 %v7909_v36, %v4153_v44 }
 0x455   : > { %v7805_v10 = vpop.f32.mrb[3].mxu0 }
 0x456   : > { %v4161_v28 = vadd.f32 %v7803_v2, %v11253_v39  ;;  %v7806_v31 = vadd.f32 %v7805_v10, %v7804_v3  ;;  %v11348_v22 = vadd.f32 %v7912_v40, %v4156_v9 }
 0x458   : > { %v4164_v38 = vadd.f32 %v7806_v31, %v11255_v16  ;;  %v7913_v47 = vpop.f32.mrb[0].mxu1 }
 0x459   : > { %v7914_v45 = vpop.f32.mrb[1].mxu1 }
 0x45a   : > { %v7807_v0 = vpop.f32.mrb[4].mxu0  ;;  %v7915_v59 = vadd.f32 %v7914_v45, %v7913_v47  ;;  %v7916_v42 = vpop.f32.mrb[2].mxu1  ;;  %v8938_v47 = vld [vmem:[#allocation10 + $0x120] sm:$0xff]  }
 0x45b   : > { %v7808_v12 = vpop.f32.mrb[5].mxu0  ;;  %v7917_v23 = vpop.f32.mrb[3].mxu1 }
 0x45c   : > { %v7809_v54 = vadd.f32 %v7808_v12, %v7807_v0  ;;  %v7810_v50 = vpop.f32.mrb[6].mxu0  ;;  %v7918_v8 = vadd.f32 %v7917_v23, %v7916_v42  ;;  %v11351_v44 = vadd.f32 %v7915_v59, %v4161_v28 }
 0x45d   : > { %v7811_v39 = vpop.f32.mrb[7].mxu0 }
 0x45e   : > { %v4169_v46 = vadd.f32 %v7809_v54, %v11259_v32  ;;  %v7812_v15 = vadd.f32 %v7811_v39, %v7810_v50  ;;  %v11354_v16 = vadd.f32 %v7918_v8, %v4164_v38 }
 0x460   : > { %v4172_v9 = vadd.f32 %v7812_v15, %v11261_v35  ;;  %v7919_v14 = vpop.f32.mrb[4].mxu1  ;;  %v8937_v35 = vld [vmem:[#allocation10 + $0x160] sm:$0xff]  }
 0x461   : > { %v7920_v51 = vpop.f32.mrb[5].mxu1  ;;  %8217 = vmatprep.subr.bf16.mxu1 %v8937_v35 }
 0x462   : > { %v7813_v36 = vpop.f32.mrb[8].mxu0  ;;  %v7921_v62 = vadd.f32 %v7920_v51, %v7919_v14  ;;  %v7922_v53 = vpop.f32.mrb[6].mxu1  ;;  %8218 = vmatpush3.bf16.msra.mxu1 %v8938_v47  ;;  %v8942_v47 = vld [vmem:[#allocation10 + $0x128] sm:$0xff]  }
 0x463   : > { %v7814_v60 = vpop.f32.mrb[9].mxu0  ;;  %v7923_v2 = vpop.f32.mrb[7].mxu1 }
 0x464   : > { %v7815_v3 = vadd.f32 %v7814_v60, %v7813_v36  ;;  %v7816_v40 = vpop.f32.mrb[10].mxu0  ;;  %v7924_v10 = vadd.f32 %v7923_v2, %v7922_v53  ;;  %v11357_v31 = vadd.f32 %v7921_v62, %v4169_v46 }
 0x465   : > { %v7817_v28 = vpop.f32.mrb[11].mxu0 }
 0x466   : > { %v4177_v32 = vadd.f32 %v7815_v3, %v11267_v19  ;;  %v7818_v61 = vadd.f32 %v7817_v28, %v7816_v40  ;;  %v11360_v38 = vadd.f32 %v7924_v10, %v4172_v9 }
 0x468   : > { %v4180_v7 = vadd.f32 %v7818_v61, %v11269_v25  ;;  %v7925_v45 = vpop.f32.mrb[8].mxu1 }
 0x469   : > { %v7926_v0 = vpop.f32.mrb[9].mxu1 }
 0x46a   : > { %v7819_v59 = vpop.f32.mrb[12].mxu0  ;;  %v7927_v42 = vadd.f32 %v7926_v0, %v7925_v45  ;;  %v7928_v12 = vpop.f32.mrb[10].mxu1 }
 0x46b   : > { %v7820_v23 = vpop.f32.mrb[13].mxu0  ;;  %v7929_v54 = vpop.f32.mrb[11].mxu1 }
 0x46c   : > { %v7821_v50 = vadd.f32 %v7820_v23, %v7819_v59  ;;  %v7822_v8 = vpop.f32.mrb[14].mxu0  ;;  %v7930_v39 = vadd.f32 %v7929_v54, %v7928_v12  ;;  %v11363_v46 = vadd.f32 %v7927_v42, %v4177_v32 }
 0x46d   : > { %v7823_v19 = vpop.f32.mrb[15].mxu0 }
 0x46e   : > { %v4185_v15 = vadd.f32 %v7821_v50, %v11274_v13  ;;  %v7824_v9 = vadd.f32 %v7823_v19, %v7822_v8  ;;  %v11366_v25 = vadd.f32 %v7930_v39, %v4180_v7  ;;  %v8941_v7 = vld [vmem:[#allocation10 + $0x168] sm:$0xff]  }
 0x46f   : > { %8219 = vmatprep.subr.bf16.mxu1 %v8941_v7 }
 0x470   : > { %v4188_v20 = vadd.f32 %v7824_v9, %v11276_v5  ;;  %v7931_v14 = vpop.f32.mrb[12].mxu1  ;;  %8220 = vmatpush3.bf16.msra.mxu1 %v8942_v47  ;;  %v8946_v47 = vld [vmem:[#allocation10 + $0x130] sm:$0xff]  }
 0x471   : > { %v7932_v51 = vpop.f32.mrb[13].mxu1 }
 0x472   : > { %v7825_v36 = vpop.f32.mrb[16].mxu0  ;;  %v7933_v62 = vadd.f32 %v7932_v51, %v7931_v14  ;;  %v7934_v53 = vpop.f32.mrb[14].mxu1 }
 0x473   : > { %v7826_v60 = vpop.f32.mrb[17].mxu0  ;;  %v7935_v2 = vpop.f32.mrb[15].mxu1 }
 0x474   : > { %v7827_v3 = vadd.f32 %v7826_v60, %v7825_v36  ;;  %v7828_v40 = vpop.f32.mrb[18].mxu0  ;;  %v7936_v10 = vadd.f32 %v7935_v2, %v7934_v53  ;;  %v11369_v32 = vadd.f32 %v7933_v62, %v4185_v15 }
 0x475   : > { %v7829_v28 = vpop.f32.mrb[19].mxu0 }
 0x476   : > { %v4193_v13 = vadd.f32 %v7827_v3, %v11278_v29  ;;  %v7830_v61 = vadd.f32 %v7829_v28, %v7828_v40  ;;  %v11372_v35 = vadd.f32 %v7936_v10, %v4188_v20 }
 0x478   : > { %v4196_v5 = vadd.f32 %v7830_v61, %v11280_v58  ;;  %v7937_v45 = vpop.f32.mrb[16].mxu1 }
 0x479   : > { %v7938_v0 = vpop.f32.mrb[17].mxu1 }
 0x47a   : > { %v7831_v59 = vpop.f32.mrb[20].mxu0  ;;  %v7939_v42 = vadd.f32 %v7938_v0, %v7937_v45  ;;  %v7940_v12 = vpop.f32.mrb[18].mxu1 }
 0x47b   : > { %v7832_v23 = vpop.f32.mrb[21].mxu0  ;;  %v7941_v54 = vpop.f32.mrb[19].mxu1 }
 0x47c   : > { %v7833_v50 = vadd.f32 %v7832_v23, %v7831_v59  ;;  %v7834_v8 = vpop.f32.mrb[22].mxu0  ;;  %v7942_v39 = vadd.f32 %v7941_v54, %v7940_v12  ;;  %v11375_v19 = vadd.f32 %v7939_v42, %v4193_v13 }
 0x47d   : > { %v7835_v29 = vpop.f32.mrb[23].mxu0 }
 0x47e   : > { %v4201_v15 = vadd.f32 %v7833_v50, %v11282_v43  ;;  %v7836_v9 = vadd.f32 %v7835_v29, %v7834_v8  ;;  %v11378_v58 = vadd.f32 %v7942_v39, %v4196_v5  ;;  %v8945_v5 = vld [vmem:[#allocation10 + $0x170] sm:$0xff]   ;;  %v4547_v29 = vsub.s32 2, %v10637_v17 }
 0x47f   : > { %8221 = vmatprep.subr.bf16.mxu1 %v8945_v5 }
 0x480   : > { %v4204_v20 = vadd.f32 %v7836_v9, %v11284_v1  ;;  %v7943_v14 = vpop.f32.mrb[20].mxu1  ;;  %8222 = vmatpush3.bf16.msra.mxu1 %v8946_v47 }
 0x481   : > { %v7944_v51 = vpop.f32.mrb[21].mxu1 }
 0x482   : > { %v7837_v36 = vpop.f32.mrb[24].mxu0  ;;  %v7945_v62 = vadd.f32 %v7944_v51, %v7943_v14  ;;  %v7946_v53 = vpop.f32.mrb[22].mxu1 }
 0x483   : > { %v7838_v60 = vpop.f32.mrb[25].mxu0  ;;  %v7947_v2 = vpop.f32.mrb[23].mxu1 }
 0x484   : > { %v7839_v3 = vadd.f32 %v7838_v60, %v7837_v36  ;;  %v7840_v40 = vpop.f32.mrb[26].mxu0  ;;  %v7948_v10 = vadd.f32 %v7947_v2, %v7946_v53  ;;  %v11381_v13 = vadd.f32 %v7945_v62, %v4201_v15  ;;  %v8970_v62 = vld [vmem:[%s12368_s5] sm:$0xff] }
 0x485   : > { %v7841_v28 = vpop.f32.mrb[27].mxu0  ;;  %v11398_v53 = vrot.slane %v8970_v62, %v4547_v29 }
 0x486   : > { %v4209_v43 = vadd.f32 %v7839_v3, %v11286_v56  ;;  %v7842_v61 = vadd.f32 %v7841_v28, %v7840_v40  ;;  %v11384_v7 = vadd.f32 %v7948_v10, %v4204_v20  ;;  %v4583_v20 = vsub.s32 3, %v10637_v17 }
 0x488   : > { %v4212_v1 = vadd.f32 %v7842_v61, %v11288_v24  ;;  %v7949_v45 = vpop.f32.mrb[24].mxu1  ;;  %v11401_v10 = vrot.slane %v8970_v62, %v4583_v20 }
 0x489   : > { %v7950_v0 = vpop.f32.mrb[25].mxu1 }
 0x48a   : > { %v7843_v59 = vpop.f32.mrb[28].mxu0  ;;  %v7951_v42 = vadd.f32 %v7950_v0, %v7949_v45  ;;  %v7952_v12 = vpop.f32.mrb[26].mxu1 }
 0x48b   : > { %v7844_v23 = vpop.f32.mrb[29].mxu0  ;;  %v7953_v54 = vpop.f32.mrb[27].mxu1 }
 0x48c   : > { %v7845_v50 = vadd.f32 %v7844_v23, %v7843_v59  ;;  %v7846_v8 = vpop.f32.mrb[30].mxu0  ;;  %v7954_v39 = vadd.f32 %v7953_v54, %v7952_v12  ;;  %v11388_v15 = vadd.f32 %v7951_v42, %v4209_v43 }
 0x48d   : > { %v7847_v56 = vpop.f32.mrb[31].mxu0 }
 0x48e   : > { %v4217_v24 = vadd.f32 %v7845_v50, %v11290_v37  ;;  %v7848_v9 = vadd.f32 %v7847_v56, %v7846_v8  ;;  %v11392_v14 = vadd.f32 %v7954_v39, %v4212_v1  ;;  %v8950_v8 = vld [vmem:[#allocation10 + $0x138] sm:$0xff]  }
 0x490   : > { %v4220_v51 = vadd.f32 %v7848_v9, %v11293_v49  ;;  %v7955_v36 = vpop.f32.mrb[28].mxu1 }
 0x491   : > { %v7956_v60 = vpop.f32.mrb[29].mxu1 }
 0x492   : > { %v8571_v2 = vpop.f32.mrb[32].mxu0  ;;  %v7957_v3 = vadd.f32 %v7956_v60, %v7955_v36  ;;  %v7958_v40 = vpop.f32.mrb[30].mxu1 }
 0x493   : > { %v4427_v37 = vadd.f32 %v8571_v2, %v11302_v33  ;;  %v4418_v28 = vpop.f32.mrb[33].mxu0  ;;  %v7959_v43 = vpop.f32.mrb[31].mxu1 }
 0x494   : > { %v4419_v61 = vadd.f32 %v4418_v28, %v11296_v63  ;;  %v8572_v49 = vpop.f32.mrb[34].mxu0  ;;  %v7960_v5 = vadd.f32 %v7959_v43, %v7958_v40  ;;  %v11406_v0 = vadd.f32 %v7957_v3, %v4217_v24  ;;  %v8949_v63 = vld [vmem:[#allocation10 + $0x178] sm:$0xff]   ;;  %v8971_v40 = vld [vmem:[#allocation2] sm:$0xff]  ;;  %v4898_v28 = vrot.slane %v11305_v41, 2 }
 0x495   : > { %v4551_v1 = vmul.f32 %v11398_v53, %v4427_v37  ;;  %v4430_v47 = vadd.f32 %v8572_v49, %v11307_v4  ;;  %v4421_v45 = vpop.f32.mrb[35].mxu0  ;;  %8223 = vmatprep.subr.bf16.mxu1 %v8949_v63  ;;  %v4895_v37 = vrot.slane %v8971_v40, 2  ;;  %v8936_v40 = vld [vmem:[#allocation10 + $0x180] sm:$0xff]  }
 0x496   : > { %v4549_v59 = vmul.f32 %v11398_v53, %v4419_v61  ;;  %v4422_v42 = vadd.f32 %v4421_v45, %v11299_v48  ;;  %v11412_v23 = vadd.f32 %v7960_v5, %v4220_v51  ;;  %8224 = vmatpush3.bf16.msra.mxu1 %v8950_v8 }
 0x497   : > { %v4587_v33 = vadd.f32 %v11401_v10, %v4551_v1  ;;  %v4552_v12 = vmul.f32 %v11398_v53, %v4430_v47  ;;  %v4899_v47 = vsel %vm977_vm1, %v4895_v37, %v4898_v28 }
 0x498   : > { %v4585_v54 = vadd.f32 %v11401_v10, %v4549_v59  ;;  %v4550_v50 = vmul.f32 %v11398_v53, %v4422_v42 }
 0x499   : > { %v4619_v4 = vmax.f32 %v4587_v33, 0.0  ;;  %v4588_v39 = vadd.f32 %v11401_v10, %v4552_v12 }
 0x49a   : > { %v4617_v56 = vmax.f32 %v4585_v54, 0.0  ;;  %v4586_v29 = vadd.f32 %v11401_v10, %v4550_v50  ;;  %v8575_v48 = vpop.f32.mrb[36].mxu0  ;;  %v5043_v50 = vpack.c.bf16 %v4899_v47, %v4895_v37  ;;  %v11446_v37 = vld [vmem:[#allocation10 + $0x200] sm:$0xff]  }
 0x49b   : > { %4651 = vst [vmem:[#allocation3 + $0x31] sm:$0xff] %v4619_v4  ;;  %v4620_v24 = vmax.f32 %v4588_v39, 0.0  ;;  %v4443_v9 = vadd.f32 %v8575_v48, %v11321_v52  ;;  %v4434_v20 = vpop.f32.mrb[37].mxu0  ;;  %8601 = vmatprep.subr.bf16.mxu1 %v11446_v37 }
 0x49c   : > { %4649 = vst [vmem:[#allocation3 + $0x19] sm:$0xff] %v4617_v56  ;;  %v4618_v51 = vmax.f32 %v4586_v29, 0.0  ;;  %v4435_v36 = vadd.f32 %v4434_v20, %v11314_v26  ;;  %v8576_v62 = vpop.f32.mrb[38].mxu0 }
 0x49d   : > { %4652 = vst [vmem:[#allocation3 + $0x39] sm:$0xff] %v4620_v24  ;;  %v4555_v60 = vmul.f32 %v11398_v53, %v4443_v9  ;;  %v4446_v2 = vadd.f32 %v8576_v62, %v11324_v11  ;;  %v4437_v3 = vpop.f32.mrb[39].mxu0 }
 0x49e   : > { %4650 = vst [vmem:[#allocation3 + $0x21] sm:$0xff] %v4618_v51  ;;  %v4553_v43 = vmul.f32 %v11398_v53, %v4435_v36  ;;  %v4438_v52 = vadd.f32 %v4437_v3, %v11318_v6 }
 0x49f   : > { %v4591_v61 = vadd.f32 %v11401_v10, %v4555_v60  ;;  %v4556_v26 = vmul.f32 %v11398_v53, %v4446_v2 }
 0x4a0   : > { %v4589_v49 = vadd.f32 %v11401_v10, %v4553_v43  ;;  %v4554_v5 = vmul.f32 %v11398_v53, %v4438_v52 }
 0x4a1   : > { %v4623_v1 = vmax.f32 %v4591_v61, 0.0  ;;  %v4592_v11 = vadd.f32 %v11401_v10, %v4556_v26  ;;  %v8939_v26 = vld [vmem:[#allocation10 + $0x1c8] sm:$0xff]  }
 0x4a2   : > { %v4621_v45 = vmax.f32 %v4589_v49, 0.0  ;;  %v4590_v41 = vadd.f32 %v11401_v10, %v4554_v5  ;;  %v8579_v59 = vpop.f32.mrb[40].mxu0  ;;  %v11432_v42 = vld [vmem:[#allocation3 + $0x30] sm:$0xff] }
 0x4a3   : > { %4655 = vst [vmem:[#allocation3 + $0x61] sm:$0xff] %v4623_v1  ;;  %v4624_v6 = vmax.f32 %v4592_v11, 0.0  ;;  %v4459_v33 = vadd.f32 %v8579_v59, %v11333_v57  ;;  %v4450_v12 = vpop.f32.mrb[41].mxu0  ;;  %v4684_v63 = vld [vmem:[#allocation3 + $0x18] sm:$0xff]  ;;  %v4793_v57 = vrot.slane %v11432_v42, 1 }
 0x4a4   : > { %4653 = vst [vmem:[#allocation3 + $0x49] sm:$0xff] %v4621_v45  ;;  %v4622_v54 = vmax.f32 %v4590_v41, 0.0  ;;  %v4451_v8 = vadd.f32 %v4450_v12, %v11327_v27  ;;  %v8580_v4 = vpop.f32.mrb[42].mxu0  ;;  %v11436_v39 = vld [vmem:[#allocation3 + $0x38] sm:$0xff]  ;;  %v4788_v9 = vrot.slane %v4684_v63, 1  ;;  %v4900_v3 = vrot.slane %v4684_v63, 2 }
 0x4a5   : > { %4656 = vst [vmem:[#allocation3 + $0x69] sm:$0xff] %v4624_v6  ;;  %v4559_v56 = vmul.f32 %v11398_v53, %v4459_v33  ;;  %v4462_v29 = vadd.f32 %v8580_v4, %v11336_v30  ;;  %v4453_v48 = vpop.f32.mrb[43].mxu0  ;;  %v4685_v24 = vld [vmem:[#allocation3 + $0x20] sm:$0xff]  ;;  %v4794_v27 = vrot.slane %v11436_v39, 1  ;;  %v4686_v62 = vld [vmem:[#allocation3 + $0x28] sm:$0x3] }
 0x4a6   : > { %4654 = vst [vmem:[#allocation3 + $0x51] sm:$0xff] %v4622_v54  ;;  %v4557_v20 = vmul.f32 %v11398_v53, %v4451_v8  ;;  %v4454_v51 = vadd.f32 %v4453_v48, %v11330_v21  ;;  %v4789_v36 = vrot.slane %v4685_v24, 1  ;;  %v5044_v30 = vpack.c.bf16 %v4685_v24, %v4684_v63  ;;  %v11454_v61 = vld [vmem:[#allocation3 + $0x40] sm:$0x3]  ;;  %v8940_v4 = vld [vmem:[#allocation10 + $0x188] sm:$0xff]  }
 0x4a7   : > { %v4595_v60 = vadd.f32 %v11401_v10, %v4559_v56  ;;  %v4560_v2 = vmul.f32 %v11398_v53, %v4462_v29  ;;  %v4901_v52 = vrot.slane %v4685_v24, 2  ;;  %v11452_v21 = vpack.c.bf16 %v11436_v39, %v11432_v42 }
 0x4a8   : > { %v4593_v28 = vadd.f32 %v11401_v10, %v4557_v20  ;;  %v4558_v43 = vmul.f32 %v11398_v53, %v4454_v51  ;;  %5864 = vmatprep.mubr.bf16.mxu0 %v5044_v30  ;;  %v4790_v1 = vsel %vm864_vm0, %v4788_v9, %v4789_v36  ;;  %v4791_v11 = vrot.slane %v4686_v62, 1 }
 0x4a9   : > { %v4627_v49 = vmax.f32 %v4595_v60, 0.0  ;;  %v4596_v5 = vadd.f32 %v11401_v10, %v4560_v2  ;;  %5865 = vmatmul.mubr.bf16.vlgmr.msra.gmra.mrb[64].mxu0 %v5043_v50  ;;  %v4903_v59 = vrot.slane %v4686_v62, 2  ;;  %v4795_v6 = vsel %vm864_vm0, %v4793_v57, %v4794_v27 }
 0x4aa   : > { %v4625_v47 = vmax.f32 %v4593_v28, 0.0  ;;  %v4594_v45 = vadd.f32 %v11401_v10, %v4558_v43  ;;  %v8583_v41 = vpop.f32.mrb[44].mxu0  ;;  %5872 = vmatprep.mubr.bf16.mxu0 %v11452_v21  ;;  %v4792_v54 = vsel %vm864_vm0, %v4789_v36, %v4791_v11  ;;  %v4796_v8 = vrot.slane %v11454_v61, 1  ;;  %8322 = vmatpush3.bf16.msra.mxu0 %v8936_v40  ;;  %v8944_v43 = vld [vmem:[#allocation10 + $0x190] sm:$0xff]  }
 0x4ab   : > { %4659 = vst [vmem:[#allocation3 + $0x91] sm:$0xff] %v4627_v49  ;;  %v4628_v33 = vmax.f32 %v4596_v5, 0.0  ;;  %v4475_v12 = vadd.f32 %v8583_v41, %v11345_v18  ;;  %v4466_v63 = vpop.f32.mrb[45].mxu0  ;;  %v4902_v50 = vsel %vm977_vm1, %v4900_v3, %v4901_v52  ;;  %v11467_v48 = vpack.c.bf16 %v4792_v54, %v4790_v1  ;;  %8323 = vmatprep.subr.bf16.mxu0 %v8939_v26  ;;  %v8943_v18 = vld [vmem:[#allocation10 + $0x1d0] sm:$0xff]   ;;  %v11480_v3 = vld [vmem:[#allocation3 + $0x48] sm:$0xff] }
 0x4ac   : > { %4657 = vst [vmem:[#allocation3 + $0x79] sm:$0xff] %v4625_v47  ;;  %v4626_v56 = vmax.f32 %v4594_v45, 0.0  ;;  %v4467_v29 = vadd.f32 %v4466_v63, %v11339_v55  ;;  %v8584_v24 = vpop.f32.mrb[46].mxu0  ;;  %v4904_v57 = vsel %vm977_vm1, %v4901_v52, %v4903_v59  ;;  %v4797_v36 = vsel %vm864_vm0, %v4794_v27, %v4796_v8 }
 0x4ad   : > { %4660 = vst [vmem:[#allocation3 + $0x99] sm:$0xff] %v4628_v33  ;;  %v4563_v9 = vmul.f32 %v11398_v53, %v4475_v12  ;;  %v4478_v20 = vadd.f32 %v8584_v24, %v11348_v22  ;;  %v4469_v51 = vpop.f32.mrb[47].mxu0  ;;  %v11473_v62 = vld [vmem:[#allocation3 + $0x50] sm:$0xff]  ;;  %5711 = vmatprep.mubr.bf16.mxu1 %v11467_v48  ;;  %v11478_v2 = vpack.c.bf16 %v4797_v36, %v4795_v6  ;;  %v4906_v22 = vrot.slane %v11436_v39, 2  ;;  %v11492_v5 = vld [vmem:[#allocation3 + $0x58] sm:$0x3] }
 0x4ae   : > { %4658 = vst [vmem:[#allocation3 + $0x81] sm:$0xff] %v4626_v56  ;;  %v4561_v55 = vmul.f32 %v11398_v53, %v4467_v29  ;;  %v4470_v60 = vadd.f32 %v4469_v51, %v11342_v34  ;;  %5712 = vmatmul.mubr.bf16.gmra.mrb[36].mxu1 %v5044_v30  ;;  %v4799_v27 = vrot.slane %v11473_v62, 1  ;;  %8324 = vmatpush3.bf16.msra.mxu0 %v8940_v4  ;;  %v4908_v49 = vrot.slane %v11454_v61, 2  ;;  %v8947_v39 = vld [vmem:[#allocation10 + $0x1d8] sm:$0xff]   ;;  %v11516_v36 = vld [vmem:[#allocation3 + $0x60] sm:$0xff] }
 0x4af   : > { %v4599_v40 = vadd.f32 %v11401_v10, %v4563_v9  ;;  %v4564_v28 = vmul.f32 %v11398_v53, %v4478_v20  ;;  %v11487_v26 = vpack.c.bf16 %v4904_v57, %v4902_v50  ;;  %5719 = vmatprep.mubr.bf16.mxu1 %v11478_v2  ;;  %8325 = vmatprep.subr.bf16.mxu0 %v8943_v18  ;;  %v4798_v11 = vrot.slane %v11480_v3, 1  ;;  %v11510_v24 = vld [vmem:[#allocation3 + $0x68] sm:$0xff] }
 0x4b0   : > { %v4597_v52 = vadd.f32 %v11401_v10, %v4561_v55  ;;  %v4562_v34 = vmul.f32 %v11398_v53, %v4470_v60  ;;  %v4905_v47 = vrot.slane %v11432_v42, 2  ;;  %v11501_v61 = vpack.c.bf16 %v11473_v62, %v11480_v3  ;;  %v8948_v42 = vld [vmem:[#allocation10 + $0x198] sm:$0xff]  }
 0x4b1   : > { %v4631_v1 = vmax.f32 %v4599_v40, 0.0  ;;  %v4600_v30 = vadd.f32 %v11401_v10, %v4564_v28  ;;  %5873 = vmatmul.mubr.bf16.gmra.mrb[68].mxu0 %v11487_v26  ;;  %v4800_v63 = vsel %vm864_vm0, %v4798_v11, %v4799_v27  ;;  %v4801_v54 = vrot.slane %v11492_v5, 1 }
 0x4b2   : > { %v4629_v45 = vmax.f32 %v4597_v52, 0.0  ;;  %v4598_v41 = vadd.f32 %v11401_v10, %v4562_v34  ;;  %v8587_v59 = vpop.f32.mrb[48].mxu0  ;;  %8326 = vmatpush3.bf16.msra.mxu0 %v8944_v43  ;;  %v4907_v8 = vsel %vm977_vm1, %v4905_v47, %v4906_v22  ;;  %v4909_v56 = vsel %vm977_vm1, %v4906_v22, %v4908_v49  ;;  %5880 = vmatprep.mubr.bf16.mxu0 %v11501_v61  ;;  %v11523_v22 = vld [vmem:[#allocation3 + $0x70] sm:$0x3] }
 0x4b3   : > { %4663 = vst [vmem:[#allocation3 + $0xc1] sm:$0xff] %v4631_v1  ;;  %v4632_v6 = vmax.f32 %v4600_v30, 0.0  ;;  %v4491_v33 = vadd.f32 %v8587_v59, %v11357_v31  ;;  %v4482_v12 = vpop.f32.mrb[49].mxu0  ;;  %8327 = vmatprep.subr.bf16.mxu0 %v8947_v39  ;;  %v8951_v31 = vld [vmem:[#allocation10 + $0x1e0] sm:$0xff]   ;;  %v4911_v9 = vrot.slane %v11473_v62, 2  ;;  %v4802_v51 = vsel %vm864_vm0, %v4799_v27, %v4801_v54 }
 0x4b4   : > { %4661 = vst [vmem:[#allocation3 + $0xa9] sm:$0xff] %v4629_v45  ;;  %v4630_v4 = vmax.f32 %v4598_v41, 0.0  ;;  %v4483_v50 = vadd.f32 %v4482_v12, %v11351_v44  ;;  %v8588_v29 = vpop.f32.mrb[50].mxu0  ;;  %v4913_v60 = vrot.slane %v11492_v5, 2  ;;  %v11521_v40 = vpack.c.bf16 %v4802_v51, %v4800_v63  ;;  %v8952_v43 = vld [vmem:[#allocation10 + $0x1a0] sm:$0xff]  }
 0x4b5   : > { %4664 = vst [vmem:[#allocation3 + $0xc9] sm:$0xff] %v4632_v6  ;;  %v4567_v18 = vmul.f32 %v11398_v53, %v4491_v33  ;;  %v4494_v57 = vadd.f32 %v8588_v29, %v11360_v38  ;;  %v4485_v20 = vpop.f32.mrb[51].mxu0  ;;  %v4910_v38 = vrot.slane %v11480_v3, 2  ;;  %v4804_v27 = vrot.slane %v11510_v24, 1  ;;  %v8953_v3 = vld [vmem:[#allocation10 + $0x1e8] sm:$0xff]  }
 0x4b6   : > { %4662 = vst [vmem:[#allocation3 + $0xb1] sm:$0xff] %v4630_v4  ;;  %v4565_v44 = vmul.f32 %v11398_v53, %v4483_v50  ;;  %v4486_v55 = vadd.f32 %v4485_v20, %v11354_v16  ;;  %5720 = vmatmul.mubr.bf16.gmra.mrb[40].mxu1 %v11452_v21  ;;  %8328 = vmatpush3.bf16.msra.mxu0 %v8948_v42  ;;  %v4803_v49 = vrot.slane %v11516_v36, 1  ;;  %v4806_v30 = vrot.slane %v11523_v22, 1  ;;  %v8954_v50 = vld [vmem:[#allocation10 + $0x1a8] sm:$0xff]  }
 0x4b7   : > { %v4603_v62 = vadd.f32 %v11401_v10, %v4567_v18  ;;  %v4568_v28 = vmul.f32 %v11398_v53, %v4494_v57  ;;  %v11530_v52 = vpack.c.bf16 %v4909_v56, %v4907_v8  ;;  %5727 = vmatprep.mubr.bf16.mxu1 %v11521_v40  ;;  %8329 = vmatprep.subr.bf16.mxu0 %v8951_v31  ;;  %v11551_v56 = vld [vmem:[#allocation3 + $0x80] sm:$0xff]  ;;  %v11555_v18 = vld [vmem:[#allocation3 + $0x88] sm:$0x3] }
 0x4b8   : > { %v4601_v16 = vadd.f32 %v11401_v10, %v4565_v44  ;;  %v4566_v34 = vmul.f32 %v11398_v53, %v4486_v55  ;;  %v11539_v1 = vpack.c.bf16 %v11510_v24, %v11516_v36  ;;  %v4912_v11 = vsel %vm977_vm1, %v4910_v38, %v4911_v9  ;;  %v11563_v44 = vld [vmem:[#allocation3 + $0x78] sm:$0xff] }
 0x4b9   : > { %v4635_v5 = vmax.f32 %v4603_v62, 0.0  ;;  %v4604_v39 = vadd.f32 %v11401_v10, %v4568_v28  ;;  %v4914_v41 = vsel %vm977_vm1, %v4911_v9, %v4913_v60  ;;  %5881 = vmatmul.mubr.bf16.gmra.mrb[72].mxu0 %v11530_v52  ;;  %v4805_v63 = vsel %vm864_vm0, %v4803_v49, %v4804_v27  ;;  %v8955_v9 = vld [vmem:[#allocation10 + $0x1f0] sm:$0xff]  }
 0x4ba   : > { %v4633_v47 = vmax.f32 %v4601_v16, 0.0  ;;  %v4602_v45 = vadd.f32 %v11401_v10, %v4566_v34  ;;  %v8591_v59 = vpop.f32.mrb[52].mxu0  ;;  %5888 = vmatprep.mubr.bf16.mxu0 %v11539_v1  ;;  %v4807_v54 = vsel %vm864_vm0, %v4804_v27, %v4806_v30  ;;  %8330 = vmatpush3.bf16.msra.mxu0 %v8952_v43  ;;  %v11557_v57 = vpack.c.bf16 %v4914_v41, %v4912_v11  ;;  %v8956_v43 = vld [vmem:[#allocation10 + $0x1b0] sm:$0xff]  }
 0x4bb   : > { %4667 = vst [vmem:[#allocation3 + $0xf1] sm:$0xff] %v4635_v5  ;;  %v4636_v6 = vmax.f32 %v4604_v39, 0.0  ;;  %v4507_v33 = vadd.f32 %v8591_v59, %v11369_v32  ;;  %v4498_v12 = vpop.f32.mrb[53].mxu0  ;;  %8331 = vmatprep.subr.bf16.mxu0 %v8953_v3  ;;  %v11561_v51 = vpack.c.bf16 %v4807_v54, %v4805_v63  ;;  %v4916_v60 = vrot.slane %v11510_v24, 2  ;;  %v8958_v3 = vld [vmem:[#allocation10 + $0x1f8] sm:$0xff]   ;;  %v11590_v63 = vld [vmem:[#allocation3 + $0x98] sm:$0xff] }
 0x4bc   : > { %4665 = vst [vmem:[#allocation3 + $0xd9] sm:$0xff] %v4633_v47  ;;  %v4634_v42 = vmax.f32 %v4602_v45, 0.0  ;;  %v4499_v8 = vadd.f32 %v4498_v12, %v11363_v46  ;;  %v8592_v4 = vpop.f32.mrb[54].mxu0  ;;  %v4809_v62 = vrot.slane %v11551_v56, 1  ;;  %v4811_v27 = vrot.slane %v11555_v18, 1 }
 0x4bd   : > { %4668 = vst [vmem:[#allocation3 + $0xf9] sm:$0xff] %v4636_v6  ;;  %v4571_v32 = vmul.f32 %v11398_v53, %v4507_v33  ;;  %v4510_v29 = vadd.f32 %v8592_v4, %v11372_v35  ;;  %v4501_v31 = vpop.f32.mrb[55].mxu0  ;;  %v4808_v34 = vrot.slane %v11563_v44, 1  ;;  %v11579_v49 = vpack.c.bf16 %v11551_v56, %v11563_v44  ;;  %v11592_v54 = vld [vmem:[#allocation3 + $0xa0] sm:$0x3] }
 0x4be   : > { %4666 = vst [vmem:[#allocation3 + $0xe1] sm:$0xff] %v4634_v42  ;;  %v4569_v20 = vmul.f32 %v11398_v53, %v4499_v8  ;;  %v4502_v46 = vadd.f32 %v4501_v31, %v11366_v25  ;;  %5728 = vmatmul.mubr.bf16.gmra.mrb[44].mxu1 %v11501_v61  ;;  %v4918_v25 = vrot.slane %v11523_v22, 2  ;;  %8332 = vmatpush3.bf16.msra.mxu0 %v8954_v50  ;;  %v4915_v5 = vrot.slane %v11516_v36, 2 }
 0x4bf   : > { %v4607_v55 = vadd.f32 %v11401_v10, %v4571_v32  ;;  %v4572_v35 = vmul.f32 %v11398_v53, %v4510_v29  ;;  %5735 = vmatprep.mubr.bf16.mxu1 %v11561_v51  ;;  %8333 = vmatprep.subr.bf16.mxu0 %v8955_v9  ;;  %v4810_v41 = vsel %vm864_vm0, %v4808_v34, %v4809_v62  ;;  %v4921_v4 = vrot.slane %v11551_v56, 2 }
 0x4c0   : > { %v4605_v38 = vadd.f32 %v11401_v10, %v4569_v20  ;;  %v4570_v28 = vmul.f32 %v11398_v53, %v4502_v46  ;;  %v4812_v59 = vsel %vm864_vm0, %v4809_v62, %v4811_v27  ;;  %v4917_v6 = vsel %vm977_vm1, %v4915_v5, %v4916_v60  ;;  %v11603_v20 = vld [vmem:[#allocation3 + $0x90] sm:$0xff] }
 0x4c1   : > { %v4639_v16 = vmax.f32 %v4607_v55, 0.0  ;;  %v4608_v24 = vadd.f32 %v11401_v10, %v4572_v35  ;;  %5889 = vmatmul.mubr.bf16.gmra.mrb[76].mxu0 %v11557_v57  ;;  %v4919_v42 = vsel %vm977_vm1, %v4916_v60, %v4918_v25  ;;  %v4923_v31 = vrot.slane %v11555_v18, 2 }
 0x4c2   : > { %v4637_v22 = vmax.f32 %v4605_v38, 0.0  ;;  %v4606_v39 = vadd.f32 %v11401_v10, %v4570_v28  ;;  %v8595_v30 = vpop.f32.mrb[56].mxu0  ;;  %5896 = vmatprep.mubr.bf16.mxu0 %v11579_v49  ;;  %8334 = vmatpush3.bf16.msra.mxu0 %v8956_v43  ;;  %v11601_v9 = vpack.c.bf16 %v4812_v59, %v4810_v41  ;;  %v4816_v56 = vrot.slane %v11592_v54, 1  ;;  %v11633_v41 = vld [vmem:[#allocation3 + $0xb8] sm:$0x3] }
 0x4c3   : > { %4671 = vst [vmem:[#allocation3 + $0x121] sm:$0xff] %v4639_v16  ;;  %v4640_v11 = vmax.f32 %v4608_v24, 0.0  ;;  %v4523_v47 = vadd.f32 %v8595_v30, %v11381_v13  ;;  %v4514_v45 = vpop.f32.mrb[57].mxu0  ;;  %v8959_v13 = vld [vmem:[#allocation10 + $0x1b8] sm:$0xff]   ;;  %8335 = vmatprep.subr.bf16.mxu0 %v8958_v3  ;;  %v11610_v60 = vpack.c.bf16 %v4919_v42, %v4917_v6  ;;  %v4813_v28 = vrot.slane %v11603_v20, 1 }
 0x4c4   : > { %4669 = vst [vmem:[#allocation3 + $0x109] sm:$0xff] %v4637_v22  ;;  %v4638_v36 = vmax.f32 %v4606_v39, 0.0  ;;  %v4515_v33 = vadd.f32 %v4514_v45, %v11375_v19  ;;  %v8596_v12 = vpop.f32.mrb[58].mxu0  ;;  %v11620_v25 = vpack.c.bf16 %v11590_v63, %v11603_v20  ;;  %v4924_v16 = vsel %vm977_vm1, %v4921_v4, %v4923_v31  ;;  %v11631_v45 = vld [vmem:[#allocation3 + $0xb0] sm:$0xff] }
 0x4c5   : > { %4672 = vst [vmem:[#allocation3 + $0x129] sm:$0xff] %v4640_v11  ;;  %v4575_v8 = vmul.f32 %v11398_v53, %v4523_v47  ;;  %v4526_v50 = vadd.f32 %v8596_v12, %v11384_v7  ;;  %v4517_v32 = vpop.f32.mrb[59].mxu0  ;;  %v4814_v7 = vrot.slane %v11590_v63, 1 }
 0x4c6   : > { %4670 = vst [vmem:[#allocation3 + $0x111] sm:$0xff] %v4638_v36  ;;  %v4573_v19 = vmul.f32 %v11398_v53, %v4515_v33  ;;  %v4518_v29 = vadd.f32 %v4517_v32, %v11378_v58  ;;  %5736 = vmatmul.mubr.bf16.gmra.mrb[48].mxu1 %v11539_v1  ;;  %v4920_v58 = vrot.slane %v11563_v44, 2  ;;  %8336 = vmatpush3.bf16.msra.mxu0 %v8959_v13 }
 0x4c7   : > { %v4611_v46 = vadd.f32 %v11401_v10, %v4575_v8  ;;  %v4576_v55 = vmul.f32 %v11398_v53, %v4526_v50  ;;  %5743 = vmatprep.mubr.bf16.mxu1 %v11601_v9  ;;  %v4815_v22 = vsel %vm864_vm0, %v4813_v28, %v4814_v7  ;;  %v4817_v39 = vsel %vm864_vm0, %v4814_v7, %v4816_v56 }
 0x4c8   : > { %v4609_v18 = vadd.f32 %v11401_v10, %v4573_v19  ;;  %v4574_v35 = vmul.f32 %v11398_v53, %v4518_v29  ;;  %v4922_v27 = vsel %vm977_vm1, %v4920_v58, %v4921_v4  ;;  %v11641_v13 = vpack.c.bf16 %v4817_v39, %v4815_v22 }
 0x4c9   : > { %v4643_v62 = vmax.f32 %v4611_v46, 0.0  ;;  %v4612_v38 = vadd.f32 %v11401_v10, %v4576_v55  ;;  %5897 = vmatmul.mubr.bf16.gmra.mrb[80].mxu0 %v11610_v60  ;;  %v11637_v36 = vpack.c.bf16 %v4924_v16, %v4922_v27  ;;  %v4819_v4 = vrot.slane %v11631_v45, 1 }
 0x4ca   : > { %v4641_v43 = vmax.f32 %v4609_v18, 0.0  ;;  %v4610_v44 = vadd.f32 %v11401_v10, %v4574_v35  ;;  %v8599_v24 = vpop.f32.mrb[60].mxu0  ;;  %5904 = vmatprep.mubr.bf16.mxu0 %v11620_v25  ;;  %v4926_v50 = vrot.slane %v11590_v63, 2  ;;  %v4925_v63 = vrot.slane %v11603_v20, 2  ;;  %v4706_v35 = vld [vmem:[#allocation3 + $0xc8] sm:$0xff]  ;;  %v4705_v20 = vld [vmem:[#allocation3 + $0xc0] sm:$0xff] }
 0x4cb   : > { %4675 = vst [vmem:[#allocation3 + $0x151] sm:$0xff] %v4643_v62  ;;  %v4644_v34 = vmax.f32 %v4612_v38, 0.0  ;;  %v4539_v3 = vadd.f32 %v8599_v24, %v11406_v0  ;;  %v4530_v5 = vpop.f32.mrb[61].mxu0  ;;  %v4707_v62 = vld [vmem:[#allocation3 + $0xd0] sm:$0x3]  ;;  %v4824_v27 = vrot.slane %v4706_v35, 1 }
 0x4cc   : > { %4673 = vst [vmem:[#allocation3 + $0x139] sm:$0xff] %v4641_v43  ;;  %v4642_v30 = vmax.f32 %v4610_v44, 0.0  ;;  %v4531_v11 = vadd.f32 %v4530_v5, %v11388_v15  ;;  %v8600_v47 = vpop.f32.mrb[62].mxu0  ;;  %v4702_v15 = vld [vmem:[#allocation3 + $0xa8] sm:$0xff]  ;;  %v4927_v38 = vsel %vm977_vm1, %v4925_v63, %v4926_v50  ;;  %v4826_v43 = vrot.slane %v4707_v62, 1 }
 0x4cd   : > { %4676 = vst [vmem:[#allocation3 + $0x159] sm:$0xff] %v4644_v34  ;;  %v4579_v59 = vmul.f32 %v11398_v53, %v4539_v3  ;;  %v4542_v0 = vadd.f32 %v8600_v47, %v11412_v23  ;;  %v4533_v6 = vpop.f32.mrb[63].mxu0  ;;  %v4821_v23 = vrot.slane %v11633_v41, 1  ;;  %v4818_v46 = vrot.slane %v4702_v15, 1 }
 0x4ce   : > { %4674 = vst [vmem:[#allocation3 + $0x141] sm:$0xff] %v4642_v30  ;;  %v4577_v33 = vmul.f32 %v11398_v53, %v4531_v11  ;;  %v4534_v12 = vadd.f32 %v4533_v6, %v11392_v14  ;;  %5744 = vmatmul.mubr.bf16.gmra.mrb[52].mxu1 %v11579_v49  ;;  %v4928_v14 = vrot.slane %v11592_v54, 2  ;;  %v11655_v55 = vpack.c.bf16 %v11631_v45, %v4702_v15  ;;  %v4709_v30 = vld [vmem:[#allocation3 + $0xe0] sm:$0xff]  ;;  %v4710_v11 = vld [vmem:[#allocation3 + $0xe8] sm:$0x3] }
 0x4cf   : > { %v4615_v42 = vadd.f32 %v11401_v10, %v4579_v59  ;;  %v4580_v8 = vmul.f32 %v11398_v53, %v4542_v0  ;;  %5751 = vmatprep.mubr.bf16.mxu1 %v11641_v13  ;;  %v4820_v54 = vsel %vm864_vm0, %v4818_v46, %v4819_v4  ;;  %v4822_v58 = vsel %vm864_vm0, %v4819_v4, %v4821_v23  ;;  %v4711_v46 = vld [vmem:[#allocation3 + $0xf0] sm:$0xff] }
 0x4d0   : > { %v4613_v32 = vadd.f32 %v11401_v10, %v4577_v33  ;;  %v4578_v19 = vmul.f32 %v11398_v53, %v4534_v12  ;;  %v11665_v28 = vpack.c.bf16 %v4822_v58, %v4820_v54  ;;  %v4931_v16 = vrot.slane %v11631_v45, 2 }
 0x4d1   : > { %v4647_v29 = vmax.f32 %v4615_v42, 0.0  ;;  %v4616_v31 = vadd.f32 %v11401_v10, %v4580_v8  ;;  %5905 = vmatmul.mubr.bf16.gmra.mrb[84].mxu0 %v11637_v36  ;;  %v4933_v24 = vrot.slane %v11633_v41, 2  ;;  %v4823_v34 = vrot.slane %v4705_v20, 1  ;;  %v4708_v41 = vld [vmem:[#allocation3 + $0xd8] sm:$0xff] }
 0x4d2   : > { %v4645_v7 = vmax.f32 %v4613_v32, 0.0  ;;  %v4614_v56 = vadd.f32 %v11401_v10, %v4578_v19  ;;  %5912 = vmatprep.mubr.bf16.mxu0 %v11655_v55  ;;  %v4929_v10 = vsel %vm977_vm1, %v4926_v50, %v4928_v14  ;;  %v11673_v3 = vpack.c.bf16 %v4706_v35, %v4705_v20  ;;  %v4712_v32 = vld [vmem:[#allocation3 + $0xf8] sm:$0xff]  ;;  %v4713_v19 = vld [vmem:[#allocation3 + $0x100] sm:$0x3] }
 0x4d3   : > { %4679 = vst [vmem:[#allocation3 + $0x181] sm:$0xff] %v4647_v29  ;;  %v4648_v53 = vmax.f32 %v4616_v31, 0.0  ;;  %v11668_v44 = vpack.c.bf16 %v4929_v10, %v4927_v38  ;;  %v4930_v5 = vrot.slane %v4702_v15, 2  ;;  %v4825_v22 = vsel %vm864_vm0, %v4823_v34, %v4824_v27  ;;  %v4716_v34 = vld [vmem:[#allocation3 + $0x118] sm:$0x3] }
 0x4d4   : > { %4677 = vst [vmem:[#allocation3 + $0x169] sm:$0xff] %v4645_v7  ;;  %v4646_v18 = vmax.f32 %v4614_v56, 0.0  ;;  %v4827_v39 = vsel %vm864_vm0, %v4824_v27, %v4826_v43  ;;  %v4934_v45 = vsel %vm977_vm1, %v4931_v16, %v4933_v24  ;;  %v4829_v0 = vrot.slane %v4709_v30, 1  ;;  %v4715_v24 = vld [vmem:[#allocation3 + $0x110] sm:$0xff] }
 0x4d5   : > { %4680 = vst [vmem:[#allocation3 + $0x189] sm:$0xff] %v4648_v53  ;;  %v4932_v47 = vsel %vm977_vm1, %v4930_v5, %v4931_v16  ;;  %v11681_v59 = vpack.c.bf16 %v4827_v39, %v4825_v22  ;;  %v4831_v6 = vrot.slane %v4710_v11, 1  ;;  %v4936_v12 = vrot.slane %v4706_v35, 2 }
 0x4d6   : > { %4678 = vst [vmem:[#allocation3 + $0x171] sm:$0xff] %v4646_v18  ;;  %5752 = vmatmul.mubr.bf16.gmra.mrb[56].mxu1 %v11620_v25  ;;  %v11684_v33 = vpack.c.bf16 %v4934_v45, %v4932_v47  ;;  %v4938_v15 = vrot.slane %v4707_v62, 2  ;;  %v4828_v42 = vrot.slane %v4708_v41, 1  ;;  %v11687_v8 = vpack.c.bf16 %v4709_v30, %v4708_v41 }
 0x4d7   : > { %5759 = vmatprep.mubr.bf16.mxu1 %v11665_v28  ;;  %v4935_v4 = vrot.slane %v4705_v20, 2  ;;  %v4832_v50 = vsel %vm864_vm0, %v4829_v0, %v4831_v6  ;;  %v4834_v7 = vrot.slane %v4712_v32, 1  ;;  %v4836_v56 = vrot.slane %v4713_v19, 1 }
 0x4d8   : > { %v4830_v23 = vsel %vm864_vm0, %v4828_v42, %v4829_v0  ;;  %v4939_v29 = vsel %vm977_vm1, %v4936_v12, %v4938_v15  ;;  %v4941_v58 = vrot.slane %v4709_v30, 2  ;;  %v4943_v18 = vrot.slane %v4710_v11, 2 }
 0x4d9   : > { %5913 = vmatmul.mubr.bf16.gmra.mrb[88].mxu0 %v11668_v44  ;;  %v4937_v14 = vsel %vm977_vm1, %v4935_v4, %v4936_v12  ;;  %v11695_v31 = vpack.c.bf16 %v4832_v50, %v4830_v23  ;;  %v4833_v35 = vrot.slane %v4711_v46, 1  ;;  %v11705_v62 = vpack.c.bf16 %v4712_v32, %v4711_v46 }
 0x4da   : > { %5920 = vmatprep.mubr.bf16.mxu0 %v11673_v3  ;;  %v11698_v63 = vpack.c.bf16 %v4939_v29, %v4937_v14  ;;  %v11701_v53 = vld [vmem:[#allocation3 + $0x180] sm:$0xff]  ;;  %v4940_v38 = vrot.slane %v4708_v41, 2  ;;  %v4837_v27 = vsel %vm864_vm0, %v4834_v7, %v4836_v56  ;;  %v4944_v30 = vsel %vm977_vm1, %v4941_v58, %v4943_v18  ;;  %v4714_v41 = vld [vmem:[#allocation3 + $0x108] sm:$0xff] }
 0x4db   : > { %v4835_v20 = vsel %vm864_vm0, %v4833_v35, %v4834_v7  ;;  %v5010_v43 = vrot.slane %v11701_v53, 1  ;;  %v5017_v5 = vrot.slane %v11701_v53, 2  ;;  %v4839_v12 = vrot.slane %v4715_v24, 1 }
 0x4dc   : > { %v11703_v54 = vld [vmem:[#allocation3 + $0x188] sm:$0xff]  ;;  %v4731_v10 = vld [vmem:[#allocation3 + $0x190] sm:$0x3]  ;;  %v4942_v39 = vsel %vm977_vm1, %v4940_v38, %v4941_v58  ;;  %v11718_v45 = vpack.c.bf16 %v4837_v27, %v4835_v20  ;;  %v4841_v15 = vrot.slane %v4716_v34, 1  ;;  %v4946_v23 = vrot.slane %v4712_v32, 2 }
 0x4dd   : > { %v5011_v16 = vrot.slane %v11703_v54, 1  ;;  %v5018_v22 = vrot.slane %v11703_v54, 2  ;;  %v5013_v47 = vrot.slane %v4731_v10, 1  ;;  %v5020_v6 = vrot.slane %v4731_v10, 2  ;;  %v4718_v38 = vld [vmem:[#allocation3 + $0x128] sm:$0xff] }
 0x4de   : > { %5760 = vmatmul.mubr.bf16.gmra.mrb[60].mxu1 %v11655_v55  ;;  %v11723_v4 = vpack.c.bf16 %v4944_v30, %v4942_v39  ;;  %v4948_v29 = vrot.slane %v4713_v19, 2  ;;  %v4838_v7 = vrot.slane %v4714_v41, 1  ;;  %v11729_v56 = vpack.c.bf16 %v4715_v24, %v4714_v41  ;;  %v4719_v10 = vld [vmem:[#allocation3 + $0x130] sm:$0x3] }
 0x4df   : > { %5767 = vmatprep.mubr.bf16.mxu1 %v11681_v59  ;;  %v5012_v11 = vsel %vm864_vm0, %v5010_v43, %v5011_v16  ;;  %v5019_v0 = vsel %vm977_vm1, %v5017_v5, %v5018_v22  ;;  %v5014_v42 = vsel %vm864_vm0, %v5011_v16, %v5013_v47  ;;  %v5021_v14 = vsel %vm977_vm1, %v5018_v22, %v5020_v6  ;;  %v4717_v43 = vld [vmem:[#allocation3 + $0x120] sm:$0xff] }
 0x4e0   : > { %v11726_v50 = vpack.c.bf16 %v5014_v42, %v5012_v11  ;;  %v11731_v58 = vpack.c.bf16 %v5021_v14, %v5019_v0  ;;  %v4945_v18 = vrot.slane %v4711_v46, 2  ;;  %v4840_v35 = vsel %vm864_vm0, %v4838_v7, %v4839_v12 }
 0x4e1   : > { %5921 = vmatmul.mubr.bf16.gmra.mrb[92].mxu0 %v11684_v33  ;;  %v4842_v32 = vsel %vm864_vm0, %v4839_v12, %v4841_v15  ;;  %v4949_v19 = vsel %vm977_vm1, %v4946_v23, %v4948_v29  ;;  %v4844_v16 = vrot.slane %v4718_v38, 1  ;;  %v4846_v5 = vrot.slane %v4719_v10, 1  ;;  %v4721_v12 = vld [vmem:[#allocation3 + $0x140] sm:$0xff]  ;;  %v4722_v15 = vld [vmem:[#allocation3 + $0x148] sm:$0x3] }
 0x4e2   : > { %5928 = vmatprep.mubr.bf16.mxu0 %v11687_v8  ;;  %12454 = vst [vmem:[#allocation51_spill] sm:$0xff] %v11726_v50  ;;  %12455 = vst [vmem:[#allocation52_spill] sm:$0xff] %v11731_v58  ;;  %v4947_v20 = vsel %vm977_vm1, %v4945_v18, %v4946_v23  ;;  %v11739_v27 = vpack.c.bf16 %v4842_v32, %v4840_v35  ;;  %v4951_v22 = vrot.slane %v4715_v24, 2  ;;  %v4953_v39 = vrot.slane %v4716_v34, 2  ;;  %v4720_v34 = vld [vmem:[#allocation3 + $0x138] sm:$0xff] }
 0x4e3   : > { %v11742_v46 = vpack.c.bf16 %v4949_v19, %v4947_v20  ;;  %v4843_v30 = vrot.slane %v4717_v43, 1  ;;  %v11745_v11 = vpack.c.bf16 %v4718_v38, %v4717_v43  ;;  %v4950_v47 = vrot.slane %v4714_v41, 2 }
 0x4e4   : > { %v4847_v6 = vsel %vm864_vm0, %v4844_v16, %v4846_v5  ;;  %v4954_v23 = vsel %vm977_vm1, %v4951_v22, %v4953_v39  ;;  %v4849_v14 = vrot.slane %v4721_v12, 1  ;;  %v4851_v29 = vrot.slane %v4722_v15, 1 }
 0x4e5   : > { %v4845_v0 = vsel %vm864_vm0, %v4843_v30, %v4844_v16  ;;  %v4952_v42 = vsel %vm977_vm1, %v4950_v47, %v4951_v22  ;;  %v4956_v18 = vrot.slane %v4718_v38, 2  ;;  %v4958_v35 = vrot.slane %v4719_v10, 2  ;;  %v4725_v38 = vld [vmem:[#allocation3 + $0x160] sm:$0x3] }
 0x4e6   : > { %5768 = vmatmul.mubr.bf16.gmra.mrb[64].mxu1 %v11673_v3  ;;  %v11753_v24 = vpack.c.bf16 %v4847_v6, %v4845_v0  ;;  %v11756_v41 = vpack.c.bf16 %v4954_v23, %v4952_v42  ;;  %v4848_v32 = vrot.slane %v4720_v34, 1  ;;  %v11759_v20 = vpack.c.bf16 %v4721_v12, %v4720_v34  ;;  %v4724_v0 = vld [vmem:[#allocation3 + $0x158] sm:$0xff] }
 0x4e7   : > { %5775 = vmatprep.mubr.bf16.mxu1 %v11695_v31  ;;  %v4955_v22 = vrot.slane %v4717_v43, 2  ;;  %v4852_v30 = vsel %vm864_vm0, %v4849_v14, %v4851_v29  ;;  %v4959_v42 = vsel %vm977_vm1, %v4956_v18, %v4958_v35  ;;  %v4854_v43 = vrot.slane %v4724_v0, 1 }
 0x4e8   : > { %v4850_v39 = vsel %vm864_vm0, %v4848_v32, %v4849_v14  ;;  %v4961_v14 = vrot.slane %v4721_v12, 2  ;;  %v4963_v29 = vrot.slane %v4722_v15, 2  ;;  %v4726_v15 = vld [vmem:[#allocation3 + $0x168] sm:$0xff]  ;;  %v4968_v50 = vrot.slane %v4725_v38, 2 }
 0x4e9   : > { %5929 = vmatmul.mubr.bf16.gmra.mrb[96].mxu0 %v11698_v63  ;;  %v4957_v6 = vsel %vm977_vm1, %v4955_v22, %v4956_v18  ;;  %v11771_v23 = vpack.c.bf16 %v4852_v30, %v4850_v39  ;;  %v4960_v22 = vrot.slane %v4720_v34, 2  ;;  %v4727_v39 = vld [vmem:[#allocation3 + $0x170] sm:$0xff]  ;;  %v4728_v30 = vld [vmem:[#allocation3 + $0x178] sm:$0x3] }
 0x4ea   : > { %5936 = vmatprep.mubr.bf16.mxu0 %v11705_v62  ;;  %v11774_v17 = vpack.c.bf16 %v4959_v42, %v4957_v6  ;;  %v4964_v6 = vsel %vm977_vm1, %v4961_v14, %v4963_v29  ;;  %v4859_v42 = vrot.slane %v4727_v39, 1  ;;  %v4861_v58 = vrot.slane %v4728_v30, 1 }
 0x4ec   : > { %v4862_v29 = vsel %vm864_vm0, %v4859_v42, %v4861_v58  ;;  %v4970_v58 = vrot.slane %v4726_v15, 2 }
 0x4ee   : > { %5776 = vmatmul.mubr.bf16.gmra.mrb[68].mxu1 %v11687_v8 }
 0x4ef   : > { %5783 = vmatprep.mubr.bf16.mxu1 %v11718_v45 }
 0x4f1   : > { %5937 = vmatmul.mubr.bf16.gmra.mrb[100].mxu0 %v11723_v4 }
 0x4f2   : > { %5944 = vmatprep.mubr.bf16.mxu0 %v11729_v56 }
 0x4f6   : > { %5784 = vmatmul.mubr.bf16.gmra.mrb[72].mxu1 %v11705_v62 }
 0x4f7   : > { %5791 = vmatprep.mubr.bf16.mxu1 %v11739_v27  ;;  %v8001_v7 = vpop.f32.mrb[32].mxu1 }
 0x4f8   : > { %v8002_v19 = vpop.f32.mrb[33].mxu1 }
 0x4f9   : > { %5945 = vmatmul.mubr.bf16.gmra.mrb[104].mxu0 %v11742_v46  ;;  %v11762_v16 = vadd.f32 %v8002_v19, %v8001_v7  ;;  %v8004_v5 = vpop.f32.mrb[34].mxu1  ;;  %v4723_v7 = vld [vmem:[#allocation3 + $0x150] sm:$0xff]  ;;  %v4856_v19 = vrot.slane %v4725_v38, 1  ;;  %v4971_v38 = vrot.slane %v4727_v39, 2 }
 0x4fa   : > { %5952 = vmatprep.mubr.bf16.mxu0 %v11745_v11  ;;  %v8005_v47 = vpop.f32.mrb[35].mxu1  ;;  %v4853_v32 = vrot.slane %v4723_v7, 1 }
 0x4fb   : > { %v11767_v10 = vadd.f32 %v8005_v47, %v8004_v5  ;;  %v11777_v5 = vpack.c.bf16 %v4724_v0, %v4723_v7  ;;  %v4857_v35 = vsel %vm864_vm0, %v4854_v43, %v4856_v19  ;;  %v4962_v47 = vsel %vm977_vm1, %v4960_v22, %v4961_v14 }
 0x4fc   : > { %v4855_v18 = vsel %vm864_vm0, %v4853_v32, %v4854_v43  ;;  %v11788_v34 = vpack.c.bf16 %v4964_v6, %v4962_v47  ;;  %v4966_v32 = vrot.slane %v4724_v0, 2  ;;  %v4858_v43 = vrot.slane %v4726_v15, 1 }
 0x4fd   : > { %v11785_v12 = vpack.c.bf16 %v4857_v35, %v4855_v18  ;;  %v11791_v19 = vpack.c.bf16 %v4727_v39, %v4726_v15  ;;  %v4965_v22 = vrot.slane %v4723_v7, 2  ;;  %v4973_v7 = vrot.slane %v4728_v30, 2 }
 0x4fe   : > { %5792 = vmatmul.mubr.bf16.gmra.mrb[76].mxu1 %v11729_v56  ;;  %v4860_v14 = vsel %vm864_vm0, %v4858_v43, %v4859_v42  ;;  %v4969_v35 = vsel %vm977_vm1, %v4966_v32, %v4968_v50  ;;  %v11807_v6 = vpack.c.bf16 %v11703_v54, %v11701_v53  ;;  %v4972_v50 = vsel %vm977_vm1, %v4970_v58, %v4971_v38  ;;  %v8960_v53 = vld [vmem:[#allocation10 + $0x208] sm:$0xff]   ;;  %v8961_v54 = vld [vmem:[#allocation10 + $0x210] sm:$0xff]  }
 0x4ff   : > { %5799 = vmatprep.mubr.bf16.mxu1 %v11753_v24  ;;  %v4967_v18 = vsel %vm977_vm1, %v4965_v22, %v4966_v32  ;;  %v11799_v47 = vpack.c.bf16 %v4862_v29, %v4860_v14  ;;  %v4974_v42 = vsel %vm977_vm1, %v4971_v38, %v4973_v7  ;;  %v11882_v22 = vld [vmem:[#allocation3 + $0x1a8] sm:$0x3]  ;;  %v11886_v38 = vld [vmem:[#allocation2] sm:$0xff] }
 0x500   : > { %v11802_v0 = vpack.c.bf16 %v4969_v35, %v4967_v18  ;;  %v11814_v32 = vpack.c.bf16 %v4974_v42, %v4972_v50  ;;  %v5027_v7 = vrot.slane %v11886_v38, 1  ;;  %v5030_v58 = vrot.slane %v11882_v22, 1 }
 0x501   : > { %5953 = vmatmul.mubr.bf16.gmra.mrb[108].mxu0 %v11756_v41 }
 0x502   : > { %5960 = vmatprep.mubr.bf16.mxu0 %v11759_v20 }
 0x506   : > { %5800 = vmatmul.mubr.bf16.gmra.mrb[80].mxu1 %v11745_v11 }
 0x507   : > { %5807 = vmatprep.mubr.bf16.mxu1 %v11771_v23 }
 0x509   : > { %5961 = vmatmul.mubr.bf16.gmra.mrb[112].mxu0 %v11774_v17 }
 0x50a   : > { %5968 = vmatprep.mubr.bf16.mxu0 %v11777_v5 }
 0x50e   : > { %5808 = vmatmul.mubr.bf16.gmra.mrb[84].mxu1 %v11759_v20 }
 0x50f   : > { %5815 = vmatprep.mubr.bf16.mxu1 %v11785_v12 }
 0x511   : > { %5969 = vmatmul.mubr.bf16.gmra.mrb[116].mxu0 %v11788_v34 }
 0x512   : > { %5976 = vmatprep.mubr.bf16.mxu0 %v11791_v19 }
 0x516   : > { %5816 = vmatmul.mubr.bf16.gmra.mrb[88].mxu1 %v11777_v5 }
 0x517   : > { %5823 = vmatprep.mubr.bf16.mxu1 %v11799_v47 }
 0x519   : > { %5977 = vmatmul.mubr.bf16.gmra.mrb[120].mxu0 %v11802_v0 }
 0x51a   : > { %5984 = vmatprep.mubr.bf16.mxu0 %v11807_v6 }
 0x51e   : > { %5824 = vmatmul.mubr.bf16.gmra.mrb[92].mxu1 %v11791_v19 }
 0x51f   : > { %6025 = vmatprep.mubr.bf16.mxu1 %v11487_v26  ;;  %v8962_v26 = vld [vmem:[#allocation10 + $0x218] sm:$0xff]  }
 0x521   : > { %5985 = vmatmul.mubr.bf16.gmra.mrb[124].mxu0 %v11814_v32 }
 0x522   : > { %6186 = vmatprep.mubr.bf16.mxu0 %v11478_v2 }
 0x526   : > { %6026 = vmatmul.mubr.bf16.vlgmr.msra.gmra.mrb[96].mxu1 %v11467_v48  ;;  %v8963_v48 = vld [vmem:[#allocation10 + $0x220] sm:$0xff]  }
 0x527   : > { %6033 = vmatprep.mubr.bf16.mxu1 %v11530_v52  ;;  %8602 = vmatpush3.bf16.msra.mxu1 %v11446_v37  ;;  %v8964_v37 = vld [vmem:[#allocation10 + $0x228] sm:$0xff]  }
 0x528   : > { %8603 = vmatprep.subr.bf16.mxu1 %v8960_v53 }
 0x529   : > { %6187 = vmatmul.mubr.bf16.vlgmr.msra.gmra.mrb[128].mxu0 %v11452_v21  ;;  %v8965_v21 = vld [vmem:[#allocation10 + $0x230] sm:$0xff]  }
 0x52a   : > { %6194 = vmatprep.mubr.bf16.mxu0 %v11521_v40 }
 0x52b   : > { %8604 = vmatpush3.bf16.msra.mxu1 %v8960_v53 }
 0x52c   : > { %8605 = vmatprep.subr.bf16.mxu1 %v8961_v54 }
 0x52e   : > { %6034 = vmatmul.mubr.bf16.gmra.mrb[100].mxu1 %v11478_v2  ;;  %v8966_v2 = vld [vmem:[#allocation10 + $0x238] sm:$0xff]  }
 0x52f   : > { %6041 = vmatprep.mubr.bf16.mxu1 %v11557_v57  ;;  %8606 = vmatpush3.bf16.msra.mxu1 %v8961_v54 }
 0x530   : > { %8607 = vmatprep.subr.bf16.mxu1 %v8962_v26 }
 0x531   : > { %6195 = vmatmul.mubr.bf16.gmra.mrb[132].mxu0 %v11501_v61 }
 0x532   : > { %6202 = vmatprep.mubr.bf16.mxu0 %v11561_v51 }
 0x533   : > { %8608 = vmatpush3.bf16.msra.mxu1 %v8962_v26  ;;  %v12456_v26 = vld [vmem:[#allocation51_spill] sm:$0xff] }
 0x534   : > { %8609 = vmatprep.subr.bf16.mxu1 %v8963_v48 }
 0x536   : > { %6042 = vmatmul.mubr.bf16.gmra.mrb[104].mxu1 %v11521_v40 }
 0x537   : > { %6049 = vmatprep.mubr.bf16.mxu1 %v11610_v60  ;;  %8610 = vmatpush3.bf16.msra.mxu1 %v8963_v48 }
 0x538   : > { %8611 = vmatprep.subr.bf16.mxu1 %v8964_v37 }
 0x539   : > { %6203 = vmatmul.mubr.bf16.gmra.mrb[136].mxu0 %v11539_v1 }
 0x53a   : > { %6210 = vmatprep.mubr.bf16.mxu0 %v11601_v9 }
 0x53b   : > { %8612 = vmatpush3.bf16.msra.mxu1 %v8964_v37 }
 0x53c   : > { %8613 = vmatprep.subr.bf16.mxu1 %v8965_v21 }
 0x53e   : > { %6050 = vmatmul.mubr.bf16.gmra.mrb[108].mxu1 %v11561_v51 }
 0x53f   : > { %6057 = vmatprep.mubr.bf16.mxu1 %v11637_v36  ;;  %8614 = vmatpush3.bf16.msra.mxu1 %v8965_v21  ;;  %v5031_v21 = vsel %vm864_vm0, %v5027_v7, %v5030_v58 }
 0x540   : > { %8615 = vmatprep.subr.bf16.mxu1 %v8966_v2 }
 0x541   : > { %6211 = vmatmul.mubr.bf16.gmra.mrb[140].mxu0 %v11579_v49 }
 0x542   : > { %6218 = vmatprep.mubr.bf16.mxu0 %v11641_v13 }
 0x543   : > { %8616 = vmatpush3.bf16.msra.mxu1 %v8966_v2 }
 0x546   : > { %6058 = vmatmul.mubr.bf16.gmra.mrb[112].mxu1 %v11601_v9 }
 0x547   : > { %6065 = vmatprep.mubr.bf16.mxu1 %v11668_v44 }
 0x549   : > { %6219 = vmatmul.mubr.bf16.gmra.mrb[144].mxu0 %v11620_v25 }
 0x54a   : > { %6226 = vmatprep.mubr.bf16.mxu0 %v11665_v28 }
 0x54e   : > { %6066 = vmatmul.mubr.bf16.gmra.mrb[116].mxu1 %v11641_v13 }
 0x54f   : > { %6073 = vmatprep.mubr.bf16.mxu1 %v11684_v33 }
 0x551   : > { %6227 = vmatmul.mubr.bf16.gmra.mrb[148].mxu0 %v11655_v55 }
 0x552   : > { %6234 = vmatprep.mubr.bf16.mxu0 %v11681_v59 }
 0x556   : > { %6074 = vmatmul.mubr.bf16.gmra.mrb[120].mxu1 %v11665_v28 }
 0x557   : > { %6081 = vmatprep.mubr.bf16.mxu1 %v11698_v63 }
 0x559   : > { %6235 = vmatmul.mubr.bf16.gmra.mrb[152].mxu0 %v11673_v3 }
 0x55a   : > { %6242 = vmatprep.mubr.bf16.mxu0 %v11695_v31 }
 0x55e   : > { %6082 = vmatmul.mubr.bf16.gmra.mrb[124].mxu1 %v11681_v59 }
 0x55f   : > { %6089 = vmatprep.mubr.bf16.mxu1 %v11723_v4 }
 0x561   : > { %6243 = vmatmul.mubr.bf16.gmra.mrb[156].mxu0 %v11687_v8 }
 0x562   : > { %6250 = vmatprep.mubr.bf16.mxu0 %v11718_v45 }
 0x566   : > { %6090 = vmatmul.mubr.bf16.gmra.mrb[128].mxu1 %v11695_v31 }
 0x567   : > { %6097 = vmatprep.mubr.bf16.mxu1 %v11742_v46 }
 0x569   : > { %6251 = vmatmul.mubr.bf16.gmra.mrb[160].mxu0 %v11705_v62 }
 0x56a   : > { %6258 = vmatprep.mubr.bf16.mxu0 %v11739_v27 }
 0x56e   : > { %6098 = vmatmul.mubr.bf16.gmra.mrb[132].mxu1 %v11718_v45 }
 0x56f   : > { %6105 = vmatprep.mubr.bf16.mxu1 %v11756_v41 }
 0x571   : > { %6259 = vmatmul.mubr.bf16.gmra.mrb[164].mxu0 %v11729_v56 }
 0x572   : > { %6266 = vmatprep.mubr.bf16.mxu0 %v11753_v24 }
 0x576   : > { %6106 = vmatmul.mubr.bf16.gmra.mrb[136].mxu1 %v11739_v27 }
 0x577   : > { %6113 = vmatprep.mubr.bf16.mxu1 %v11774_v17 }
 0x579   : > { %6267 = vmatmul.mubr.bf16.gmra.mrb[168].mxu0 %v11745_v11 }
 0x57a   : > { %6274 = vmatprep.mubr.bf16.mxu0 %v11771_v23 }
 0x57c   : > { %v8113_v61 = vpop.f32.mrb[64].mxu0 }
 0x57d   : > { %v8114_v40 = vpop.f32.mrb[65].mxu0 }
 0x57e   : > { %6114 = vmatmul.mubr.bf16.gmra.mrb[140].mxu1 %v11753_v24  ;;  %v8115_v1 = vadd.f32 %v8114_v40, %v8113_v61  ;;  %v8116_v51 = vpop.f32.mrb[66].mxu0 }
 0x57f   : > { %6121 = vmatprep.mubr.bf16.mxu1 %v11788_v34  ;;  %v8117_v49 = vpop.f32.mrb[67].mxu0 }
 0x580   : > { %v11867_v9 = vadd.f32 %v8115_v1, %v11762_v16  ;;  %v8118_v25 = vadd.f32 %v8117_v49, %v8116_v51 }
 0x581   : > { %v8007_v13 = vpop.f32.mrb[36].mxu1  ;;  %6275 = vmatmul.mubr.bf16.gmra.mrb[172].mxu0 %v11759_v20 }
 0x582   : > { %v11871_v55 = vadd.f32 %v8118_v25, %v11767_v10  ;;  %v8008_v28 = vpop.f32.mrb[37].mxu1  ;;  %6282 = vmatprep.mubr.bf16.mxu0 %v11785_v12  ;;  %v5093_v25 = vpack.c.bf16 %v5031_v21, %v5027_v7 }
 0x583   : > { %v8009_v3 = vadd.f32 %v8008_v28, %v8007_v13  ;;  %v8010_v59 = vpop.f32.mrb[38].mxu1  ;;  %v12457_v13 = vld [vmem:[#allocation52_spill] sm:$0xff] }
 0x584   : > { %v8011_v8 = vpop.f32.mrb[39].mxu1  ;;  %v8119_v31 = vpop.f32.mrb[68].mxu0 }
 0x585   : > { %v8012_v62 = vadd.f32 %v8011_v8, %v8010_v59  ;;  %v8120_v45 = vpop.f32.mrb[69].mxu0 }
 0x586   : > { %6122 = vmatmul.mubr.bf16.gmra.mrb[144].mxu1 %v11771_v23  ;;  %v8121_v56 = vadd.f32 %v8120_v45, %v8119_v31  ;;  %v8122_v27 = vpop.f32.mrb[70].mxu0 }
 0x587   : > { %6129 = vmatprep.mubr.bf16.mxu1 %v11802_v0  ;;  %v8123_v11 = vpop.f32.mrb[71].mxu0 }
 0x588   : > { %v11876_v24 = vadd.f32 %v8121_v56, %v8009_v3  ;;  %v8124_v20 = vadd.f32 %v8123_v11, %v8122_v27 }
 0x589   : > { %v8013_v16 = vpop.f32.mrb[40].mxu1  ;;  %6283 = vmatmul.mubr.bf16.gmra.mrb[176].mxu0 %v11777_v5 }
 0x58a   : > { %v11879_v10 = vadd.f32 %v8124_v20, %v8012_v62  ;;  %v8014_v39 = vpop.f32.mrb[41].mxu1  ;;  %6290 = vmatprep.mubr.bf16.mxu0 %v11799_v47  ;;  %v5092_v20 = vpack.c.bf16 %v11886_v38, %v11886_v38 }
 0x58b   : > { %v8015_v30 = vadd.f32 %v8014_v39, %v8013_v16  ;;  %v8016_v15 = vpop.f32.mrb[42].mxu1 }
 0x58c   : > { %v8017_v43 = vpop.f32.mrb[43].mxu1  ;;  %v8125_v23 = vpop.f32.mrb[72].mxu0 }
 0x58d   : > { %v8018_v14 = vadd.f32 %v8017_v43, %v8016_v15  ;;  %v8126_v29 = vpop.f32.mrb[73].mxu0 }
 0x58e   : > { %6130 = vmatmul.mubr.bf16.gmra.mrb[148].mxu1 %v11785_v12  ;;  %v8127_v18 = vadd.f32 %v8126_v29, %v8125_v23  ;;  %v8128_v35 = vpop.f32.mrb[74].mxu0 }
 0x58f   : > { %6137 = vmatprep.mubr.bf16.mxu1 %v11814_v32  ;;  %v8129_v5 = vpop.f32.mrb[75].mxu0 }
 0x590   : > { %v11890_v50 = vadd.f32 %v8127_v18, %v8015_v30  ;;  %v8130_v42 = vadd.f32 %v8129_v5, %v8128_v35 }
 0x591   : > { %v8019_v53 = vpop.f32.mrb[44].mxu1  ;;  %6291 = vmatmul.mubr.bf16.gmra.mrb[180].mxu0 %v11791_v19 }
 0x592   : > { %v11893_v54 = vadd.f32 %v8130_v42, %v8018_v14  ;;  %v8020_v12 = vpop.f32.mrb[45].mxu1  ;;  %6298 = vmatprep.mubr.bf16.mxu0 %v12456_v26 }
 0x593   : > { %v8021_v48 = vadd.f32 %v8020_v12, %v8019_v53  ;;  %v8022_v37 = vpop.f32.mrb[46].mxu1 }
 0x594   : > { %v8023_v2 = vpop.f32.mrb[47].mxu1  ;;  %v8131_v61 = vpop.f32.mrb[76].mxu0 }
 0x595   : > { %v8024_v40 = vadd.f32 %v8023_v2, %v8022_v37  ;;  %v8132_v1 = vpop.f32.mrb[77].mxu0 }
 0x596   : > { %6138 = vmatmul.mubr.bf16.gmra.mrb[152].mxu1 %v11799_v47  ;;  %v8133_v51 = vadd.f32 %v8132_v1, %v8131_v61  ;;  %v8134_v49 = vpop.f32.mrb[78].mxu0 }
 0x597   : > { %6145 = vmatprep.mubr.bf16.mxu1 %v12457_v13  ;;  %v8135_v19 = vpop.f32.mrb[79].mxu0 }
 0x598   : > { %v11899_v28 = vadd.f32 %v8133_v51, %v8021_v48  ;;  %v8136_v3 = vadd.f32 %v8135_v19, %v8134_v49 }
 0x599   : > { %v8025_v59 = vpop.f32.mrb[48].mxu1  ;;  %6299 = vmatmul.mubr.bf16.gmra.mrb[184].mxu0 %v11807_v6 }
 0x59a   : > { %v11902_v8 = vadd.f32 %v8136_v3, %v8024_v40  ;;  %v8026_v31 = vpop.f32.mrb[49].mxu1  ;;  %6306 = vmatprep.mubr.bf16.mxu0 %v5093_v25 }
 0x59b   : > { %v8027_v62 = vadd.f32 %v8026_v31, %v8025_v59  ;;  %v8028_v45 = vpop.f32.mrb[50].mxu1 }
 0x59c   : > { %v8029_v56 = vpop.f32.mrb[51].mxu1  ;;  %v8137_v47 = vpop.f32.mrb[80].mxu0 }
 0x59d   : > { %v8030_v27 = vadd.f32 %v8029_v56, %v8028_v45  ;;  %v8138_v11 = vpop.f32.mrb[81].mxu0 }
 0x59e   : > { %6146 = vmatmul.mubr.bf16.gmra.mrb[156].mxu1 %v12456_v26  ;;  %v8139_v16 = vadd.f32 %v8138_v11, %v8137_v47  ;;  %v8140_v39 = vpop.f32.mrb[82].mxu0 }
 0x59f   : > { %8617 = vmatprep.mubr.bf16.mxu1 %v11530_v52  ;;  %v8141_v6 = vpop.f32.mrb[83].mxu0 }
 0x5a0   : > { %v11908_v30 = vadd.f32 %v8139_v16, %v8027_v62  ;;  %v8142_v15 = vadd.f32 %v8141_v6, %v8140_v39 }
 0x5a1   : > { %v8031_v43 = vpop.f32.mrb[52].mxu1  ;;  %6307 = vmatmul.mubr.bf16.gmra.mrb[188].mxu0 %v5092_v20 }
 0x5a2   : > { %v11910_v23 = vadd.f32 %v8142_v15, %v8030_v27  ;;  %v8032_v14 = vpop.f32.mrb[53].mxu1 }
 0x5a3   : > { %v8033_v29 = vadd.f32 %v8032_v14, %v8031_v43  ;;  %v8034_v18 = vpop.f32.mrb[54].mxu1 }
 0x5a4   : > { %v8035_v35 = vpop.f32.mrb[55].mxu1  ;;  %v8143_v5 = vpop.f32.mrb[84].mxu0 }
 0x5a5   : > { %v8036_v7 = vadd.f32 %v8035_v35, %v8034_v18  ;;  %v8144_v58 = vpop.f32.mrb[85].mxu0 }
 0x5a6   : > { %8618 = vmatmul.mubr.bf16.vlgmr.msra.gmra.mrb[160].mxu1 %v11557_v57  ;;  %v8145_v42 = vadd.f32 %v8144_v58, %v8143_v5  ;;  %v8146_v53 = vpop.f32.mrb[86].mxu0 }
 0x5a7   : > { %8621 = vmatprep.mubr.bf16.mxu1 %v11610_v60  ;;  %v8147_v52 = vpop.f32.mrb[87].mxu0 }
 0x5a8   : > { %v11914_v12 = vadd.f32 %v8145_v42, %v8033_v29  ;;  %v8148_v26 = vadd.f32 %v8147_v52, %v8146_v53 }
 0x5a9   : > { %v8037_v48 = vpop.f32.mrb[56].mxu1 }
 0x5aa   : > { %v11916_v37 = vadd.f32 %v8148_v26, %v8036_v7  ;;  %v8038_v21 = vpop.f32.mrb[57].mxu1 }
 0x5ab   : > { %v8039_v2 = vadd.f32 %v8038_v21, %v8037_v48  ;;  %v8040_v61 = vpop.f32.mrb[58].mxu1 }
 0x5ac   : > { %v8041_v40 = vpop.f32.mrb[59].mxu1  ;;  %v8149_v1 = vpop.f32.mrb[88].mxu0 }
 0x5ad   : > { %v8042_v51 = vadd.f32 %v8041_v40, %v8040_v61  ;;  %v8150_v49 = vpop.f32.mrb[89].mxu0 }
 0x5ae   : > { %8622 = vmatmul.mubr.bf16.gmra.mrb[164].mxu1 %v11637_v36  ;;  %v8151_v57 = vadd.f32 %v8150_v49, %v8149_v1  ;;  %v8152_v25 = vpop.f32.mrb[90].mxu0 }
 0x5af   : > { %8625 = vmatprep.mubr.bf16.mxu1 %v11668_v44  ;;  %v8153_v60 = vpop.f32.mrb[91].mxu0 }
 0x5b0   : > { %v11920_v19 = vadd.f32 %v8151_v57, %v8039_v2  ;;  %v8154_v3 = vadd.f32 %v8153_v60, %v8152_v25 }
 0x5b1   : > { %v8043_v59 = vpop.f32.mrb[60].mxu1 }
 0x5b2   : > { %v11922_v31 = vadd.f32 %v8154_v3, %v8042_v51  ;;  %v8044_v62 = vpop.f32.mrb[61].mxu1 }
 0x5b3   : > { %v8045_v45 = vadd.f32 %v8044_v62, %v8043_v59  ;;  %v8046_v56 = vpop.f32.mrb[62].mxu1 }
 0x5b4   : > { %v8047_v47 = vpop.f32.mrb[63].mxu1  ;;  %v8155_v27 = vpop.f32.mrb[92].mxu0 }
 0x5b5   : > { %v8048_v11 = vadd.f32 %v8047_v47, %v8046_v56  ;;  %v8156_v20 = vpop.f32.mrb[93].mxu0 }
 0x5b6   : > { %8626 = vmatmul.mubr.bf16.gmra.mrb[168].mxu1 %v11684_v33  ;;  %v8157_v36 = vadd.f32 %v8156_v20, %v8155_v27  ;;  %v8158_v16 = vpop.f32.mrb[94].mxu0 }
 0x5b7   : > { %8629 = vmatprep.mubr.bf16.mxu1 %v11698_v63  ;;  %v8159_v44 = vpop.f32.mrb[95].mxu0 }
 0x5b8   : > { %v11926_v39 = vadd.f32 %v8157_v36, %v8045_v45  ;;  %v8160_v6 = vadd.f32 %v8159_v44, %v8158_v16 }
 0x5b9   : > { %v8049_v15 = vpop.f32.mrb[64].mxu1 }
 0x5ba   : > { %v11928_v43 = vadd.f32 %v8160_v6, %v8048_v11  ;;  %v8050_v14 = vpop.f32.mrb[65].mxu1 }
 0x5bb   : > { %v8051_v29 = vadd.f32 %v8050_v14, %v8049_v15  ;;  %v8052_v18 = vpop.f32.mrb[66].mxu1 }
 0x5bc   : > { %v8053_v35 = vpop.f32.mrb[67].mxu1  ;;  %v8161_v5 = vpop.f32.mrb[96].mxu0 }
 0x5bd   : > { %v8054_v7 = vadd.f32 %v8053_v35, %v8052_v18  ;;  %v8162_v58 = vpop.f32.mrb[97].mxu0  ;;  %v5037_v18 = vrot.slane %v11882_v22, 2 }
 0x5be   : > { %8630 = vmatmul.mubr.bf16.gmra.mrb[172].mxu1 %v11723_v4  ;;  %v8163_v33 = vadd.f32 %v8162_v58, %v8161_v5  ;;  %v8164_v42 = vpop.f32.mrb[98].mxu0 }
 0x5bf   : > { %8633 = vmatprep.mubr.bf16.mxu1 %v11742_v46  ;;  %v8165_v63 = vpop.f32.mrb[99].mxu0 }
 0x5c0   : > { %v11932_v53 = vadd.f32 %v8163_v33, %v8051_v29  ;;  %v8166_v52 = vadd.f32 %v8165_v63, %v8164_v42  ;;  %v5034_v29 = vrot.slane %v11886_v38, 2 }
 0x5c1   : > { %v8055_v26 = vpop.f32.mrb[68].mxu1 }
 0x5c2   : > { %v11934_v48 = vadd.f32 %v8166_v52, %v8054_v7  ;;  %v8056_v21 = vpop.f32.mrb[69].mxu1  ;;  %v5038_v63 = vsel %vm977_vm1, %v5034_v29, %v5037_v18 }
 0x5c3   : > { %v8057_v2 = vadd.f32 %v8056_v21, %v8055_v26  ;;  %v8058_v61 = vpop.f32.mrb[70].mxu1  ;;  %v5094_v22 = vpack.c.bf16 %v5038_v63, %v5034_v29 }
 0x5c4   : > { %v8059_v40 = vpop.f32.mrb[71].mxu1  ;;  %v8167_v1 = vpop.f32.mrb[100].mxu0 }
 0x5c5   : > { %v8060_v51 = vadd.f32 %v8059_v40, %v8058_v61  ;;  %v8168_v49 = vpop.f32.mrb[101].mxu0 }
 0x5c6   : > { %8634 = vmatmul.mubr.bf16.gmra.mrb[176].mxu1 %v11756_v41  ;;  %v8169_v4 = vadd.f32 %v8168_v49, %v8167_v1  ;;  %v8170_v57 = vpop.f32.mrb[102].mxu0 }
 0x5c7   : > { %8637 = vmatprep.mubr.bf16.mxu1 %v11774_v17  ;;  %v8171_v46 = vpop.f32.mrb[103].mxu0 }
 0x5c8   : > { %v11938_v25 = vadd.f32 %v8169_v4, %v8057_v2  ;;  %v8172_v60 = vadd.f32 %v8171_v46, %v8170_v57 }
 0x5c9   : > { %v8061_v3 = vpop.f32.mrb[72].mxu1 }
 0x5ca   : > { %v11940_v59 = vadd.f32 %v8172_v60, %v8060_v51  ;;  %v8062_v62 = vpop.f32.mrb[73].mxu1 }
 0x5cb   : > { %v8063_v45 = vadd.f32 %v8062_v62, %v8061_v3  ;;  %v8064_v56 = vpop.f32.mrb[74].mxu1 }
 0x5cc   : > { %v8065_v47 = vpop.f32.mrb[75].mxu1  ;;  %v8173_v27 = vpop.f32.mrb[104].mxu0 }
 0x5cd   : > { %v8066_v11 = vadd.f32 %v8065_v47, %v8064_v56  ;;  %v8174_v20 = vpop.f32.mrb[105].mxu0 }
 0x5ce   : > { %8638 = vmatmul.mubr.bf16.gmra.mrb[180].mxu1 %v11788_v34  ;;  %v8175_v41 = vadd.f32 %v8174_v20, %v8173_v27  ;;  %v8176_v36 = vpop.f32.mrb[106].mxu0 }
 0x5cf   : > { %8641 = vmatprep.mubr.bf16.mxu1 %v11802_v0  ;;  %v8177_v17 = vpop.f32.mrb[107].mxu0 }
 0x5d0   : > { %v11944_v16 = vadd.f32 %v8175_v41, %v8063_v45  ;;  %v8178_v44 = vadd.f32 %v8177_v17, %v8176_v36 }
 0x5d1   : > { %v8067_v6 = vpop.f32.mrb[76].mxu1 }
 0x5d2   : > { %v11946_v15 = vadd.f32 %v8178_v44, %v8066_v11  ;;  %v8068_v14 = vpop.f32.mrb[77].mxu1 }
 0x5d3   : > { %v8069_v35 = vadd.f32 %v8068_v14, %v8067_v6  ;;  %v8070_v5 = vpop.f32.mrb[78].mxu1 }
 0x5d4   : > { %v8071_v7 = vpop.f32.mrb[79].mxu1  ;;  %v8179_v34 = vpop.f32.mrb[108].mxu0 }
 0x5d5   : > { %v8072_v58 = vadd.f32 %v8071_v7, %v8070_v5  ;;  %v8180_v33 = vpop.f32.mrb[109].mxu0 }
 0x5d6   : > { %8642 = vmatmul.mubr.bf16.gmra.mrb[184].mxu1 %v11814_v32  ;;  %v8181_v0 = vadd.f32 %v8180_v33, %v8179_v34  ;;  %v8182_v42 = vpop.f32.mrb[110].mxu0 }
 0x5d7   : > { %8645 = vmatprep.mubr.bf16.mxu1 %v12457_v13  ;;  %v8183_v52 = vpop.f32.mrb[111].mxu0 }
 0x5d8   : > { %v11953_v26 = vadd.f32 %v8181_v0, %v8069_v35  ;;  %v8184_v38 = vadd.f32 %v8183_v52, %v8182_v42 }
 0x5d9   : > { %v8073_v21 = vpop.f32.mrb[80].mxu1 }
 0x5da   : > { %v11955_v2 = vadd.f32 %v8184_v38, %v8072_v58  ;;  %v8074_v61 = vpop.f32.mrb[81].mxu1 }
 0x5db   : > { %v8075_v40 = vadd.f32 %v8074_v61, %v8073_v21  ;;  %v8076_v1 = vpop.f32.mrb[82].mxu1 }
 0x5dc   : > { %v8077_v51 = vpop.f32.mrb[83].mxu1  ;;  %v8185_v49 = vpop.f32.mrb[112].mxu0 }
 0x5dd   : > { %v8078_v32 = vadd.f32 %v8077_v51, %v8076_v1  ;;  %v8186_v4 = vpop.f32.mrb[113].mxu0 }
 0x5de   : > { %8646 = vmatmul.mubr.bf16.gmra.mrb[188].mxu1 %v5094_v22  ;;  %v8187_v57 = vadd.f32 %v8186_v4, %v8185_v49  ;;  %v8188_v46 = vpop.f32.mrb[114].mxu0 }
 0x5df   : > { %v8189_v60 = vpop.f32.mrb[115].mxu0 }
 0x5e0   : > { %v11957_v13 = vadd.f32 %v8187_v57, %v8075_v40  ;;  %v8190_v3 = vadd.f32 %v8189_v60, %v8188_v46 }
 0x5e1   : > { %v8079_v62 = vpop.f32.mrb[84].mxu1 }
 0x5e2   : > { %v11959_v45 = vadd.f32 %v8190_v3, %v8078_v32  ;;  %v8080_v56 = vpop.f32.mrb[85].mxu1 }
 0x5e3   : > { %v8081_v47 = vadd.f32 %v8080_v56, %v8079_v62  ;;  %v8082_v27 = vpop.f32.mrb[86].mxu1 }
 0x5e4   : > { %v8083_v11 = vpop.f32.mrb[87].mxu1  ;;  %v8191_v20 = vpop.f32.mrb[116].mxu0 }
 0x5e5   : > { %v8084_v41 = vadd.f32 %v8083_v11, %v8082_v27  ;;  %v8192_v36 = vpop.f32.mrb[117].mxu0 }
 0x5e6   : > { %v8193_v17 = vadd.f32 %v8192_v36, %v8191_v20  ;;  %v8194_v44 = vpop.f32.mrb[118].mxu0 }
 0x5e7   : > { %v8195_v6 = vpop.f32.mrb[119].mxu0 }
 0x5e8   : > { %v11961_v14 = vadd.f32 %v8193_v17, %v8081_v47  ;;  %v8196_v29 = vadd.f32 %v8195_v6, %v8194_v44 }
 0x5e9   : > { %v8085_v18 = vpop.f32.mrb[88].mxu1 }
 0x5ea   : > { %v11963_v35 = vadd.f32 %v8196_v29, %v8084_v41  ;;  %v8086_v5 = vpop.f32.mrb[89].mxu1 }
 0x5eb   : > { %v8087_v7 = vadd.f32 %v8086_v5, %v8085_v18  ;;  %v8088_v34 = vpop.f32.mrb[90].mxu1 }
 0x5ec   : > { %v8089_v58 = vpop.f32.mrb[91].mxu1  ;;  %v8197_v33 = vpop.f32.mrb[120].mxu0 }
 0x5ed   : > { %v8090_v0 = vadd.f32 %v8089_v58, %v8088_v34  ;;  %v8198_v42 = vpop.f32.mrb[121].mxu0 }
 0x5ee   : > { %v8199_v63 = vadd.f32 %v8198_v42, %v8197_v33  ;;  %v8200_v52 = vpop.f32.mrb[122].mxu0 }
 0x5ef   : > { %v8201_v38 = vpop.f32.mrb[123].mxu0 }
 0x5f0   : > { %v11965_v21 = vadd.f32 %v8199_v63, %v8087_v7  ;;  %v8202_v22 = vadd.f32 %v8201_v38, %v8200_v52 }
 0x5f1   : > { %v8091_v61 = vpop.f32.mrb[92].mxu1 }
 0x5f2   : > { %v11967_v40 = vadd.f32 %v8202_v22, %v8090_v0  ;;  %v8092_v1 = vpop.f32.mrb[93].mxu1 }
 0x5f3   : > { %v8093_v51 = vadd.f32 %v8092_v1, %v8091_v61  ;;  %v8094_v49 = vpop.f32.mrb[94].mxu1 }
 0x5f4   : > { %v8095_v32 = vpop.f32.mrb[95].mxu1  ;;  %v8203_v4 = vpop.f32.mrb[124].mxu0 }
 0x5f5   : > { %v8096_v57 = vadd.f32 %v8095_v32, %v8094_v49  ;;  %v8204_v46 = vpop.f32.mrb[125].mxu0 }
 0x5f6   : > { %v8205_v60 = vadd.f32 %v8204_v46, %v8203_v4  ;;  %v8206_v3 = vpop.f32.mrb[126].mxu0 }
 0x5f7   : > { %v8207_v62 = vpop.f32.mrb[127].mxu0 }
 0x5f8   : > { %v11969_v56 = vadd.f32 %v8205_v60, %v8093_v51  ;;  %v8208_v47 = vadd.f32 %v8207_v62, %v8206_v3 }
 0x5f9   : > { %v8225_v27 = vpop.f32.mrb[96].mxu1 }
 0x5fa   : > { %v11971_v11 = vadd.f32 %v8208_v47, %v8096_v57  ;;  %v8226_v20 = vpop.f32.mrb[97].mxu1 }
 0x5fb   : > { %v8227_v41 = vadd.f32 %v8226_v20, %v8225_v27  ;;  %v8228_v36 = vpop.f32.mrb[98].mxu1 }
 0x5fc   : > { %v8229_v17 = vpop.f32.mrb[99].mxu1  ;;  %v8337_v44 = vpop.f32.mrb[128].mxu0 }
 0x5fd   : > { %v6028_v6 = vadd.f32 %v8227_v41, %v11867_v9  ;;  %v8230_v29 = vadd.f32 %v8229_v17, %v8228_v36  ;;  %v8338_v18 = vpop.f32.mrb[129].mxu0 }
 0x5fe   : > { %v8339_v5 = vadd.f32 %v8338_v18, %v8337_v44  ;;  %v8340_v7 = vpop.f32.mrb[130].mxu0 }
 0x5ff   : > { %v6031_v34 = vadd.f32 %v8230_v29, %v11871_v55  ;;  %v8341_v58 = vpop.f32.mrb[131].mxu0 }
 0x600   : > { %v8342_v33 = vadd.f32 %v8341_v58, %v8340_v7  ;;  %v11975_v0 = vadd.f32 %v8339_v5, %v6028_v6 }
 0x601   : > { %v8231_v42 = vpop.f32.mrb[100].mxu1 }
 0x602   : > { %v8232_v63 = vpop.f32.mrb[101].mxu1  ;;  %v11977_v52 = vadd.f32 %v8342_v33, %v6031_v34 }
 0x603   : > { %v8233_v38 = vadd.f32 %v8232_v63, %v8231_v42  ;;  %v8234_v22 = vpop.f32.mrb[102].mxu1 }
 0x604   : > { %v8235_v61 = vpop.f32.mrb[103].mxu1  ;;  %v8343_v1 = vpop.f32.mrb[132].mxu0 }
 0x605   : > { %v6036_v9 = vadd.f32 %v8233_v38, %v11876_v24  ;;  %v8236_v51 = vadd.f32 %v8235_v61, %v8234_v22  ;;  %v8344_v49 = vpop.f32.mrb[133].mxu0 }
 0x606   : > { %v8345_v32 = vadd.f32 %v8344_v49, %v8343_v1  ;;  %v8346_v4 = vpop.f32.mrb[134].mxu0 }
 0x607   : > { %v6039_v55 = vadd.f32 %v8236_v51, %v11879_v10  ;;  %v8347_v57 = vpop.f32.mrb[135].mxu0 }
 0x608   : > { %v8348_v46 = vadd.f32 %v8347_v57, %v8346_v4  ;;  %v11981_v60 = vadd.f32 %v8345_v32, %v6036_v9 }
 0x609   : > { %v8237_v3 = vpop.f32.mrb[104].mxu1 }
 0x60a   : > { %v8238_v62 = vpop.f32.mrb[105].mxu1  ;;  %v11983_v47 = vadd.f32 %v8348_v46, %v6039_v55 }
 0x60b   : > { %v8239_v27 = vadd.f32 %v8238_v62, %v8237_v3  ;;  %v8240_v20 = vpop.f32.mrb[106].mxu1 }
 0x60c   : > { %v8241_v41 = vpop.f32.mrb[107].mxu1  ;;  %v8349_v36 = vpop.f32.mrb[136].mxu0 }
 0x60d   : > { %v6044_v24 = vadd.f32 %v8239_v27, %v11890_v50  ;;  %v8242_v17 = vadd.f32 %v8241_v41, %v8240_v20  ;;  %v8350_v44 = vpop.f32.mrb[137].mxu0 }
 0x60e   : > { %v8351_v6 = vadd.f32 %v8350_v44, %v8349_v36  ;;  %v8352_v29 = vpop.f32.mrb[138].mxu0 }
 0x60f   : > { %v6047_v10 = vadd.f32 %v8242_v17, %v11893_v54  ;;  %v8353_v18 = vpop.f32.mrb[139].mxu0 }
 0x610   : > { %v8354_v5 = vadd.f32 %v8353_v18, %v8352_v29  ;;  %v11987_v7 = vadd.f32 %v8351_v6, %v6044_v24 }
 0x611   : > { %v8243_v34 = vpop.f32.mrb[108].mxu1 }
 0x612   : > { %v8244_v58 = vpop.f32.mrb[109].mxu1  ;;  %v11989_v33 = vadd.f32 %v8354_v5, %v6047_v10 }
 0x613   : > { %v8245_v42 = vadd.f32 %v8244_v58, %v8243_v34  ;;  %v8246_v63 = vpop.f32.mrb[110].mxu1 }
 0x614   : > { %v8247_v38 = vpop.f32.mrb[111].mxu1  ;;  %v8355_v22 = vpop.f32.mrb[140].mxu0 }
 0x615   : > { %v6052_v50 = vadd.f32 %v8245_v42, %v11899_v28  ;;  %v8248_v61 = vadd.f32 %v8247_v38, %v8246_v63  ;;  %v8356_v1 = vpop.f32.mrb[141].mxu0 }
 0x616   : > { %v8357_v9 = vadd.f32 %v8356_v1, %v8355_v22  ;;  %v8358_v51 = vpop.f32.mrb[142].mxu0 }
 0x617   : > { %v6055_v54 = vadd.f32 %v8248_v61, %v11902_v8  ;;  %v8359_v49 = vpop.f32.mrb[143].mxu0 }
 0x618   : > { %v8360_v32 = vadd.f32 %v8359_v49, %v8358_v51  ;;  %v11993_v4 = vadd.f32 %v8357_v9, %v6052_v50 }
 0x619   : > { %v8249_v55 = vpop.f32.mrb[112].mxu1 }
 0x61a   : > { %v8250_v57 = vpop.f32.mrb[113].mxu1  ;;  %v11995_v46 = vadd.f32 %v8360_v32, %v6055_v54 }
 0x61b   : > { %v8251_v3 = vadd.f32 %v8250_v57, %v8249_v55  ;;  %v8252_v62 = vpop.f32.mrb[114].mxu1 }
 0x61c   : > { %v8253_v27 = vpop.f32.mrb[115].mxu1  ;;  %v8361_v20 = vpop.f32.mrb[144].mxu0 }
 0x61d   : > { %v6060_v28 = vadd.f32 %v8251_v3, %v11908_v30  ;;  %v8254_v41 = vadd.f32 %v8253_v27, %v8252_v62  ;;  %v8362_v36 = vpop.f32.mrb[145].mxu0 }
 0x61e   : > { %v8363_v24 = vadd.f32 %v8362_v36, %v8361_v20  ;;  %v8364_v17 = vpop.f32.mrb[146].mxu0 }
 0x61f   : > { %v6063_v8 = vadd.f32 %v8254_v41, %v11910_v23  ;;  %v8365_v44 = vpop.f32.mrb[147].mxu0 }
 0x620   : > { %v8366_v6 = vadd.f32 %v8365_v44, %v8364_v17  ;;  %v11999_v29 = vadd.f32 %v8363_v24, %v6060_v28 }
 0x621   : > { %v8255_v10 = vpop.f32.mrb[116].mxu1 }
 0x622   : > { %v8256_v18 = vpop.f32.mrb[117].mxu1  ;;  %v12001_v5 = vadd.f32 %v8366_v6, %v6063_v8 }
 0x623   : > { %v8257_v34 = vadd.f32 %v8256_v18, %v8255_v10  ;;  %v8258_v58 = vpop.f32.mrb[118].mxu1 }
 0x624   : > { %v8259_v42 = vpop.f32.mrb[119].mxu1  ;;  %v8367_v63 = vpop.f32.mrb[148].mxu0 }
 0x625   : > { %v6068_v30 = vadd.f32 %v8257_v34, %v11914_v12  ;;  %v8260_v38 = vadd.f32 %v8259_v42, %v8258_v58  ;;  %v8368_v22 = vpop.f32.mrb[149].mxu0 }
 0x626   : > { %v8369_v50 = vadd.f32 %v8368_v22, %v8367_v63  ;;  %v8370_v61 = vpop.f32.mrb[150].mxu0 }
 0x627   : > { %v6071_v23 = vadd.f32 %v8260_v38, %v11916_v37  ;;  %v8371_v1 = vpop.f32.mrb[151].mxu0 }
 0x628   : > { %v8372_v9 = vadd.f32 %v8371_v1, %v8370_v61  ;;  %v12005_v51 = vadd.f32 %v8369_v50, %v6068_v30 }
 0x629   : > { %v8261_v54 = vpop.f32.mrb[120].mxu1 }
 0x62a   : > { %v8262_v49 = vpop.f32.mrb[121].mxu1  ;;  %v12007_v32 = vadd.f32 %v8372_v9, %v6071_v23 }
 0x62b   : > { %v8263_v55 = vadd.f32 %v8262_v49, %v8261_v54  ;;  %v8264_v57 = vpop.f32.mrb[122].mxu1 }
 0x62c   : > { %v8265_v3 = vpop.f32.mrb[123].mxu1  ;;  %v8373_v62 = vpop.f32.mrb[152].mxu0 }
 0x62d   : > { %v6076_v12 = vadd.f32 %v8263_v55, %v11920_v19  ;;  %v8266_v27 = vadd.f32 %v8265_v3, %v8264_v57  ;;  %v8374_v20 = vpop.f32.mrb[153].mxu0 }
 0x62e   : > { %v8375_v28 = vadd.f32 %v8374_v20, %v8373_v62  ;;  %v8376_v41 = vpop.f32.mrb[154].mxu0 }
 0x62f   : > { %v6079_v37 = vadd.f32 %v8266_v27, %v11922_v31  ;;  %v8377_v36 = vpop.f32.mrb[155].mxu0 }
 0x630   : > { %v8378_v24 = vadd.f32 %v8377_v36, %v8376_v41  ;;  %v12011_v17 = vadd.f32 %v8375_v28, %v6076_v12 }
 0x631   : > { %v8267_v8 = vpop.f32.mrb[124].mxu1 }
 0x632   : > { %v8268_v44 = vpop.f32.mrb[125].mxu1  ;;  %v12013_v6 = vadd.f32 %v8378_v24, %v6079_v37 }
 0x633   : > { %v8269_v10 = vadd.f32 %v8268_v44, %v8267_v8  ;;  %v8270_v18 = vpop.f32.mrb[126].mxu1 }
 0x634   : > { %v8271_v34 = vpop.f32.mrb[127].mxu1  ;;  %v8379_v58 = vpop.f32.mrb[156].mxu0 }
 0x635   : > { %v6084_v19 = vadd.f32 %v8269_v10, %v11926_v39  ;;  %v8272_v42 = vadd.f32 %v8271_v34, %v8270_v18  ;;  %v8380_v63 = vpop.f32.mrb[157].mxu0 }
 0x636   : > { %v8381_v30 = vadd.f32 %v8380_v63, %v8379_v58  ;;  %v8382_v38 = vpop.f32.mrb[158].mxu0 }
 0x637   : > { %v6087_v31 = vadd.f32 %v8272_v42, %v11928_v43  ;;  %v8383_v22 = vpop.f32.mrb[159].mxu0 }
 0x638   : > { %v8384_v50 = vadd.f32 %v8383_v22, %v8382_v38  ;;  %v12017_v61 = vadd.f32 %v8381_v30, %v6084_v19 }
 0x639   : > { %v8273_v23 = vpop.f32.mrb[128].mxu1 }
 0x63a   : > { %v8274_v1 = vpop.f32.mrb[129].mxu1  ;;  %v12019_v9 = vadd.f32 %v8384_v50, %v6087_v31 }
 0x63b   : > { %v8275_v54 = vadd.f32 %v8274_v1, %v8273_v23  ;;  %v8276_v49 = vpop.f32.mrb[130].mxu1 }
 0x63c   : > { %v8277_v55 = vpop.f32.mrb[131].mxu1  ;;  %v8385_v57 = vpop.f32.mrb[160].mxu0 }
 0x63d   : > { %v6092_v39 = vadd.f32 %v8275_v54, %v11932_v53  ;;  %v8278_v3 = vadd.f32 %v8277_v55, %v8276_v49  ;;  %v8386_v62 = vpop.f32.mrb[161].mxu0 }
 0x63e   : > { %v8387_v12 = vadd.f32 %v8386_v62, %v8385_v57  ;;  %v8388_v27 = vpop.f32.mrb[162].mxu0 }
 0x63f   : > { %v6095_v43 = vadd.f32 %v8278_v3, %v11934_v48  ;;  %v8389_v20 = vpop.f32.mrb[163].mxu0 }
 0x640   : > { %v8390_v28 = vadd.f32 %v8389_v20, %v8388_v27  ;;  %v12023_v41 = vadd.f32 %v8387_v12, %v6092_v39 }
 0x641   : > { %v8279_v37 = vpop.f32.mrb[132].mxu1 }
 0x642   : > { %v8280_v36 = vpop.f32.mrb[133].mxu1  ;;  %v12025_v24 = vadd.f32 %v8390_v28, %v6095_v43 }
 0x643   : > { %v8281_v8 = vadd.f32 %v8280_v36, %v8279_v37  ;;  %v8282_v44 = vpop.f32.mrb[134].mxu1 }
 0x644   : > { %v8283_v10 = vpop.f32.mrb[135].mxu1  ;;  %v8391_v18 = vpop.f32.mrb[164].mxu0 }
 0x645   : > { %v6100_v53 = vadd.f32 %v8281_v8, %v11938_v25  ;;  %v8284_v34 = vadd.f32 %v8283_v10, %v8282_v44  ;;  %v8392_v58 = vpop.f32.mrb[165].mxu0 }
 0x646   : > { %v8393_v19 = vadd.f32 %v8392_v58, %v8391_v18  ;;  %v8394_v42 = vpop.f32.mrb[166].mxu0 }
 0x647   : > { %v6103_v48 = vadd.f32 %v8284_v34, %v11940_v59  ;;  %v8395_v63 = vpop.f32.mrb[167].mxu0 }
 0x648   : > { %v8396_v30 = vadd.f32 %v8395_v63, %v8394_v42  ;;  %v12029_v38 = vadd.f32 %v8393_v19, %v6100_v53 }
 0x649   : > { %v8285_v31 = vpop.f32.mrb[136].mxu1 }
 0x64a   : > { %v8286_v22 = vpop.f32.mrb[137].mxu1  ;;  %v12031_v50 = vadd.f32 %v8396_v30, %v6103_v48 }
 0x64b   : > { %v8287_v23 = vadd.f32 %v8286_v22, %v8285_v31  ;;  %v8288_v1 = vpop.f32.mrb[138].mxu1 }
 0x64c   : > { %v8289_v54 = vpop.f32.mrb[139].mxu1  ;;  %v8397_v49 = vpop.f32.mrb[168].mxu0 }
 0x64d   : > { %v6108_v25 = vadd.f32 %v8287_v23, %v11944_v16  ;;  %v8290_v55 = vadd.f32 %v8289_v54, %v8288_v1  ;;  %v8398_v57 = vpop.f32.mrb[169].mxu0 }
 0x64e   : > { %v8399_v39 = vadd.f32 %v8398_v57, %v8397_v49  ;;  %v8400_v3 = vpop.f32.mrb[170].mxu0 }
 0x64f   : > { %v6111_v59 = vadd.f32 %v8290_v55, %v11946_v15  ;;  %v8401_v62 = vpop.f32.mrb[171].mxu0 }
 0x650   : > { %v8402_v12 = vadd.f32 %v8401_v62, %v8400_v3  ;;  %v12035_v27 = vadd.f32 %v8399_v39, %v6108_v25 }
 0x651   : > { %v8291_v43 = vpop.f32.mrb[140].mxu1 }
 0x652   : > { %v8292_v20 = vpop.f32.mrb[141].mxu1  ;;  %v12037_v28 = vadd.f32 %v8402_v12, %v6111_v59 }
 0x653   : > { %v8293_v37 = vadd.f32 %v8292_v20, %v8291_v43  ;;  %v8294_v36 = vpop.f32.mrb[142].mxu1 }
 0x654   : > { %v8295_v8 = vpop.f32.mrb[143].mxu1  ;;  %v8403_v44 = vpop.f32.mrb[172].mxu0 }
 0x655   : > { %v6116_v16 = vadd.f32 %v8293_v37, %v11953_v26  ;;  %v8296_v10 = vadd.f32 %v8295_v8, %v8294_v36  ;;  %v8404_v18 = vpop.f32.mrb[173].mxu0 }
 0x656   : > { %v8405_v53 = vadd.f32 %v8404_v18, %v8403_v44  ;;  %v8406_v34 = vpop.f32.mrb[174].mxu0 }
 0x657   : > { %v6119_v15 = vadd.f32 %v8296_v10, %v11955_v2  ;;  %v8407_v58 = vpop.f32.mrb[175].mxu0 }
 0x658   : > { %v8408_v19 = vadd.f32 %v8407_v58, %v8406_v34  ;;  %v12041_v42 = vadd.f32 %v8405_v53, %v6116_v16 }
 0x659   : > { %v8297_v48 = vpop.f32.mrb[144].mxu1 }
 0x65a   : > { %v8298_v63 = vpop.f32.mrb[145].mxu1  ;;  %v12043_v30 = vadd.f32 %v8408_v19, %v6119_v15 }
 0x65b   : > { %v8299_v31 = vadd.f32 %v8298_v63, %v8297_v48  ;;  %v8300_v22 = vpop.f32.mrb[146].mxu1 }
 0x65c   : > { %v8301_v23 = vpop.f32.mrb[147].mxu1  ;;  %v8409_v1 = vpop.f32.mrb[176].mxu0 }
 0x65d   : > { %v6124_v26 = vadd.f32 %v8299_v31, %v11957_v13  ;;  %v8302_v54 = vadd.f32 %v8301_v23, %v8300_v22  ;;  %v8410_v49 = vpop.f32.mrb[177].mxu0 }
 0x65e   : > { %v8411_v25 = vadd.f32 %v8410_v49, %v8409_v1  ;;  %v8412_v55 = vpop.f32.mrb[178].mxu0 }
 0x65f   : > { %v6127_v2 = vadd.f32 %v8302_v54, %v11959_v45  ;;  %v8413_v57 = vpop.f32.mrb[179].mxu0 }
 0x660   : > { %v8414_v39 = vadd.f32 %v8413_v57, %v8412_v55  ;;  %v12047_v3 = vadd.f32 %v8411_v25, %v6124_v26  ;;  %v12458_v57 = vld [vmem:[#allocation50_spill] sm:$0xff] }
 0x661   : > { %v8303_v59 = vpop.f32.mrb[148].mxu1 }
 0x662   : > { %v8304_v62 = vpop.f32.mrb[149].mxu1  ;;  %v12049_v12 = vadd.f32 %v8414_v39, %v6127_v2  ;;  %v605_v39 = vsub.s32 6, %v12458_v57 }
 0x663   : > { %v8305_v43 = vadd.f32 %v8304_v62, %v8303_v59  ;;  %v8306_v20 = vpop.f32.mrb[150].mxu1 }
 0x664   : > { %v8307_v37 = vpop.f32.mrb[151].mxu1  ;;  %v8415_v36 = vpop.f32.mrb[180].mxu0 }
 0x665   : > { %v6132_v13 = vadd.f32 %v8305_v43, %v11961_v14  ;;  %v8308_v8 = vadd.f32 %v8307_v37, %v8306_v20  ;;  %v8416_v44 = vpop.f32.mrb[181].mxu0 }
 0x666   : > { %v8417_v16 = vadd.f32 %v8416_v44, %v8415_v36  ;;  %v8418_v10 = vpop.f32.mrb[182].mxu0 }
 0x667   : > { %v6135_v45 = vadd.f32 %v8308_v8, %v11963_v35  ;;  %v8419_v18 = vpop.f32.mrb[183].mxu0 }
 0x668   : > { %v8420_v53 = vadd.f32 %v8419_v18, %v8418_v10  ;;  %v12053_v34 = vadd.f32 %v8417_v16, %v6132_v13  ;;  %v641_v13 = vsub.s32 7, %v12458_v57  ;;  %v8973_v16 = vld [vmem:[%s12368_s5] sm:$0xff] }
 0x669   : > { %v8309_v15 = vpop.f32.mrb[152].mxu1  ;;  %v12070_v10 = vrot.slane %v8973_v16, %v605_v39 }
 0x66a   : > { %v8310_v58 = vpop.f32.mrb[153].mxu1  ;;  %v12055_v19 = vadd.f32 %v8420_v53, %v6135_v45  ;;  %v6514_v45 = vsub.s32 5, %v12458_v57 }
 0x66b   : > { %v8311_v48 = vadd.f32 %v8310_v58, %v8309_v15  ;;  %v8312_v63 = vpop.f32.mrb[154].mxu1 }
 0x66c   : > { %v8313_v31 = vpop.f32.mrb[155].mxu1  ;;  %v8421_v22 = vpop.f32.mrb[184].mxu0 }
 0x66d   : > { %v6140_v14 = vadd.f32 %v8311_v48, %v11965_v21  ;;  %v8314_v23 = vadd.f32 %v8313_v31, %v8312_v63  ;;  %v8422_v1 = vpop.f32.mrb[185].mxu0  ;;  %v6478_v21 = vsub.s32 4, %v12458_v57  ;;  %v12461_v57 = vld [vmem:[#allocation24_spill] sm:$0xff] }
 0x66e   : > { %v8423_v26 = vadd.f32 %v8422_v1, %v8421_v22  ;;  %v8424_v54 = vpop.f32.mrb[186].mxu0  ;;  %v610_v39 = vmul.f32 %v12461_v57, %v12070_v10 }
 0x66f   : > { %v6143_v35 = vadd.f32 %v8314_v23, %v11967_v40  ;;  %v8425_v49 = vpop.f32.mrb[187].mxu0  ;;  %v12074_v63 = vrot.slane %v8973_v16, %v6478_v21 }
 0x670   : > { %v8426_v25 = vadd.f32 %v8425_v49, %v8424_v54  ;;  %v12059_v55 = vadd.f32 %v8423_v26, %v6140_v14  ;;  %v12459_v14 = vld [vmem:[#allocation23_spill] sm:$0xff]  ;;  %v12083_v26 = vrot.slane %v8973_v16, %v6514_v45 }
 0x671   : > { %v8315_v2 = vpop.f32.mrb[156].mxu1  ;;  %v609_v23 = vmul.f32 %v12459_v14, %v12070_v10 }
 0x672   : > { %v8316_v59 = vpop.f32.mrb[157].mxu1  ;;  %v12062_v62 = vadd.f32 %v8426_v25, %v6143_v35 }
 0x673   : > { %v8317_v43 = vadd.f32 %v8316_v59, %v8315_v2  ;;  %v8318_v20 = vpop.f32.mrb[158].mxu1 }
 0x674   : > { %v8319_v37 = vpop.f32.mrb[159].mxu1  ;;  %v8427_v36 = vpop.f32.mrb[188].mxu0 }
 0x675   : > { %v6148_v40 = vadd.f32 %v8317_v43, %v11969_v56  ;;  %v8320_v8 = vadd.f32 %v8319_v37, %v8318_v20  ;;  %v8428_v44 = vpop.f32.mrb[189].mxu0  ;;  %v12078_v56 = vrot.slane %v8973_v16, %v641_v13 }
 0x676   : > { %v8429_v18 = vadd.f32 %v8428_v44, %v8427_v36  ;;  %v8430_v53 = vpop.f32.mrb[190].mxu0 }
 0x677   : > { %v6151_v15 = vadd.f32 %v8320_v8, %v11971_v11  ;;  %v8431_v58 = vpop.f32.mrb[191].mxu0  ;;  %v12460_v11 = vld [vmem:[#allocation19_spill] sm:$0xff]  ;;  %v645_v13 = vadd.f32 %v12078_v56, %v609_v23  ;;  %v646_v16 = vadd.f32 %v12078_v56, %v610_v39 }
 0x678   : > { %v8432_v48 = vadd.f32 %v8431_v58, %v8430_v53  ;;  %v12076_v31 = vadd.f32 %v8429_v18, %v6148_v40  ;;  %v607_v49 = vmul.f32 %v12070_v10, %v12460_v11  ;;  %v12464_v11 = vld [vmem:[#allocation18_spill] sm:$0xff] }
 0x679   : > { %v8619_v22 = vpop.f32.mrb[160].mxu1 }
 0x67a   : > { %v6358_v1 = vadd.f32 %v8619_v22, %v11981_v60  ;;  %v6349_v54 = vpop.f32.mrb[161].mxu1  ;;  %v12085_v35 = vadd.f32 %v8432_v48, %v6151_v15  ;;  %v12462_v60 = vld [vmem:[#allocation20_spill] sm:$0xff]  ;;  %v643_v8 = vadd.f32 %v12078_v56, %v607_v49  ;;  %v12463_v48 = vld [vmem:[#allocation21_spill] sm:$0xff]  ;;  %v611_v49 = vmul.f32 %v12070_v10, %v12464_v11  ;;  %v12468_v11 = vld [vmem:[#allocation27_spill] sm:$0xff] }
 0x67b   : > { %v6350_v25 = vadd.f32 %v6349_v54, %v11975_v0  ;;  %v8620_v2 = vpop.f32.mrb[162].mxu1  ;;  %v608_v21 = vmul.f32 %v12070_v10, %v12462_v60  ;;  %v613_v22 = vmul.f32 %v12463_v48, %v12070_v10  ;;  %v12467_v48 = vld [vmem:[#allocation26_spill] sm:$0xff] }
 0x67c   : > { %v6482_v59 = vmul.f32 %v12074_v63, %v6358_v1  ;;  %v6361_v43 = vadd.f32 %v8620_v2, %v11983_v47  ;;  %v6352_v20 = vpop.f32.mrb[163].mxu1 }
 0x67d   : > { %v6480_v37 = vmul.f32 %v12074_v63, %v6350_v25  ;;  %v6353_v36 = vadd.f32 %v6352_v20, %v11977_v52  ;;  %v644_v52 = vadd.f32 %v12078_v56, %v608_v21 }
 0x67e   : > { %v6518_v0 = vadd.f32 %v12083_v26, %v6482_v59  ;;  %v6483_v40 = vmul.f32 %v12074_v63, %v6361_v43  ;;  %v12465_v59 = vld [vmem:[#allocation22_spill] sm:$0xff] }
 0x67f   : > { %v6516_v44 = vadd.f32 %v12083_v26, %v6480_v37  ;;  %v6481_v47 = vmul.f32 %v12074_v63, %v6353_v36  ;;  %v614_v43 = vmul.f32 %v12465_v59, %v12070_v10  ;;  %v12466_v37 = vld [vmem:[#allocation25_spill] sm:$0xff]  ;;  %v12469_v59 = vld [vmem:[#allocation28_spill] sm:$0xff] }
 0x680   : > { %v6550_v45 = vadd.f32 %v6518_v0, %v645_v13  ;;  %v6519_v18 = vadd.f32 %v12083_v26, %v6483_v40  ;;  %v649_v40 = vadd.f32 %v12078_v56, %v613_v22  ;;  %v617_v22 = vmul.f32 %v12467_v48, %v12070_v10 }
 0x681   : > { %v6548_v53 = vadd.f32 %v6516_v44, %v643_v8  ;;  %v6517_v15 = vadd.f32 %v12083_v26, %v6481_v47  ;;  %v8623_v58 = vpop.f32.mrb[164].mxu1  ;;  %v647_v47 = vadd.f32 %v12078_v56, %v611_v49  ;;  %v615_v49 = vmul.f32 %v12070_v10, %v12468_v11 }
 0x682   : > { %v6582_v14 = vmax.f32 %v6550_v45, 0.0  ;;  %v6551_v23 = vadd.f32 %v6519_v18, %v646_v16  ;;  %v6374_v1 = vadd.f32 %v8623_v58, %v11993_v4  ;;  %v6365_v54 = vpop.f32.mrb[165].mxu1  ;;  %v650_v45 = vadd.f32 %v12078_v56, %v614_v43 }
 0x683   : > { %v6580_v25 = vmax.f32 %v6548_v53, 0.0  ;;  %v6549_v2 = vadd.f32 %v6517_v15, %v644_v52  ;;  %v6366_v57 = vadd.f32 %v6365_v54, %v11987_v7  ;;  %v8624_v39 = vpop.f32.mrb[166].mxu1  ;;  %v612_v7 = vmul.f32 %v12070_v10, %v12466_v37 }
 0x684   : > { %6614 = vst [vmem:[%s12118_s14 + $0x10] sm:$0xff] %v6582_v14  ;;  %v6583_v4 = vmax.f32 %v6551_v23, 0.0  ;;  %v6486_v20 = vmul.f32 %v12074_v63, %v6374_v1  ;;  %v6377_v60 = vadd.f32 %v8624_v39, %v11995_v46  ;;  %v6368_v21 = vpop.f32.mrb[167].mxu1  ;;  %v618_v43 = vmul.f32 %v12469_v59, %v12070_v10 }
 0x685   : > { %6612 = vst [vmem:[%s12118_s14] sm:$0xff] %v6580_v25  ;;  %v6581_v36 = vmax.f32 %v6549_v2, 0.0  ;;  %v6484_v13 = vmul.f32 %v12074_v63, %v6366_v57  ;;  %v6369_v0 = vadd.f32 %v6368_v21, %v11989_v33  ;;  %v648_v33 = vadd.f32 %v12078_v56, %v612_v7  ;;  %v12470_v21 = vld [vmem:[#allocation29_spill] sm:$0xff] }
 0x686   : > { %6615 = vst [vmem:[%s12118_s14 + $0x18] sm:$0xff] %v6583_v4  ;;  %v6522_v8 = vadd.f32 %v12083_v26, %v6486_v20  ;;  %v6487_v44 = vmul.f32 %v12074_v63, %v6377_v60  ;;  %v616_v37 = vmul.f32 %v12070_v10, %v12470_v21 }
 0x687   : > { %6613 = vst [vmem:[%s12118_s14 + $0x8] sm:$0xff] %v6581_v36  ;;  %v6520_v46 = vadd.f32 %v12083_v26, %v6484_v13  ;;  %v6485_v16 = vmul.f32 %v12074_v63, %v6369_v0  ;;  %v653_v13 = vadd.f32 %v12078_v56, %v617_v22 }
 0x688   : > { %v6554_v18 = vadd.f32 %v6522_v8, %v649_v40  ;;  %v6523_v52 = vadd.f32 %v12083_v26, %v6487_v44  ;;  %v651_v8 = vadd.f32 %v12078_v56, %v615_v49 }
 0x689   : > { %v6552_v53 = vadd.f32 %v6520_v46, %v647_v47  ;;  %v6521_v15 = vadd.f32 %v12083_v26, %v6485_v16  ;;  %v8627_v58 = vpop.f32.mrb[168].mxu1  ;;  %v654_v47 = vadd.f32 %v12078_v56, %v618_v43  ;;  %v12474_v43 = vld [vmem:[#allocation33_spill] sm:$0xff] }
 0x68a   : > { %v6586_v14 = vmax.f32 %v6554_v18, 0.0  ;;  %v6555_v23 = vadd.f32 %v6523_v52, %v650_v45  ;;  %v6390_v1 = vadd.f32 %v8627_v58, %v12005_v51  ;;  %v6381_v54 = vpop.f32.mrb[169].mxu1 }
 0x68b   : > { %v6584_v25 = vmax.f32 %v6552_v53, 0.0  ;;  %v6553_v2 = vadd.f32 %v6521_v15, %v648_v33  ;;  %v6382_v57 = vadd.f32 %v6381_v54, %v11999_v29  ;;  %v8628_v39 = vpop.f32.mrb[170].mxu1  ;;  %v12471_v33 = vld [vmem:[#allocation30_spill] sm:$0xff] }
 0x68c   : > { %6618 = vst [vmem:[%s12118_s14 + $0x30] sm:$0xff] %v6586_v14  ;;  %v6587_v4 = vmax.f32 %v6555_v23, 0.0  ;;  %v6490_v20 = vmul.f32 %v12074_v63, %v6390_v1  ;;  %v6393_v51 = vadd.f32 %v8628_v39, %v12007_v32  ;;  %v6384_v60 = vpop.f32.mrb[171].mxu1  ;;  %v621_v53 = vmul.f32 %v12471_v33, %v12070_v10  ;;  %v12472_v14 = vld [vmem:[#allocation31_spill] sm:$0xff] }
 0x68d   : > { %6616 = vst [vmem:[%s12118_s14 + $0x20] sm:$0xff] %v6584_v25  ;;  %v6585_v7 = vmax.f32 %v6553_v2, 0.0  ;;  %v6488_v36 = vmul.f32 %v12074_v63, %v6382_v57  ;;  %v6385_v29 = vadd.f32 %v6384_v60, %v12001_v5  ;;  %v652_v5 = vadd.f32 %v12078_v56, %v616_v37  ;;  %v12473_v25 = vld [vmem:[#allocation32_spill] sm:$0xff] }
 0x68e   : > { %6619 = vst [vmem:[%s12118_s14 + $0x38] sm:$0xff] %v6587_v4  ;;  %v6526_v0 = vadd.f32 %v12083_v26, %v6490_v20  ;;  %v6491_v40 = vmul.f32 %v12074_v63, %v6393_v51  ;;  %v619_v23 = vmul.f32 %v12070_v10, %v12472_v14  ;;  %v622_v2 = vmul.f32 %v12473_v25, %v12070_v10 }
 0x68f   : > { %6617 = vst [vmem:[%s12118_s14 + $0x28] sm:$0xff] %v6585_v7  ;;  %v6524_v32 = vadd.f32 %v12083_v26, %v6488_v36  ;;  %v6489_v44 = vmul.f32 %v12074_v63, %v6385_v29  ;;  %v620_v4 = vmul.f32 %v12070_v10, %v12474_v43  ;;  %v657_v60 = vadd.f32 %v12078_v56, %v621_v53 }
 0x690   : > { %v6558_v46 = vadd.f32 %v6526_v0, %v653_v13  ;;  %v6527_v16 = vadd.f32 %v12083_v26, %v6491_v40  ;;  %v655_v7 = vadd.f32 %v12078_v56, %v619_v23  ;;  %v658_v29 = vadd.f32 %v12078_v56, %v622_v2 }
 0x691   : > { %v6556_v45 = vadd.f32 %v6524_v32, %v651_v8  ;;  %v6525_v18 = vadd.f32 %v12083_v26, %v6489_v44  ;;  %v8631_v52 = vpop.f32.mrb[172].mxu1  ;;  %v12475_v44 = vld [vmem:[#allocation34_spill] sm:$0xff] }
 0x692   : > { %v6590_v15 = vmax.f32 %v6558_v46, 0.0  ;;  %v6559_v58 = vadd.f32 %v6527_v16, %v654_v47  ;;  %v6406_v48 = vadd.f32 %v8631_v52, %v12017_v61  ;;  %v6397_v22 = vpop.f32.mrb[173].mxu1  ;;  %v625_v47 = vmul.f32 %v12475_v44, %v12070_v10  ;;  %v12481_v44 = vld [vmem:[#allocation40_spill] sm:$0xff] }
 0x693   : > { %v6588_v1 = vmax.f32 %v6556_v45, 0.0  ;;  %v6557_v54 = vadd.f32 %v6525_v18, %v652_v5  ;;  %v6398_v11 = vadd.f32 %v6397_v22, %v12011_v17  ;;  %v8632_v49 = vpop.f32.mrb[174].mxu1  ;;  %v12476_v18 = vld [vmem:[#allocation35_spill] sm:$0xff] }
 0x694   : > { %6622 = vst [vmem:[%s12118_s14 + $0x50] sm:$0xff] %v6590_v15  ;;  %v6591_v57 = vmax.f32 %v6559_v58, 0.0  ;;  %v6494_v39 = vmul.f32 %v12074_v63, %v6406_v48  ;;  %v6409_v61 = vadd.f32 %v8632_v49, %v12019_v9  ;;  %v6400_v59 = vpop.f32.mrb[175].mxu1  ;;  %v623_v52 = vmul.f32 %v12070_v10, %v12476_v18  ;;  %v12477_v48 = vld [vmem:[#allocation36_spill] sm:$0xff] }
 0x695   : > { %6620 = vst [vmem:[%s12118_s14 + $0x40] sm:$0xff] %v6588_v1  ;;  %v6589_v20 = vmax.f32 %v6557_v54, 0.0  ;;  %v6492_v51 = vmul.f32 %v12074_v63, %v6398_v11  ;;  %v6401_v17 = vadd.f32 %v6400_v59, %v12013_v6  ;;  %v656_v6 = vadd.f32 %v12078_v56, %v620_v4  ;;  %v12478_v54 = vld [vmem:[#allocation37_spill] sm:$0xff] }
 0x696   : > { %6623 = vst [vmem:[%s12118_s14 + $0x58] sm:$0xff] %v6591_v57  ;;  %v6530_v21 = vadd.f32 %v12083_v26, %v6494_v39  ;;  %v6495_v37 = vmul.f32 %v12074_v63, %v6409_v61  ;;  %v626_v22 = vmul.f32 %v12477_v48, %v12070_v10  ;;  %v624_v11 = vmul.f32 %v12070_v10, %v12478_v54 }
 0x697   : > { %6621 = vst [vmem:[%s12118_s14 + $0x48] sm:$0xff] %v6589_v20  ;;  %v6528_v9 = vadd.f32 %v12083_v26, %v6492_v51  ;;  %v6493_v36 = vmul.f32 %v12074_v63, %v6401_v17  ;;  %v661_v2 = vadd.f32 %v12078_v56, %v625_v47  ;;  %v659_v61 = vadd.f32 %v12078_v56, %v623_v52 }
 0x698   : > { %v6562_v13 = vadd.f32 %v6530_v21, %v657_v60  ;;  %v6531_v0 = vadd.f32 %v12083_v26, %v6495_v37  ;;  %v662_v43 = vadd.f32 %v12078_v56, %v626_v22  ;;  %v12479_v21 = vld [vmem:[#allocation38_spill] sm:$0xff]  ;;  %v630_v47 = vmul.f32 %v12481_v44, %v12070_v10 }
 0x699   : > { %v6560_v40 = vadd.f32 %v6528_v9, %v655_v7  ;;  %v6529_v8 = vadd.f32 %v12083_v26, %v6493_v36  ;;  %v8635_v32 = vpop.f32.mrb[176].mxu1  ;;  %v629_v37 = vmul.f32 %v12479_v21, %v12070_v10 }
 0x69a   : > { %v6594_v46 = vmax.f32 %v6562_v13, 0.0  ;;  %v6563_v16 = vadd.f32 %v6531_v0, %v658_v29  ;;  %v6422_v5 = vadd.f32 %v8635_v32, %v12029_v38  ;;  %v6413_v45 = vpop.f32.mrb[177].mxu1  ;;  %v12480_v13 = vld [vmem:[#allocation39_spill] sm:$0xff] }
 0x69b   : > { %v6592_v33 = vmax.f32 %v6560_v40, 0.0  ;;  %v6561_v53 = vadd.f32 %v6529_v8, %v656_v6  ;;  %v6414_v15 = vadd.f32 %v6413_v45, %v12023_v41  ;;  %v8636_v58 = vpop.f32.mrb[178].mxu1  ;;  %v627_v0 = vmul.f32 %v12070_v10, %v12480_v13  ;;  %v12482_v45 = vld [vmem:[#allocation41_spill] sm:$0xff] }
 0x69c   : > { %6626 = vst [vmem:[%s12118_s14 + $0x70] sm:$0xff] %v6594_v46  ;;  %v6595_v14 = vmax.f32 %v6563_v16, 0.0  ;;  %v6498_v23 = vmul.f32 %v12074_v63, %v6422_v5  ;;  %v6425_v38 = vadd.f32 %v8636_v58, %v12031_v50  ;;  %v6416_v1 = vpop.f32.mrb[179].mxu1  ;;  %v628_v18 = vmul.f32 %v12070_v10, %v12482_v45 }
 0x69d   : > { %6624 = vst [vmem:[%s12118_s14 + $0x60] sm:$0xff] %v6592_v33  ;;  %v6593_v49 = vmax.f32 %v6561_v53, 0.0  ;;  %v6496_v25 = vmul.f32 %v12074_v63, %v6414_v15  ;;  %v6417_v41 = vadd.f32 %v6416_v1, %v12025_v24  ;;  %v660_v24 = vadd.f32 %v12078_v56, %v624_v11 }
 0x69e   : > { %6627 = vst [vmem:[%s12118_s14 + $0x78] sm:$0xff] %v6595_v14  ;;  %v6534_v57 = vadd.f32 %v12083_v26, %v6498_v23  ;;  %v6499_v39 = vmul.f32 %v12074_v63, %v6425_v38  ;;  %v665_v53 = vadd.f32 %v12078_v56, %v629_v37  ;;  %v663_v48 = vadd.f32 %v12078_v56, %v627_v0  ;;  %v12486_v37 = vld [vmem:[#allocation45_spill] sm:$0xff] }
 0x69f   : > { %6625 = vst [vmem:[%s12118_s14 + $0x68] sm:$0xff] %v6593_v49  ;;  %v6532_v50 = vadd.f32 %v12083_v26, %v6496_v25  ;;  %v6497_v59 = vmul.f32 %v12074_v63, %v6417_v41  ;;  %v666_v14 = vadd.f32 %v12078_v56, %v630_v47  ;;  %v12483_v49 = vld [vmem:[#allocation42_spill] sm:$0xff] }
 0x6a0   : > { %v6566_v4 = vadd.f32 %v6534_v57, %v661_v2  ;;  %v6535_v20 = vadd.f32 %v12083_v26, %v6499_v39  ;;  %v633_v25 = vmul.f32 %v12483_v49, %v12070_v10 }
 0x6a1   : > { %v6564_v51 = vadd.f32 %v6532_v50, %v659_v61  ;;  %v6533_v17 = vadd.f32 %v12083_v26, %v6497_v59  ;;  %v8639_v60 = vpop.f32.mrb[180].mxu1  ;;  %v12484_v61 = vld [vmem:[#allocation43_spill] sm:$0xff] }
 0x6a2   : > { %v6598_v7 = vmax.f32 %v6566_v4, 0.0  ;;  %v6567_v9 = vadd.f32 %v6535_v20, %v662_v43  ;;  %v6438_v36 = vadd.f32 %v8639_v60, %v12041_v42  ;;  %v6429_v29 = vpop.f32.mrb[181].mxu1  ;;  %v631_v50 = vmul.f32 %v12070_v10, %v12484_v61 }
 0x6a3   : > { %v6596_v6 = vmax.f32 %v6564_v51, 0.0  ;;  %v6565_v40 = vadd.f32 %v6533_v17, %v660_v24  ;;  %v6430_v8 = vadd.f32 %v6429_v29, %v12035_v27  ;;  %v8640_v32 = vpop.f32.mrb[182].mxu1  ;;  %v12485_v24 = vld [vmem:[#allocation44_spill] sm:$0xff]  ;;  %v669_v29 = vadd.f32 %v12078_v56, %v633_v25 }
 0x6a4   : > { %6630 = vst [vmem:[%s12118_s14 + $0x90] sm:$0xff] %v6598_v7  ;;  %v6599_v46 = vmax.f32 %v6567_v9, 0.0  ;;  %v6502_v16 = vmul.f32 %v12074_v63, %v6438_v36  ;;  %v6441_v42 = vadd.f32 %v8640_v32, %v12043_v30  ;;  %v6432_v5 = vpop.f32.mrb[183].mxu1  ;;  %v634_v51 = vmul.f32 %v12485_v24, %v12070_v10 }
 0x6a5   : > { %6628 = vst [vmem:[%s12118_s14 + $0x80] sm:$0xff] %v6596_v6  ;;  %v6597_v52 = vmax.f32 %v6565_v40, 0.0  ;;  %v6500_v33 = vmul.f32 %v12074_v63, %v6430_v8  ;;  %v6433_v27 = vadd.f32 %v6432_v5, %v12037_v28  ;;  %v664_v28 = vadd.f32 %v12078_v56, %v628_v18 }
 0x6a6   : > { %6631 = vst [vmem:[%s12118_s14 + $0x98] sm:$0xff] %v6599_v46  ;;  %v6538_v15 = vadd.f32 %v12083_v26, %v6502_v16  ;;  %v6503_v58 = vmul.f32 %v12074_v63, %v6441_v42  ;;  %v632_v7 = vmul.f32 %v12070_v10, %v12486_v37  ;;  %v667_v6 = vadd.f32 %v12078_v56, %v631_v50  ;;  %v12487_v42 = vld [vmem:[#allocation46_spill] sm:$0xff] }
 0x6a7   : > { %6629 = vst [vmem:[%s12118_s14 + $0x88] sm:$0xff] %v6597_v52  ;;  %v6536_v30 = vadd.f32 %v12083_v26, %v6500_v33  ;;  %v6501_v22 = vmul.f32 %v12074_v63, %v6433_v27  ;;  %v670_v8 = vadd.f32 %v12078_v56, %v634_v51  ;;  %v637_v5 = vmul.f32 %v12487_v42, %v12070_v10  ;;  %v12488_v27 = vld [vmem:[#allocation47_spill] sm:$0xff] }
 0x6a8   : > { %v6570_v23 = vadd.f32 %v6538_v15, %v665_v53  ;;  %v6539_v38 = vadd.f32 %v12083_v26, %v6503_v58  ;;  %v635_v53 = vmul.f32 %v12070_v10, %v12488_v27 }
 0x6a9   : > { %v6568_v1 = vadd.f32 %v6536_v30, %v663_v48  ;;  %v6537_v54 = vadd.f32 %v12083_v26, %v6501_v22  ;;  %v8643_v11 = vpop.f32.mrb[184].mxu1  ;;  %v12489_v22 = vld [vmem:[#allocation48_spill] sm:$0xff]  ;;  %v673_v25 = vadd.f32 %v12078_v56, %v637_v5 }
 0x6aa   : > { %v6602_v41 = vmax.f32 %v6570_v23, 0.0  ;;  %v6571_v2 = vadd.f32 %v6539_v38, %v666_v14  ;;  %v6454_v57 = vadd.f32 %v8643_v11, %v12053_v34  ;;  %v6445_v39 = vpop.f32.mrb[185].mxu1  ;;  %v638_v14 = vmul.f32 %v12489_v22, %v12070_v10 }
 0x6ab   : > { %v6600_v59 = vmax.f32 %v6568_v1, 0.0  ;;  %v6569_v43 = vadd.f32 %v6537_v54, %v664_v28  ;;  %v6446_v4 = vadd.f32 %v6445_v39, %v12047_v3  ;;  %v8644_v20 = vpop.f32.mrb[186].mxu1  ;;  %v12490_v1 = vld [vmem:[#allocation49_spill] sm:$0xff] }
 0x6ac   : > { %6634 = vst [vmem:[%s12118_s14 + $0xb0] sm:$0xff] %v6602_v41  ;;  %v6603_v17 = vmax.f32 %v6571_v2, 0.0  ;;  %v6506_v60 = vmul.f32 %v12074_v63, %v6454_v57  ;;  %v6457_v34 = vadd.f32 %v8644_v20, %v12055_v19  ;;  %v6448_v21 = vpop.f32.mrb[187].mxu1  ;;  %v636_v54 = vmul.f32 %v12070_v10, %v12490_v1 }
 0x6ad   : > { %6632 = vst [vmem:[%s12118_s14 + $0xa0] sm:$0xff] %v6600_v59  ;;  %v6601_v9 = vmax.f32 %v6569_v43, 0.0  ;;  %v6504_v36 = vmul.f32 %v12074_v63, %v6446_v4  ;;  %v6449_v3 = vadd.f32 %v6448_v21, %v12049_v12  ;;  %v668_v12 = vadd.f32 %v12078_v56, %v632_v7 }
 0x6ae   : > { %6635 = vst [vmem:[%s12118_s14 + $0xb8] sm:$0xff] %v6603_v17  ;;  %v6542_v13 = vadd.f32 %v12083_v26, %v6506_v60  ;;  %v6507_v0 = vmul.f32 %v12074_v63, %v6457_v34  ;;  %v674_v39 = vadd.f32 %v12078_v56, %v638_v14  ;;  %v672_v50 = vadd.f32 %v12078_v56, %v636_v54 }
 0x6af   : > { %6633 = vst [vmem:[%s12118_s14 + $0xa8] sm:$0xff] %v6601_v9  ;;  %v6540_v19 = vadd.f32 %v12083_v26, %v6504_v36  ;;  %v6505_v40 = vmul.f32 %v12074_v63, %v6449_v3 }
 0x6b0   : > { %v6574_v32 = vadd.f32 %v6542_v13, %v669_v29  ;;  %v6543_v44 = vadd.f32 %v12083_v26, %v6507_v0 }
 0x6b1   : > { %v6572_v47 = vadd.f32 %v6540_v19, %v667_v6  ;;  %v6541_v46 = vadd.f32 %v12083_v26, %v6505_v40  ;;  %v8647_v16 = vpop.f32.mrb[188].mxu1 }
 0x6b2   : > { %v6606_v45 = vmax.f32 %v6574_v32, 0.0  ;;  %v6575_v18 = vadd.f32 %v6543_v44, %v670_v8  ;;  %v6470_v52 = vadd.f32 %v8647_v16, %v12076_v31  ;;  %v6461_v33 = vpop.f32.mrb[189].mxu1 }
 0x6b3   : > { %v6604_v15 = vmax.f32 %v6572_v47, 0.0  ;;  %v6573_v58 = vadd.f32 %v6541_v46, %v668_v12  ;;  %v6462_v48 = vadd.f32 %v6461_v33, %v12059_v55  ;;  %v8648_v30 = vpop.f32.mrb[190].mxu1 }
 0x6b4   : > { %6638 = vst [vmem:[%s12118_s14 + $0xd0] sm:$0xff] %v6606_v45  ;;  %v6607_v23 = vmax.f32 %v6575_v18, 0.0  ;;  %v6510_v38 = vmul.f32 %v12074_v63, %v6470_v52  ;;  %v6473_v31 = vadd.f32 %v8648_v30, %v12085_v35  ;;  %v6464_v28 = vpop.f32.mrb[191].mxu1  ;;  %v671_v35 = vadd.f32 %v12078_v56, %v635_v53 }
 0x6b5   : > { %6636 = vst [vmem:[%s12118_s14 + $0xc0] sm:$0xff] %v6604_v15  ;;  %v6605_v11 = vmax.f32 %v6573_v58, 0.0  ;;  %v6508_v49 = vmul.f32 %v12074_v63, %v6462_v48  ;;  %v6465_v55 = vadd.f32 %v6464_v28, %v12062_v62 }
 0x6b6   : > { %6639 = vst [vmem:[%s12118_s14 + $0xd8] sm:$0xff] %v6607_v23  ;;  %v6546_v41 = vadd.f32 %v12083_v26, %v6510_v38  ;;  %v6511_v2 = vmul.f32 %v12074_v63, %v6473_v31 }
 0x6b7   : > { %6637 = vst [vmem:[%s12118_s14 + $0xc8] sm:$0xff] %v6605_v11  ;;  %v6544_v10 = vadd.f32 %v12083_v26, %v6508_v49  ;;  %v6509_v57 = vmul.f32 %v12074_v63, %v6465_v55 }
 0x6b8   : > { %v6578_v62 = vadd.f32 %v6546_v41, %v673_v25  ;;  %v6547_v61 = vadd.f32 %v12083_v26, %v6511_v2 }
 0x6b9   : > { %v6576_v59 = vadd.f32 %v6544_v10, %v671_v35  ;;  %v6545_v43 = vadd.f32 %v12083_v26, %v6509_v57 }
 0x6ba   : > { %v6610_v4 = vmax.f32 %v6578_v62, 0.0  ;;  %v6579_v20 = vadd.f32 %v6547_v61, %v674_v39 }
 0x6bb   : > { %v6608_v63 = vmax.f32 %v6576_v59, 0.0  ;;  %v6577_v24 = vadd.f32 %v6545_v43, %v672_v50 }
 0x6bc   : > { %6642 = vst [vmem:[%s12118_s14 + $0xf0] sm:$0xff] %v6610_v4  ;;  %v6611_v51 = vmax.f32 %v6579_v20, 0.0 }
 0x6bd   : > { %6640 = vst [vmem:[%s12118_s14 + $0xe0] sm:$0xff] %v6608_v63  ;;  %v6609_v56 = vmax.f32 %v6577_v24, 0.0 }
 0x6be   : > { %6643 = vst [vmem:[%s12118_s14 + $0xf8] sm:$0xff] %v6611_v51 }
 0x6bf   : > { %6641 = vst [vmem:[%s12118_s14 + $0xe8] sm:$0xff] %v6609_v56 }
 0x6c0   : > { %9129 = shalt.err (!%p9126_p13)
}
 0x6c1   : > { %s9130_s20 = scalar_lea.hbm %s12314_s30, 4096  ;;  %s9134_s10 = scalar_lea.hbm %s12369_s6, 8192 }
 0x6c2   : > { %p9131_p9 = scmp.ne.s32.totalorder %s12314_s30, %s9130_s20  ;;  %p9135_p4 = scmp.lt.u32.totalorder %s12314_s30, %s12369_s6 }
 0x6c3   : > { %p9136_p8 = scmp.lt.u32.totalorder %s9134_s10, %s9130_s20  ;;  %p9138_p3 = scmp.lt.u32.totalorder %s9130_s20, %s12314_s30 }
 0x6c4   : > { %p9132_p0 = pnand %p9131_p9, %p9412_p10 }
 0x6c5   : > { %p9137_p6 = por %p9136_p8, %p9135_p4 }
 0x6c6   : > { %p9133_p11 = pneg %p9132_p0 }
 0x6c7   : > { %p9139_p5 = por %p9138_p3, %p9137_p6 }
 0x6c9   : > { %p9140_p7 = pnand %p9139_p5, %p9133_p11 }
 0x6cb   : > { %9143 = shalt.err (!%p9140_p7)
}
 0x6cc   : > { %s9204_s11 = smov 128   ;;  %s9205_s13 = smov 8  }
 0x6cd   : > { %8667 = dma.vmem_to_hbm [thread:$0]  (%p9412_p10), %s12316_s8, 4096, %s12314_s30, %s6645_s25, %s9204_s11, %s9204_s11, %s9205_s13  }
 0x6ce PF: > { %s6673_s9 = sand.u32 1, %s9178_s21   ;;  %p12491_p12 = scmp.ne.s32.totalorder %s12389_s28, 0 }
 0x6cf   : > { %p12492_p1 = scmp.ge.s32.totalorder %s9190_s24, 2  ;;  %s6674_s17 = scalar_lea.sflag [#allocation6], %s6673_s9 }
 0x6d1   : > { %p8687_p2 = pnand %p12492_p1, %p12491_p12 }
 0x6d3   : > { %9173 = dma.done.wait (!%p8687_p2), %s6674_s17, 4096  }
 0x6d4   : > { %9175 = vsyncadd (!%p8687_p2), %s6674_s17, 4294963200  ;;  %p21_p13 = scmp.ge.s32.totalorder %s9402_s18, 4   ;;  %s12493_s21 = smov %s9182_s22 }
 0x6d5   : > { %s12494_s22 = smov %s9186_s23  ;;  %s12495_s23 = smov %s9418_s16 }
 0x6d6   : > { %s12496_s24 = smov %s9402_s18  ;;  %23 = sbr.rel (!%p21_p13) target bundleno = 7 (0x7), region = 107 }
 0x6dd   :  { %6679 = vsyncpa [#allocation5], 1 }
 0x6de   :  { %6681 = vsyncpa [#allocation5 + $0x1], 1 }
 0x6df   :  { %6682 = vsyncpa [#allocation8], 1 }
 0x6e0   :  { %6683 = vsyncpa [#allocation11], 1 }
 0x6e1   :  { %6684 = vsyncpa [#allocation6], 1 }
 0x6e2   :  { %6686 = vsyncpa [#allocation6 + $0x1], 1 }

</bundles_post_ra>
